<compile_context>
chip_gen: v6e
topology: v6e:2x2x1
jax: 0.10.0
libtpu: 0.0.40
codegen_flags: <defaults>
</compile_context>

<pallas_src>
import functools
import math

import jax
import jax.numpy as jnp
from jax.experimental import pallas as pl
from jax.experimental.pallas import tpu as pltpu


# ------------------------- parameter layout (flat) -------------------------

def _param_layout(n_enc, n_dec):
    names = ["backbone_w", "backbone_b", "dr_w", "dr_b"]
    for i in range(n_enc):
        p = f"enc{i}_"
        names += [p + s for s in
                  ("wqkv", "bqkv", "wo", "bo", "w1", "b1", "w2", "b2",
                   "ln1", "ln2")]
    for i in range(n_dec):
        p = f"dec{i}_"
        names += [p + s for s in
                  ("sa_wqkv", "sa_bqkv", "sa_wo", "sa_bo",
                   "ca_wqkv", "ca_bqkv", "ca_wo", "ca_bo",
                   "w1", "b1", "w2", "b2", "ln1", "ln2", "ln3")]
    names += ["dec_norm", "query_embed", "class_w", "class_b",
              "reg_w", "reg_b", "centers"]
    return tuple(names)


# ------------------------------ fused kernel -------------------------------

def _fused_forward_kernel(*refs, param_names, d, nheads, nq, n_enc, n_dec):
    # refs = (feat_ref, *param_refs, logits_ref, age_ref); one batch element per step.
    assert len(refs) == len(param_names) + 3
    f32 = jnp.float32
    feat_ref = refs[0]
    logits_ref, age_ref = refs[-2], refs[-1]
    prm = dict(zip(param_names, refs[1:-2]))

    hd = d // nheads
    scale = 1.0 / math.sqrt(hd)

    def layer_norm(x, name, eps=1e-5):
        gb = prm[name][...]                      # [2, d]: row0 = gamma, row1 = beta
        mu = jnp.mean(x, axis=-1, keepdims=True)
        xc = x - mu
        var = jnp.mean(xc * xc, axis=-1, keepdims=True)
        return xc * jax.lax.rsqrt(var + eps) * gb[0:1, :] + gb[1:2, :]

    def linear(x, w_ref, b_ref):
        return jnp.dot(x, w_ref[...], preferred_element_type=f32) + b_ref[...]

    def mha(q, k, v, wo, bo):
        # q [Lq, d], k/v [Lk, d]; multi-head attention with the output
        # projection fused into the per-head accumulation (no head concat).
        Lq = q.shape[0]
        q = q * scale                            # pre-scale once (matches torch MHA)
        out = jnp.zeros((Lq, d), f32) + bo
        for hi in range(nheads):
            sl = slice(hi * hd, (hi + 1) * hd)
            s = jax.lax.dot_general(q[:, sl], k[:, sl],
                                    (((1,), (1,)), ((), ())),
                                    preferred_element_type=f32)         # [Lq, Lk]
            s = s - jnp.max(s, axis=-1, keepdims=True)
            pr = jnp.exp(s)
            pr = pr * pl.reciprocal(jnp.sum(pr, axis=-1, keepdims=True),
                                    approx=True)
            oh = jnp.dot(pr, v[:, sl], preferred_element_type=f32)      # [Lq, hd]
            out = out + jnp.dot(oh, wo[sl, :], preferred_element_type=f32)
        return out

    # -------- backbone stand-in + dimensionality reduction --------
    # TODO(synk): `backbone` is an externally supplied module in the reference;
    # a synthetic global-average-pool + Linear backbone is used here.
    feat = linear(feat_ref[...], prm["backbone_w"], prm["backbone_b"])   # [S, F]
    h = linear(feat, prm["dr_w"], prm["dr_b"])                           # [S, d]
    h = jnp.where(h >= 0.0, h, 0.01 * h)                                 # F.leaky_relu
    nrm = jnp.sqrt(jnp.sum(h * h, axis=-1, keepdims=True))
    src = h / jnp.maximum(nrm, 1e-12)                                    # F.normalize(dim=1)

    # ------------------------ encoder stack ------------------------
    for li in range(n_enc):
        pre = f"enc{li}_"
        qkv = linear(src, prm[pre + "wqkv"], prm[pre + "bqkv"])          # fused QKV
        sa = mha(qkv[:, :d], qkv[:, d:2 * d], qkv[:, 2 * d:],
                 prm[pre + "wo"][...], prm[pre + "bo"][...])
        src = layer_norm(src + sa, pre + "ln1")
        ff = jnp.maximum(linear(src, prm[pre + "w1"], prm[pre + "b1"]), 0.0)
        ff = linear(ff, prm[pre + "w2"], prm[pre + "b2"])
        src = layer_norm(src + ff, pre + "ln2")
    memory = src                                                         # [S, d]

    # ------------------------ decoder stack ------------------------
    qpos = prm["query_embed"][...]                                       # [nq, d]
    tgt = jnp.zeros((nq, d), f32)
    for li in range(n_dec):
        pre = f"dec{li}_"
        # self-attention: q = k = tgt + qpos, v = tgt  (fused QK projection)
        w = prm[pre + "sa_wqkv"][...]
        b = prm[pre + "sa_bqkv"][...]
        qk = jnp.dot(tgt + qpos, w[:, :2 * d],
                     preferred_element_type=f32) + b[:, :2 * d]
        v = jnp.dot(tgt, w[:, 2 * d:], preferred_element_type=f32) + b[:, 2 * d:]
        sa = mha(qk[:, :d], qk[:, d:], v,
                 prm[pre + "sa_wo"][...], prm[pre + "sa_bo"][...])
        tgt = layer_norm(tgt + sa, pre + "ln1")
        # cross-attention: q = tgt + qpos, k = v = memory  (fused KV projection)
        w = prm[pre + "ca_wqkv"][...]
        b = prm[pre + "ca_bqkv"][...]
        q = jnp.dot(tgt + qpos, w[:, :d], preferred_element_type=f32) + b[:, :d]
        kv = jnp.dot(memory, w[:, d:], preferred_element_type=f32) + b[:, d:]
        ca = mha(q, kv[:, :d], kv[:, d:],
                 prm[pre + "ca_wo"][...], prm[pre + "ca_bo"][...])
        tgt = layer_norm(tgt + ca, pre + "ln2")
        ff = jnp.maximum(linear(tgt, prm[pre + "w1"], prm[pre + "b1"]), 0.0)
        ff = linear(ff, prm[pre + "w2"], prm[pre + "b2"])
        tgt = layer_norm(tgt + ff, pre + "ln3")
    tgt = layer_norm(tgt, "dec_norm")     # final decoder LayerNorm, no fake residual

    # --------------------------- heads -----------------------------
    half = nq // 2
    e1 = jnp.mean(tgt[:half, :], axis=0, keepdims=True)                  # [1, d]
    e2 = jnp.mean(tgt[half:, :], axis=0, keepdims=True)                  # [1, d]
    logits = linear(e1, prm["class_w"], prm["class_b"])                  # [1, C]
    logits_ref[...] = logits
    m = jnp.max(logits, axis=-1, keepdims=True)
    e = jnp.exp(logits - m)
    weights = e / jnp.sum(e, axis=-1, keepdims=True)                     # softmax (exact)
    reg = linear(e2, prm["reg_w"], prm["reg_b"]) + prm["centers"][...]   # [1, C]
    # softmax weights sum to 1, so the reference's "/ sum(weights)" is an identity.
    age_ref[...] = jnp.sum(reg * weights, axis=-1, keepdims=True)


# ------------------------------ host wrapper -------------------------------

def actual_transformer_forward(params, x, *, nheads, n_enc, n_dec, num_classes):
    B, S, C, H, W = x.shape
    d = params["dr_w"].shape[1]
    names = _param_layout(n_enc, n_dec)

    # synthetic backbone's global average pool (tiny; keeps the kernel input 2-D)
    feat_pooled = jnp.mean(x, axis=(3, 4))                               # [B, S, C]

    vals = dict(params)
    # query_embed = torch.cat(B * [query_pos]) -> [2B, d]; shared by every batch element
    vals["query_embed"] = jnp.tile(params["query_pos"], (B, 1))
    nq = 2 * B

    flat_inputs = [feat_pooled] + [vals[n] for n in names]

    def _const_map(nd):
        return lambda b: (0,) * nd

    in_specs = [pl.BlockSpec((None, S, C), lambda b: (b, 0, 0))]
    for n in names:
        a = vals[n]
        in_specs.append(pl.BlockSpec(a.shape, _const_map(a.ndim)))

    out_shape = (jax.ShapeDtypeStruct((B, 1, num_classes), jnp.float32),
                 jax.ShapeDtypeStruct((B, 1, 1), jnp.float32))
    out_specs = (pl.BlockSpec((None, 1, num_classes), lambda b: (b, 0, 0)),
                 pl.BlockSpec((None, 1, 1), lambda b: (b, 0, 0)))

    kernel = functools.partial(
        _fused_forward_kernel, param_names=names, d=d, nheads=nheads,
        nq=nq, n_enc=n_enc, n_dec=n_dec)

    logits, age = pl.pallas_call(
        kernel,
        out_shape=out_shape,
        grid=(B,),
        in_specs=in_specs,
        out_specs=out_specs,
        compiler_params=pltpu.CompilerParams(
            dimension_semantics=("parallel",)),   # batch elements split across TCs (v7x)
    )(*flat_inputs)
    return logits.reshape(B, num_classes), age.reshape(B)


# ----------------------------- parameter init ------------------------------

def _init_linear(key, fan_in, fan_out):
    k1, k2 = jax.random.split(key)
    bound = 1.0 / math.sqrt(fan_in)
    w = jax.random.uniform(k1, (fan_in, fan_out), jnp.float32, -bound, bound)
    b = jax.random.uniform(k2, (1, fan_out), jnp.float32, -bound, bound)
    return w, b


def init_params(key, C, feat, d, nheads, ffn, n_enc, n_dec, num_classes,
                min_age, age_interval):
    keys = iter(jax.random.split(key, 256))
    nk = lambda: next(keys)
    P = {}
    P["backbone_w"], P["backbone_b"] = _init_linear(nk(), C, feat)
    P["dr_w"], P["dr_b"] = _init_linear(nk(), feat, d)

    def ln_param():  # [2, d]: row0 gamma, row1 beta
        return jnp.concatenate([jnp.ones((1, d), jnp.float32),
                                jnp.zeros((1, d), jnp.float32)], axis=0)

    def mha_qkv():   # fused QKV weights [d, 3d] / bias [1, 3d]
        ws, bs = [], []
        for _ in range(3):
            w, b = _init_linear(nk(), d, d)
            ws.append(w)
            bs.append(b)
        return jnp.concatenate(ws, axis=1), jnp.concatenate(bs, axis=1)

    for i in range(n_enc):
        p = f"enc{i}_"
        P[p + "wqkv"], P[p + "bqkv"] = mha_qkv()
        P[p + "wo"], P[p + "bo"] = _init_linear(nk(), d, d)
        P[p + "w1"], P[p + "b1"] = _init_linear(nk(), d, ffn)
        P[p + "w2"], P[p + "b2"] = _init_linear(nk(), ffn, d)
        P[p + "ln1"], P[p + "ln2"] = ln_param(), ln_param()
    for i in range(n_dec):
        p = f"dec{i}_"
        P[p + "sa_wqkv"], P[p + "sa_bqkv"] = mha_qkv()
        P[p + "sa_wo"], P[p + "sa_bo"] = _init_linear(nk(), d, d)
        P[p + "ca_wqkv"], P[p + "ca_bqkv"] = mha_qkv()
        P[p + "ca_wo"], P[p + "ca_bo"] = _init_linear(nk(), d, d)
        P[p + "w1"], P[p + "b1"] = _init_linear(nk(), d, ffn)
        P[p + "w2"], P[p + "b2"] = _init_linear(nk(), ffn, d)
        P[p + "ln1"], P[p + "ln2"], P[p + "ln3"] = ln_param(), ln_param(), ln_param()
    P["dec_norm"] = ln_param()
    P["query_pos"] = jax.random.uniform(nk(), (2, d), jnp.float32)  # torch.rand(2, hidden_dim)
    P["class_w"], P["class_b"] = _init_linear(nk(), d, num_classes)
    rws, rbs = [], []
    for _ in range(num_classes):
        w, b = _init_linear(nk(), d, 1)
        rws.append(w)
        rbs.append(b)
    P["reg_w"] = jnp.concatenate(rws, axis=1)     # [d, num_classes]
    P["reg_b"] = jnp.concatenate(rbs, axis=1)     # [1, num_classes]
    P["centers"] = jnp.array(
        [[min_age + 0.5 * age_interval + i * age_interval
          for i in range(num_classes)]], jnp.float32)                # [1, num_classes]
    return P


# ----------------------------------- main -----------------------------------

if __name__ == "__main__":
    B, S, C, H, W = 2, 4, 3, 8, 8
    backbone_feat = 64
    hidden_dim = 32
    nheads = 4
    ffn = hidden_dim            # dim_feedforward = hidden_dim in the reference
    n_enc, n_dec = 2, 2
    num_classes = 4
    min_age, age_interval = 20.0, 10.0

    key = jax.random.PRNGKey(0)
    pkey, xkey = jax.random.split(key)
    params = init_params(pkey, C, backbone_feat, hidden_dim, nheads, ffn,
                         n_enc, n_dec, num_classes, min_age, age_interval)
    x = jax.random.normal(xkey, (B, S, C, H, W), jnp.float32)

    fwd = jax.jit(functools.partial(actual_transformer_forward, nheads=nheads,
                                    n_enc=n_enc, n_dec=n_dec,
                                    num_classes=num_classes))
    logits, age = fwd(params, x)
    jax.block_until_ready((logits, age))
    assert logits.shape == (B, num_classes)
    assert age.shape == (B,)
    print("KERNEL_OK")
</pallas_src>

<mosaic_0001>
module attributes {stable_mosaic.version = 11 : i64} {
  func.func @_fused_forward_kernel(%arg0: i32, %arg1: memref<1x4x3xf32, #tpu.memory_space<vmem>>, %arg2: memref<3x64xf32, #tpu.memory_space<vmem>>, %arg3: memref<1x64xf32, #tpu.memory_space<vmem>>, %arg4: memref<64x32xf32, #tpu.memory_space<vmem>>, %arg5: memref<1x32xf32, #tpu.memory_space<vmem>>, %arg6: memref<32x96xf32, #tpu.memory_space<vmem>>, %arg7: memref<1x96xf32, #tpu.memory_space<vmem>>, %arg8: memref<32x32xf32, #tpu.memory_space<vmem>>, %arg9: memref<1x32xf32, #tpu.memory_space<vmem>>, %arg10: memref<32x32xf32, #tpu.memory_space<vmem>>, %arg11: memref<1x32xf32, #tpu.memory_space<vmem>>, %arg12: memref<32x32xf32, #tpu.memory_space<vmem>>, %arg13: memref<1x32xf32, #tpu.memory_space<vmem>>, %arg14: memref<2x32xf32, #tpu.memory_space<vmem>>, %arg15: memref<2x32xf32, #tpu.memory_space<vmem>>, %arg16: memref<32x96xf32, #tpu.memory_space<vmem>>, %arg17: memref<1x96xf32, #tpu.memory_space<vmem>>, %arg18: memref<32x32xf32, #tpu.memory_space<vmem>>, %arg19: memref<1x32xf32, #tpu.memory_space<vmem>>, %arg20: memref<32x32xf32, #tpu.memory_space<vmem>>, %arg21: memref<1x32xf32, #tpu.memory_space<vmem>>, %arg22: memref<32x32xf32, #tpu.memory_space<vmem>>, %arg23: memref<1x32xf32, #tpu.memory_space<vmem>>, %arg24: memref<2x32xf32, #tpu.memory_space<vmem>>, %arg25: memref<2x32xf32, #tpu.memory_space<vmem>>, %arg26: memref<32x96xf32, #tpu.memory_space<vmem>>, %arg27: memref<1x96xf32, #tpu.memory_space<vmem>>, %arg28: memref<32x32xf32, #tpu.memory_space<vmem>>, %arg29: memref<1x32xf32, #tpu.memory_space<vmem>>, %arg30: memref<32x96xf32, #tpu.memory_space<vmem>>, %arg31: memref<1x96xf32, #tpu.memory_space<vmem>>, %arg32: memref<32x32xf32, #tpu.memory_space<vmem>>, %arg33: memref<1x32xf32, #tpu.memory_space<vmem>>, %arg34: memref<32x32xf32, #tpu.memory_space<vmem>>, %arg35: memref<1x32xf32, #tpu.memory_space<vmem>>, %arg36: memref<32x32xf32, #tpu.memory_space<vmem>>, %arg37: memref<1x32xf32, #tpu.memory_space<vmem>>, %arg38: memref<2x32xf32, #tpu.memory_space<vmem>>, %arg39: memref<2x32xf32, #tpu.memory_space<vmem>>, %arg40: memref<2x32xf32, #tpu.memory_space<vmem>>, %arg41: memref<32x96xf32, #tpu.memory_space<vmem>>, %arg42: memref<1x96xf32, #tpu.memory_space<vmem>>, %arg43: memref<32x32xf32, #tpu.memory_space<vmem>>, %arg44: memref<1x32xf32, #tpu.memory_space<vmem>>, %arg45: memref<32x96xf32, #tpu.memory_space<vmem>>, %arg46: memref<1x96xf32, #tpu.memory_space<vmem>>, %arg47: memref<32x32xf32, #tpu.memory_space<vmem>>, %arg48: memref<1x32xf32, #tpu.memory_space<vmem>>, %arg49: memref<32x32xf32, #tpu.memory_space<vmem>>, %arg50: memref<1x32xf32, #tpu.memory_space<vmem>>, %arg51: memref<32x32xf32, #tpu.memory_space<vmem>>, %arg52: memref<1x32xf32, #tpu.memory_space<vmem>>, %arg53: memref<2x32xf32, #tpu.memory_space<vmem>>, %arg54: memref<2x32xf32, #tpu.memory_space<vmem>>, %arg55: memref<2x32xf32, #tpu.memory_space<vmem>>, %arg56: memref<2x32xf32, #tpu.memory_space<vmem>>, %arg57: memref<4x32xf32, #tpu.memory_space<vmem>>, %arg58: memref<32x4xf32, #tpu.memory_space<vmem>>, %arg59: memref<1x4xf32, #tpu.memory_space<vmem>>, %arg60: memref<32x4xf32, #tpu.memory_space<vmem>>, %arg61: memref<1x4xf32, #tpu.memory_space<vmem>>, %arg62: memref<1x4xf32, #tpu.memory_space<vmem>>, %arg63: memref<1x1x4xf32, #tpu.memory_space<vmem>>, %arg64: memref<1x1x1xf32, #tpu.memory_space<vmem>>) attributes {dimension_semantics = [#tpu.dimension_semantics<parallel>], iteration_bounds = array<i64: 2>, scalar_prefetch = 0 : i64, scratch_operands = 0 : i64, tpu.core_type = #tpu.core_type<tc>, window_params = [{transform_indices = @transform_0, window_bounds = array<i64: 1, 4, 3>}, {pipeline_mode = #tpu.pipeline_mode<synchronous>, transform_indices = @transform_1, window_bounds = array<i64: 3, 64>}, {pipeline_mode = #tpu.pipeline_mode<synchronous>, transform_indices = @transform_2, window_bounds = array<i64: 1, 64>}, {pipeline_mode = #tpu.pipeline_mode<synchronous>, transform_indices = @transform_3, window_bounds = array<i64: 64, 32>}, {pipeline_mode = #tpu.pipeline_mode<synchronous>, transform_indices = @transform_4, window_bounds = array<i64: 1, 32>}, {pipeline_mode = #tpu.pipeline_mode<synchronous>, transform_indices = @transform_5, window_bounds = array<i64: 32, 96>}, {pipeline_mode = #tpu.pipeline_mode<synchronous>, transform_indices = @transform_6, window_bounds = array<i64: 1, 96>}, {pipeline_mode = #tpu.pipeline_mode<synchronous>, transform_indices = @transform_7, window_bounds = array<i64: 32, 32>}, {pipeline_mode = #tpu.pipeline_mode<synchronous>, transform_indices = @transform_8, window_bounds = array<i64: 1, 32>}, {pipeline_mode = #tpu.pipeline_mode<synchronous>, transform_indices = @transform_9, window_bounds = array<i64: 32, 32>}, {pipeline_mode = #tpu.pipeline_mode<synchronous>, transform_indices = @transform_10, window_bounds = array<i64: 1, 32>}, {pipeline_mode = #tpu.pipeline_mode<synchronous>, transform_indices = @transform_11, window_bounds = array<i64: 32, 32>}, {pipeline_mode = #tpu.pipeline_mode<synchronous>, transform_indices = @transform_12, window_bounds = array<i64: 1, 32>}, {pipeline_mode = #tpu.pipeline_mode<synchronous>, transform_indices = @transform_13, window_bounds = array<i64: 2, 32>}, {pipeline_mode = #tpu.pipeline_mode<synchronous>, transform_indices = @transform_14, window_bounds = array<i64: 2, 32>}, {pipeline_mode = #tpu.pipeline_mode<synchronous>, transform_indices = @transform_15, window_bounds = array<i64: 32, 96>}, {pipeline_mode = #tpu.pipeline_mode<synchronous>, transform_indices = @transform_16, window_bounds = array<i64: 1, 96>}, {pipeline_mode = #tpu.pipeline_mode<synchronous>, transform_indices = @transform_17, window_bounds = array<i64: 32, 32>}, {pipeline_mode = #tpu.pipeline_mode<synchronous>, transform_indices = @transform_18, window_bounds = array<i64: 1, 32>}, {pipeline_mode = #tpu.pipeline_mode<synchronous>, transform_indices = @transform_19, window_bounds = array<i64: 32, 32>}, {pipeline_mode = #tpu.pipeline_mode<synchronous>, transform_indices = @transform_20, window_bounds = array<i64: 1, 32>}, {pipeline_mode = #tpu.pipeline_mode<synchronous>, transform_indices = @transform_21, window_bounds = array<i64: 32, 32>}, {pipeline_mode = #tpu.pipeline_mode<synchronous>, transform_indices = @transform_22, window_bounds = array<i64: 1, 32>}, {pipeline_mode = #tpu.pipeline_mode<synchronous>, transform_indices = @transform_23, window_bounds = array<i64: 2, 32>}, {pipeline_mode = #tpu.pipeline_mode<synchronous>, transform_indices = @transform_24, window_bounds = array<i64: 2, 32>}, {pipeline_mode = #tpu.pipeline_mode<synchronous>, transform_indices = @transform_25, window_bounds = array<i64: 32, 96>}, {pipeline_mode = #tpu.pipeline_mode<synchronous>, transform_indices = @transform_26, window_bounds = array<i64: 1, 96>}, {pipeline_mode = #tpu.pipeline_mode<synchronous>, transform_indices = @transform_27, window_bounds = array<i64: 32, 32>}, {pipeline_mode = #tpu.pipeline_mode<synchronous>, transform_indices = @transform_28, window_bounds = array<i64: 1, 32>}, {pipeline_mode = #tpu.pipeline_mode<synchronous>, transform_indices = @transform_29, window_bounds = array<i64: 32, 96>}, {pipeline_mode = #tpu.pipeline_mode<synchronous>, transform_indices = @transform_30, window_bounds = array<i64: 1, 96>}, {pipeline_mode = #tpu.pipeline_mode<synchronous>, transform_indices = @transform_31, window_bounds = array<i64: 32, 32>}, {pipeline_mode = #tpu.pipeline_mode<synchronous>, transform_indices = @transform_32, window_bounds = array<i64: 1, 32>}, {pipeline_mode = #tpu.pipeline_mode<synchronous>, transform_indices = @transform_33, window_bounds = array<i64: 32, 32>}, {pipeline_mode = #tpu.pipeline_mode<synchronous>, transform_indices = @transform_34, window_bounds = array<i64: 1, 32>}, {pipeline_mode = #tpu.pipeline_mode<synchronous>, transform_indices = @transform_35, window_bounds = array<i64: 32, 32>}, {pipeline_mode = #tpu.pipeline_mode<synchronous>, transform_indices = @transform_36, window_bounds = array<i64: 1, 32>}, {pipeline_mode = #tpu.pipeline_mode<synchronous>, transform_indices = @transform_37, window_bounds = array<i64: 2, 32>}, {pipeline_mode = #tpu.pipeline_mode<synchronous>, transform_indices = @transform_38, window_bounds = array<i64: 2, 32>}, {pipeline_mode = #tpu.pipeline_mode<synchronous>, transform_indices = @transform_39, window_bounds = array<i64: 2, 32>}, {pipeline_mode = #tpu.pipeline_mode<synchronous>, transform_indices = @transform_40, window_bounds = array<i64: 32, 96>}, {pipeline_mode = #tpu.pipeline_mode<synchronous>, transform_indices = @transform_41, window_bounds = array<i64: 1, 96>}, {pipeline_mode = #tpu.pipeline_mode<synchronous>, transform_indices = @transform_42, window_bounds = array<i64: 32, 32>}, {pipeline_mode = #tpu.pipeline_mode<synchronous>, transform_indices = @transform_43, window_bounds = array<i64: 1, 32>}, {pipeline_mode = #tpu.pipeline_mode<synchronous>, transform_indices = @transform_44, window_bounds = array<i64: 32, 96>}, {pipeline_mode = #tpu.pipeline_mode<synchronous>, transform_indices = @transform_45, window_bounds = array<i64: 1, 96>}, {pipeline_mode = #tpu.pipeline_mode<synchronous>, transform_indices = @transform_46, window_bounds = array<i64: 32, 32>}, {pipeline_mode = #tpu.pipeline_mode<synchronous>, transform_indices = @transform_47, window_bounds = array<i64: 1, 32>}, {pipeline_mode = #tpu.pipeline_mode<synchronous>, transform_indices = @transform_48, window_bounds = array<i64: 32, 32>}, {pipeline_mode = #tpu.pipeline_mode<synchronous>, transform_indices = @transform_49, window_bounds = array<i64: 1, 32>}, {pipeline_mode = #tpu.pipeline_mode<synchronous>, transform_indices = @transform_50, window_bounds = array<i64: 32, 32>}, {pipeline_mode = #tpu.pipeline_mode<synchronous>, transform_indices = @transform_51, window_bounds = array<i64: 1, 32>}, {pipeline_mode = #tpu.pipeline_mode<synchronous>, transform_indices = @transform_52, window_bounds = array<i64: 2, 32>}, {pipeline_mode = #tpu.pipeline_mode<synchronous>, transform_indices = @transform_53, window_bounds = array<i64: 2, 32>}, {pipeline_mode = #tpu.pipeline_mode<synchronous>, transform_indices = @transform_54, window_bounds = array<i64: 2, 32>}, {pipeline_mode = #tpu.pipeline_mode<synchronous>, transform_indices = @transform_55, window_bounds = array<i64: 2, 32>}, {pipeline_mode = #tpu.pipeline_mode<synchronous>, transform_indices = @transform_56, window_bounds = array<i64: 4, 32>}, {pipeline_mode = #tpu.pipeline_mode<synchronous>, transform_indices = @transform_57, window_bounds = array<i64: 32, 4>}, {pipeline_mode = #tpu.pipeline_mode<synchronous>, transform_indices = @transform_58, window_bounds = array<i64: 1, 4>}, {pipeline_mode = #tpu.pipeline_mode<synchronous>, transform_indices = @transform_59, window_bounds = array<i64: 32, 4>}, {pipeline_mode = #tpu.pipeline_mode<synchronous>, transform_indices = @transform_60, window_bounds = array<i64: 1, 4>}, {pipeline_mode = #tpu.pipeline_mode<synchronous>, transform_indices = @transform_61, window_bounds = array<i64: 1, 4>}, {transform_indices = @transform_62, window_bounds = array<i64: 1, 1, 4>}, {transform_indices = @transform_63, window_bounds = array<i64: 1, 1, 1>}]} {
    %c0 = arith.constant 0 : index
    %c0_0 = arith.constant 0 : index
    %c0_1 = arith.constant 0 : index
    %0 = vector.load %arg1[%c0, %c0_0, %c0_1] : memref<1x4x3xf32, #tpu.memory_space<vmem>>, vector<1x4x3xf32>
    %1 = vector.shape_cast %0 : vector<1x4x3xf32> to vector<4x3xf32>
    %c0_2 = arith.constant 0 : index
    %c0_3 = arith.constant 0 : index
    %2 = vector.load %arg2[%c0_2, %c0_3] : memref<3x64xf32, #tpu.memory_space<vmem>>, vector<3x64xf32>
    %cst = arith.constant dense<0.000000e+00> : vector<4x64xf32>
    %3 = tpu.matmul %1, %2, %cst {dimension_numbers = #tpu.dot_dimension_numbers<[1], [0], [0], [1], [0, 0, 1, 1], [], []>} : vector<4x3xf32>, vector<3x64xf32>, vector<4x64xf32> -> vector<4x64xf32>
    %c0_4 = arith.constant 0 : index
    %c0_5 = arith.constant 0 : index
    %4 = vector.load %arg3[%c0_4, %c0_5] : memref<1x64xf32, #tpu.memory_space<vmem>>, vector<1x64xf32>
    %5 = vector.broadcast %4 : vector<1x64xf32> to vector<4x64xf32>
    %6 = arith.addf %3, %5 : vector<4x64xf32>
    %c0_6 = arith.constant 0 : index
    %c0_7 = arith.constant 0 : index
    %7 = vector.load %arg4[%c0_6, %c0_7] : memref<64x32xf32, #tpu.memory_space<vmem>>, vector<64x32xf32>
    %cst_8 = arith.constant dense<0.000000e+00> : vector<4x32xf32>
    %8 = tpu.matmul %6, %7, %cst_8 {dimension_numbers = #tpu.dot_dimension_numbers<[1], [0], [0], [1], [0, 0, 1, 1], [], []>} : vector<4x64xf32>, vector<64x32xf32>, vector<4x32xf32> -> vector<4x32xf32>
    %c0_9 = arith.constant 0 : index
    %c0_10 = arith.constant 0 : index
    %9 = vector.load %arg5[%c0_9, %c0_10] : memref<1x32xf32, #tpu.memory_space<vmem>>, vector<1x32xf32>
    %10 = vector.broadcast %9 : vector<1x32xf32> to vector<4x32xf32>
    %11 = arith.addf %8, %10 : vector<4x32xf32>
    %cst_11 = arith.constant 0.000000e+00 : f32
    %12 = vector.broadcast %cst_11 : f32 to vector<4x32xf32>
    %13 = arith.cmpf oge, %11, %12 : vector<4x32xf32>
    %cst_12 = arith.constant 0.00999999977 : f32
    %14 = vector.broadcast %cst_12 : f32 to vector<4x32xf32>
    %15 = arith.mulf %14, %11 : vector<4x32xf32>
    %16 = arith.select %13, %11, %15 : vector<4x32xi1>, vector<4x32xf32>
    %17 = arith.mulf %16, %16 : vector<4x32xf32>
    %cst_13 = arith.constant dense<0.000000e+00> : vector<4xf32>
    %18 = vector.multi_reduction <add>, %17, %cst_13 [1] : vector<4x32xf32> to vector<4xf32>
    %19 = vector.shape_cast %18 : vector<4xf32> to vector<4x1xf32>
    %20 = math.sqrt %19 : vector<4x1xf32>
    %cst_14 = arith.constant 9.99999996E-13 : f32
    %21 = vector.broadcast %cst_14 : f32 to vector<4x1xf32>
    %22 = arith.maximumf %20, %21 : vector<4x1xf32>
    %23 = vector.broadcast %22 : vector<4x1xf32> to vector<4x32xf32>
    %24 = arith.divf %16, %23 : vector<4x32xf32>
    %c0_15 = arith.constant 0 : index
    %c0_16 = arith.constant 0 : index
    %25 = vector.load %arg6[%c0_15, %c0_16] : memref<32x96xf32, #tpu.memory_space<vmem>>, vector<32x96xf32>
    %cst_17 = arith.constant dense<0.000000e+00> : vector<4x96xf32>
    %26 = tpu.matmul %24, %25, %cst_17 {dimension_numbers = #tpu.dot_dimension_numbers<[1], [0], [0], [1], [0, 0, 1, 1], [], []>} : vector<4x32xf32>, vector<32x96xf32>, vector<4x96xf32> -> vector<4x96xf32>
    %c0_18 = arith.constant 0 : index
    %c0_19 = arith.constant 0 : index
    %27 = vector.load %arg7[%c0_18, %c0_19] : memref<1x96xf32, #tpu.memory_space<vmem>>, vector<1x96xf32>
    %28 = vector.broadcast %27 : vector<1x96xf32> to vector<4x96xf32>
    %29 = arith.addf %26, %28 : vector<4x96xf32>
    %30 = vector.extract_strided_slice %29 {offsets = [0, 0], sizes = [4, 32], strides = [1, 1]} : vector<4x96xf32> to vector<4x32xf32>
    %31 = vector.extract_strided_slice %29 {offsets = [0, 32], sizes = [4, 32], strides = [1, 1]} : vector<4x96xf32> to vector<4x32xf32>
    %32 = vector.extract_strided_slice %29 {offsets = [0, 64], sizes = [4, 32], strides = [1, 1]} : vector<4x96xf32> to vector<4x32xf32>
    %c0_20 = arith.constant 0 : index
    %c0_21 = arith.constant 0 : index
    %33 = vector.load %arg8[%c0_20, %c0_21] : memref<32x32xf32, #tpu.memory_space<vmem>>, vector<32x32xf32>
    %c0_22 = arith.constant 0 : index
    %c0_23 = arith.constant 0 : index
    %34 = vector.load %arg9[%c0_22, %c0_23] : memref<1x32xf32, #tpu.memory_space<vmem>>, vector<1x32xf32>
    %cst_24 = arith.constant 0.353553385 : f32
    %35 = vector.broadcast %cst_24 : f32 to vector<4x32xf32>
    %36 = arith.mulf %30, %35 : vector<4x32xf32>
    %cst_25 = arith.constant 0.000000e+00 : f32
    %37 = vector.broadcast %cst_25 : f32 to vector<4x32xf32>
    %38 = vector.broadcast %34 : vector<1x32xf32> to vector<4x32xf32>
    %39 = arith.addf %37, %38 : vector<4x32xf32>
    %40 = vector.extract_strided_slice %36 {offsets = [0, 0], sizes = [4, 8], strides = [1, 1]} : vector<4x32xf32> to vector<4x8xf32>
    %41 = vector.extract_strided_slice %31 {offsets = [0, 0], sizes = [4, 8], strides = [1, 1]} : vector<4x32xf32> to vector<4x8xf32>
    %cst_26 = arith.constant dense<0.000000e+00> : vector<4x4xf32>
    %42 = tpu.matmul %40, %41, %cst_26 {dimension_numbers = #tpu.dot_dimension_numbers<[1], [1], [0], [0], [0, 0, 1, 0], [], []>} : vector<4x8xf32>, vector<4x8xf32>, vector<4x4xf32> -> vector<4x4xf32>
    %cst_27 = arith.constant dense<0xFF800000> : vector<4xf32>
    %43 = vector.multi_reduction <maximumf>, %42, %cst_27 [1] : vector<4x4xf32> to vector<4xf32>
    %44 = vector.shape_cast %43 : vector<4xf32> to vector<4x1xf32>
    %45 = vector.broadcast %44 : vector<4x1xf32> to vector<4x4xf32>
    %46 = arith.subf %42, %45 : vector<4x4xf32>
    %47 = math.exp %46 : vector<4x4xf32>
    %cst_28 = arith.constant dense<0.000000e+00> : vector<4xf32>
    %48 = vector.multi_reduction <add>, %47, %cst_28 [1] : vector<4x4xf32> to vector<4xf32>
    %49 = vector.shape_cast %48 : vector<4xf32> to vector<4x1xf32>
    %50 = tpu.reciprocal %49 {approx = true} : vector<4x1xf32> -> vector<4x1xf32>
    %51 = vector.broadcast %50 : vector<4x1xf32> to vector<4x4xf32>
    %52 = arith.mulf %47, %51 : vector<4x4xf32>
    %53 = vector.extract_strided_slice %32 {offsets = [0, 0], sizes = [4, 8], strides = [1, 1]} : vector<4x32xf32> to vector<4x8xf32>
    %cst_29 = arith.constant dense<0.000000e+00> : vector<4x8xf32>
    %54 = tpu.matmul %52, %53, %cst_29 {dimension_numbers = #tpu.dot_dimension_numbers<[1], [0], [0], [1], [0, 0, 1, 1], [], []>} : vector<4x4xf32>, vector<4x8xf32>, vector<4x8xf32> -> vector<4x8xf32>
    %55 = vector.extract_strided_slice %33 {offsets = [0, 0], sizes = [8, 32], strides = [1, 1]} : vector<32x32xf32> to vector<8x32xf32>
    %cst_30 = arith.constant dense<0.000000e+00> : vector<4x32xf32>
    %56 = tpu.matmul %54, %55, %cst_30 {dimension_numbers = #tpu.dot_dimension_numbers<[1], [0], [0], [1], [0, 0, 1, 1], [], []>} : vector<4x8xf32>, vector<8x32xf32>, vector<4x32xf32> -> vector<4x32xf32>
    %57 = arith.addf %39, %56 : vector<4x32xf32>
    %58 = vector.extract_strided_slice %36 {offsets = [0, 8], sizes = [4, 8], strides = [1, 1]} : vector<4x32xf32> to vector<4x8xf32>
    %59 = vector.extract_strided_slice %31 {offsets = [0, 8], sizes = [4, 8], strides = [1, 1]} : vector<4x32xf32> to vector<4x8xf32>
    %cst_31 = arith.constant dense<0.000000e+00> : vector<4x4xf32>
    %60 = tpu.matmul %58, %59, %cst_31 {dimension_numbers = #tpu.dot_dimension_numbers<[1], [1], [0], [0], [0, 0, 1, 0], [], []>} : vector<4x8xf32>, vector<4x8xf32>, vector<4x4xf32> -> vector<4x4xf32>
    %cst_32 = arith.constant dense<0xFF800000> : vector<4xf32>
    %61 = vector.multi_reduction <maximumf>, %60, %cst_32 [1] : vector<4x4xf32> to vector<4xf32>
    %62 = vector.shape_cast %61 : vector<4xf32> to vector<4x1xf32>
    %63 = vector.broadcast %62 : vector<4x1xf32> to vector<4x4xf32>
    %64 = arith.subf %60, %63 : vector<4x4xf32>
    %65 = math.exp %64 : vector<4x4xf32>
    %cst_33 = arith.constant dense<0.000000e+00> : vector<4xf32>
    %66 = vector.multi_reduction <add>, %65, %cst_33 [1] : vector<4x4xf32> to vector<4xf32>
    %67 = vector.shape_cast %66 : vector<4xf32> to vector<4x1xf32>
    %68 = tpu.reciprocal %67 {approx = true} : vector<4x1xf32> -> vector<4x1xf32>
    %69 = vector.broadcast %68 : vector<4x1xf32> to vector<4x4xf32>
    %70 = arith.mulf %65, %69 : vector<4x4xf32>
    %71 = vector.extract_strided_slice %32 {offsets = [0, 8], sizes = [4, 8], strides = [1, 1]} : vector<4x32xf32> to vector<4x8xf32>
    %cst_34 = arith.constant dense<0.000000e+00> : vector<4x8xf32>
    %72 = tpu.matmul %70, %71, %cst_34 {dimension_numbers = #tpu.dot_dimension_numbers<[1], [0], [0], [1], [0, 0, 1, 1], [], []>} : vector<4x4xf32>, vector<4x8xf32>, vector<4x8xf32> -> vector<4x8xf32>
    %73 = vector.extract_strided_slice %33 {offsets = [8, 0], sizes = [8, 32], strides = [1, 1]} : vector<32x32xf32> to vector<8x32xf32>
    %cst_35 = arith.constant dense<0.000000e+00> : vector<4x32xf32>
    %74 = tpu.matmul %72, %73, %cst_35 {dimension_numbers = #tpu.dot_dimension_numbers<[1], [0], [0], [1], [0, 0, 1, 1], [], []>} : vector<4x8xf32>, vector<8x32xf32>, vector<4x32xf32> -> vector<4x32xf32>
    %75 = arith.addf %57, %74 : vector<4x32xf32>
    %76 = vector.extract_strided_slice %36 {offsets = [0, 16], sizes = [4, 8], strides = [1, 1]} : vector<4x32xf32> to vector<4x8xf32>
    %77 = vector.extract_strided_slice %31 {offsets = [0, 16], sizes = [4, 8], strides = [1, 1]} : vector<4x32xf32> to vector<4x8xf32>
    %cst_36 = arith.constant dense<0.000000e+00> : vector<4x4xf32>
    %78 = tpu.matmul %76, %77, %cst_36 {dimension_numbers = #tpu.dot_dimension_numbers<[1], [1], [0], [0], [0, 0, 1, 0], [], []>} : vector<4x8xf32>, vector<4x8xf32>, vector<4x4xf32> -> vector<4x4xf32>
    %cst_37 = arith.constant dense<0xFF800000> : vector<4xf32>
    %79 = vector.multi_reduction <maximumf>, %78, %cst_37 [1] : vector<4x4xf32> to vector<4xf32>
    %80 = vector.shape_cast %79 : vector<4xf32> to vector<4x1xf32>
    %81 = vector.broadcast %80 : vector<4x1xf32> to vector<4x4xf32>
    %82 = arith.subf %78, %81 : vector<4x4xf32>
    %83 = math.exp %82 : vector<4x4xf32>
    %cst_38 = arith.constant dense<0.000000e+00> : vector<4xf32>
    %84 = vector.multi_reduction <add>, %83, %cst_38 [1] : vector<4x4xf32> to vector<4xf32>
    %85 = vector.shape_cast %84 : vector<4xf32> to vector<4x1xf32>
    %86 = tpu.reciprocal %85 {approx = true} : vector<4x1xf32> -> vector<4x1xf32>
    %87 = vector.broadcast %86 : vector<4x1xf32> to vector<4x4xf32>
    %88 = arith.mulf %83, %87 : vector<4x4xf32>
    %89 = vector.extract_strided_slice %32 {offsets = [0, 16], sizes = [4, 8], strides = [1, 1]} : vector<4x32xf32> to vector<4x8xf32>
    %cst_39 = arith.constant dense<0.000000e+00> : vector<4x8xf32>
    %90 = tpu.matmul %88, %89, %cst_39 {dimension_numbers = #tpu.dot_dimension_numbers<[1], [0], [0], [1], [0, 0, 1, 1], [], []>} : vector<4x4xf32>, vector<4x8xf32>, vector<4x8xf32> -> vector<4x8xf32>
    %91 = vector.extract_strided_slice %33 {offsets = [16, 0], sizes = [8, 32], strides = [1, 1]} : vector<32x32xf32> to vector<8x32xf32>
    %cst_40 = arith.constant dense<0.000000e+00> : vector<4x32xf32>
    %92 = tpu.matmul %90, %91, %cst_40 {dimension_numbers = #tpu.dot_dimension_numbers<[1], [0], [0], [1], [0, 0, 1, 1], [], []>} : vector<4x8xf32>, vector<8x32xf32>, vector<4x32xf32> -> vector<4x32xf32>
    %93 = arith.addf %75, %92 : vector<4x32xf32>
    %94 = vector.extract_strided_slice %36 {offsets = [0, 24], sizes = [4, 8], strides = [1, 1]} : vector<4x32xf32> to vector<4x8xf32>
    %95 = vector.extract_strided_slice %31 {offsets = [0, 24], sizes = [4, 8], strides = [1, 1]} : vector<4x32xf32> to vector<4x8xf32>
    %cst_41 = arith.constant dense<0.000000e+00> : vector<4x4xf32>
    %96 = tpu.matmul %94, %95, %cst_41 {dimension_numbers = #tpu.dot_dimension_numbers<[1], [1], [0], [0], [0, 0, 1, 0], [], []>} : vector<4x8xf32>, vector<4x8xf32>, vector<4x4xf32> -> vector<4x4xf32>
    %cst_42 = arith.constant dense<0xFF800000> : vector<4xf32>
    %97 = vector.multi_reduction <maximumf>, %96, %cst_42 [1] : vector<4x4xf32> to vector<4xf32>
    %98 = vector.shape_cast %97 : vector<4xf32> to vector<4x1xf32>
    %99 = vector.broadcast %98 : vector<4x1xf32> to vector<4x4xf32>
    %100 = arith.subf %96, %99 : vector<4x4xf32>
    %101 = math.exp %100 : vector<4x4xf32>
    %cst_43 = arith.constant dense<0.000000e+00> : vector<4xf32>
    %102 = vector.multi_reduction <add>, %101, %cst_43 [1] : vector<4x4xf32> to vector<4xf32>
    %103 = vector.shape_cast %102 : vector<4xf32> to vector<4x1xf32>
    %104 = tpu.reciprocal %103 {approx = true} : vector<4x1xf32> -> vector<4x1xf32>
    %105 = vector.broadcast %104 : vector<4x1xf32> to vector<4x4xf32>
    %106 = arith.mulf %101, %105 : vector<4x4xf32>
    %107 = vector.extract_strided_slice %32 {offsets = [0, 24], sizes = [4, 8], strides = [1, 1]} : vector<4x32xf32> to vector<4x8xf32>
    %cst_44 = arith.constant dense<0.000000e+00> : vector<4x8xf32>
    %108 = tpu.matmul %106, %107, %cst_44 {dimension_numbers = #tpu.dot_dimension_numbers<[1], [0], [0], [1], [0, 0, 1, 1], [], []>} : vector<4x4xf32>, vector<4x8xf32>, vector<4x8xf32> -> vector<4x8xf32>
    %109 = vector.extract_strided_slice %33 {offsets = [24, 0], sizes = [8, 32], strides = [1, 1]} : vector<32x32xf32> to vector<8x32xf32>
    %cst_45 = arith.constant dense<0.000000e+00> : vector<4x32xf32>
    %110 = tpu.matmul %108, %109, %cst_45 {dimension_numbers = #tpu.dot_dimension_numbers<[1], [0], [0], [1], [0, 0, 1, 1], [], []>} : vector<4x8xf32>, vector<8x32xf32>, vector<4x32xf32> -> vector<4x32xf32>
    %111 = arith.addf %93, %110 : vector<4x32xf32>
    %112 = arith.addf %24, %111 : vector<4x32xf32>
    %c0_46 = arith.constant 0 : index
    %c0_47 = arith.constant 0 : index
    %113 = vector.load %arg14[%c0_46, %c0_47] : memref<2x32xf32, #tpu.memory_space<vmem>>, vector<2x32xf32>
    %cst_48 = arith.constant dense<0.000000e+00> : vector<4xf32>
    %114 = vector.multi_reduction <add>, %112, %cst_48 [1] : vector<4x32xf32> to vector<4xf32>
    %115 = vector.shape_cast %114 : vector<4xf32> to vector<4x1xf32>
    %cst_49 = arith.constant 3.200000e+01 : f32
    %116 = vector.broadcast %cst_49 : f32 to vector<4x1xf32>
    %117 = arith.divf %115, %116 : vector<4x1xf32>
    %118 = vector.broadcast %117 : vector<4x1xf32> to vector<4x32xf32>
    %119 = arith.subf %112, %118 : vector<4x32xf32>
    %120 = arith.mulf %119, %119 : vector<4x32xf32>
    %cst_50 = arith.constant dense<0.000000e+00> : vector<4xf32>
    %121 = vector.multi_reduction <add>, %120, %cst_50 [1] : vector<4x32xf32> to vector<4xf32>
    %122 = vector.shape_cast %121 : vector<4xf32> to vector<4x1xf32>
    %cst_51 = arith.constant 3.200000e+01 : f32
    %123 = vector.broadcast %cst_51 : f32 to vector<4x1xf32>
    %124 = arith.divf %122, %123 : vector<4x1xf32>
    %cst_52 = arith.constant 9.99999974E-6 : f32
    %125 = vector.broadcast %cst_52 : f32 to vector<4x1xf32>
    %126 = arith.addf %124, %125 : vector<4x1xf32>
    %127 = math.rsqrt %126 : vector<4x1xf32>
    %128 = vector.broadcast %127 : vector<4x1xf32> to vector<4x32xf32>
    %129 = arith.mulf %119, %128 : vector<4x32xf32>
    %130 = vector.extract_strided_slice %113 {offsets = [0, 0], sizes = [1, 32], strides = [1, 1]} : vector<2x32xf32> to vector<1x32xf32>
    %131 = vector.broadcast %130 : vector<1x32xf32> to vector<4x32xf32>
    %132 = arith.mulf %129, %131 : vector<4x32xf32>
    %133 = vector.extract_strided_slice %113 {offsets = [1, 0], sizes = [1, 32], strides = [1, 1]} : vector<2x32xf32> to vector<1x32xf32>
    %134 = vector.broadcast %133 : vector<1x32xf32> to vector<4x32xf32>
    %135 = arith.addf %132, %134 : vector<4x32xf32>
    %c0_53 = arith.constant 0 : index
    %c0_54 = arith.constant 0 : index
    %136 = vector.load %arg10[%c0_53, %c0_54] : memref<32x32xf32, #tpu.memory_space<vmem>>, vector<32x32xf32>
    %cst_55 = arith.constant dense<0.000000e+00> : vector<4x32xf32>
    %137 = tpu.matmul %135, %136, %cst_55 {dimension_numbers = #tpu.dot_dimension_numbers<[1], [0], [0], [1], [0, 0, 1, 1], [], []>} : vector<4x32xf32>, vector<32x32xf32>, vector<4x32xf32> -> vector<4x32xf32>
    %c0_56 = arith.constant 0 : index
    %c0_57 = arith.constant 0 : index
    %138 = vector.load %arg11[%c0_56, %c0_57] : memref<1x32xf32, #tpu.memory_space<vmem>>, vector<1x32xf32>
    %139 = vector.broadcast %138 : vector<1x32xf32> to vector<4x32xf32>
    %140 = arith.addf %137, %139 : vector<4x32xf32>
    %cst_58 = arith.constant 0.000000e+00 : f32
    %141 = vector.broadcast %cst_58 : f32 to vector<4x32xf32>
    %142 = arith.maximumf %140, %141 : vector<4x32xf32>
    %c0_59 = arith.constant 0 : index
    %c0_60 = arith.constant 0 : index
    %143 = vector.load %arg12[%c0_59, %c0_60] : memref<32x32xf32, #tpu.memory_space<vmem>>, vector<32x32xf32>
    %cst_61 = arith.constant dense<0.000000e+00> : vector<4x32xf32>
    %144 = tpu.matmul %142, %143, %cst_61 {dimension_numbers = #tpu.dot_dimension_numbers<[1], [0], [0], [1], [0, 0, 1, 1], [], []>} : vector<4x32xf32>, vector<32x32xf32>, vector<4x32xf32> -> vector<4x32xf32>
    %c0_62 = arith.constant 0 : index
    %c0_63 = arith.constant 0 : index
    %145 = vector.load %arg13[%c0_62, %c0_63] : memref<1x32xf32, #tpu.memory_space<vmem>>, vector<1x32xf32>
    %146 = vector.broadcast %145 : vector<1x32xf32> to vector<4x32xf32>
    %147 = arith.addf %144, %146 : vector<4x32xf32>
    %148 = arith.addf %135, %147 : vector<4x32xf32>
    %c0_64 = arith.constant 0 : index
    %c0_65 = arith.constant 0 : index
    %149 = vector.load %arg15[%c0_64, %c0_65] : memref<2x32xf32, #tpu.memory_space<vmem>>, vector<2x32xf32>
    %cst_66 = arith.constant dense<0.000000e+00> : vector<4xf32>
    %150 = vector.multi_reduction <add>, %148, %cst_66 [1] : vector<4x32xf32> to vector<4xf32>
    %151 = vector.shape_cast %150 : vector<4xf32> to vector<4x1xf32>
    %cst_67 = arith.constant 3.200000e+01 : f32
    %152 = vector.broadcast %cst_67 : f32 to vector<4x1xf32>
    %153 = arith.divf %151, %152 : vector<4x1xf32>
    %154 = vector.broadcast %153 : vector<4x1xf32> to vector<4x32xf32>
    %155 = arith.subf %148, %154 : vector<4x32xf32>
    %156 = arith.mulf %155, %155 : vector<4x32xf32>
    %cst_68 = arith.constant dense<0.000000e+00> : vector<4xf32>
    %157 = vector.multi_reduction <add>, %156, %cst_68 [1] : vector<4x32xf32> to vector<4xf32>
    %158 = vector.shape_cast %157 : vector<4xf32> to vector<4x1xf32>
    %cst_69 = arith.constant 3.200000e+01 : f32
    %159 = vector.broadcast %cst_69 : f32 to vector<4x1xf32>
    %160 = arith.divf %158, %159 : vector<4x1xf32>
    %cst_70 = arith.constant 9.99999974E-6 : f32
    %161 = vector.broadcast %cst_70 : f32 to vector<4x1xf32>
    %162 = arith.addf %160, %161 : vector<4x1xf32>
    %163 = math.rsqrt %162 : vector<4x1xf32>
    %164 = vector.broadcast %163 : vector<4x1xf32> to vector<4x32xf32>
    %165 = arith.mulf %155, %164 : vector<4x32xf32>
    %166 = vector.extract_strided_slice %149 {offsets = [0, 0], sizes = [1, 32], strides = [1, 1]} : vector<2x32xf32> to vector<1x32xf32>
    %167 = vector.broadcast %166 : vector<1x32xf32> to vector<4x32xf32>
    %168 = arith.mulf %165, %167 : vector<4x32xf32>
    %169 = vector.extract_strided_slice %149 {offsets = [1, 0], sizes = [1, 32], strides = [1, 1]} : vector<2x32xf32> to vector<1x32xf32>
    %170 = vector.broadcast %169 : vector<1x32xf32> to vector<4x32xf32>
    %171 = arith.addf %168, %170 : vector<4x32xf32>
    %c0_71 = arith.constant 0 : index
    %c0_72 = arith.constant 0 : index
    %172 = vector.load %arg16[%c0_71, %c0_72] : memref<32x96xf32, #tpu.memory_space<vmem>>, vector<32x96xf32>
    %cst_73 = arith.constant dense<0.000000e+00> : vector<4x96xf32>
    %173 = tpu.matmul %171, %172, %cst_73 {dimension_numbers = #tpu.dot_dimension_numbers<[1], [0], [0], [1], [0, 0, 1, 1], [], []>} : vector<4x32xf32>, vector<32x96xf32>, vector<4x96xf32> -> vector<4x96xf32>
    %c0_74 = arith.constant 0 : index
    %c0_75 = arith.constant 0 : index
    %174 = vector.load %arg17[%c0_74, %c0_75] : memref<1x96xf32, #tpu.memory_space<vmem>>, vector<1x96xf32>
    %175 = vector.broadcast %174 : vector<1x96xf32> to vector<4x96xf32>
    %176 = arith.addf %173, %175 : vector<4x96xf32>
    %177 = vector.extract_strided_slice %176 {offsets = [0, 0], sizes = [4, 32], strides = [1, 1]} : vector<4x96xf32> to vector<4x32xf32>
    %178 = vector.extract_strided_slice %176 {offsets = [0, 32], sizes = [4, 32], strides = [1, 1]} : vector<4x96xf32> to vector<4x32xf32>
    %179 = vector.extract_strided_slice %176 {offsets = [0, 64], sizes = [4, 32], strides = [1, 1]} : vector<4x96xf32> to vector<4x32xf32>
    %c0_76 = arith.constant 0 : index
    %c0_77 = arith.constant 0 : index
    %180 = vector.load %arg18[%c0_76, %c0_77] : memref<32x32xf32, #tpu.memory_space<vmem>>, vector<32x32xf32>
    %c0_78 = arith.constant 0 : index
    %c0_79 = arith.constant 0 : index
    %181 = vector.load %arg19[%c0_78, %c0_79] : memref<1x32xf32, #tpu.memory_space<vmem>>, vector<1x32xf32>
    %cst_80 = arith.constant 0.353553385 : f32
    %182 = vector.broadcast %cst_80 : f32 to vector<4x32xf32>
    %183 = arith.mulf %177, %182 : vector<4x32xf32>
    %cst_81 = arith.constant 0.000000e+00 : f32
    %184 = vector.broadcast %cst_81 : f32 to vector<4x32xf32>
    %185 = vector.broadcast %181 : vector<1x32xf32> to vector<4x32xf32>
    %186 = arith.addf %184, %185 : vector<4x32xf32>
    %187 = vector.extract_strided_slice %183 {offsets = [0, 0], sizes = [4, 8], strides = [1, 1]} : vector<4x32xf32> to vector<4x8xf32>
    %188 = vector.extract_strided_slice %178 {offsets = [0, 0], sizes = [4, 8], strides = [1, 1]} : vector<4x32xf32> to vector<4x8xf32>
    %cst_82 = arith.constant dense<0.000000e+00> : vector<4x4xf32>
    %189 = tpu.matmul %187, %188, %cst_82 {dimension_numbers = #tpu.dot_dimension_numbers<[1], [1], [0], [0], [0, 0, 1, 0], [], []>} : vector<4x8xf32>, vector<4x8xf32>, vector<4x4xf32> -> vector<4x4xf32>
    %cst_83 = arith.constant dense<0xFF800000> : vector<4xf32>
    %190 = vector.multi_reduction <maximumf>, %189, %cst_83 [1] : vector<4x4xf32> to vector<4xf32>
    %191 = vector.shape_cast %190 : vector<4xf32> to vector<4x1xf32>
    %192 = vector.broadcast %191 : vector<4x1xf32> to vector<4x4xf32>
    %193 = arith.subf %189, %192 : vector<4x4xf32>
    %194 = math.exp %193 : vector<4x4xf32>
    %cst_84 = arith.constant dense<0.000000e+00> : vector<4xf32>
    %195 = vector.multi_reduction <add>, %194, %cst_84 [1] : vector<4x4xf32> to vector<4xf32>
    %196 = vector.shape_cast %195 : vector<4xf32> to vector<4x1xf32>
    %197 = tpu.reciprocal %196 {approx = true} : vector<4x1xf32> -> vector<4x1xf32>
    %198 = vector.broadcast %197 : vector<4x1xf32> to vector<4x4xf32>
    %199 = arith.mulf %194, %198 : vector<4x4xf32>
    %200 = vector.extract_strided_slice %179 {offsets = [0, 0], sizes = [4, 8], strides = [1, 1]} : vector<4x32xf32> to vector<4x8xf32>
    %cst_85 = arith.constant dense<0.000000e+00> : vector<4x8xf32>
    %201 = tpu.matmul %199, %200, %cst_85 {dimension_numbers = #tpu.dot_dimension_numbers<[1], [0], [0], [1], [0, 0, 1, 1], [], []>} : vector<4x4xf32>, vector<4x8xf32>, vector<4x8xf32> -> vector<4x8xf32>
    %202 = vector.extract_strided_slice %180 {offsets = [0, 0], sizes = [8, 32], strides = [1, 1]} : vector<32x32xf32> to vector<8x32xf32>
    %cst_86 = arith.constant dense<0.000000e+00> : vector<4x32xf32>
    %203 = tpu.matmul %201, %202, %cst_86 {dimension_numbers = #tpu.dot_dimension_numbers<[1], [0], [0], [1], [0, 0, 1, 1], [], []>} : vector<4x8xf32>, vector<8x32xf32>, vector<4x32xf32> -> vector<4x32xf32>
    %204 = arith.addf %186, %203 : vector<4x32xf32>
    %205 = vector.extract_strided_slice %183 {offsets = [0, 8], sizes = [4, 8], strides = [1, 1]} : vector<4x32xf32> to vector<4x8xf32>
    %206 = vector.extract_strided_slice %178 {offsets = [0, 8], sizes = [4, 8], strides = [1, 1]} : vector<4x32xf32> to vector<4x8xf32>
    %cst_87 = arith.constant dense<0.000000e+00> : vector<4x4xf32>
    %207 = tpu.matmul %205, %206, %cst_87 {dimension_numbers = #tpu.dot_dimension_numbers<[1], [1], [0], [0], [0, 0, 1, 0], [], []>} : vector<4x8xf32>, vector<4x8xf32>, vector<4x4xf32> -> vector<4x4xf32>
    %cst_88 = arith.constant dense<0xFF800000> : vector<4xf32>
    %208 = vector.multi_reduction <maximumf>, %207, %cst_88 [1] : vector<4x4xf32> to vector<4xf32>
    %209 = vector.shape_cast %208 : vector<4xf32> to vector<4x1xf32>
    %210 = vector.broadcast %209 : vector<4x1xf32> to vector<4x4xf32>
    %211 = arith.subf %207, %210 : vector<4x4xf32>
    %212 = math.exp %211 : vector<4x4xf32>
    %cst_89 = arith.constant dense<0.000000e+00> : vector<4xf32>
    %213 = vector.multi_reduction <add>, %212, %cst_89 [1] : vector<4x4xf32> to vector<4xf32>
    %214 = vector.shape_cast %213 : vector<4xf32> to vector<4x1xf32>
    %215 = tpu.reciprocal %214 {approx = true} : vector<4x1xf32> -> vector<4x1xf32>
    %216 = vector.broadcast %215 : vector<4x1xf32> to vector<4x4xf32>
    %217 = arith.mulf %212, %216 : vector<4x4xf32>
    %218 = vector.extract_strided_slice %179 {offsets = [0, 8], sizes = [4, 8], strides = [1, 1]} : vector<4x32xf32> to vector<4x8xf32>
    %cst_90 = arith.constant dense<0.000000e+00> : vector<4x8xf32>
    %219 = tpu.matmul %217, %218, %cst_90 {dimension_numbers = #tpu.dot_dimension_numbers<[1], [0], [0], [1], [0, 0, 1, 1], [], []>} : vector<4x4xf32>, vector<4x8xf32>, vector<4x8xf32> -> vector<4x8xf32>
    %220 = vector.extract_strided_slice %180 {offsets = [8, 0], sizes = [8, 32], strides = [1, 1]} : vector<32x32xf32> to vector<8x32xf32>
    %cst_91 = arith.constant dense<0.000000e+00> : vector<4x32xf32>
    %221 = tpu.matmul %219, %220, %cst_91 {dimension_numbers = #tpu.dot_dimension_numbers<[1], [0], [0], [1], [0, 0, 1, 1], [], []>} : vector<4x8xf32>, vector<8x32xf32>, vector<4x32xf32> -> vector<4x32xf32>
    %222 = arith.addf %204, %221 : vector<4x32xf32>
    %223 = vector.extract_strided_slice %183 {offsets = [0, 16], sizes = [4, 8], strides = [1, 1]} : vector<4x32xf32> to vector<4x8xf32>
    %224 = vector.extract_strided_slice %178 {offsets = [0, 16], sizes = [4, 8], strides = [1, 1]} : vector<4x32xf32> to vector<4x8xf32>
    %cst_92 = arith.constant dense<0.000000e+00> : vector<4x4xf32>
    %225 = tpu.matmul %223, %224, %cst_92 {dimension_numbers = #tpu.dot_dimension_numbers<[1], [1], [0], [0], [0, 0, 1, 0], [], []>} : vector<4x8xf32>, vector<4x8xf32>, vector<4x4xf32> -> vector<4x4xf32>
    %cst_93 = arith.constant dense<0xFF800000> : vector<4xf32>
    %226 = vector.multi_reduction <maximumf>, %225, %cst_93 [1] : vector<4x4xf32> to vector<4xf32>
    %227 = vector.shape_cast %226 : vector<4xf32> to vector<4x1xf32>
    %228 = vector.broadcast %227 : vector<4x1xf32> to vector<4x4xf32>
    %229 = arith.subf %225, %228 : vector<4x4xf32>
    %230 = math.exp %229 : vector<4x4xf32>
    %cst_94 = arith.constant dense<0.000000e+00> : vector<4xf32>
    %231 = vector.multi_reduction <add>, %230, %cst_94 [1] : vector<4x4xf32> to vector<4xf32>
    %232 = vector.shape_cast %231 : vector<4xf32> to vector<4x1xf32>
    %233 = tpu.reciprocal %232 {approx = true} : vector<4x1xf32> -> vector<4x1xf32>
    %234 = vector.broadcast %233 : vector<4x1xf32> to vector<4x4xf32>
    %235 = arith.mulf %230, %234 : vector<4x4xf32>
    %236 = vector.extract_strided_slice %179 {offsets = [0, 16], sizes = [4, 8], strides = [1, 1]} : vector<4x32xf32> to vector<4x8xf32>
    %cst_95 = arith.constant dense<0.000000e+00> : vector<4x8xf32>
    %237 = tpu.matmul %235, %236, %cst_95 {dimension_numbers = #tpu.dot_dimension_numbers<[1], [0], [0], [1], [0, 0, 1, 1], [], []>} : vector<4x4xf32>, vector<4x8xf32>, vector<4x8xf32> -> vector<4x8xf32>
    %238 = vector.extract_strided_slice %180 {offsets = [16, 0], sizes = [8, 32], strides = [1, 1]} : vector<32x32xf32> to vector<8x32xf32>
    %cst_96 = arith.constant dense<0.000000e+00> : vector<4x32xf32>
    %239 = tpu.matmul %237, %238, %cst_96 {dimension_numbers = #tpu.dot_dimension_numbers<[1], [0], [0], [1], [0, 0, 1, 1], [], []>} : vector<4x8xf32>, vector<8x32xf32>, vector<4x32xf32> -> vector<4x32xf32>
    %240 = arith.addf %222, %239 : vector<4x32xf32>
    %241 = vector.extract_strided_slice %183 {offsets = [0, 24], sizes = [4, 8], strides = [1, 1]} : vector<4x32xf32> to vector<4x8xf32>
    %242 = vector.extract_strided_slice %178 {offsets = [0, 24], sizes = [4, 8], strides = [1, 1]} : vector<4x32xf32> to vector<4x8xf32>
    %cst_97 = arith.constant dense<0.000000e+00> : vector<4x4xf32>
    %243 = tpu.matmul %241, %242, %cst_97 {dimension_numbers = #tpu.dot_dimension_numbers<[1], [1], [0], [0], [0, 0, 1, 0], [], []>} : vector<4x8xf32>, vector<4x8xf32>, vector<4x4xf32> -> vector<4x4xf32>
    %cst_98 = arith.constant dense<0xFF800000> : vector<4xf32>
    %244 = vector.multi_reduction <maximumf>, %243, %cst_98 [1] : vector<4x4xf32> to vector<4xf32>
    %245 = vector.shape_cast %244 : vector<4xf32> to vector<4x1xf32>
    %246 = vector.broadcast %245 : vector<4x1xf32> to vector<4x4xf32>
    %247 = arith.subf %243, %246 : vector<4x4xf32>
    %248 = math.exp %247 : vector<4x4xf32>
    %cst_99 = arith.constant dense<0.000000e+00> : vector<4xf32>
    %249 = vector.multi_reduction <add>, %248, %cst_99 [1] : vector<4x4xf32> to vector<4xf32>
    %250 = vector.shape_cast %249 : vector<4xf32> to vector<4x1xf32>
    %251 = tpu.reciprocal %250 {approx = true} : vector<4x1xf32> -> vector<4x1xf32>
    %252 = vector.broadcast %251 : vector<4x1xf32> to vector<4x4xf32>
    %253 = arith.mulf %248, %252 : vector<4x4xf32>
    %254 = vector.extract_strided_slice %179 {offsets = [0, 24], sizes = [4, 8], strides = [1, 1]} : vector<4x32xf32> to vector<4x8xf32>
    %cst_100 = arith.constant dense<0.000000e+00> : vector<4x8xf32>
    %255 = tpu.matmul %253, %254, %cst_100 {dimension_numbers = #tpu.dot_dimension_numbers<[1], [0], [0], [1], [0, 0, 1, 1], [], []>} : vector<4x4xf32>, vector<4x8xf32>, vector<4x8xf32> -> vector<4x8xf32>
    %256 = vector.extract_strided_slice %180 {offsets = [24, 0], sizes = [8, 32], strides = [1, 1]} : vector<32x32xf32> to vector<8x32xf32>
    %cst_101 = arith.constant dense<0.000000e+00> : vector<4x32xf32>
    %257 = tpu.matmul %255, %256, %cst_101 {dimension_numbers = #tpu.dot_dimension_numbers<[1], [0], [0], [1], [0, 0, 1, 1], [], []>} : vector<4x8xf32>, vector<8x32xf32>, vector<4x32xf32> -> vector<4x32xf32>
    %258 = arith.addf %240, %257 : vector<4x32xf32>
    %259 = arith.addf %171, %258 : vector<4x32xf32>
    %c0_102 = arith.constant 0 : index
    %c0_103 = arith.constant 0 : index
    %260 = vector.load %arg24[%c0_102, %c0_103] : memref<2x32xf32, #tpu.memory_space<vmem>>, vector<2x32xf32>
    %cst_104 = arith.constant dense<0.000000e+00> : vector<4xf32>
    %261 = vector.multi_reduction <add>, %259, %cst_104 [1] : vector<4x32xf32> to vector<4xf32>
    %262 = vector.shape_cast %261 : vector<4xf32> to vector<4x1xf32>
    %cst_105 = arith.constant 3.200000e+01 : f32
    %263 = vector.broadcast %cst_105 : f32 to vector<4x1xf32>
    %264 = arith.divf %262, %263 : vector<4x1xf32>
    %265 = vector.broadcast %264 : vector<4x1xf32> to vector<4x32xf32>
    %266 = arith.subf %259, %265 : vector<4x32xf32>
    %267 = arith.mulf %266, %266 : vector<4x32xf32>
    %cst_106 = arith.constant dense<0.000000e+00> : vector<4xf32>
    %268 = vector.multi_reduction <add>, %267, %cst_106 [1] : vector<4x32xf32> to vector<4xf32>
    %269 = vector.shape_cast %268 : vector<4xf32> to vector<4x1xf32>
    %cst_107 = arith.constant 3.200000e+01 : f32
    %270 = vector.broadcast %cst_107 : f32 to vector<4x1xf32>
    %271 = arith.divf %269, %270 : vector<4x1xf32>
    %cst_108 = arith.constant 9.99999974E-6 : f32
    %272 = vector.broadcast %cst_108 : f32 to vector<4x1xf32>
    %273 = arith.addf %271, %272 : vector<4x1xf32>
    %274 = math.rsqrt %273 : vector<4x1xf32>
    %275 = vector.broadcast %274 : vector<4x1xf32> to vector<4x32xf32>
    %276 = arith.mulf %266, %275 : vector<4x32xf32>
    %277 = vector.extract_strided_slice %260 {offsets = [0, 0], sizes = [1, 32], strides = [1, 1]} : vector<2x32xf32> to vector<1x32xf32>
    %278 = vector.broadcast %277 : vector<1x32xf32> to vector<4x32xf32>
    %279 = arith.mulf %276, %278 : vector<4x32xf32>
    %280 = vector.extract_strided_slice %260 {offsets = [1, 0], sizes = [1, 32], strides = [1, 1]} : vector<2x32xf32> to vector<1x32xf32>
    %281 = vector.broadcast %280 : vector<1x32xf32> to vector<4x32xf32>
    %282 = arith.addf %279, %281 : vector<4x32xf32>
    %c0_109 = arith.constant 0 : index
    %c0_110 = arith.constant 0 : index
    %283 = vector.load %arg20[%c0_109, %c0_110] : memref<32x32xf32, #tpu.memory_space<vmem>>, vector<32x32xf32>
    %cst_111 = arith.constant dense<0.000000e+00> : vector<4x32xf32>
    %284 = tpu.matmul %282, %283, %cst_111 {dimension_numbers = #tpu.dot_dimension_numbers<[1], [0], [0], [1], [0, 0, 1, 1], [], []>} : vector<4x32xf32>, vector<32x32xf32>, vector<4x32xf32> -> vector<4x32xf32>
    %c0_112 = arith.constant 0 : index
    %c0_113 = arith.constant 0 : index
    %285 = vector.load %arg21[%c0_112, %c0_113] : memref<1x32xf32, #tpu.memory_space<vmem>>, vector<1x32xf32>
    %286 = vector.broadcast %285 : vector<1x32xf32> to vector<4x32xf32>
    %287 = arith.addf %284, %286 : vector<4x32xf32>
    %cst_114 = arith.constant 0.000000e+00 : f32
    %288 = vector.broadcast %cst_114 : f32 to vector<4x32xf32>
    %289 = arith.maximumf %287, %288 : vector<4x32xf32>
    %c0_115 = arith.constant 0 : index
    %c0_116 = arith.constant 0 : index
    %290 = vector.load %arg22[%c0_115, %c0_116] : memref<32x32xf32, #tpu.memory_space<vmem>>, vector<32x32xf32>
    %cst_117 = arith.constant dense<0.000000e+00> : vector<4x32xf32>
    %291 = tpu.matmul %289, %290, %cst_117 {dimension_numbers = #tpu.dot_dimension_numbers<[1], [0], [0], [1], [0, 0, 1, 1], [], []>} : vector<4x32xf32>, vector<32x32xf32>, vector<4x32xf32> -> vector<4x32xf32>
    %c0_118 = arith.constant 0 : index
    %c0_119 = arith.constant 0 : index
    %292 = vector.load %arg23[%c0_118, %c0_119] : memref<1x32xf32, #tpu.memory_space<vmem>>, vector<1x32xf32>
    %293 = vector.broadcast %292 : vector<1x32xf32> to vector<4x32xf32>
    %294 = arith.addf %291, %293 : vector<4x32xf32>
    %295 = arith.addf %282, %294 : vector<4x32xf32>
    %c0_120 = arith.constant 0 : index
    %c0_121 = arith.constant 0 : index
    %296 = vector.load %arg25[%c0_120, %c0_121] : memref<2x32xf32, #tpu.memory_space<vmem>>, vector<2x32xf32>
    %cst_122 = arith.constant dense<0.000000e+00> : vector<4xf32>
    %297 = vector.multi_reduction <add>, %295, %cst_122 [1] : vector<4x32xf32> to vector<4xf32>
    %298 = vector.shape_cast %297 : vector<4xf32> to vector<4x1xf32>
    %cst_123 = arith.constant 3.200000e+01 : f32
    %299 = vector.broadcast %cst_123 : f32 to vector<4x1xf32>
    %300 = arith.divf %298, %299 : vector<4x1xf32>
    %301 = vector.broadcast %300 : vector<4x1xf32> to vector<4x32xf32>
    %302 = arith.subf %295, %301 : vector<4x32xf32>
    %303 = arith.mulf %302, %302 : vector<4x32xf32>
    %cst_124 = arith.constant dense<0.000000e+00> : vector<4xf32>
    %304 = vector.multi_reduction <add>, %303, %cst_124 [1] : vector<4x32xf32> to vector<4xf32>
    %305 = vector.shape_cast %304 : vector<4xf32> to vector<4x1xf32>
    %cst_125 = arith.constant 3.200000e+01 : f32
    %306 = vector.broadcast %cst_125 : f32 to vector<4x1xf32>
    %307 = arith.divf %305, %306 : vector<4x1xf32>
    %cst_126 = arith.constant 9.99999974E-6 : f32
    %308 = vector.broadcast %cst_126 : f32 to vector<4x1xf32>
    %309 = arith.addf %307, %308 : vector<4x1xf32>
    %310 = math.rsqrt %309 : vector<4x1xf32>
    %311 = vector.broadcast %310 : vector<4x1xf32> to vector<4x32xf32>
    %312 = arith.mulf %302, %311 : vector<4x32xf32>
    %313 = vector.extract_strided_slice %296 {offsets = [0, 0], sizes = [1, 32], strides = [1, 1]} : vector<2x32xf32> to vector<1x32xf32>
    %314 = vector.broadcast %313 : vector<1x32xf32> to vector<4x32xf32>
    %315 = arith.mulf %312, %314 : vector<4x32xf32>
    %316 = vector.extract_strided_slice %296 {offsets = [1, 0], sizes = [1, 32], strides = [1, 1]} : vector<2x32xf32> to vector<1x32xf32>
    %317 = vector.broadcast %316 : vector<1x32xf32> to vector<4x32xf32>
    %318 = arith.addf %315, %317 : vector<4x32xf32>
    %c0_127 = arith.constant 0 : index
    %c0_128 = arith.constant 0 : index
    %319 = vector.load %arg57[%c0_127, %c0_128] : memref<4x32xf32, #tpu.memory_space<vmem>>, vector<4x32xf32>
    %cst_129 = arith.constant 0.000000e+00 : f32
    %320 = vector.broadcast %cst_129 : f32 to vector<4x32xf32>
    %c0_130 = arith.constant 0 : index
    %c0_131 = arith.constant 0 : index
    %321 = vector.load %arg26[%c0_130, %c0_131] : memref<32x96xf32, #tpu.memory_space<vmem>>, vector<32x96xf32>
    %c0_132 = arith.constant 0 : index
    %c0_133 = arith.constant 0 : index
    %322 = vector.load %arg27[%c0_132, %c0_133] : memref<1x96xf32, #tpu.memory_space<vmem>>, vector<1x96xf32>
    %323 = arith.addf %320, %319 : vector<4x32xf32>
    %324 = vector.extract_strided_slice %321 {offsets = [0, 0], sizes = [32, 64], strides = [1, 1]} : vector<32x96xf32> to vector<32x64xf32>
    %cst_134 = arith.constant dense<0.000000e+00> : vector<4x64xf32>
    %325 = tpu.matmul %323, %324, %cst_134 {dimension_numbers = #tpu.dot_dimension_numbers<[1], [0], [0], [1], [0, 0, 1, 1], [], []>} : vector<4x32xf32>, vector<32x64xf32>, vector<4x64xf32> -> vector<4x64xf32>
    %326 = vector.extract_strided_slice %322 {offsets = [0, 0], sizes = [1, 64], strides = [1, 1]} : vector<1x96xf32> to vector<1x64xf32>
    %327 = vector.broadcast %326 : vector<1x64xf32> to vector<4x64xf32>
    %328 = arith.addf %325, %327 : vector<4x64xf32>
    %329 = vector.extract_strided_slice %321 {offsets = [0, 64], sizes = [32, 32], strides = [1, 1]} : vector<32x96xf32> to vector<32x32xf32>
    %cst_135 = arith.constant dense<0.000000e+00> : vector<4x32xf32>
    %330 = tpu.matmul %320, %329, %cst_135 {dimension_numbers = #tpu.dot_dimension_numbers<[1], [0], [0], [1], [0, 0, 1, 1], [], []>} : vector<4x32xf32>, vector<32x32xf32>, vector<4x32xf32> -> vector<4x32xf32>
    %331 = vector.extract_strided_slice %322 {offsets = [0, 64], sizes = [1, 32], strides = [1, 1]} : vector<1x96xf32> to vector<1x32xf32>
    %332 = vector.broadcast %331 : vector<1x32xf32> to vector<4x32xf32>
    %333 = arith.addf %330, %332 : vector<4x32xf32>
    %334 = vector.extract_strided_slice %328 {offsets = [0, 0], sizes = [4, 32], strides = [1, 1]} : vector<4x64xf32> to vector<4x32xf32>
    %335 = vector.extract_strided_slice %328 {offsets = [0, 32], sizes = [4, 32], strides = [1, 1]} : vector<4x64xf32> to vector<4x32xf32>
    %c0_136 = arith.constant 0 : index
    %c0_137 = arith.constant 0 : index
    %336 = vector.load %arg28[%c0_136, %c0_137] : memref<32x32xf32, #tpu.memory_space<vmem>>, vector<32x32xf32>
    %c0_138 = arith.constant 0 : index
    %c0_139 = arith.constant 0 : index
    %337 = vector.load %arg29[%c0_138, %c0_139] : memref<1x32xf32, #tpu.memory_space<vmem>>, vector<1x32xf32>
    %cst_140 = arith.constant 0.353553385 : f32
    %338 = vector.broadcast %cst_140 : f32 to vector<4x32xf32>
    %339 = arith.mulf %334, %338 : vector<4x32xf32>
    %cst_141 = arith.constant 0.000000e+00 : f32
    %340 = vector.broadcast %cst_141 : f32 to vector<4x32xf32>
    %341 = vector.broadcast %337 : vector<1x32xf32> to vector<4x32xf32>
    %342 = arith.addf %340, %341 : vector<4x32xf32>
    %343 = vector.extract_strided_slice %339 {offsets = [0, 0], sizes = [4, 8], strides = [1, 1]} : vector<4x32xf32> to vector<4x8xf32>
    %344 = vector.extract_strided_slice %335 {offsets = [0, 0], sizes = [4, 8], strides = [1, 1]} : vector<4x32xf32> to vector<4x8xf32>
    %cst_142 = arith.constant dense<0.000000e+00> : vector<4x4xf32>
    %345 = tpu.matmul %343, %344, %cst_142 {dimension_numbers = #tpu.dot_dimension_numbers<[1], [1], [0], [0], [0, 0, 1, 0], [], []>} : vector<4x8xf32>, vector<4x8xf32>, vector<4x4xf32> -> vector<4x4xf32>
    %cst_143 = arith.constant dense<0xFF800000> : vector<4xf32>
    %346 = vector.multi_reduction <maximumf>, %345, %cst_143 [1] : vector<4x4xf32> to vector<4xf32>
    %347 = vector.shape_cast %346 : vector<4xf32> to vector<4x1xf32>
    %348 = vector.broadcast %347 : vector<4x1xf32> to vector<4x4xf32>
    %349 = arith.subf %345, %348 : vector<4x4xf32>
    %350 = math.exp %349 : vector<4x4xf32>
    %cst_144 = arith.constant dense<0.000000e+00> : vector<4xf32>
    %351 = vector.multi_reduction <add>, %350, %cst_144 [1] : vector<4x4xf32> to vector<4xf32>
    %352 = vector.shape_cast %351 : vector<4xf32> to vector<4x1xf32>
    %353 = tpu.reciprocal %352 {approx = true} : vector<4x1xf32> -> vector<4x1xf32>
    %354 = vector.broadcast %353 : vector<4x1xf32> to vector<4x4xf32>
    %355 = arith.mulf %350, %354 : vector<4x4xf32>
    %356 = vector.extract_strided_slice %333 {offsets = [0, 0], sizes = [4, 8], strides = [1, 1]} : vector<4x32xf32> to vector<4x8xf32>
    %cst_145 = arith.constant dense<0.000000e+00> : vector<4x8xf32>
    %357 = tpu.matmul %355, %356, %cst_145 {dimension_numbers = #tpu.dot_dimension_numbers<[1], [0], [0], [1], [0, 0, 1, 1], [], []>} : vector<4x4xf32>, vector<4x8xf32>, vector<4x8xf32> -> vector<4x8xf32>
    %358 = vector.extract_strided_slice %336 {offsets = [0, 0], sizes = [8, 32], strides = [1, 1]} : vector<32x32xf32> to vector<8x32xf32>
    %cst_146 = arith.constant dense<0.000000e+00> : vector<4x32xf32>
    %359 = tpu.matmul %357, %358, %cst_146 {dimension_numbers = #tpu.dot_dimension_numbers<[1], [0], [0], [1], [0, 0, 1, 1], [], []>} : vector<4x8xf32>, vector<8x32xf32>, vector<4x32xf32> -> vector<4x32xf32>
    %360 = arith.addf %342, %359 : vector<4x32xf32>
    %361 = vector.extract_strided_slice %339 {offsets = [0, 8], sizes = [4, 8], strides = [1, 1]} : vector<4x32xf32> to vector<4x8xf32>
    %362 = vector.extract_strided_slice %335 {offsets = [0, 8], sizes = [4, 8], strides = [1, 1]} : vector<4x32xf32> to vector<4x8xf32>
    %cst_147 = arith.constant dense<0.000000e+00> : vector<4x4xf32>
    %363 = tpu.matmul %361, %362, %cst_147 {dimension_numbers = #tpu.dot_dimension_numbers<[1], [1], [0], [0], [0, 0, 1, 0], [], []>} : vector<4x8xf32>, vector<4x8xf32>, vector<4x4xf32> -> vector<4x4xf32>
    %cst_148 = arith.constant dense<0xFF800000> : vector<4xf32>
    %364 = vector.multi_reduction <maximumf>, %363, %cst_148 [1] : vector<4x4xf32> to vector<4xf32>
    %365 = vector.shape_cast %364 : vector<4xf32> to vector<4x1xf32>
    %366 = vector.broadcast %365 : vector<4x1xf32> to vector<4x4xf32>
    %367 = arith.subf %363, %366 : vector<4x4xf32>
    %368 = math.exp %367 : vector<4x4xf32>
    %cst_149 = arith.constant dense<0.000000e+00> : vector<4xf32>
    %369 = vector.multi_reduction <add>, %368, %cst_149 [1] : vector<4x4xf32> to vector<4xf32>
    %370 = vector.shape_cast %369 : vector<4xf32> to vector<4x1xf32>
    %371 = tpu.reciprocal %370 {approx = true} : vector<4x1xf32> -> vector<4x1xf32>
    %372 = vector.broadcast %371 : vector<4x1xf32> to vector<4x4xf32>
    %373 = arith.mulf %368, %372 : vector<4x4xf32>
    %374 = vector.extract_strided_slice %333 {offsets = [0, 8], sizes = [4, 8], strides = [1, 1]} : vector<4x32xf32> to vector<4x8xf32>
    %cst_150 = arith.constant dense<0.000000e+00> : vector<4x8xf32>
    %375 = tpu.matmul %373, %374, %cst_150 {dimension_numbers = #tpu.dot_dimension_numbers<[1], [0], [0], [1], [0, 0, 1, 1], [], []>} : vector<4x4xf32>, vector<4x8xf32>, vector<4x8xf32> -> vector<4x8xf32>
    %376 = vector.extract_strided_slice %336 {offsets = [8, 0], sizes = [8, 32], strides = [1, 1]} : vector<32x32xf32> to vector<8x32xf32>
    %cst_151 = arith.constant dense<0.000000e+00> : vector<4x32xf32>
    %377 = tpu.matmul %375, %376, %cst_151 {dimension_numbers = #tpu.dot_dimension_numbers<[1], [0], [0], [1], [0, 0, 1, 1], [], []>} : vector<4x8xf32>, vector<8x32xf32>, vector<4x32xf32> -> vector<4x32xf32>
    %378 = arith.addf %360, %377 : vector<4x32xf32>
    %379 = vector.extract_strided_slice %339 {offsets = [0, 16], sizes = [4, 8], strides = [1, 1]} : vector<4x32xf32> to vector<4x8xf32>
    %380 = vector.extract_strided_slice %335 {offsets = [0, 16], sizes = [4, 8], strides = [1, 1]} : vector<4x32xf32> to vector<4x8xf32>
    %cst_152 = arith.constant dense<0.000000e+00> : vector<4x4xf32>
    %381 = tpu.matmul %379, %380, %cst_152 {dimension_numbers = #tpu.dot_dimension_numbers<[1], [1], [0], [0], [0, 0, 1, 0], [], []>} : vector<4x8xf32>, vector<4x8xf32>, vector<4x4xf32> -> vector<4x4xf32>
    %cst_153 = arith.constant dense<0xFF800000> : vector<4xf32>
    %382 = vector.multi_reduction <maximumf>, %381, %cst_153 [1] : vector<4x4xf32> to vector<4xf32>
    %383 = vector.shape_cast %382 : vector<4xf32> to vector<4x1xf32>
    %384 = vector.broadcast %383 : vector<4x1xf32> to vector<4x4xf32>
    %385 = arith.subf %381, %384 : vector<4x4xf32>
    %386 = math.exp %385 : vector<4x4xf32>
    %cst_154 = arith.constant dense<0.000000e+00> : vector<4xf32>
    %387 = vector.multi_reduction <add>, %386, %cst_154 [1] : vector<4x4xf32> to vector<4xf32>
    %388 = vector.shape_cast %387 : vector<4xf32> to vector<4x1xf32>
    %389 = tpu.reciprocal %388 {approx = true} : vector<4x1xf32> -> vector<4x1xf32>
    %390 = vector.broadcast %389 : vector<4x1xf32> to vector<4x4xf32>
    %391 = arith.mulf %386, %390 : vector<4x4xf32>
    %392 = vector.extract_strided_slice %333 {offsets = [0, 16], sizes = [4, 8], strides = [1, 1]} : vector<4x32xf32> to vector<4x8xf32>
    %cst_155 = arith.constant dense<0.000000e+00> : vector<4x8xf32>
    %393 = tpu.matmul %391, %392, %cst_155 {dimension_numbers = #tpu.dot_dimension_numbers<[1], [0], [0], [1], [0, 0, 1, 1], [], []>} : vector<4x4xf32>, vector<4x8xf32>, vector<4x8xf32> -> vector<4x8xf32>
    %394 = vector.extract_strided_slice %336 {offsets = [16, 0], sizes = [8, 32], strides = [1, 1]} : vector<32x32xf32> to vector<8x32xf32>
    %cst_156 = arith.constant dense<0.000000e+00> : vector<4x32xf32>
    %395 = tpu.matmul %393, %394, %cst_156 {dimension_numbers = #tpu.dot_dimension_numbers<[1], [0], [0], [1], [0, 0, 1, 1], [], []>} : vector<4x8xf32>, vector<8x32xf32>, vector<4x32xf32> -> vector<4x32xf32>
    %396 = arith.addf %378, %395 : vector<4x32xf32>
    %397 = vector.extract_strided_slice %339 {offsets = [0, 24], sizes = [4, 8], strides = [1, 1]} : vector<4x32xf32> to vector<4x8xf32>
    %398 = vector.extract_strided_slice %335 {offsets = [0, 24], sizes = [4, 8], strides = [1, 1]} : vector<4x32xf32> to vector<4x8xf32>
    %cst_157 = arith.constant dense<0.000000e+00> : vector<4x4xf32>
    %399 = tpu.matmul %397, %398, %cst_157 {dimension_numbers = #tpu.dot_dimension_numbers<[1], [1], [0], [0], [0, 0, 1, 0], [], []>} : vector<4x8xf32>, vector<4x8xf32>, vector<4x4xf32> -> vector<4x4xf32>
    %cst_158 = arith.constant dense<0xFF800000> : vector<4xf32>
    %400 = vector.multi_reduction <maximumf>, %399, %cst_158 [1] : vector<4x4xf32> to vector<4xf32>
    %401 = vector.shape_cast %400 : vector<4xf32> to vector<4x1xf32>
    %402 = vector.broadcast %401 : vector<4x1xf32> to vector<4x4xf32>
    %403 = arith.subf %399, %402 : vector<4x4xf32>
    %404 = math.exp %403 : vector<4x4xf32>
    %cst_159 = arith.constant dense<0.000000e+00> : vector<4xf32>
    %405 = vector.multi_reduction <add>, %404, %cst_159 [1] : vector<4x4xf32> to vector<4xf32>
    %406 = vector.shape_cast %405 : vector<4xf32> to vector<4x1xf32>
    %407 = tpu.reciprocal %406 {approx = true} : vector<4x1xf32> -> vector<4x1xf32>
    %408 = vector.broadcast %407 : vector<4x1xf32> to vector<4x4xf32>
    %409 = arith.mulf %404, %408 : vector<4x4xf32>
    %410 = vector.extract_strided_slice %333 {offsets = [0, 24], sizes = [4, 8], strides = [1, 1]} : vector<4x32xf32> to vector<4x8xf32>
    %cst_160 = arith.constant dense<0.000000e+00> : vector<4x8xf32>
    %411 = tpu.matmul %409, %410, %cst_160 {dimension_numbers = #tpu.dot_dimension_numbers<[1], [0], [0], [1], [0, 0, 1, 1], [], []>} : vector<4x4xf32>, vector<4x8xf32>, vector<4x8xf32> -> vector<4x8xf32>
    %412 = vector.extract_strided_slice %336 {offsets = [24, 0], sizes = [8, 32], strides = [1, 1]} : vector<32x32xf32> to vector<8x32xf32>
    %cst_161 = arith.constant dense<0.000000e+00> : vector<4x32xf32>
    %413 = tpu.matmul %411, %412, %cst_161 {dimension_numbers = #tpu.dot_dimension_numbers<[1], [0], [0], [1], [0, 0, 1, 1], [], []>} : vector<4x8xf32>, vector<8x32xf32>, vector<4x32xf32> -> vector<4x32xf32>
    %414 = arith.addf %396, %413 : vector<4x32xf32>
    %415 = arith.addf %320, %414 : vector<4x32xf32>
    %c0_162 = arith.constant 0 : index
    %c0_163 = arith.constant 0 : index
    %416 = vector.load %arg38[%c0_162, %c0_163] : memref<2x32xf32, #tpu.memory_space<vmem>>, vector<2x32xf32>
    %cst_164 = arith.constant dense<0.000000e+00> : vector<4xf32>
    %417 = vector.multi_reduction <add>, %415, %cst_164 [1] : vector<4x32xf32> to vector<4xf32>
    %418 = vector.shape_cast %417 : vector<4xf32> to vector<4x1xf32>
    %cst_165 = arith.constant 3.200000e+01 : f32
    %419 = vector.broadcast %cst_165 : f32 to vector<4x1xf32>
    %420 = arith.divf %418, %419 : vector<4x1xf32>
    %421 = vector.broadcast %420 : vector<4x1xf32> to vector<4x32xf32>
    %422 = arith.subf %415, %421 : vector<4x32xf32>
    %423 = arith.mulf %422, %422 : vector<4x32xf32>
    %cst_166 = arith.constant dense<0.000000e+00> : vector<4xf32>
    %424 = vector.multi_reduction <add>, %423, %cst_166 [1] : vector<4x32xf32> to vector<4xf32>
    %425 = vector.shape_cast %424 : vector<4xf32> to vector<4x1xf32>
    %cst_167 = arith.constant 3.200000e+01 : f32
    %426 = vector.broadcast %cst_167 : f32 to vector<4x1xf32>
    %427 = arith.divf %425, %426 : vector<4x1xf32>
    %cst_168 = arith.constant 9.99999974E-6 : f32
    %428 = vector.broadcast %cst_168 : f32 to vector<4x1xf32>
    %429 = arith.addf %427, %428 : vector<4x1xf32>
    %430 = math.rsqrt %429 : vector<4x1xf32>
    %431 = vector.broadcast %430 : vector<4x1xf32> to vector<4x32xf32>
    %432 = arith.mulf %422, %431 : vector<4x32xf32>
    %433 = vector.extract_strided_slice %416 {offsets = [0, 0], sizes = [1, 32], strides = [1, 1]} : vector<2x32xf32> to vector<1x32xf32>
    %434 = vector.broadcast %433 : vector<1x32xf32> to vector<4x32xf32>
    %435 = arith.mulf %432, %434 : vector<4x32xf32>
    %436 = vector.extract_strided_slice %416 {offsets = [1, 0], sizes = [1, 32], strides = [1, 1]} : vector<2x32xf32> to vector<1x32xf32>
    %437 = vector.broadcast %436 : vector<1x32xf32> to vector<4x32xf32>
    %438 = arith.addf %435, %437 : vector<4x32xf32>
    %c0_169 = arith.constant 0 : index
    %c0_170 = arith.constant 0 : index
    %439 = vector.load %arg30[%c0_169, %c0_170] : memref<32x96xf32, #tpu.memory_space<vmem>>, vector<32x96xf32>
    %c0_171 = arith.constant 0 : index
    %c0_172 = arith.constant 0 : index
    %440 = vector.load %arg31[%c0_171, %c0_172] : memref<1x96xf32, #tpu.memory_space<vmem>>, vector<1x96xf32>
    %441 = arith.addf %438, %319 : vector<4x32xf32>
    %442 = vector.extract_strided_slice %439 {offsets = [0, 0], sizes = [32, 32], strides = [1, 1]} : vector<32x96xf32> to vector<32x32xf32>
    %cst_173 = arith.constant dense<0.000000e+00> : vector<4x32xf32>
    %443 = tpu.matmul %441, %442, %cst_173 {dimension_numbers = #tpu.dot_dimension_numbers<[1], [0], [0], [1], [0, 0, 1, 1], [], []>} : vector<4x32xf32>, vector<32x32xf32>, vector<4x32xf32> -> vector<4x32xf32>
    %444 = vector.extract_strided_slice %440 {offsets = [0, 0], sizes = [1, 32], strides = [1, 1]} : vector<1x96xf32> to vector<1x32xf32>
    %445 = vector.broadcast %444 : vector<1x32xf32> to vector<4x32xf32>
    %446 = arith.addf %443, %445 : vector<4x32xf32>
    %447 = vector.extract_strided_slice %439 {offsets = [0, 32], sizes = [32, 64], strides = [1, 1]} : vector<32x96xf32> to vector<32x64xf32>
    %cst_174 = arith.constant dense<0.000000e+00> : vector<4x64xf32>
    %448 = tpu.matmul %318, %447, %cst_174 {dimension_numbers = #tpu.dot_dimension_numbers<[1], [0], [0], [1], [0, 0, 1, 1], [], []>} : vector<4x32xf32>, vector<32x64xf32>, vector<4x64xf32> -> vector<4x64xf32>
    %449 = vector.extract_strided_slice %440 {offsets = [0, 32], sizes = [1, 64], strides = [1, 1]} : vector<1x96xf32> to vector<1x64xf32>
    %450 = vector.broadcast %449 : vector<1x64xf32> to vector<4x64xf32>
    %451 = arith.addf %448, %450 : vector<4x64xf32>
    %452 = vector.extract_strided_slice %451 {offsets = [0, 0], sizes = [4, 32], strides = [1, 1]} : vector<4x64xf32> to vector<4x32xf32>
    %453 = vector.extract_strided_slice %451 {offsets = [0, 32], sizes = [4, 32], strides = [1, 1]} : vector<4x64xf32> to vector<4x32xf32>
    %c0_175 = arith.constant 0 : index
    %c0_176 = arith.constant 0 : index
    %454 = vector.load %arg32[%c0_175, %c0_176] : memref<32x32xf32, #tpu.memory_space<vmem>>, vector<32x32xf32>
    %c0_177 = arith.constant 0 : index
    %c0_178 = arith.constant 0 : index
    %455 = vector.load %arg33[%c0_177, %c0_178] : memref<1x32xf32, #tpu.memory_space<vmem>>, vector<1x32xf32>
    %cst_179 = arith.constant 0.353553385 : f32
    %456 = vector.broadcast %cst_179 : f32 to vector<4x32xf32>
    %457 = arith.mulf %446, %456 : vector<4x32xf32>
    %cst_180 = arith.constant 0.000000e+00 : f32
    %458 = vector.broadcast %cst_180 : f32 to vector<4x32xf32>
    %459 = vector.broadcast %455 : vector<1x32xf32> to vector<4x32xf32>
    %460 = arith.addf %458, %459 : vector<4x32xf32>
    %461 = vector.extract_strided_slice %457 {offsets = [0, 0], sizes = [4, 8], strides = [1, 1]} : vector<4x32xf32> to vector<4x8xf32>
    %462 = vector.extract_strided_slice %452 {offsets = [0, 0], sizes = [4, 8], strides = [1, 1]} : vector<4x32xf32> to vector<4x8xf32>
    %cst_181 = arith.constant dense<0.000000e+00> : vector<4x4xf32>
    %463 = tpu.matmul %461, %462, %cst_181 {dimension_numbers = #tpu.dot_dimension_numbers<[1], [1], [0], [0], [0, 0, 1, 0], [], []>} : vector<4x8xf32>, vector<4x8xf32>, vector<4x4xf32> -> vector<4x4xf32>
    %cst_182 = arith.constant dense<0xFF800000> : vector<4xf32>
    %464 = vector.multi_reduction <maximumf>, %463, %cst_182 [1] : vector<4x4xf32> to vector<4xf32>
    %465 = vector.shape_cast %464 : vector<4xf32> to vector<4x1xf32>
    %466 = vector.broadcast %465 : vector<4x1xf32> to vector<4x4xf32>
    %467 = arith.subf %463, %466 : vector<4x4xf32>
    %468 = math.exp %467 : vector<4x4xf32>
    %cst_183 = arith.constant dense<0.000000e+00> : vector<4xf32>
    %469 = vector.multi_reduction <add>, %468, %cst_183 [1] : vector<4x4xf32> to vector<4xf32>
    %470 = vector.shape_cast %469 : vector<4xf32> to vector<4x1xf32>
    %471 = tpu.reciprocal %470 {approx = true} : vector<4x1xf32> -> vector<4x1xf32>
    %472 = vector.broadcast %471 : vector<4x1xf32> to vector<4x4xf32>
    %473 = arith.mulf %468, %472 : vector<4x4xf32>
    %474 = vector.extract_strided_slice %453 {offsets = [0, 0], sizes = [4, 8], strides = [1, 1]} : vector<4x32xf32> to vector<4x8xf32>
    %cst_184 = arith.constant dense<0.000000e+00> : vector<4x8xf32>
    %475 = tpu.matmul %473, %474, %cst_184 {dimension_numbers = #tpu.dot_dimension_numbers<[1], [0], [0], [1], [0, 0, 1, 1], [], []>} : vector<4x4xf32>, vector<4x8xf32>, vector<4x8xf32> -> vector<4x8xf32>
    %476 = vector.extract_strided_slice %454 {offsets = [0, 0], sizes = [8, 32], strides = [1, 1]} : vector<32x32xf32> to vector<8x32xf32>
    %cst_185 = arith.constant dense<0.000000e+00> : vector<4x32xf32>
    %477 = tpu.matmul %475, %476, %cst_185 {dimension_numbers = #tpu.dot_dimension_numbers<[1], [0], [0], [1], [0, 0, 1, 1], [], []>} : vector<4x8xf32>, vector<8x32xf32>, vector<4x32xf32> -> vector<4x32xf32>
    %478 = arith.addf %460, %477 : vector<4x32xf32>
    %479 = vector.extract_strided_slice %457 {offsets = [0, 8], sizes = [4, 8], strides = [1, 1]} : vector<4x32xf32> to vector<4x8xf32>
    %480 = vector.extract_strided_slice %452 {offsets = [0, 8], sizes = [4, 8], strides = [1, 1]} : vector<4x32xf32> to vector<4x8xf32>
    %cst_186 = arith.constant dense<0.000000e+00> : vector<4x4xf32>
    %481 = tpu.matmul %479, %480, %cst_186 {dimension_numbers = #tpu.dot_dimension_numbers<[1], [1], [0], [0], [0, 0, 1, 0], [], []>} : vector<4x8xf32>, vector<4x8xf32>, vector<4x4xf32> -> vector<4x4xf32>
    %cst_187 = arith.constant dense<0xFF800000> : vector<4xf32>
    %482 = vector.multi_reduction <maximumf>, %481, %cst_187 [1] : vector<4x4xf32> to vector<4xf32>
    %483 = vector.shape_cast %482 : vector<4xf32> to vector<4x1xf32>
    %484 = vector.broadcast %483 : vector<4x1xf32> to vector<4x4xf32>
    %485 = arith.subf %481, %484 : vector<4x4xf32>
    %486 = math.exp %485 : vector<4x4xf32>
    %cst_188 = arith.constant dense<0.000000e+00> : vector<4xf32>
    %487 = vector.multi_reduction <add>, %486, %cst_188 [1] : vector<4x4xf32> to vector<4xf32>
    %488 = vector.shape_cast %487 : vector<4xf32> to vector<4x1xf32>
    %489 = tpu.reciprocal %488 {approx = true} : vector<4x1xf32> -> vector<4x1xf32>
    %490 = vector.broadcast %489 : vector<4x1xf32> to vector<4x4xf32>
    %491 = arith.mulf %486, %490 : vector<4x4xf32>
    %492 = vector.extract_strided_slice %453 {offsets = [0, 8], sizes = [4, 8], strides = [1, 1]} : vector<4x32xf32> to vector<4x8xf32>
    %cst_189 = arith.constant dense<0.000000e+00> : vector<4x8xf32>
    %493 = tpu.matmul %491, %492, %cst_189 {dimension_numbers = #tpu.dot_dimension_numbers<[1], [0], [0], [1], [0, 0, 1, 1], [], []>} : vector<4x4xf32>, vector<4x8xf32>, vector<4x8xf32> -> vector<4x8xf32>
    %494 = vector.extract_strided_slice %454 {offsets = [8, 0], sizes = [8, 32], strides = [1, 1]} : vector<32x32xf32> to vector<8x32xf32>
    %cst_190 = arith.constant dense<0.000000e+00> : vector<4x32xf32>
    %495 = tpu.matmul %493, %494, %cst_190 {dimension_numbers = #tpu.dot_dimension_numbers<[1], [0], [0], [1], [0, 0, 1, 1], [], []>} : vector<4x8xf32>, vector<8x32xf32>, vector<4x32xf32> -> vector<4x32xf32>
    %496 = arith.addf %478, %495 : vector<4x32xf32>
    %497 = vector.extract_strided_slice %457 {offsets = [0, 16], sizes = [4, 8], strides = [1, 1]} : vector<4x32xf32> to vector<4x8xf32>
    %498 = vector.extract_strided_slice %452 {offsets = [0, 16], sizes = [4, 8], strides = [1, 1]} : vector<4x32xf32> to vector<4x8xf32>
    %cst_191 = arith.constant dense<0.000000e+00> : vector<4x4xf32>
    %499 = tpu.matmul %497, %498, %cst_191 {dimension_numbers = #tpu.dot_dimension_numbers<[1], [1], [0], [0], [0, 0, 1, 0], [], []>} : vector<4x8xf32>, vector<4x8xf32>, vector<4x4xf32> -> vector<4x4xf32>
    %cst_192 = arith.constant dense<0xFF800000> : vector<4xf32>
    %500 = vector.multi_reduction <maximumf>, %499, %cst_192 [1] : vector<4x4xf32> to vector<4xf32>
    %501 = vector.shape_cast %500 : vector<4xf32> to vector<4x1xf32>
    %502 = vector.broadcast %501 : vector<4x1xf32> to vector<4x4xf32>
    %503 = arith.subf %499, %502 : vector<4x4xf32>
    %504 = math.exp %503 : vector<4x4xf32>
    %cst_193 = arith.constant dense<0.000000e+00> : vector<4xf32>
    %505 = vector.multi_reduction <add>, %504, %cst_193 [1] : vector<4x4xf32> to vector<4xf32>
    %506 = vector.shape_cast %505 : vector<4xf32> to vector<4x1xf32>
    %507 = tpu.reciprocal %506 {approx = true} : vector<4x1xf32> -> vector<4x1xf32>
    %508 = vector.broadcast %507 : vector<4x1xf32> to vector<4x4xf32>
    %509 = arith.mulf %504, %508 : vector<4x4xf32>
    %510 = vector.extract_strided_slice %453 {offsets = [0, 16], sizes = [4, 8], strides = [1, 1]} : vector<4x32xf32> to vector<4x8xf32>
    %cst_194 = arith.constant dense<0.000000e+00> : vector<4x8xf32>
    %511 = tpu.matmul %509, %510, %cst_194 {dimension_numbers = #tpu.dot_dimension_numbers<[1], [0], [0], [1], [0, 0, 1, 1], [], []>} : vector<4x4xf32>, vector<4x8xf32>, vector<4x8xf32> -> vector<4x8xf32>
    %512 = vector.extract_strided_slice %454 {offsets = [16, 0], sizes = [8, 32], strides = [1, 1]} : vector<32x32xf32> to vector<8x32xf32>
    %cst_195 = arith.constant dense<0.000000e+00> : vector<4x32xf32>
    %513 = tpu.matmul %511, %512, %cst_195 {dimension_numbers = #tpu.dot_dimension_numbers<[1], [0], [0], [1], [0, 0, 1, 1], [], []>} : vector<4x8xf32>, vector<8x32xf32>, vector<4x32xf32> -> vector<4x32xf32>
    %514 = arith.addf %496, %513 : vector<4x32xf32>
    %515 = vector.extract_strided_slice %457 {offsets = [0, 24], sizes = [4, 8], strides = [1, 1]} : vector<4x32xf32> to vector<4x8xf32>
    %516 = vector.extract_strided_slice %452 {offsets = [0, 24], sizes = [4, 8], strides = [1, 1]} : vector<4x32xf32> to vector<4x8xf32>
    %cst_196 = arith.constant dense<0.000000e+00> : vector<4x4xf32>
    %517 = tpu.matmul %515, %516, %cst_196 {dimension_numbers = #tpu.dot_dimension_numbers<[1], [1], [0], [0], [0, 0, 1, 0], [], []>} : vector<4x8xf32>, vector<4x8xf32>, vector<4x4xf32> -> vector<4x4xf32>
    %cst_197 = arith.constant dense<0xFF800000> : vector<4xf32>
    %518 = vector.multi_reduction <maximumf>, %517, %cst_197 [1] : vector<4x4xf32> to vector<4xf32>
    %519 = vector.shape_cast %518 : vector<4xf32> to vector<4x1xf32>
    %520 = vector.broadcast %519 : vector<4x1xf32> to vector<4x4xf32>
    %521 = arith.subf %517, %520 : vector<4x4xf32>
    %522 = math.exp %521 : vector<4x4xf32>
    %cst_198 = arith.constant dense<0.000000e+00> : vector<4xf32>
    %523 = vector.multi_reduction <add>, %522, %cst_198 [1] : vector<4x4xf32> to vector<4xf32>
    %524 = vector.shape_cast %523 : vector<4xf32> to vector<4x1xf32>
    %525 = tpu.reciprocal %524 {approx = true} : vector<4x1xf32> -> vector<4x1xf32>
    %526 = vector.broadcast %525 : vector<4x1xf32> to vector<4x4xf32>
    %527 = arith.mulf %522, %526 : vector<4x4xf32>
    %528 = vector.extract_strided_slice %453 {offsets = [0, 24], sizes = [4, 8], strides = [1, 1]} : vector<4x32xf32> to vector<4x8xf32>
    %cst_199 = arith.constant dense<0.000000e+00> : vector<4x8xf32>
    %529 = tpu.matmul %527, %528, %cst_199 {dimension_numbers = #tpu.dot_dimension_numbers<[1], [0], [0], [1], [0, 0, 1, 1], [], []>} : vector<4x4xf32>, vector<4x8xf32>, vector<4x8xf32> -> vector<4x8xf32>
    %530 = vector.extract_strided_slice %454 {offsets = [24, 0], sizes = [8, 32], strides = [1, 1]} : vector<32x32xf32> to vector<8x32xf32>
    %cst_200 = arith.constant dense<0.000000e+00> : vector<4x32xf32>
    %531 = tpu.matmul %529, %530, %cst_200 {dimension_numbers = #tpu.dot_dimension_numbers<[1], [0], [0], [1], [0, 0, 1, 1], [], []>} : vector<4x8xf32>, vector<8x32xf32>, vector<4x32xf32> -> vector<4x32xf32>
    %532 = arith.addf %514, %531 : vector<4x32xf32>
    %533 = arith.addf %438, %532 : vector<4x32xf32>
    %c0_201 = arith.constant 0 : index
    %c0_202 = arith.constant 0 : index
    %534 = vector.load %arg39[%c0_201, %c0_202] : memref<2x32xf32, #tpu.memory_space<vmem>>, vector<2x32xf32>
    %cst_203 = arith.constant dense<0.000000e+00> : vector<4xf32>
    %535 = vector.multi_reduction <add>, %533, %cst_203 [1] : vector<4x32xf32> to vector<4xf32>
    %536 = vector.shape_cast %535 : vector<4xf32> to vector<4x1xf32>
    %cst_204 = arith.constant 3.200000e+01 : f32
    %537 = vector.broadcast %cst_204 : f32 to vector<4x1xf32>
    %538 = arith.divf %536, %537 : vector<4x1xf32>
    %539 = vector.broadcast %538 : vector<4x1xf32> to vector<4x32xf32>
    %540 = arith.subf %533, %539 : vector<4x32xf32>
    %541 = arith.mulf %540, %540 : vector<4x32xf32>
    %cst_205 = arith.constant dense<0.000000e+00> : vector<4xf32>
    %542 = vector.multi_reduction <add>, %541, %cst_205 [1] : vector<4x32xf32> to vector<4xf32>
    %543 = vector.shape_cast %542 : vector<4xf32> to vector<4x1xf32>
    %cst_206 = arith.constant 3.200000e+01 : f32
    %544 = vector.broadcast %cst_206 : f32 to vector<4x1xf32>
    %545 = arith.divf %543, %544 : vector<4x1xf32>
    %cst_207 = arith.constant 9.99999974E-6 : f32
    %546 = vector.broadcast %cst_207 : f32 to vector<4x1xf32>
    %547 = arith.addf %545, %546 : vector<4x1xf32>
    %548 = math.rsqrt %547 : vector<4x1xf32>
    %549 = vector.broadcast %548 : vector<4x1xf32> to vector<4x32xf32>
    %550 = arith.mulf %540, %549 : vector<4x32xf32>
    %551 = vector.extract_strided_slice %534 {offsets = [0, 0], sizes = [1, 32], strides = [1, 1]} : vector<2x32xf32> to vector<1x32xf32>
    %552 = vector.broadcast %551 : vector<1x32xf32> to vector<4x32xf32>
    %553 = arith.mulf %550, %552 : vector<4x32xf32>
    %554 = vector.extract_strided_slice %534 {offsets = [1, 0], sizes = [1, 32], strides = [1, 1]} : vector<2x32xf32> to vector<1x32xf32>
    %555 = vector.broadcast %554 : vector<1x32xf32> to vector<4x32xf32>
    %556 = arith.addf %553, %555 : vector<4x32xf32>
    %c0_208 = arith.constant 0 : index
    %c0_209 = arith.constant 0 : index
    %557 = vector.load %arg34[%c0_208, %c0_209] : memref<32x32xf32, #tpu.memory_space<vmem>>, vector<32x32xf32>
    %cst_210 = arith.constant dense<0.000000e+00> : vector<4x32xf32>
    %558 = tpu.matmul %556, %557, %cst_210 {dimension_numbers = #tpu.dot_dimension_numbers<[1], [0], [0], [1], [0, 0, 1, 1], [], []>} : vector<4x32xf32>, vector<32x32xf32>, vector<4x32xf32> -> vector<4x32xf32>
    %c0_211 = arith.constant 0 : index
    %c0_212 = arith.constant 0 : index
    %559 = vector.load %arg35[%c0_211, %c0_212] : memref<1x32xf32, #tpu.memory_space<vmem>>, vector<1x32xf32>
    %560 = vector.broadcast %559 : vector<1x32xf32> to vector<4x32xf32>
    %561 = arith.addf %558, %560 : vector<4x32xf32>
    %cst_213 = arith.constant 0.000000e+00 : f32
    %562 = vector.broadcast %cst_213 : f32 to vector<4x32xf32>
    %563 = arith.maximumf %561, %562 : vector<4x32xf32>
    %c0_214 = arith.constant 0 : index
    %c0_215 = arith.constant 0 : index
    %564 = vector.load %arg36[%c0_214, %c0_215] : memref<32x32xf32, #tpu.memory_space<vmem>>, vector<32x32xf32>
    %cst_216 = arith.constant dense<0.000000e+00> : vector<4x32xf32>
    %565 = tpu.matmul %563, %564, %cst_216 {dimension_numbers = #tpu.dot_dimension_numbers<[1], [0], [0], [1], [0, 0, 1, 1], [], []>} : vector<4x32xf32>, vector<32x32xf32>, vector<4x32xf32> -> vector<4x32xf32>
    %c0_217 = arith.constant 0 : index
    %c0_218 = arith.constant 0 : index
    %566 = vector.load %arg37[%c0_217, %c0_218] : memref<1x32xf32, #tpu.memory_space<vmem>>, vector<1x32xf32>
    %567 = vector.broadcast %566 : vector<1x32xf32> to vector<4x32xf32>
    %568 = arith.addf %565, %567 : vector<4x32xf32>
    %569 = arith.addf %556, %568 : vector<4x32xf32>
    %c0_219 = arith.constant 0 : index
    %c0_220 = arith.constant 0 : index
    %570 = vector.load %arg40[%c0_219, %c0_220] : memref<2x32xf32, #tpu.memory_space<vmem>>, vector<2x32xf32>
    %cst_221 = arith.constant dense<0.000000e+00> : vector<4xf32>
    %571 = vector.multi_reduction <add>, %569, %cst_221 [1] : vector<4x32xf32> to vector<4xf32>
    %572 = vector.shape_cast %571 : vector<4xf32> to vector<4x1xf32>
    %cst_222 = arith.constant 3.200000e+01 : f32
    %573 = vector.broadcast %cst_222 : f32 to vector<4x1xf32>
    %574 = arith.divf %572, %573 : vector<4x1xf32>
    %575 = vector.broadcast %574 : vector<4x1xf32> to vector<4x32xf32>
    %576 = arith.subf %569, %575 : vector<4x32xf32>
    %577 = arith.mulf %576, %576 : vector<4x32xf32>
    %cst_223 = arith.constant dense<0.000000e+00> : vector<4xf32>
    %578 = vector.multi_reduction <add>, %577, %cst_223 [1] : vector<4x32xf32> to vector<4xf32>
    %579 = vector.shape_cast %578 : vector<4xf32> to vector<4x1xf32>
    %cst_224 = arith.constant 3.200000e+01 : f32
    %580 = vector.broadcast %cst_224 : f32 to vector<4x1xf32>
    %581 = arith.divf %579, %580 : vector<4x1xf32>
    %cst_225 = arith.constant 9.99999974E-6 : f32
    %582 = vector.broadcast %cst_225 : f32 to vector<4x1xf32>
    %583 = arith.addf %581, %582 : vector<4x1xf32>
    %584 = math.rsqrt %583 : vector<4x1xf32>
    %585 = vector.broadcast %584 : vector<4x1xf32> to vector<4x32xf32>
    %586 = arith.mulf %576, %585 : vector<4x32xf32>
    %587 = vector.extract_strided_slice %570 {offsets = [0, 0], sizes = [1, 32], strides = [1, 1]} : vector<2x32xf32> to vector<1x32xf32>
    %588 = vector.broadcast %587 : vector<1x32xf32> to vector<4x32xf32>
    %589 = arith.mulf %586, %588 : vector<4x32xf32>
    %590 = vector.extract_strided_slice %570 {offsets = [1, 0], sizes = [1, 32], strides = [1, 1]} : vector<2x32xf32> to vector<1x32xf32>
    %591 = vector.broadcast %590 : vector<1x32xf32> to vector<4x32xf32>
    %592 = arith.addf %589, %591 : vector<4x32xf32>
    %c0_226 = arith.constant 0 : index
    %c0_227 = arith.constant 0 : index
    %593 = vector.load %arg41[%c0_226, %c0_227] : memref<32x96xf32, #tpu.memory_space<vmem>>, vector<32x96xf32>
    %c0_228 = arith.constant 0 : index
    %c0_229 = arith.constant 0 : index
    %594 = vector.load %arg42[%c0_228, %c0_229] : memref<1x96xf32, #tpu.memory_space<vmem>>, vector<1x96xf32>
    %595 = arith.addf %592, %319 : vector<4x32xf32>
    %596 = vector.extract_strided_slice %593 {offsets = [0, 0], sizes = [32, 64], strides = [1, 1]} : vector<32x96xf32> to vector<32x64xf32>
    %cst_230 = arith.constant dense<0.000000e+00> : vector<4x64xf32>
    %597 = tpu.matmul %595, %596, %cst_230 {dimension_numbers = #tpu.dot_dimension_numbers<[1], [0], [0], [1], [0, 0, 1, 1], [], []>} : vector<4x32xf32>, vector<32x64xf32>, vector<4x64xf32> -> vector<4x64xf32>
    %598 = vector.extract_strided_slice %594 {offsets = [0, 0], sizes = [1, 64], strides = [1, 1]} : vector<1x96xf32> to vector<1x64xf32>
    %599 = vector.broadcast %598 : vector<1x64xf32> to vector<4x64xf32>
    %600 = arith.addf %597, %599 : vector<4x64xf32>
    %601 = vector.extract_strided_slice %593 {offsets = [0, 64], sizes = [32, 32], strides = [1, 1]} : vector<32x96xf32> to vector<32x32xf32>
    %cst_231 = arith.constant dense<0.000000e+00> : vector<4x32xf32>
    %602 = tpu.matmul %592, %601, %cst_231 {dimension_numbers = #tpu.dot_dimension_numbers<[1], [0], [0], [1], [0, 0, 1, 1], [], []>} : vector<4x32xf32>, vector<32x32xf32>, vector<4x32xf32> -> vector<4x32xf32>
    %603 = vector.extract_strided_slice %594 {offsets = [0, 64], sizes = [1, 32], strides = [1, 1]} : vector<1x96xf32> to vector<1x32xf32>
    %604 = vector.broadcast %603 : vector<1x32xf32> to vector<4x32xf32>
    %605 = arith.addf %602, %604 : vector<4x32xf32>
    %606 = vector.extract_strided_slice %600 {offsets = [0, 0], sizes = [4, 32], strides = [1, 1]} : vector<4x64xf32> to vector<4x32xf32>
    %607 = vector.extract_strided_slice %600 {offsets = [0, 32], sizes = [4, 32], strides = [1, 1]} : vector<4x64xf32> to vector<4x32xf32>
    %c0_232 = arith.constant 0 : index
    %c0_233 = arith.constant 0 : index
    %608 = vector.load %arg43[%c0_232, %c0_233] : memref<32x32xf32, #tpu.memory_space<vmem>>, vector<32x32xf32>
    %c0_234 = arith.constant 0 : index
    %c0_235 = arith.constant 0 : index
    %609 = vector.load %arg44[%c0_234, %c0_235] : memref<1x32xf32, #tpu.memory_space<vmem>>, vector<1x32xf32>
    %cst_236 = arith.constant 0.353553385 : f32
    %610 = vector.broadcast %cst_236 : f32 to vector<4x32xf32>
    %611 = arith.mulf %606, %610 : vector<4x32xf32>
    %cst_237 = arith.constant 0.000000e+00 : f32
    %612 = vector.broadcast %cst_237 : f32 to vector<4x32xf32>
    %613 = vector.broadcast %609 : vector<1x32xf32> to vector<4x32xf32>
    %614 = arith.addf %612, %613 : vector<4x32xf32>
    %615 = vector.extract_strided_slice %611 {offsets = [0, 0], sizes = [4, 8], strides = [1, 1]} : vector<4x32xf32> to vector<4x8xf32>
    %616 = vector.extract_strided_slice %607 {offsets = [0, 0], sizes = [4, 8], strides = [1, 1]} : vector<4x32xf32> to vector<4x8xf32>
    %cst_238 = arith.constant dense<0.000000e+00> : vector<4x4xf32>
    %617 = tpu.matmul %615, %616, %cst_238 {dimension_numbers = #tpu.dot_dimension_numbers<[1], [1], [0], [0], [0, 0, 1, 0], [], []>} : vector<4x8xf32>, vector<4x8xf32>, vector<4x4xf32> -> vector<4x4xf32>
    %cst_239 = arith.constant dense<0xFF800000> : vector<4xf32>
    %618 = vector.multi_reduction <maximumf>, %617, %cst_239 [1] : vector<4x4xf32> to vector<4xf32>
    %619 = vector.shape_cast %618 : vector<4xf32> to vector<4x1xf32>
    %620 = vector.broadcast %619 : vector<4x1xf32> to vector<4x4xf32>
    %621 = arith.subf %617, %620 : vector<4x4xf32>
    %622 = math.exp %621 : vector<4x4xf32>
    %cst_240 = arith.constant dense<0.000000e+00> : vector<4xf32>
    %623 = vector.multi_reduction <add>, %622, %cst_240 [1] : vector<4x4xf32> to vector<4xf32>
    %624 = vector.shape_cast %623 : vector<4xf32> to vector<4x1xf32>
    %625 = tpu.reciprocal %624 {approx = true} : vector<4x1xf32> -> vector<4x1xf32>
    %626 = vector.broadcast %625 : vector<4x1xf32> to vector<4x4xf32>
    %627 = arith.mulf %622, %626 : vector<4x4xf32>
    %628 = vector.extract_strided_slice %605 {offsets = [0, 0], sizes = [4, 8], strides = [1, 1]} : vector<4x32xf32> to vector<4x8xf32>
    %cst_241 = arith.constant dense<0.000000e+00> : vector<4x8xf32>
    %629 = tpu.matmul %627, %628, %cst_241 {dimension_numbers = #tpu.dot_dimension_numbers<[1], [0], [0], [1], [0, 0, 1, 1], [], []>} : vector<4x4xf32>, vector<4x8xf32>, vector<4x8xf32> -> vector<4x8xf32>
    %630 = vector.extract_strided_slice %608 {offsets = [0, 0], sizes = [8, 32], strides = [1, 1]} : vector<32x32xf32> to vector<8x32xf32>
    %cst_242 = arith.constant dense<0.000000e+00> : vector<4x32xf32>
    %631 = tpu.matmul %629, %630, %cst_242 {dimension_numbers = #tpu.dot_dimension_numbers<[1], [0], [0], [1], [0, 0, 1, 1], [], []>} : vector<4x8xf32>, vector<8x32xf32>, vector<4x32xf32> -> vector<4x32xf32>
    %632 = arith.addf %614, %631 : vector<4x32xf32>
    %633 = vector.extract_strided_slice %611 {offsets = [0, 8], sizes = [4, 8], strides = [1, 1]} : vector<4x32xf32> to vector<4x8xf32>
    %634 = vector.extract_strided_slice %607 {offsets = [0, 8], sizes = [4, 8], strides = [1, 1]} : vector<4x32xf32> to vector<4x8xf32>
    %cst_243 = arith.constant dense<0.000000e+00> : vector<4x4xf32>
    %635 = tpu.matmul %633, %634, %cst_243 {dimension_numbers = #tpu.dot_dimension_numbers<[1], [1], [0], [0], [0, 0, 1, 0], [], []>} : vector<4x8xf32>, vector<4x8xf32>, vector<4x4xf32> -> vector<4x4xf32>
    %cst_244 = arith.constant dense<0xFF800000> : vector<4xf32>
    %636 = vector.multi_reduction <maximumf>, %635, %cst_244 [1] : vector<4x4xf32> to vector<4xf32>
    %637 = vector.shape_cast %636 : vector<4xf32> to vector<4x1xf32>
    %638 = vector.broadcast %637 : vector<4x1xf32> to vector<4x4xf32>
    %639 = arith.subf %635, %638 : vector<4x4xf32>
    %640 = math.exp %639 : vector<4x4xf32>
    %cst_245 = arith.constant dense<0.000000e+00> : vector<4xf32>
    %641 = vector.multi_reduction <add>, %640, %cst_245 [1] : vector<4x4xf32> to vector<4xf32>
    %642 = vector.shape_cast %641 : vector<4xf32> to vector<4x1xf32>
    %643 = tpu.reciprocal %642 {approx = true} : vector<4x1xf32> -> vector<4x1xf32>
    %644 = vector.broadcast %643 : vector<4x1xf32> to vector<4x4xf32>
    %645 = arith.mulf %640, %644 : vector<4x4xf32>
    %646 = vector.extract_strided_slice %605 {offsets = [0, 8], sizes = [4, 8], strides = [1, 1]} : vector<4x32xf32> to vector<4x8xf32>
    %cst_246 = arith.constant dense<0.000000e+00> : vector<4x8xf32>
    %647 = tpu.matmul %645, %646, %cst_246 {dimension_numbers = #tpu.dot_dimension_numbers<[1], [0], [0], [1], [0, 0, 1, 1], [], []>} : vector<4x4xf32>, vector<4x8xf32>, vector<4x8xf32> -> vector<4x8xf32>
    %648 = vector.extract_strided_slice %608 {offsets = [8, 0], sizes = [8, 32], strides = [1, 1]} : vector<32x32xf32> to vector<8x32xf32>
    %cst_247 = arith.constant dense<0.000000e+00> : vector<4x32xf32>
    %649 = tpu.matmul %647, %648, %cst_247 {dimension_numbers = #tpu.dot_dimension_numbers<[1], [0], [0], [1], [0, 0, 1, 1], [], []>} : vector<4x8xf32>, vector<8x32xf32>, vector<4x32xf32> -> vector<4x32xf32>
    %650 = arith.addf %632, %649 : vector<4x32xf32>
    %651 = vector.extract_strided_slice %611 {offsets = [0, 16], sizes = [4, 8], strides = [1, 1]} : vector<4x32xf32> to vector<4x8xf32>
    %652 = vector.extract_strided_slice %607 {offsets = [0, 16], sizes = [4, 8], strides = [1, 1]} : vector<4x32xf32> to vector<4x8xf32>
    %cst_248 = arith.constant dense<0.000000e+00> : vector<4x4xf32>
    %653 = tpu.matmul %651, %652, %cst_248 {dimension_numbers = #tpu.dot_dimension_numbers<[1], [1], [0], [0], [0, 0, 1, 0], [], []>} : vector<4x8xf32>, vector<4x8xf32>, vector<4x4xf32> -> vector<4x4xf32>
    %cst_249 = arith.constant dense<0xFF800000> : vector<4xf32>
    %654 = vector.multi_reduction <maximumf>, %653, %cst_249 [1] : vector<4x4xf32> to vector<4xf32>
    %655 = vector.shape_cast %654 : vector<4xf32> to vector<4x1xf32>
    %656 = vector.broadcast %655 : vector<4x1xf32> to vector<4x4xf32>
    %657 = arith.subf %653, %656 : vector<4x4xf32>
    %658 = math.exp %657 : vector<4x4xf32>
    %cst_250 = arith.constant dense<0.000000e+00> : vector<4xf32>
    %659 = vector.multi_reduction <add>, %658, %cst_250 [1] : vector<4x4xf32> to vector<4xf32>
    %660 = vector.shape_cast %659 : vector<4xf32> to vector<4x1xf32>
    %661 = tpu.reciprocal %660 {approx = true} : vector<4x1xf32> -> vector<4x1xf32>
    %662 = vector.broadcast %661 : vector<4x1xf32> to vector<4x4xf32>
    %663 = arith.mulf %658, %662 : vector<4x4xf32>
    %664 = vector.extract_strided_slice %605 {offsets = [0, 16], sizes = [4, 8], strides = [1, 1]} : vector<4x32xf32> to vector<4x8xf32>
    %cst_251 = arith.constant dense<0.000000e+00> : vector<4x8xf32>
    %665 = tpu.matmul %663, %664, %cst_251 {dimension_numbers = #tpu.dot_dimension_numbers<[1], [0], [0], [1], [0, 0, 1, 1], [], []>} : vector<4x4xf32>, vector<4x8xf32>, vector<4x8xf32> -> vector<4x8xf32>
    %666 = vector.extract_strided_slice %608 {offsets = [16, 0], sizes = [8, 32], strides = [1, 1]} : vector<32x32xf32> to vector<8x32xf32>
    %cst_252 = arith.constant dense<0.000000e+00> : vector<4x32xf32>
    %667 = tpu.matmul %665, %666, %cst_252 {dimension_numbers = #tpu.dot_dimension_numbers<[1], [0], [0], [1], [0, 0, 1, 1], [], []>} : vector<4x8xf32>, vector<8x32xf32>, vector<4x32xf32> -> vector<4x32xf32>
    %668 = arith.addf %650, %667 : vector<4x32xf32>
    %669 = vector.extract_strided_slice %611 {offsets = [0, 24], sizes = [4, 8], strides = [1, 1]} : vector<4x32xf32> to vector<4x8xf32>
    %670 = vector.extract_strided_slice %607 {offsets = [0, 24], sizes = [4, 8], strides = [1, 1]} : vector<4x32xf32> to vector<4x8xf32>
    %cst_253 = arith.constant dense<0.000000e+00> : vector<4x4xf32>
    %671 = tpu.matmul %669, %670, %cst_253 {dimension_numbers = #tpu.dot_dimension_numbers<[1], [1], [0], [0], [0, 0, 1, 0], [], []>} : vector<4x8xf32>, vector<4x8xf32>, vector<4x4xf32> -> vector<4x4xf32>
    %cst_254 = arith.constant dense<0xFF800000> : vector<4xf32>
    %672 = vector.multi_reduction <maximumf>, %671, %cst_254 [1] : vector<4x4xf32> to vector<4xf32>
    %673 = vector.shape_cast %672 : vector<4xf32> to vector<4x1xf32>
    %674 = vector.broadcast %673 : vector<4x1xf32> to vector<4x4xf32>
    %675 = arith.subf %671, %674 : vector<4x4xf32>
    %676 = math.exp %675 : vector<4x4xf32>
    %cst_255 = arith.constant dense<0.000000e+00> : vector<4xf32>
    %677 = vector.multi_reduction <add>, %676, %cst_255 [1] : vector<4x4xf32> to vector<4xf32>
    %678 = vector.shape_cast %677 : vector<4xf32> to vector<4x1xf32>
    %679 = tpu.reciprocal %678 {approx = true} : vector<4x1xf32> -> vector<4x1xf32>
    %680 = vector.broadcast %679 : vector<4x1xf32> to vector<4x4xf32>
    %681 = arith.mulf %676, %680 : vector<4x4xf32>
    %682 = vector.extract_strided_slice %605 {offsets = [0, 24], sizes = [4, 8], strides = [1, 1]} : vector<4x32xf32> to vector<4x8xf32>
    %cst_256 = arith.constant dense<0.000000e+00> : vector<4x8xf32>
    %683 = tpu.matmul %681, %682, %cst_256 {dimension_numbers = #tpu.dot_dimension_numbers<[1], [0], [0], [1], [0, 0, 1, 1], [], []>} : vector<4x4xf32>, vector<4x8xf32>, vector<4x8xf32> -> vector<4x8xf32>
    %684 = vector.extract_strided_slice %608 {offsets = [24, 0], sizes = [8, 32], strides = [1, 1]} : vector<32x32xf32> to vector<8x32xf32>
    %cst_257 = arith.constant dense<0.000000e+00> : vector<4x32xf32>
    %685 = tpu.matmul %683, %684, %cst_257 {dimension_numbers = #tpu.dot_dimension_numbers<[1], [0], [0], [1], [0, 0, 1, 1], [], []>} : vector<4x8xf32>, vector<8x32xf32>, vector<4x32xf32> -> vector<4x32xf32>
    %686 = arith.addf %668, %685 : vector<4x32xf32>
    %687 = arith.addf %592, %686 : vector<4x32xf32>
    %c0_258 = arith.constant 0 : index
    %c0_259 = arith.constant 0 : index
    %688 = vector.load %arg53[%c0_258, %c0_259] : memref<2x32xf32, #tpu.memory_space<vmem>>, vector<2x32xf32>
    %cst_260 = arith.constant dense<0.000000e+00> : vector<4xf32>
    %689 = vector.multi_reduction <add>, %687, %cst_260 [1] : vector<4x32xf32> to vector<4xf32>
    %690 = vector.shape_cast %689 : vector<4xf32> to vector<4x1xf32>
    %cst_261 = arith.constant 3.200000e+01 : f32
    %691 = vector.broadcast %cst_261 : f32 to vector<4x1xf32>
    %692 = arith.divf %690, %691 : vector<4x1xf32>
    %693 = vector.broadcast %692 : vector<4x1xf32> to vector<4x32xf32>
    %694 = arith.subf %687, %693 : vector<4x32xf32>
    %695 = arith.mulf %694, %694 : vector<4x32xf32>
    %cst_262 = arith.constant dense<0.000000e+00> : vector<4xf32>
    %696 = vector.multi_reduction <add>, %695, %cst_262 [1] : vector<4x32xf32> to vector<4xf32>
    %697 = vector.shape_cast %696 : vector<4xf32> to vector<4x1xf32>
    %cst_263 = arith.constant 3.200000e+01 : f32
    %698 = vector.broadcast %cst_263 : f32 to vector<4x1xf32>
    %699 = arith.divf %697, %698 : vector<4x1xf32>
    %cst_264 = arith.constant 9.99999974E-6 : f32
    %700 = vector.broadcast %cst_264 : f32 to vector<4x1xf32>
    %701 = arith.addf %699, %700 : vector<4x1xf32>
    %702 = math.rsqrt %701 : vector<4x1xf32>
    %703 = vector.broadcast %702 : vector<4x1xf32> to vector<4x32xf32>
    %704 = arith.mulf %694, %703 : vector<4x32xf32>
    %705 = vector.extract_strided_slice %688 {offsets = [0, 0], sizes = [1, 32], strides = [1, 1]} : vector<2x32xf32> to vector<1x32xf32>
    %706 = vector.broadcast %705 : vector<1x32xf32> to vector<4x32xf32>
    %707 = arith.mulf %704, %706 : vector<4x32xf32>
    %708 = vector.extract_strided_slice %688 {offsets = [1, 0], sizes = [1, 32], strides = [1, 1]} : vector<2x32xf32> to vector<1x32xf32>
    %709 = vector.broadcast %708 : vector<1x32xf32> to vector<4x32xf32>
    %710 = arith.addf %707, %709 : vector<4x32xf32>
    %c0_265 = arith.constant 0 : index
    %c0_266 = arith.constant 0 : index
    %711 = vector.load %arg45[%c0_265, %c0_266] : memref<32x96xf32, #tpu.memory_space<vmem>>, vector<32x96xf32>
    %c0_267 = arith.constant 0 : index
    %c0_268 = arith.constant 0 : index
    %712 = vector.load %arg46[%c0_267, %c0_268] : memref<1x96xf32, #tpu.memory_space<vmem>>, vector<1x96xf32>
    %713 = arith.addf %710, %319 : vector<4x32xf32>
    %714 = vector.extract_strided_slice %711 {offsets = [0, 0], sizes = [32, 32], strides = [1, 1]} : vector<32x96xf32> to vector<32x32xf32>
    %cst_269 = arith.constant dense<0.000000e+00> : vector<4x32xf32>
    %715 = tpu.matmul %713, %714, %cst_269 {dimension_numbers = #tpu.dot_dimension_numbers<[1], [0], [0], [1], [0, 0, 1, 1], [], []>} : vector<4x32xf32>, vector<32x32xf32>, vector<4x32xf32> -> vector<4x32xf32>
    %716 = vector.extract_strided_slice %712 {offsets = [0, 0], sizes = [1, 32], strides = [1, 1]} : vector<1x96xf32> to vector<1x32xf32>
    %717 = vector.broadcast %716 : vector<1x32xf32> to vector<4x32xf32>
    %718 = arith.addf %715, %717 : vector<4x32xf32>
    %719 = vector.extract_strided_slice %711 {offsets = [0, 32], sizes = [32, 64], strides = [1, 1]} : vector<32x96xf32> to vector<32x64xf32>
    %cst_270 = arith.constant dense<0.000000e+00> : vector<4x64xf32>
    %720 = tpu.matmul %318, %719, %cst_270 {dimension_numbers = #tpu.dot_dimension_numbers<[1], [0], [0], [1], [0, 0, 1, 1], [], []>} : vector<4x32xf32>, vector<32x64xf32>, vector<4x64xf32> -> vector<4x64xf32>
    %721 = vector.extract_strided_slice %712 {offsets = [0, 32], sizes = [1, 64], strides = [1, 1]} : vector<1x96xf32> to vector<1x64xf32>
    %722 = vector.broadcast %721 : vector<1x64xf32> to vector<4x64xf32>
    %723 = arith.addf %720, %722 : vector<4x64xf32>
    %724 = vector.extract_strided_slice %723 {offsets = [0, 0], sizes = [4, 32], strides = [1, 1]} : vector<4x64xf32> to vector<4x32xf32>
    %725 = vector.extract_strided_slice %723 {offsets = [0, 32], sizes = [4, 32], strides = [1, 1]} : vector<4x64xf32> to vector<4x32xf32>
    %c0_271 = arith.constant 0 : index
    %c0_272 = arith.constant 0 : index
    %726 = vector.load %arg47[%c0_271, %c0_272] : memref<32x32xf32, #tpu.memory_space<vmem>>, vector<32x32xf32>
    %c0_273 = arith.constant 0 : index
    %c0_274 = arith.constant 0 : index
    %727 = vector.load %arg48[%c0_273, %c0_274] : memref<1x32xf32, #tpu.memory_space<vmem>>, vector<1x32xf32>
    %cst_275 = arith.constant 0.353553385 : f32
    %728 = vector.broadcast %cst_275 : f32 to vector<4x32xf32>
    %729 = arith.mulf %718, %728 : vector<4x32xf32>
    %cst_276 = arith.constant 0.000000e+00 : f32
    %730 = vector.broadcast %cst_276 : f32 to vector<4x32xf32>
    %731 = vector.broadcast %727 : vector<1x32xf32> to vector<4x32xf32>
    %732 = arith.addf %730, %731 : vector<4x32xf32>
    %733 = vector.extract_strided_slice %729 {offsets = [0, 0], sizes = [4, 8], strides = [1, 1]} : vector<4x32xf32> to vector<4x8xf32>
    %734 = vector.extract_strided_slice %724 {offsets = [0, 0], sizes = [4, 8], strides = [1, 1]} : vector<4x32xf32> to vector<4x8xf32>
    %cst_277 = arith.constant dense<0.000000e+00> : vector<4x4xf32>
    %735 = tpu.matmul %733, %734, %cst_277 {dimension_numbers = #tpu.dot_dimension_numbers<[1], [1], [0], [0], [0, 0, 1, 0], [], []>} : vector<4x8xf32>, vector<4x8xf32>, vector<4x4xf32> -> vector<4x4xf32>
    %cst_278 = arith.constant dense<0xFF800000> : vector<4xf32>
    %736 = vector.multi_reduction <maximumf>, %735, %cst_278 [1] : vector<4x4xf32> to vector<4xf32>
    %737 = vector.shape_cast %736 : vector<4xf32> to vector<4x1xf32>
    %738 = vector.broadcast %737 : vector<4x1xf32> to vector<4x4xf32>
    %739 = arith.subf %735, %738 : vector<4x4xf32>
    %740 = math.exp %739 : vector<4x4xf32>
    %cst_279 = arith.constant dense<0.000000e+00> : vector<4xf32>
    %741 = vector.multi_reduction <add>, %740, %cst_279 [1] : vector<4x4xf32> to vector<4xf32>
    %742 = vector.shape_cast %741 : vector<4xf32> to vector<4x1xf32>
    %743 = tpu.reciprocal %742 {approx = true} : vector<4x1xf32> -> vector<4x1xf32>
    %744 = vector.broadcast %743 : vector<4x1xf32> to vector<4x4xf32>
    %745 = arith.mulf %740, %744 : vector<4x4xf32>
    %746 = vector.extract_strided_slice %725 {offsets = [0, 0], sizes = [4, 8], strides = [1, 1]} : vector<4x32xf32> to vector<4x8xf32>
    %cst_280 = arith.constant dense<0.000000e+00> : vector<4x8xf32>
    %747 = tpu.matmul %745, %746, %cst_280 {dimension_numbers = #tpu.dot_dimension_numbers<[1], [0], [0], [1], [0, 0, 1, 1], [], []>} : vector<4x4xf32>, vector<4x8xf32>, vector<4x8xf32> -> vector<4x8xf32>
    %748 = vector.extract_strided_slice %726 {offsets = [0, 0], sizes = [8, 32], strides = [1, 1]} : vector<32x32xf32> to vector<8x32xf32>
    %cst_281 = arith.constant dense<0.000000e+00> : vector<4x32xf32>
    %749 = tpu.matmul %747, %748, %cst_281 {dimension_numbers = #tpu.dot_dimension_numbers<[1], [0], [0], [1], [0, 0, 1, 1], [], []>} : vector<4x8xf32>, vector<8x32xf32>, vector<4x32xf32> -> vector<4x32xf32>
    %750 = arith.addf %732, %749 : vector<4x32xf32>
    %751 = vector.extract_strided_slice %729 {offsets = [0, 8], sizes = [4, 8], strides = [1, 1]} : vector<4x32xf32> to vector<4x8xf32>
    %752 = vector.extract_strided_slice %724 {offsets = [0, 8], sizes = [4, 8], strides = [1, 1]} : vector<4x32xf32> to vector<4x8xf32>
    %cst_282 = arith.constant dense<0.000000e+00> : vector<4x4xf32>
    %753 = tpu.matmul %751, %752, %cst_282 {dimension_numbers = #tpu.dot_dimension_numbers<[1], [1], [0], [0], [0, 0, 1, 0], [], []>} : vector<4x8xf32>, vector<4x8xf32>, vector<4x4xf32> -> vector<4x4xf32>
    %cst_283 = arith.constant dense<0xFF800000> : vector<4xf32>
    %754 = vector.multi_reduction <maximumf>, %753, %cst_283 [1] : vector<4x4xf32> to vector<4xf32>
    %755 = vector.shape_cast %754 : vector<4xf32> to vector<4x1xf32>
    %756 = vector.broadcast %755 : vector<4x1xf32> to vector<4x4xf32>
    %757 = arith.subf %753, %756 : vector<4x4xf32>
    %758 = math.exp %757 : vector<4x4xf32>
    %cst_284 = arith.constant dense<0.000000e+00> : vector<4xf32>
    %759 = vector.multi_reduction <add>, %758, %cst_284 [1] : vector<4x4xf32> to vector<4xf32>
    %760 = vector.shape_cast %759 : vector<4xf32> to vector<4x1xf32>
    %761 = tpu.reciprocal %760 {approx = true} : vector<4x1xf32> -> vector<4x1xf32>
    %762 = vector.broadcast %761 : vector<4x1xf32> to vector<4x4xf32>
    %763 = arith.mulf %758, %762 : vector<4x4xf32>
    %764 = vector.extract_strided_slice %725 {offsets = [0, 8], sizes = [4, 8], strides = [1, 1]} : vector<4x32xf32> to vector<4x8xf32>
    %cst_285 = arith.constant dense<0.000000e+00> : vector<4x8xf32>
    %765 = tpu.matmul %763, %764, %cst_285 {dimension_numbers = #tpu.dot_dimension_numbers<[1], [0], [0], [1], [0, 0, 1, 1], [], []>} : vector<4x4xf32>, vector<4x8xf32>, vector<4x8xf32> -> vector<4x8xf32>
    %766 = vector.extract_strided_slice %726 {offsets = [8, 0], sizes = [8, 32], strides = [1, 1]} : vector<32x32xf32> to vector<8x32xf32>
    %cst_286 = arith.constant dense<0.000000e+00> : vector<4x32xf32>
    %767 = tpu.matmul %765, %766, %cst_286 {dimension_numbers = #tpu.dot_dimension_numbers<[1], [0], [0], [1], [0, 0, 1, 1], [], []>} : vector<4x8xf32>, vector<8x32xf32>, vector<4x32xf32> -> vector<4x32xf32>
    %768 = arith.addf %750, %767 : vector<4x32xf32>
    %769 = vector.extract_strided_slice %729 {offsets = [0, 16], sizes = [4, 8], strides = [1, 1]} : vector<4x32xf32> to vector<4x8xf32>
    %770 = vector.extract_strided_slice %724 {offsets = [0, 16], sizes = [4, 8], strides = [1, 1]} : vector<4x32xf32> to vector<4x8xf32>
    %cst_287 = arith.constant dense<0.000000e+00> : vector<4x4xf32>
    %771 = tpu.matmul %769, %770, %cst_287 {dimension_numbers = #tpu.dot_dimension_numbers<[1], [1], [0], [0], [0, 0, 1, 0], [], []>} : vector<4x8xf32>, vector<4x8xf32>, vector<4x4xf32> -> vector<4x4xf32>
    %cst_288 = arith.constant dense<0xFF800000> : vector<4xf32>
    %772 = vector.multi_reduction <maximumf>, %771, %cst_288 [1] : vector<4x4xf32> to vector<4xf32>
    %773 = vector.shape_cast %772 : vector<4xf32> to vector<4x1xf32>
    %774 = vector.broadcast %773 : vector<4x1xf32> to vector<4x4xf32>
    %775 = arith.subf %771, %774 : vector<4x4xf32>
    %776 = math.exp %775 : vector<4x4xf32>
    %cst_289 = arith.constant dense<0.000000e+00> : vector<4xf32>
    %777 = vector.multi_reduction <add>, %776, %cst_289 [1] : vector<4x4xf32> to vector<4xf32>
    %778 = vector.shape_cast %777 : vector<4xf32> to vector<4x1xf32>
    %779 = tpu.reciprocal %778 {approx = true} : vector<4x1xf32> -> vector<4x1xf32>
    %780 = vector.broadcast %779 : vector<4x1xf32> to vector<4x4xf32>
    %781 = arith.mulf %776, %780 : vector<4x4xf32>
    %782 = vector.extract_strided_slice %725 {offsets = [0, 16], sizes = [4, 8], strides = [1, 1]} : vector<4x32xf32> to vector<4x8xf32>
    %cst_290 = arith.constant dense<0.000000e+00> : vector<4x8xf32>
    %783 = tpu.matmul %781, %782, %cst_290 {dimension_numbers = #tpu.dot_dimension_numbers<[1], [0], [0], [1], [0, 0, 1, 1], [], []>} : vector<4x4xf32>, vector<4x8xf32>, vector<4x8xf32> -> vector<4x8xf32>
    %784 = vector.extract_strided_slice %726 {offsets = [16, 0], sizes = [8, 32], strides = [1, 1]} : vector<32x32xf32> to vector<8x32xf32>
    %cst_291 = arith.constant dense<0.000000e+00> : vector<4x32xf32>
    %785 = tpu.matmul %783, %784, %cst_291 {dimension_numbers = #tpu.dot_dimension_numbers<[1], [0], [0], [1], [0, 0, 1, 1], [], []>} : vector<4x8xf32>, vector<8x32xf32>, vector<4x32xf32> -> vector<4x32xf32>
    %786 = arith.addf %768, %785 : vector<4x32xf32>
    %787 = vector.extract_strided_slice %729 {offsets = [0, 24], sizes = [4, 8], strides = [1, 1]} : vector<4x32xf32> to vector<4x8xf32>
    %788 = vector.extract_strided_slice %724 {offsets = [0, 24], sizes = [4, 8], strides = [1, 1]} : vector<4x32xf32> to vector<4x8xf32>
    %cst_292 = arith.constant dense<0.000000e+00> : vector<4x4xf32>
    %789 = tpu.matmul %787, %788, %cst_292 {dimension_numbers = #tpu.dot_dimension_numbers<[1], [1], [0], [0], [0, 0, 1, 0], [], []>} : vector<4x8xf32>, vector<4x8xf32>, vector<4x4xf32> -> vector<4x4xf32>
    %cst_293 = arith.constant dense<0xFF800000> : vector<4xf32>
    %790 = vector.multi_reduction <maximumf>, %789, %cst_293 [1] : vector<4x4xf32> to vector<4xf32>
    %791 = vector.shape_cast %790 : vector<4xf32> to vector<4x1xf32>
    %792 = vector.broadcast %791 : vector<4x1xf32> to vector<4x4xf32>
    %793 = arith.subf %789, %792 : vector<4x4xf32>
    %794 = math.exp %793 : vector<4x4xf32>
    %cst_294 = arith.constant dense<0.000000e+00> : vector<4xf32>
    %795 = vector.multi_reduction <add>, %794, %cst_294 [1] : vector<4x4xf32> to vector<4xf32>
    %796 = vector.shape_cast %795 : vector<4xf32> to vector<4x1xf32>
    %797 = tpu.reciprocal %796 {approx = true} : vector<4x1xf32> -> vector<4x1xf32>
    %798 = vector.broadcast %797 : vector<4x1xf32> to vector<4x4xf32>
    %799 = arith.mulf %794, %798 : vector<4x4xf32>
    %800 = vector.extract_strided_slice %725 {offsets = [0, 24], sizes = [4, 8], strides = [1, 1]} : vector<4x32xf32> to vector<4x8xf32>
    %cst_295 = arith.constant dense<0.000000e+00> : vector<4x8xf32>
    %801 = tpu.matmul %799, %800, %cst_295 {dimension_numbers = #tpu.dot_dimension_numbers<[1], [0], [0], [1], [0, 0, 1, 1], [], []>} : vector<4x4xf32>, vector<4x8xf32>, vector<4x8xf32> -> vector<4x8xf32>
    %802 = vector.extract_strided_slice %726 {offsets = [24, 0], sizes = [8, 32], strides = [1, 1]} : vector<32x32xf32> to vector<8x32xf32>
    %cst_296 = arith.constant dense<0.000000e+00> : vector<4x32xf32>
    %803 = tpu.matmul %801, %802, %cst_296 {dimension_numbers = #tpu.dot_dimension_numbers<[1], [0], [0], [1], [0, 0, 1, 1], [], []>} : vector<4x8xf32>, vector<8x32xf32>, vector<4x32xf32> -> vector<4x32xf32>
    %804 = arith.addf %786, %803 : vector<4x32xf32>
    %805 = arith.addf %710, %804 : vector<4x32xf32>
    %c0_297 = arith.constant 0 : index
    %c0_298 = arith.constant 0 : index
    %806 = vector.load %arg54[%c0_297, %c0_298] : memref<2x32xf32, #tpu.memory_space<vmem>>, vector<2x32xf32>
    %cst_299 = arith.constant dense<0.000000e+00> : vector<4xf32>
    %807 = vector.multi_reduction <add>, %805, %cst_299 [1] : vector<4x32xf32> to vector<4xf32>
    %808 = vector.shape_cast %807 : vector<4xf32> to vector<4x1xf32>
    %cst_300 = arith.constant 3.200000e+01 : f32
    %809 = vector.broadcast %cst_300 : f32 to vector<4x1xf32>
    %810 = arith.divf %808, %809 : vector<4x1xf32>
    %811 = vector.broadcast %810 : vector<4x1xf32> to vector<4x32xf32>
    %812 = arith.subf %805, %811 : vector<4x32xf32>
    %813 = arith.mulf %812, %812 : vector<4x32xf32>
    %cst_301 = arith.constant dense<0.000000e+00> : vector<4xf32>
    %814 = vector.multi_reduction <add>, %813, %cst_301 [1] : vector<4x32xf32> to vector<4xf32>
    %815 = vector.shape_cast %814 : vector<4xf32> to vector<4x1xf32>
    %cst_302 = arith.constant 3.200000e+01 : f32
    %816 = vector.broadcast %cst_302 : f32 to vector<4x1xf32>
    %817 = arith.divf %815, %816 : vector<4x1xf32>
    %cst_303 = arith.constant 9.99999974E-6 : f32
    %818 = vector.broadcast %cst_303 : f32 to vector<4x1xf32>
    %819 = arith.addf %817, %818 : vector<4x1xf32>
    %820 = math.rsqrt %819 : vector<4x1xf32>
    %821 = vector.broadcast %820 : vector<4x1xf32> to vector<4x32xf32>
    %822 = arith.mulf %812, %821 : vector<4x32xf32>
    %823 = vector.extract_strided_slice %806 {offsets = [0, 0], sizes = [1, 32], strides = [1, 1]} : vector<2x32xf32> to vector<1x32xf32>
    %824 = vector.broadcast %823 : vector<1x32xf32> to vector<4x32xf32>
    %825 = arith.mulf %822, %824 : vector<4x32xf32>
    %826 = vector.extract_strided_slice %806 {offsets = [1, 0], sizes = [1, 32], strides = [1, 1]} : vector<2x32xf32> to vector<1x32xf32>
    %827 = vector.broadcast %826 : vector<1x32xf32> to vector<4x32xf32>
    %828 = arith.addf %825, %827 : vector<4x32xf32>
    %c0_304 = arith.constant 0 : index
    %c0_305 = arith.constant 0 : index
    %829 = vector.load %arg49[%c0_304, %c0_305] : memref<32x32xf32, #tpu.memory_space<vmem>>, vector<32x32xf32>
    %cst_306 = arith.constant dense<0.000000e+00> : vector<4x32xf32>
    %830 = tpu.matmul %828, %829, %cst_306 {dimension_numbers = #tpu.dot_dimension_numbers<[1], [0], [0], [1], [0, 0, 1, 1], [], []>} : vector<4x32xf32>, vector<32x32xf32>, vector<4x32xf32> -> vector<4x32xf32>
    %c0_307 = arith.constant 0 : index
    %c0_308 = arith.constant 0 : index
    %831 = vector.load %arg50[%c0_307, %c0_308] : memref<1x32xf32, #tpu.memory_space<vmem>>, vector<1x32xf32>
    %832 = vector.broadcast %831 : vector<1x32xf32> to vector<4x32xf32>
    %833 = arith.addf %830, %832 : vector<4x32xf32>
    %cst_309 = arith.constant 0.000000e+00 : f32
    %834 = vector.broadcast %cst_309 : f32 to vector<4x32xf32>
    %835 = arith.maximumf %833, %834 : vector<4x32xf32>
    %c0_310 = arith.constant 0 : index
    %c0_311 = arith.constant 0 : index
    %836 = vector.load %arg51[%c0_310, %c0_311] : memref<32x32xf32, #tpu.memory_space<vmem>>, vector<32x32xf32>
    %cst_312 = arith.constant dense<0.000000e+00> : vector<4x32xf32>
    %837 = tpu.matmul %835, %836, %cst_312 {dimension_numbers = #tpu.dot_dimension_numbers<[1], [0], [0], [1], [0, 0, 1, 1], [], []>} : vector<4x32xf32>, vector<32x32xf32>, vector<4x32xf32> -> vector<4x32xf32>
    %c0_313 = arith.constant 0 : index
    %c0_314 = arith.constant 0 : index
    %838 = vector.load %arg52[%c0_313, %c0_314] : memref<1x32xf32, #tpu.memory_space<vmem>>, vector<1x32xf32>
    %839 = vector.broadcast %838 : vector<1x32xf32> to vector<4x32xf32>
    %840 = arith.addf %837, %839 : vector<4x32xf32>
    %841 = arith.addf %828, %840 : vector<4x32xf32>
    %c0_315 = arith.constant 0 : index
    %c0_316 = arith.constant 0 : index
    %842 = vector.load %arg55[%c0_315, %c0_316] : memref<2x32xf32, #tpu.memory_space<vmem>>, vector<2x32xf32>
    %cst_317 = arith.constant dense<0.000000e+00> : vector<4xf32>
    %843 = vector.multi_reduction <add>, %841, %cst_317 [1] : vector<4x32xf32> to vector<4xf32>
    %844 = vector.shape_cast %843 : vector<4xf32> to vector<4x1xf32>
    %cst_318 = arith.constant 3.200000e+01 : f32
    %845 = vector.broadcast %cst_318 : f32 to vector<4x1xf32>
    %846 = arith.divf %844, %845 : vector<4x1xf32>
    %847 = vector.broadcast %846 : vector<4x1xf32> to vector<4x32xf32>
    %848 = arith.subf %841, %847 : vector<4x32xf32>
    %849 = arith.mulf %848, %848 : vector<4x32xf32>
    %cst_319 = arith.constant dense<0.000000e+00> : vector<4xf32>
    %850 = vector.multi_reduction <add>, %849, %cst_319 [1] : vector<4x32xf32> to vector<4xf32>
    %851 = vector.shape_cast %850 : vector<4xf32> to vector<4x1xf32>
    %cst_320 = arith.constant 3.200000e+01 : f32
    %852 = vector.broadcast %cst_320 : f32 to vector<4x1xf32>
    %853 = arith.divf %851, %852 : vector<4x1xf32>
    %cst_321 = arith.constant 9.99999974E-6 : f32
    %854 = vector.broadcast %cst_321 : f32 to vector<4x1xf32>
    %855 = arith.addf %853, %854 : vector<4x1xf32>
    %856 = math.rsqrt %855 : vector<4x1xf32>
    %857 = vector.broadcast %856 : vector<4x1xf32> to vector<4x32xf32>
    %858 = arith.mulf %848, %857 : vector<4x32xf32>
    %859 = vector.extract_strided_slice %842 {offsets = [0, 0], sizes = [1, 32], strides = [1, 1]} : vector<2x32xf32> to vector<1x32xf32>
    %860 = vector.broadcast %859 : vector<1x32xf32> to vector<4x32xf32>
    %861 = arith.mulf %858, %860 : vector<4x32xf32>
    %862 = vector.extract_strided_slice %842 {offsets = [1, 0], sizes = [1, 32], strides = [1, 1]} : vector<2x32xf32> to vector<1x32xf32>
    %863 = vector.broadcast %862 : vector<1x32xf32> to vector<4x32xf32>
    %864 = arith.addf %861, %863 : vector<4x32xf32>
    %c0_322 = arith.constant 0 : index
    %c0_323 = arith.constant 0 : index
    %865 = vector.load %arg56[%c0_322, %c0_323] : memref<2x32xf32, #tpu.memory_space<vmem>>, vector<2x32xf32>
    %cst_324 = arith.constant dense<0.000000e+00> : vector<4xf32>
    %866 = vector.multi_reduction <add>, %864, %cst_324 [1] : vector<4x32xf32> to vector<4xf32>
    %867 = vector.shape_cast %866 : vector<4xf32> to vector<4x1xf32>
    %cst_325 = arith.constant 3.200000e+01 : f32
    %868 = vector.broadcast %cst_325 : f32 to vector<4x1xf32>
    %869 = arith.divf %867, %868 : vector<4x1xf32>
    %870 = vector.broadcast %869 : vector<4x1xf32> to vector<4x32xf32>
    %871 = arith.subf %864, %870 : vector<4x32xf32>
    %872 = arith.mulf %871, %871 : vector<4x32xf32>
    %cst_326 = arith.constant dense<0.000000e+00> : vector<4xf32>
    %873 = vector.multi_reduction <add>, %872, %cst_326 [1] : vector<4x32xf32> to vector<4xf32>
    %874 = vector.shape_cast %873 : vector<4xf32> to vector<4x1xf32>
    %cst_327 = arith.constant 3.200000e+01 : f32
    %875 = vector.broadcast %cst_327 : f32 to vector<4x1xf32>
    %876 = arith.divf %874, %875 : vector<4x1xf32>
    %cst_328 = arith.constant 9.99999974E-6 : f32
    %877 = vector.broadcast %cst_328 : f32 to vector<4x1xf32>
    %878 = arith.addf %876, %877 : vector<4x1xf32>
    %879 = math.rsqrt %878 : vector<4x1xf32>
    %880 = vector.broadcast %879 : vector<4x1xf32> to vector<4x32xf32>
    %881 = arith.mulf %871, %880 : vector<4x32xf32>
    %882 = vector.extract_strided_slice %865 {offsets = [0, 0], sizes = [1, 32], strides = [1, 1]} : vector<2x32xf32> to vector<1x32xf32>
    %883 = vector.broadcast %882 : vector<1x32xf32> to vector<4x32xf32>
    %884 = arith.mulf %881, %883 : vector<4x32xf32>
    %885 = vector.extract_strided_slice %865 {offsets = [1, 0], sizes = [1, 32], strides = [1, 1]} : vector<2x32xf32> to vector<1x32xf32>
    %886 = vector.broadcast %885 : vector<1x32xf32> to vector<4x32xf32>
    %887 = arith.addf %884, %886 : vector<4x32xf32>
    %888 = vector.extract_strided_slice %887 {offsets = [0, 0], sizes = [2, 32], strides = [1, 1]} : vector<4x32xf32> to vector<2x32xf32>
    %cst_329 = arith.constant dense<0.000000e+00> : vector<32xf32>
    %889 = vector.multi_reduction <add>, %888, %cst_329 [0] : vector<2x32xf32> to vector<32xf32>
    %890 = vector.shape_cast %889 : vector<32xf32> to vector<1x32xf32>
    %cst_330 = arith.constant 2.000000e+00 : f32
    %891 = vector.broadcast %cst_330 : f32 to vector<1x32xf32>
    %892 = arith.divf %890, %891 : vector<1x32xf32>
    %893 = vector.extract_strided_slice %887 {offsets = [2, 0], sizes = [2, 32], strides = [1, 1]} : vector<4x32xf32> to vector<2x32xf32>
    %cst_331 = arith.constant dense<0.000000e+00> : vector<32xf32>
    %894 = vector.multi_reduction <add>, %893, %cst_331 [0] : vector<2x32xf32> to vector<32xf32>
    %895 = vector.shape_cast %894 : vector<32xf32> to vector<1x32xf32>
    %cst_332 = arith.constant 2.000000e+00 : f32
    %896 = vector.broadcast %cst_332 : f32 to vector<1x32xf32>
    %897 = arith.divf %895, %896 : vector<1x32xf32>
    %c0_333 = arith.constant 0 : index
    %c0_334 = arith.constant 0 : index
    %898 = vector.load %arg58[%c0_333, %c0_334] : memref<32x4xf32, #tpu.memory_space<vmem>>, vector<32x4xf32>
    %cst_335 = arith.constant dense<0.000000e+00> : vector<1x4xf32>
    %899 = tpu.matmul %892, %898, %cst_335 {dimension_numbers = #tpu.dot_dimension_numbers<[1], [0], [0], [1], [0, 0, 1, 1], [], []>} : vector<1x32xf32>, vector<32x4xf32>, vector<1x4xf32> -> vector<1x4xf32>
    %c0_336 = arith.constant 0 : index
    %c0_337 = arith.constant 0 : index
    %900 = vector.load %arg59[%c0_336, %c0_337] : memref<1x4xf32, #tpu.memory_space<vmem>>, vector<1x4xf32>
    %901 = arith.addf %899, %900 : vector<1x4xf32>
    %c0_338 = arith.constant 0 : index
    %c0_339 = arith.constant 0 : index
    %c0_340 = arith.constant 0 : index
    %902 = vector.load %arg63[%c0_338, %c0_339, %c0_340] : memref<1x1x4xf32, #tpu.memory_space<vmem>>, vector<1x1x4xf32>
    %903 = vector.shape_cast %902 : vector<1x1x4xf32> to vector<1x4xf32>
    %904 = vector.shape_cast %901 : vector<1x4xf32> to vector<1x1x4xf32>
    tpu.vector_store %arg63[%c0_338, %c0_339, %c0_340], %904 {strides = array<i32>} : memref<1x1x4xf32, #tpu.memory_space<vmem>>, vector<1x1x4xf32>,
    %cst_341 = arith.constant dense<0xFF800000> : vector<1xf32>
    %905 = vector.multi_reduction <maximumf>, %901, %cst_341 [1] : vector<1x4xf32> to vector<1xf32>
    %906 = vector.shape_cast %905 : vector<1xf32> to vector<1x1xf32>
    %907 = vector.broadcast %906 : vector<1x1xf32> to vector<1x4xf32>
    %908 = arith.subf %901, %907 : vector<1x4xf32>
    %909 = math.exp %908 : vector<1x4xf32>
    %cst_342 = arith.constant dense<0.000000e+00> : vector<1xf32>
    %910 = vector.multi_reduction <add>, %909, %cst_342 [1] : vector<1x4xf32> to vector<1xf32>
    %911 = vector.shape_cast %910 : vector<1xf32> to vector<1x1xf32>
    %912 = vector.broadcast %911 : vector<1x1xf32> to vector<1x4xf32>
    %913 = arith.divf %909, %912 : vector<1x4xf32>
    %c0_343 = arith.constant 0 : index
    %c0_344 = arith.constant 0 : index
    %914 = vector.load %arg60[%c0_343, %c0_344] : memref<32x4xf32, #tpu.memory_space<vmem>>, vector<32x4xf32>
    %cst_345 = arith.constant dense<0.000000e+00> : vector<1x4xf32>
    %915 = tpu.matmul %897, %914, %cst_345 {dimension_numbers = #tpu.dot_dimension_numbers<[1], [0], [0], [1], [0, 0, 1, 1], [], []>} : vector<1x32xf32>, vector<32x4xf32>, vector<1x4xf32> -> vector<1x4xf32>
    %c0_346 = arith.constant 0 : index
    %c0_347 = arith.constant 0 : index
    %916 = vector.load %arg61[%c0_346, %c0_347] : memref<1x4xf32, #tpu.memory_space<vmem>>, vector<1x4xf32>
    %917 = arith.addf %915, %916 : vector<1x4xf32>
    %c0_348 = arith.constant 0 : index
    %c0_349 = arith.constant 0 : index
    %918 = vector.load %arg62[%c0_348, %c0_349] : memref<1x4xf32, #tpu.memory_space<vmem>>, vector<1x4xf32>
    %919 = arith.addf %917, %918 : vector<1x4xf32>
    %920 = arith.mulf %919, %913 : vector<1x4xf32>
    %cst_350 = arith.constant dense<0.000000e+00> : vector<1xf32>
    %921 = vector.multi_reduction <add>, %920, %cst_350 [1] : vector<1x4xf32> to vector<1xf32>
    %922 = vector.shape_cast %921 : vector<1xf32> to vector<1x1xf32>
    %c0_351 = arith.constant 0 : index
    %c0_352 = arith.constant 0 : index
    %c0_353 = arith.constant 0 : index
    %923 = vector.load %arg64[%c0_351, %c0_352, %c0_353] : memref<1x1x1xf32, #tpu.memory_space<vmem>>, vector<1x1x1xf32>
    %924 = vector.shape_cast %923 : vector<1x1x1xf32> to vector<1x1xf32>
    %925 = vector.shape_cast %922 : vector<1x1xf32> to vector<1x1x1xf32>
    tpu.vector_store %arg64[%c0_351, %c0_352, %c0_353], %925 {strides = array<i32>} : memref<1x1x1xf32, #tpu.memory_space<vmem>>, vector<1x1x1xf32>,
    return
  }
  func.func @transform_0(%arg0: i32) -> (i32, i32, i32) {
    %c0_i32 = arith.constant 0 : i32
    %c0_i32_0 = arith.constant 0 : i32
    %c0_i32_1 = arith.constant 0 : i32
    return %arg0, %c0_i32, %c0_i32_0 : i32, i32, i32
  }
  func.func @transform_1(%arg0: i32) -> (i32, i32) {
    %c0_i32 = arith.constant 0 : i32
    %c0_i32_0 = arith.constant 0 : i32
    %c0_i32_1 = arith.constant 0 : i32
    return %c0_i32, %c0_i32_0 : i32, i32
  }
  func.func @transform_2(%arg0: i32) -> (i32, i32) {
    %c0_i32 = arith.constant 0 : i32
    %c0_i32_0 = arith.constant 0 : i32
    %c0_i32_1 = arith.constant 0 : i32
    return %c0_i32, %c0_i32_0 : i32, i32
  }
  func.func @transform_3(%arg0: i32) -> (i32, i32) {
    %c0_i32 = arith.constant 0 : i32
    %c0_i32_0 = arith.constant 0 : i32
    %c0_i32_1 = arith.constant 0 : i32
    return %c0_i32, %c0_i32_0 : i32, i32
  }
  func.func @transform_4(%arg0: i32) -> (i32, i32) {
    %c0_i32 = arith.constant 0 : i32
    %c0_i32_0 = arith.constant 0 : i32
    %c0_i32_1 = arith.constant 0 : i32
    return %c0_i32, %c0_i32_0 : i32, i32
  }
  func.func @transform_5(%arg0: i32) -> (i32, i32) {
    %c0_i32 = arith.constant 0 : i32
    %c0_i32_0 = arith.constant 0 : i32
    %c0_i32_1 = arith.constant 0 : i32
    return %c0_i32, %c0_i32_0 : i32, i32
  }
  func.func @transform_6(%arg0: i32) -> (i32, i32) {
    %c0_i32 = arith.constant 0 : i32
    %c0_i32_0 = arith.constant 0 : i32
    %c0_i32_1 = arith.constant 0 : i32
    return %c0_i32, %c0_i32_0 : i32, i32
  }
  func.func @transform_7(%arg0: i32) -> (i32, i32) {
    %c0_i32 = arith.constant 0 : i32
    %c0_i32_0 = arith.constant 0 : i32
    %c0_i32_1 = arith.constant 0 : i32
    return %c0_i32, %c0_i32_0 : i32, i32
  }
  func.func @transform_8(%arg0: i32) -> (i32, i32) {
    %c0_i32 = arith.constant 0 : i32
    %c0_i32_0 = arith.constant 0 : i32
    %c0_i32_1 = arith.constant 0 : i32
    return %c0_i32, %c0_i32_0 : i32, i32
  }
  func.func @transform_9(%arg0: i32) -> (i32, i32) {
    %c0_i32 = arith.constant 0 : i32
    %c0_i32_0 = arith.constant 0 : i32
    %c0_i32_1 = arith.constant 0 : i32
    return %c0_i32, %c0_i32_0 : i32, i32
  }
  func.func @transform_10(%arg0: i32) -> (i32, i32) {
    %c0_i32 = arith.constant 0 : i32
    %c0_i32_0 = arith.constant 0 : i32
    %c0_i32_1 = arith.constant 0 : i32
    return %c0_i32, %c0_i32_0 : i32, i32
  }
  func.func @transform_11(%arg0: i32) -> (i32, i32) {
    %c0_i32 = arith.constant 0 : i32
    %c0_i32_0 = arith.constant 0 : i32
    %c0_i32_1 = arith.constant 0 : i32
    return %c0_i32, %c0_i32_0 : i32, i32
  }
  func.func @transform_12(%arg0: i32) -> (i32, i32) {
    %c0_i32 = arith.constant 0 : i32
    %c0_i32_0 = arith.constant 0 : i32
    %c0_i32_1 = arith.constant 0 : i32
    return %c0_i32, %c0_i32_0 : i32, i32
  }
  func.func @transform_13(%arg0: i32) -> (i32, i32) {
    %c0_i32 = arith.constant 0 : i32
    %c0_i32_0 = arith.constant 0 : i32
    %c0_i32_1 = arith.constant 0 : i32
    return %c0_i32, %c0_i32_0 : i32, i32
  }
  func.func @transform_14(%arg0: i32) -> (i32, i32) {
    %c0_i32 = arith.constant 0 : i32
    %c0_i32_0 = arith.constant 0 : i32
    %c0_i32_1 = arith.constant 0 : i32
    return %c0_i32, %c0_i32_0 : i32, i32
  }
  func.func @transform_15(%arg0: i32) -> (i32, i32) {
    %c0_i32 = arith.constant 0 : i32
    %c0_i32_0 = arith.constant 0 : i32
    %c0_i32_1 = arith.constant 0 : i32
    return %c0_i32, %c0_i32_0 : i32, i32
  }
  func.func @transform_16(%arg0: i32) -> (i32, i32) {
    %c0_i32 = arith.constant 0 : i32
    %c0_i32_0 = arith.constant 0 : i32
    %c0_i32_1 = arith.constant 0 : i32
    return %c0_i32, %c0_i32_0 : i32, i32
  }
  func.func @transform_17(%arg0: i32) -> (i32, i32) {
    %c0_i32 = arith.constant 0 : i32
    %c0_i32_0 = arith.constant 0 : i32
    %c0_i32_1 = arith.constant 0 : i32
    return %c0_i32, %c0_i32_0 : i32, i32
  }
  func.func @transform_18(%arg0: i32) -> (i32, i32) {
    %c0_i32 = arith.constant 0 : i32
    %c0_i32_0 = arith.constant 0 : i32
    %c0_i32_1 = arith.constant 0 : i32
    return %c0_i32, %c0_i32_0 : i32, i32
  }
  func.func @transform_19(%arg0: i32) -> (i32, i32) {
    %c0_i32 = arith.constant 0 : i32
    %c0_i32_0 = arith.constant 0 : i32
    %c0_i32_1 = arith.constant 0 : i32
    return %c0_i32, %c0_i32_0 : i32, i32
  }
  func.func @transform_20(%arg0: i32) -> (i32, i32) {
    %c0_i32 = arith.constant 0 : i32
    %c0_i32_0 = arith.constant 0 : i32
    %c0_i32_1 = arith.constant 0 : i32
    return %c0_i32, %c0_i32_0 : i32, i32
  }
  func.func @transform_21(%arg0: i32) -> (i32, i32) {
    %c0_i32 = arith.constant 0 : i32
    %c0_i32_0 = arith.constant 0 : i32
    %c0_i32_1 = arith.constant 0 : i32
    return %c0_i32, %c0_i32_0 : i32, i32
  }
  func.func @transform_22(%arg0: i32) -> (i32, i32) {
    %c0_i32 = arith.constant 0 : i32
    %c0_i32_0 = arith.constant 0 : i32
    %c0_i32_1 = arith.constant 0 : i32
    return %c0_i32, %c0_i32_0 : i32, i32
  }
  func.func @transform_23(%arg0: i32) -> (i32, i32) {
    %c0_i32 = arith.constant 0 : i32
    %c0_i32_0 = arith.constant 0 : i32
    %c0_i32_1 = arith.constant 0 : i32
    return %c0_i32, %c0_i32_0 : i32, i32
  }
  func.func @transform_24(%arg0: i32) -> (i32, i32) {
    %c0_i32 = arith.constant 0 : i32
    %c0_i32_0 = arith.constant 0 : i32
    %c0_i32_1 = arith.constant 0 : i32
    return %c0_i32, %c0_i32_0 : i32, i32
  }
  func.func @transform_25(%arg0: i32) -> (i32, i32) {
    %c0_i32 = arith.constant 0 : i32
    %c0_i32_0 = arith.constant 0 : i32
    %c0_i32_1 = arith.constant 0 : i32
    return %c0_i32, %c0_i32_0 : i32, i32
  }
  func.func @transform_26(%arg0: i32) -> (i32, i32) {
    %c0_i32 = arith.constant 0 : i32
    %c0_i32_0 = arith.constant 0 : i32
    %c0_i32_1 = arith.constant 0 : i32
    return %c0_i32, %c0_i32_0 : i32, i32
  }
  func.func @transform_27(%arg0: i32) -> (i32, i32) {
    %c0_i32 = arith.constant 0 : i32
    %c0_i32_0 = arith.constant 0 : i32
    %c0_i32_1 = arith.constant 0 : i32
    return %c0_i32, %c0_i32_0 : i32, i32
  }
  func.func @transform_28(%arg0: i32) -> (i32, i32) {
    %c0_i32 = arith.constant 0 : i32
    %c0_i32_0 = arith.constant 0 : i32
    %c0_i32_1 = arith.constant 0 : i32
    return %c0_i32, %c0_i32_0 : i32, i32
  }
  func.func @transform_29(%arg0: i32) -> (i32, i32) {
    %c0_i32 = arith.constant 0 : i32
    %c0_i32_0 = arith.constant 0 : i32
    %c0_i32_1 = arith.constant 0 : i32
    return %c0_i32, %c0_i32_0 : i32, i32
  }
  func.func @transform_30(%arg0: i32) -> (i32, i32) {
    %c0_i32 = arith.constant 0 : i32
    %c0_i32_0 = arith.constant 0 : i32
    %c0_i32_1 = arith.constant 0 : i32
    return %c0_i32, %c0_i32_0 : i32, i32
  }
  func.func @transform_31(%arg0: i32) -> (i32, i32) {
    %c0_i32 = arith.constant 0 : i32
    %c0_i32_0 = arith.constant 0 : i32
    %c0_i32_1 = arith.constant 0 : i32
    return %c0_i32, %c0_i32_0 : i32, i32
  }
  func.func @transform_32(%arg0: i32) -> (i32, i32) {
    %c0_i32 = arith.constant 0 : i32
    %c0_i32_0 = arith.constant 0 : i32
    %c0_i32_1 = arith.constant 0 : i32
    return %c0_i32, %c0_i32_0 : i32, i32
  }
  func.func @transform_33(%arg0: i32) -> (i32, i32) {
    %c0_i32 = arith.constant 0 : i32
    %c0_i32_0 = arith.constant 0 : i32
    %c0_i32_1 = arith.constant 0 : i32
    return %c0_i32, %c0_i32_0 : i32, i32
  }
  func.func @transform_34(%arg0: i32) -> (i32, i32) {
    %c0_i32 = arith.constant 0 : i32
    %c0_i32_0 = arith.constant 0 : i32
    %c0_i32_1 = arith.constant 0 : i32
    return %c0_i32, %c0_i32_0 : i32, i32
  }
  func.func @transform_35(%arg0: i32) -> (i32, i32) {
    %c0_i32 = arith.constant 0 : i32
    %c0_i32_0 = arith.constant 0 : i32
    %c0_i32_1 = arith.constant 0 : i32
    return %c0_i32, %c0_i32_0 : i32, i32
  }
  func.func @transform_36(%arg0: i32) -> (i32, i32) {
    %c0_i32 = arith.constant 0 : i32
    %c0_i32_0 = arith.constant 0 : i32
    %c0_i32_1 = arith.constant 0 : i32
    return %c0_i32, %c0_i32_0 : i32, i32
  }
  func.func @transform_37(%arg0: i32) -> (i32, i32) {
    %c0_i32 = arith.constant 0 : i32
    %c0_i32_0 = arith.constant 0 : i32
    %c0_i32_1 = arith.constant 0 : i32
    return %c0_i32, %c0_i32_0 : i32, i32
  }
  func.func @transform_38(%arg0: i32) -> (i32, i32) {
    %c0_i32 = arith.constant 0 : i32
    %c0_i32_0 = arith.constant 0 : i32
    %c0_i32_1 = arith.constant 0 : i32
    return %c0_i32, %c0_i32_0 : i32, i32
  }
  func.func @transform_39(%arg0: i32) -> (i32, i32) {
    %c0_i32 = arith.constant 0 : i32
    %c0_i32_0 = arith.constant 0 : i32
    %c0_i32_1 = arith.constant 0 : i32
    return %c0_i32, %c0_i32_0 : i32, i32
  }
  func.func @transform_40(%arg0: i32) -> (i32, i32) {
    %c0_i32 = arith.constant 0 : i32
    %c0_i32_0 = arith.constant 0 : i32
    %c0_i32_1 = arith.constant 0 : i32
    return %c0_i32, %c0_i32_0 : i32, i32
  }
  func.func @transform_41(%arg0: i32) -> (i32, i32) {
    %c0_i32 = arith.constant 0 : i32
    %c0_i32_0 = arith.constant 0 : i32
    %c0_i32_1 = arith.constant 0 : i32
    return %c0_i32, %c0_i32_0 : i32, i32
  }
  func.func @transform_42(%arg0: i32) -> (i32, i32) {
    %c0_i32 = arith.constant 0 : i32
    %c0_i32_0 = arith.constant 0 : i32
    %c0_i32_1 = arith.constant 0 : i32
    return %c0_i32, %c0_i32_0 : i32, i32
  }
  func.func @transform_43(%arg0: i32) -> (i32, i32) {
    %c0_i32 = arith.constant 0 : i32
    %c0_i32_0 = arith.constant 0 : i32
    %c0_i32_1 = arith.constant 0 : i32
    return %c0_i32, %c0_i32_0 : i32, i32
  }
  func.func @transform_44(%arg0: i32) -> (i32, i32) {
    %c0_i32 = arith.constant 0 : i32
    %c0_i32_0 = arith.constant 0 : i32
    %c0_i32_1 = arith.constant 0 : i32
    return %c0_i32, %c0_i32_0 : i32, i32
  }
  func.func @transform_45(%arg0: i32) -> (i32, i32) {
    %c0_i32 = arith.constant 0 : i32
    %c0_i32_0 = arith.constant 0 : i32
    %c0_i32_1 = arith.constant 0 : i32
    return %c0_i32, %c0_i32_0 : i32, i32
  }
  func.func @transform_46(%arg0: i32) -> (i32, i32) {
    %c0_i32 = arith.constant 0 : i32
    %c0_i32_0 = arith.constant 0 : i32
    %c0_i32_1 = arith.constant 0 : i32
    return %c0_i32, %c0_i32_0 : i32, i32
  }
  func.func @transform_47(%arg0: i32) -> (i32, i32) {
    %c0_i32 = arith.constant 0 : i32
    %c0_i32_0 = arith.constant 0 : i32
    %c0_i32_1 = arith.constant 0 : i32
    return %c0_i32, %c0_i32_0 : i32, i32
  }
  func.func @transform_48(%arg0: i32) -> (i32, i32) {
    %c0_i32 = arith.constant 0 : i32
    %c0_i32_0 = arith.constant 0 : i32
    %c0_i32_1 = arith.constant 0 : i32
    return %c0_i32, %c0_i32_0 : i32, i32
  }
  func.func @transform_49(%arg0: i32) -> (i32, i32) {
    %c0_i32 = arith.constant 0 : i32
    %c0_i32_0 = arith.constant 0 : i32
    %c0_i32_1 = arith.constant 0 : i32
    return %c0_i32, %c0_i32_0 : i32, i32
  }
  func.func @transform_50(%arg0: i32) -> (i32, i32) {
    %c0_i32 = arith.constant 0 : i32
    %c0_i32_0 = arith.constant 0 : i32
    %c0_i32_1 = arith.constant 0 : i32
    return %c0_i32, %c0_i32_0 : i32, i32
  }
  func.func @transform_51(%arg0: i32) -> (i32, i32) {
    %c0_i32 = arith.constant 0 : i32
    %c0_i32_0 = arith.constant 0 : i32
    %c0_i32_1 = arith.constant 0 : i32
    return %c0_i32, %c0_i32_0 : i32, i32
  }
  func.func @transform_52(%arg0: i32) -> (i32, i32) {
    %c0_i32 = arith.constant 0 : i32
    %c0_i32_0 = arith.constant 0 : i32
    %c0_i32_1 = arith.constant 0 : i32
    return %c0_i32, %c0_i32_0 : i32, i32
  }
  func.func @transform_53(%arg0: i32) -> (i32, i32) {
    %c0_i32 = arith.constant 0 : i32
    %c0_i32_0 = arith.constant 0 : i32
    %c0_i32_1 = arith.constant 0 : i32
    return %c0_i32, %c0_i32_0 : i32, i32
  }
  func.func @transform_54(%arg0: i32) -> (i32, i32) {
    %c0_i32 = arith.constant 0 : i32
    %c0_i32_0 = arith.constant 0 : i32
    %c0_i32_1 = arith.constant 0 : i32
    return %c0_i32, %c0_i32_0 : i32, i32
  }
  func.func @transform_55(%arg0: i32) -> (i32, i32) {
    %c0_i32 = arith.constant 0 : i32
    %c0_i32_0 = arith.constant 0 : i32
    %c0_i32_1 = arith.constant 0 : i32
    return %c0_i32, %c0_i32_0 : i32, i32
  }
  func.func @transform_56(%arg0: i32) -> (i32, i32) {
    %c0_i32 = arith.constant 0 : i32
    %c0_i32_0 = arith.constant 0 : i32
    %c0_i32_1 = arith.constant 0 : i32
    return %c0_i32, %c0_i32_0 : i32, i32
  }
  func.func @transform_57(%arg0: i32) -> (i32, i32) {
    %c0_i32 = arith.constant 0 : i32
    %c0_i32_0 = arith.constant 0 : i32
    %c0_i32_1 = arith.constant 0 : i32
    return %c0_i32, %c0_i32_0 : i32, i32
  }
  func.func @transform_58(%arg0: i32) -> (i32, i32) {
    %c0_i32 = arith.constant 0 : i32
    %c0_i32_0 = arith.constant 0 : i32
    %c0_i32_1 = arith.constant 0 : i32
    return %c0_i32, %c0_i32_0 : i32, i32
  }
  func.func @transform_59(%arg0: i32) -> (i32, i32) {
    %c0_i32 = arith.constant 0 : i32
    %c0_i32_0 = arith.constant 0 : i32
    %c0_i32_1 = arith.constant 0 : i32
    return %c0_i32, %c0_i32_0 : i32, i32
  }
  func.func @transform_60(%arg0: i32) -> (i32, i32) {
    %c0_i32 = arith.constant 0 : i32
    %c0_i32_0 = arith.constant 0 : i32
    %c0_i32_1 = arith.constant 0 : i32
    return %c0_i32, %c0_i32_0 : i32, i32
  }
  func.func @transform_61(%arg0: i32) -> (i32, i32) {
    %c0_i32 = arith.constant 0 : i32
    %c0_i32_0 = arith.constant 0 : i32
    %c0_i32_1 = arith.constant 0 : i32
    return %c0_i32, %c0_i32_0 : i32, i32
  }
  func.func @transform_62(%arg0: i32) -> (i32, i32, i32) {
    %c0_i32 = arith.constant 0 : i32
    %c0_i32_0 = arith.constant 0 : i32
    %c0_i32_1 = arith.constant 0 : i32
    return %arg0, %c0_i32, %c0_i32_0 : i32, i32, i32
  }
  func.func @transform_63(%arg0: i32) -> (i32, i32, i32) {
    %c0_i32 = arith.constant 0 : i32
    %c0_i32_0 = arith.constant 0 : i32
    %c0_i32_1 = arith.constant 0 : i32
    return %arg0, %c0_i32, %c0_i32_0 : i32, i32, i32
  }
}

</mosaic_0001>

<bundles_post_ra>
// kernel: actual_transformer_forward.1
= control target key start
LH: loop header
LB: loop body
LE: loop exit
PB: predicated region body
PF: predicated region fallthrough
CT: control target
= control target key end

     0   :  { %s13419_s6 = smov 1   ;;  %s13420_s10 = smov 2   ;;  %s15119_s0 = inlined_call_operand.smem [shape: u32[64], index: -1, kind: input, shape index: {}] }
   0x1   :  { %s13541_s5 = sld [smem:[%s15119_s0]]   ;;  %s13421_s14 = smov 3  }
   0x2   :  { %s13546_s9 = sld [smem:[%s15119_s0 + %s13419_s6]]   ;;  %s13422_s18 = smov 4  }
   0x3   :  { %s13551_s13 = sld [smem:[%s15119_s0 + %s13420_s10]]   ;;  %s13423_s22 = smov 5  }
   0x4   :  { %s13556_s17 = sld [smem:[%s15119_s0 + %s13421_s14]]   ;;  %s13424_s26 = smov 6  }
   0x5   :  { %s13561_s21 = sld [smem:[%s15119_s0 + %s13422_s18]]   ;;  %s13425_s30 = smov 7  }
   0x6   :  { %s13566_s25 = sld [smem:[%s15119_s0 + %s13423_s22]]   ;;  %s13426_s4 = smov 8  }
   0x7   :  { %15179 = sst [smem:[#allocation76_spill]] %s13541_s5  ;;  %s13427_s10 = smov 9  }
   0x8   :  { %15180 = sst [smem:[#allocation77_spill]] %s13546_s9  ;;  %s13428_s15 = smov 10  }
   0x9   :  { %15181 = sst [smem:[#allocation78_spill]] %s13551_s13  ;;  %s13429_s20 = smov 11  }
   0xa   :  { %15182 = sst [smem:[#allocation79_spill]] %s13556_s17  ;;  %s13431_s1 = smov 13  }
   0xb   :  { %15183 = sst [smem:[#allocation80_spill]] %s13561_s21  ;;  %s13432_s7 = smov 14  }
   0xc   :  { %15184 = sst [smem:[#allocation81_spill]] %s13566_s25  ;;  %s13434_s22 = smov 16  }
   0xd   :  { %s13571_s29 = sld [smem:[%s15119_s0 + %s13424_s26]]   ;;  %s13430_s26 = smov 12  }
   0xe   :  { %s13576_s3 = sld [smem:[%s15119_s0 + %s13425_s30]]   ;;  %s13435_s28 = smov 17  }
   0xf   :  { %s13581_s8 = sld [smem:[%s15119_s0 + %s13426_s4]]  }
  0x10   :  { %s13586_s14 = sld [smem:[%s15119_s0 + %s13427_s10]]  }
  0x11   :  { %s13591_s19 = sld [smem:[%s15119_s0 + %s13428_s15]]   ;;  %s13433_s15 = smov 15  }
  0x12   :  { %s13596_s24 = sld [smem:[%s15119_s0 + %s13429_s20]]  }
  0x13   :  { %s13601_s30 = sld [smem:[%s15119_s0 + %s13430_s26]]  }
  0x14   :  { %15185 = sst [smem:[#allocation82_spill]] %s13576_s3 }
  0x15   :  { %15186 = sst [smem:[#allocation83_spill]] %s13581_s8 }
  0x16   :  { %15187 = sst [smem:[#allocation84_spill]] %s13586_s14 }
  0x17   :  { %s13606_s6 = sld [smem:[%s15119_s0 + %s13431_s1]]  }
  0x18   :  { %15188 = sst [smem:[#allocation85_spill]] %s13596_s24 }
  0x19   :  { %15189 = sst [smem:[#allocation86_spill]] %s13601_s30 }
  0x1a   :  { %s13611_s12 = sld [smem:[%s15119_s0 + %s13432_s7]]   ;;  %s13436_s7 = smov 18  }
  0x1b   :  { %s13616_s20 = sld [smem:[%s15119_s0 + %s13433_s15]]   ;;  %s13437_s15 = smov 19  }
  0x1c   :  { %s13621_s27 = sld [smem:[%s15119_s0 + %s13434_s22]]   ;;  %s13438_s22 = smov 20  }
  0x1d   :  { %15190 = sst [smem:[#allocation87_spill]] %s13606_s6 }
  0x1e   :  { %s13626_s4 = sld [smem:[%s15119_s0 + %s13435_s28]]   ;;  %s13439_s28 = smov 21  }
  0x20   :  { %15191 = sst [smem:[#allocation88_spill]] %s13611_s12 }
  0x21   :  { %15192 = sst [smem:[#allocation89_spill]] %s13616_s20 }
  0x22   :  { %15193 = sst [smem:[#allocation90_spill]] %s13621_s27 }
  0x23   :  { %s13631_s12 = sld [smem:[%s15119_s0 + %s13436_s7]]   ;;  %s13440_s7 = smov 22  }
  0x24   :  { %15194 = sst [smem:[#allocation91_spill]] %s13626_s4 }
  0x25   :  { %s13636_s20 = sld [smem:[%s15119_s0 + %s13437_s15]]   ;;  %s13441_s15 = smov 23  }
  0x26   :  { %s13641_s27 = sld [smem:[%s15119_s0 + %s13438_s22]]   ;;  %s13442_s22 = smov 24  }
  0x27   :  { %s13646_s4 = sld [smem:[%s15119_s0 + %s13439_s28]]   ;;  %s13443_s28 = smov 25  }
  0x29   :  { %15195 = sst [smem:[#allocation92_spill]] %s13631_s12 }
  0x2a   :  { %s13651_s12 = sld [smem:[%s15119_s0 + %s13440_s7]]   ;;  %s13444_s7 = smov 26  }
  0x2b   :  { %15196 = sst [smem:[#allocation93_spill]] %s13636_s20 }
  0x2c   :  { %15197 = sst [smem:[#allocation94_spill]] %s13641_s27 }
  0x2d   :  { %15198 = sst [smem:[#allocation95_spill]] %s13646_s4 }
  0x2e   :  { %s13656_s20 = sld [smem:[%s15119_s0 + %s13441_s15]]   ;;  %s13445_s15 = smov 27  }
  0x2f   :  { %s13661_s27 = sld [smem:[%s15119_s0 + %s13442_s22]]   ;;  %s13446_s22 = smov 28  }
  0x30   :  { %15199 = sst [smem:[#allocation96_spill]] %s13651_s12 }
  0x31   :  { %s13666_s4 = sld [smem:[%s15119_s0 + %s13443_s28]]   ;;  %s13447_s28 = smov 29  }
  0x32   :  { %s13671_s12 = sld [smem:[%s15119_s0 + %s13444_s7]]   ;;  %s13448_s7 = smov 30  }
  0x33   :  { %s13691_s6 = sld [smem:[%s15119_s0 + %s13448_s7]]   ;;  %s13452_s7 = smov 34  }
  0x34   :  { %15200 = sst [smem:[#allocation97_spill]] %s13656_s20 }
  0x35   :  { %15201 = sst [smem:[#allocation98_spill]] %s13661_s27 }
  0x36   :  { %s13676_s20 = sld [smem:[%s15119_s0 + %s13445_s15]]   ;;  %s13449_s15 = smov 31  }
  0x37   :  { %15202 = sst [smem:[#allocation99_spill]] %s13666_s4 }
  0x38   :  { %s13681_s27 = sld [smem:[%s15119_s0 + %s13446_s22]]   ;;  %s13450_s22 = smov 32  }
  0x39   :  { %s13686_s4 = sld [smem:[%s15119_s0 + %s13447_s28]]   ;;  %s13451_s28 = smov 33  }
  0x3a   :  { %15206 = sst [smem:[#allocation103_spill]] %s13691_s6 }
  0x3b   :  { %s13701_s24 = sld [smem:[%s15119_s0 + %s13450_s22]]   ;;  %s13454_s22 = smov 36  }
  0x3c   :  { %15203 = sst [smem:[#allocation100_spill]] %s13676_s20 }
  0x3d   :  { %s13696_s20 = sld [smem:[%s15119_s0 + %s13449_s15]]   ;;  %s13453_s15 = smov 35  }
  0x3e   :  { %15204 = sst [smem:[#allocation101_spill]] %s13681_s27 }
  0x3f   :  { %15205 = sst [smem:[#allocation102_spill]] %s13686_s4 }
  0x40   :  { %s13706_s4 = sld [smem:[%s15119_s0 + %s13451_s28]]   ;;  %s13455_s28 = smov 37  }
  0x41   :  { %s13711_s14 = sld [smem:[%s15119_s0 + %s13452_s7]]   ;;  %s13456_s7 = smov 38  }
  0x42   :  { %s13716_s3 = sld [smem:[%s15119_s0 + %s13453_s15]]   ;;  %s13457_s15 = smov 39  }
  0x43   :  { %15207 = sst [smem:[#allocation104_spill]] %s13696_s20 }
  0x44   :  { %s13721_s25 = sld [smem:[%s15119_s0 + %s13454_s22]]   ;;  %s13458_s22 = smov 40  }
  0x45   :  { %s13731_s17 = sld [smem:[%s15119_s0 + %s13456_s7]]   ;;  %s13460_s7 = smov 42  }
  0x46   :  { %15208 = sst [smem:[#allocation105_spill]] %s13706_s4 }
  0x47   :  { %15209 = sst [smem:[#allocation106_spill]] %s13711_s14 }
  0x48   :  { %15210 = sst [smem:[#allocation107_spill]] %s13716_s3 }
  0x49   :  { %s13726_s4 = sld [smem:[%s15119_s0 + %s13455_s28]]   ;;  %s13459_s28 = smov 41  }
  0x4a   :  { %15211 = sst [smem:[#allocation108_spill]] %s13721_s25 }
  0x4b   :  { %15213 = sst [smem:[#allocation110_spill]] %s13731_s17 }
  0x4c   :  { %s13736_s5 = sld [smem:[%s15119_s0 + %s13457_s15]]   ;;  %s13461_s15 = smov 43  }
  0x4d   :  { %s13741_s25 = sld [smem:[%s15119_s0 + %s13458_s22]]   ;;  %s13462_s22 = smov 44  }
  0x4e   :  { %s13746_s14 = sld [smem:[%s15119_s0 + %s13459_s28]]   ;;  %s13463_s28 = smov 45  }
  0x4f   :  { %15212 = sst [smem:[#allocation109_spill]] %s13726_s4 }
  0x50   :  { %s13751_s17 = sld [smem:[%s15119_s0 + %s13460_s7]]   ;;  %s13464_s7 = smov 46  }
  0x51   :  { %s13756_s20 = sld [smem:[%s15119_s0 + %s13461_s15]]   ;;  %s13465_s15 = smov 47  }
  0x52   :  { %15214 = sst [smem:[#allocation111_spill]] %s13736_s5 }
  0x53   :  { %15215 = sst [smem:[#allocation112_spill]] %s13741_s25 }
  0x54   :  { %s13761_s25 = sld [smem:[%s15119_s0 + %s13462_s22]]   ;;  %s13466_s22 = smov 48  }
  0x55   :  { %s13766_s27 = sld [smem:[%s15119_s0 + %s13463_s28]]   ;;  %s13467_s28 = smov 49  }
  0x56   :  { %15216 = sst [smem:[#allocation113_spill]] %s13751_s17 }
  0x57   :  { %s13771_s17 = sld [smem:[%s15119_s0 + %s13464_s7]]   ;;  %s13468_s7 = smov 50  }
  0x58   :  { %s13776_s30 = sld [smem:[%s15119_s0 + %s13465_s15]]   ;;  %s13469_s15 = smov 51  }
  0x59   :  { %s13786_s8 = sld [smem:[%s15119_s0 + %s13467_s28]]   ;;  %s13471_s28 = smov 53  }
  0x5a   :  { %15217 = sst [smem:[#allocation114_spill]] %s13761_s25 }
  0x5b   :  { %s13781_s25 = sld [smem:[%s15119_s0 + %s13466_s22]]   ;;  %s13470_s22 = smov 52  }
  0x5c   :  { %s13796_s21 = sld [smem:[%s15119_s0 + %s13469_s15]]   ;;  %s13473_s15 = smov 55  }
  0x5d   :  { %15218 = sst [smem:[#allocation115_spill]] %s13771_s17 }
  0x5e   :  { %s13791_s17 = sld [smem:[%s15119_s0 + %s13468_s7]]   ;;  %s13472_s7 = smov 54  }
  0x5f   :  { %15220 = sst [smem:[#allocation117_spill]] %s13786_s8 }
  0x60   :  { %s13806_s8 = sld [smem:[%s15119_s0 + %s13471_s28]]   ;;  %s13475_s28 = smov 57  }
  0x61   :  { %15219 = sst [smem:[#allocation116_spill]] %s13781_s25 }
  0x62   :  { %15221 = sst [smem:[#allocation118_spill]] %s13796_s21 }
  0x63   :  { %s13801_s25 = sld [smem:[%s15119_s0 + %s13470_s22]]   ;;  %s13474_s22 = smov 56  }
  0x64   :  { %s13811_s9 = sld [smem:[%s15119_s0 + %s13472_s7]]   ;;  %s13476_s7 = smov 58  }
  0x65   :  { %s13816_s21 = sld [smem:[%s15119_s0 + %s13473_s15]]   ;;  %s13477_s15 = smov 59  }
  0x66   :  { %15223 = sst [smem:[#allocation120_spill]] %s13806_s8 }
  0x67   :  { %s13826_s8 = sld [smem:[%s15119_s0 + %s13475_s28]]   ;;  %s13479_s28 = smov 61  }
  0x69   :  { %15222 = sst [smem:[#allocation119_spill]] %s13801_s25 }
  0x6a   :  { %15224 = sst [smem:[#allocation121_spill]] %s13811_s9 }
  0x6b   :  { %15225 = sst [smem:[#allocation122_spill]] %s13816_s21 }
  0x6c   :  { %s13821_s25 = sld [smem:[%s15119_s0 + %s13474_s22]]   ;;  %s13478_s22 = smov 60  }
  0x6d   :  { %15227 = sst [smem:[#allocation124_spill]] %s13826_s8 }
  0x6e   :  { %s13831_s9 = sld [smem:[%s15119_s0 + %s13476_s7]]   ;;  %s13480_s7 = smov 62  }
  0x6f   :  { %s13836_s21 = sld [smem:[%s15119_s0 + %s13477_s15]]   ;;  %s13481_s15 = smov 63  }
  0x70   :  { %s13846_s8 = sld [smem:[%s15119_s0 + %s13479_s28]]  }
  0x72   :  { %15226 = sst [smem:[#allocation123_spill]] %s13821_s25 }
  0x73   :  { %s13841_s25 = sld [smem:[%s15119_s0 + %s13478_s22]]  }
  0x74   :  { %15228 = sst [smem:[#allocation125_spill]] %s13831_s9 }
  0x75   :  { %15229 = sst [smem:[#allocation126_spill]] %s13836_s21 }
  0x76   :  { %15230 = sst [smem:[#allocation127_spill]] %s13846_s8 }
  0x77   :  { %s13851_s9 = sld [smem:[%s15119_s0 + %s13480_s7]]  }
  0x78   :  { %s13856_s21 = sld [smem:[%s15119_s0 + %s13481_s15]]  }
  0x79   :  { %133 = vsyncpa [#allocation3], 0 }
  0x7a   :  { %134 = vsyncpa [#allocation6], 0 }
  0x7b   :  { %135 = vsyncpa [#allocation9], 0 }
  0x7c   :  { %136 = vsyncpa [#allocation12], 0 }
  0x7d   :  { %137 = vsyncpa [#allocation15], 0 }
  0x7e   :  { %138 = vsyncpa [#allocation18], 0 }
  0x7f   :  { %139 = vsyncpa [#allocation21], 0 }
  0x80   :  { %140 = vsyncpa [#allocation24], 0 }
  0x81   :  { %141 = vsyncpa [#allocation27], 0 }
  0x82   :  { %142 = vsyncpa [#allocation30], 0 }
  0x83   :  { %143 = vsyncpa [#allocation33], 0 }
  0x84   :  { %144 = vsyncpa [#allocation36], 0 }
  0x85   :  { %145 = vsyncpa [#allocation39], 0 }
  0x86   :  { %146 = vsyncpa [#allocation42], 0 }
  0x87   :  { %147 = vsyncpa [#allocation45], 0 }
  0x88   :  { %148 = vsyncpa [#allocation48], 0 }
  0x89   :  { %149 = vsyncpa [#allocation51], 0 }
  0x8a   :  { %150 = vsyncpa [#allocation54], 0 }
  0x8b   :  { %151 = vsyncpa [#allocation4], 0 }
  0x8c   :  { %153 = vsyncpa [#allocation4 + $0x1], 0  ;;  %s13858_s0 = smov 0   ;;  %s13860_s22 = smov 0  }
  0x8d   :  { %s13862_s23 = smov 0   ;;  %s13864_s26 = smov 0  }
  0x8e LB: > { %15231 = sst [smem:[#allocation128_spill]] %s13405_s0  ;;  %s13879_s28 = sadd.s32 4294967295, %s13417_s26   ;;  %s13417_s26 = sphi %s13864_s26, %s15312_s26   ;;  %s13413_s23 = sphi %s13862_s23, %s15314_s23   ;;  %s13409_s22 = sphi %s13860_s22, %s15316_s22   ;;  %s13405_s0 = sphi %s13858_s0, %s15315_s0  }
  0x8f   : > { %15232 = sst [smem:[#allocation129_spill]] %s13413_s23  ;;  %s10855_s1 = sadd.s32 4294967294, %s13417_s26  }
  0x90   : > { %s13883_s2 = sadd.s32 1, %s13417_s26   ;;  %s1473_s7 = sadd.s32 1, %s13413_s23 }
  0x91   : > { %15233 = sst [smem:[#allocation130_spill]] %s13883_s2  ;;  %s1470_s10 = ssub.s32 %s13417_s26, %s13883_s2 }
  0x92   : > { %p1483_p0 = scmp.ne.s32.totalorder %s13413_s23, %s13409_s22  ;;  %p1471_p1 = scmp.eq.s32.totalorder %s1470_s10, 0 }
  0x93   : > { %p1484_p2 = scmp.eq.s32.totalorder %s13879_s28, 1  ;;  %p1489_p3 = scmp.ne.s32.totalorder %s13409_s22, %s13405_s0 }
  0x94   : > { %p1490_p4 = scmp.eq.s32.totalorder %s10855_s1, 1  ;;  %p10856_p7 = scmp.ge.s32.totalorder %s13417_s26, 1 }
  0x95   : > { %s13894_s11 = scalar_select %p1471_p1, %s13413_s23, %s1473_s7  }
  0x96   : > { %p13896_p5 = por %p1484_p2, %p1483_p0  ;;  %p13900_p6 = por %p1490_p4, %p1489_p3 }
  0x97   : > { %15234 = sst [smem:[#allocation131_spill]] %s13894_s11  ;;  %p1523_p8 = scmp.lt.s32.totalorder %s13417_s26, 3 }
  0x98   : > { %s15235_s15 = scalar_select %p13896_p5, 1, 0 }
  0x99   : > { %s15236_s16 = scalar_select %p13900_p6, 1, 0 }
  0x9a   : > { %p13906_p9 = pnand %p10856_p7, %p1523_p8 }
  0x9b   : > { %15237 = sst [smem:[#allocation132_spill]] %s15236_s16  ;;  %p12102_p10 = scmp.eq.s32.totalorder (!%p13906_p9), %s13879_s28, 0 }
  0x9c   : > { %1527 = sbr.rel (%p13906_p9) target bundleno = 561 (0x231), region = 12  ;;  %s13482_s1 = smov (!%p13906_p9), [#allocation5]  }
  0x9d   : > { %s1547_s7 = sshll.u32 (!%p13906_p9), %s13482_s1, 4  ;;  %s13483_s10 = smov (!%p13906_p9), [#allocation8]   ;;  %s1548_s7 = int_to_ptr.vmem [resolvable:$true] %s1547_s7 }
  0x9e   : > { %s1575_s11 = sshll.u32 (!%p13906_p9), %s13483_s10, 4  ;;  %s12455_s23 = scalar_lea.vmem (!%p13906_p9), %s1548_s7, 16  ;;  %s1576_s11 = int_to_ptr.vmem [resolvable:$true] %s1575_s11 }
  0x9f   : > { %p12456_p11 = scmp.ne.s32.totalorder (!%p13906_p9), %s1548_s7, %s12455_s23  ;;  %s12461_s2 = scalar_lea.vmem (!%p13906_p9), %s1548_s7, 32 }
  0xa0   : > { %p12462_p0 = scmp.lt.s32.totalorder (!%p13906_p9), %s1548_s7, %s1548_s7  ;;  %p12463_p1 = scmp.lt.s32.totalorder (!%p13906_p9), %s12461_s2, %s12455_s23 }
  0xa1   : > { %p12457_p12 = pnand %p12456_p11, %p12102_p10 }
  0xa2   : > { %p12464_p2 = por %p12463_p1, %p12462_p0 }
  0xa3   : > { %p12458_p13 = pneg %p12457_p12 }
  0xa5   : > { %p12465_p3 = pnand %p12464_p2, %p12458_p13 }
  0xa7   : > { %12468 = shalt.err (!%p12465_p3)
}
  0xa8   : > { %s15239_s13 = sld [smem:[#allocation78_spill]]  ;;  %s12479_s1 = scalar_lea.vmem %s1576_s11, 16 }
  0xa9   : > { %p12480_p4 = scmp.ne.s32.totalorder %s1576_s11, %s12479_s1  ;;  %s12485_s10 = scalar_lea.vmem %s1576_s11, 32 }
  0xaa   : > { %p12486_p11 = scmp.lt.s32.totalorder %s1576_s11, %s1576_s11  ;;  %p12487_p12 = scmp.lt.s32.totalorder %s12485_s10, %s12479_s1 }
  0xab   : > { %p12481_p7 = pnand %p12480_p4, %p12102_p10 }
  0xac   : > { %p12488_p6 = por %p12487_p12, %p12486_p11 }
  0xad   : > { %p12482_p8 = pneg %p12481_p7 }
  0xae   : > { %11959 = dma.hbm_to_vmem [thread:$0]  (%p12102_p10), %s15239_s13, 16, %s1548_s7, [#allocation6]  }
  0xaf   : > { %p12489_p5 = pnand %p12488_p6, %p12482_p8 }
  0xb1   : > { %12492 = shalt.err (!%p12489_p5)
}
  0xb2   : > { %11963 = dma.hbm_to_vmem [thread:$0]  (%p12102_p10), %s13571_s29, 16, %s1576_s11, [#allocation9]  }
  0xb3   : > { %s13484_s23 = smov [#allocation11]   ;;  %s13485_s7 = smov [#allocation14]  }
  0xb4   : > { %s1603_s2 = sshll.u32 %s13484_s23, 4  ;;  %s1667_s13 = sshll.u32 %s13485_s7, 4  ;;  %s1604_s2 = int_to_ptr.vmem [resolvable:$true] %s1603_s2  ;;  %s1668_s13 = int_to_ptr.vmem [resolvable:$true] %s1667_s13 }
  0xb5   : > { %s12503_s16 = scalar_lea.vmem %s1604_s2, 16  ;;  %s12509_s0 = scalar_lea.vmem %s1604_s2, 32 }
  0xb6   : > { %p12504_p13 = scmp.ne.s32.totalorder %s1604_s2, %s12503_s16  ;;  %p12510_p2 = scmp.lt.s32.totalorder %s1604_s2, %s1604_s2 }
  0xb7   : > { %p12511_p3 = scmp.lt.s32.totalorder %s12509_s0, %s12503_s16 }
  0xb8   : > { %p12505_p0 = pnand %p12504_p13, %p12102_p10 }
  0xb9   : > { %p12512_p6 = por %p12511_p3, %p12510_p2 }
  0xba   : > { %p12506_p1 = pneg %p12505_p0 }
  0xbc   : > { %p12513_p5 = pnand %p12512_p6, %p12506_p1 }
  0xbe   : > { %12516 = shalt.err (!%p12513_p5)
}
  0xbf   : > { %11967 = dma.hbm_to_vmem [thread:$0]  (%p12102_p10), %s13591_s19, 16, %s1604_s2, [#allocation12]  }
  0xc0   : > { %s12527_s11 = scalar_lea.vmem %s1668_s13, 16  ;;  %s12533_s1 = scalar_lea.vmem %s1668_s13, 32 }
  0xc1   : > { %p12528_p4 = scmp.ne.s32.totalorder %s1668_s13, %s12527_s11  ;;  %p12534_p11 = scmp.lt.s32.totalorder %s1668_s13, %s1668_s13 }
  0xc2   : > { %p12535_p12 = scmp.lt.s32.totalorder %s12533_s1, %s12527_s11 }
  0xc3   : > { %p12529_p7 = pnand %p12528_p4, %p12102_p10 }
  0xc4   : > { %p12536_p13 = por %p12535_p12, %p12534_p11 }
  0xc5   : > { %p12530_p8 = pneg %p12529_p7 }
  0xc7   : > { %p12537_p0 = pnand %p12536_p13, %p12530_p8 }
  0xc9   : > { %12540 = shalt.err (!%p12537_p0)
}
  0xca   : > { %11971 = dma.hbm_to_vmem [thread:$0]  (%p12102_p10), %s13671_s12, 16, %s1668_s13, [#allocation15]  }
  0xcb   : > { %s13486_s0 = smov [#allocation17]   ;;  %s13487_s10 = smov [#allocation20]  }
  0xcc   : > { %s1695_s16 = sshll.u32 %s13486_s0, 4  ;;  %s1719_s23 = sshll.u32 %s13487_s10, 4  ;;  %s1696_s16 = int_to_ptr.vmem [resolvable:$true] %s1695_s16  ;;  %s1720_s23 = int_to_ptr.vmem [resolvable:$true] %s1719_s23 }
  0xcd   : > { %s12551_s2 = scalar_lea.vmem %s1696_s16, 16  ;;  %s12557_s7 = scalar_lea.vmem %s1696_s16, 32 }
  0xce   : > { %p12552_p1 = scmp.ne.s32.totalorder %s1696_s16, %s12551_s2  ;;  %p12558_p6 = scmp.lt.s32.totalorder %s1696_s16, %s1696_s16 }
  0xcf   : > { %p12559_p5 = scmp.lt.s32.totalorder %s12557_s7, %s12551_s2 }
  0xd0   : > { %p12553_p2 = pnand %p12552_p1, %p12102_p10 }
  0xd1   : > { %p12560_p4 = por %p12559_p5, %p12558_p6 }
  0xd2   : > { %p12554_p3 = pneg %p12553_p2 }
  0xd4   : > { %p12561_p7 = pnand %p12560_p4, %p12554_p3 }
  0xd6   : > { %12564 = shalt.err (!%p12561_p7)
}
  0xd7   : > { %s15240_s6 = sld [smem:[#allocation103_spill]]  ;;  %s12575_s13 = scalar_lea.vmem %s1720_s23, 16 }
  0xd8   : > { %p12576_p8 = scmp.ne.s32.totalorder %s1720_s23, %s12575_s13  ;;  %s12581_s11 = scalar_lea.vmem %s1720_s23, 32 }
  0xd9   : > { %p12582_p13 = scmp.lt.s32.totalorder %s1720_s23, %s1720_s23  ;;  %p12583_p0 = scmp.lt.s32.totalorder %s12581_s11, %s12575_s13 }
  0xda   : > { %p12577_p11 = pnand %p12576_p8, %p12102_p10 }
  0xdb   : > { %p12584_p1 = por %p12583_p0, %p12582_p13 }
  0xdc   : > { %p12578_p12 = pneg %p12577_p11 }
  0xdd   : > { %11975 = dma.hbm_to_vmem [thread:$0]  (%p12102_p10), %s15240_s6, 16, %s1696_s16, [#allocation18]  }
  0xde   : > { %p12585_p2 = pnand %p12584_p1, %p12578_p12 }
  0xe0   : > { %12588 = shalt.err (!%p12585_p2)
}
  0xe1   : > { %11979 = dma.hbm_to_vmem [thread:$0]  (%p12102_p10), %s13701_s24, 16, %s1720_s23, [#allocation21]  }
  0xe2   : > { %s13488_s1 = smov [#allocation23]   ;;  %s13489_s16 = smov [#allocation26]  }
  0xe3   : > { %s1743_s0 = sshll.u32 %s13488_s1, 4  ;;  %s1768_s10 = sshll.u32 %s13489_s16, 4  ;;  %s1744_s0 = int_to_ptr.vmem [resolvable:$true] %s1743_s0  ;;  %s1769_s10 = int_to_ptr.vmem [resolvable:$true] %s1768_s10 }
  0xe4   : > { %s12599_s2 = scalar_lea.vmem %s1744_s0, 512  ;;  %p12606_p4 = scmp.lt.s32.totalorder %s1744_s0, %s1744_s0 }
  0xe5   : > { %p12600_p3 = scmp.ne.s32.totalorder %s1744_s0, %s12599_s2  ;;  %p12607_p7 = scmp.lt.s32.totalorder %s12599_s2, %s12599_s2 }
  0xe7   : > { %p12601_p6 = pnand %p12600_p3, %p12102_p10  ;;  %p12608_p8 = por %p12607_p7, %p12606_p4 }
  0xe9   : > { %p12602_p5 = pneg %p12601_p6 }
  0xeb   : > { %p12609_p11 = pnand %p12608_p8, %p12602_p5 }
  0xed   : > { %12612 = shalt.err (!%p12609_p11)
}
  0xee   : > { %s15143_s7 = smov 128   ;;  %s15241_s3 = sld [smem:[#allocation107_spill]] }
  0xef   : > { %s15145_s23 = smov 8   ;;  %s12623_s13 = scalar_lea.vmem %s1769_s10, 32 }
  0xf0   : > { %p12624_p12 = scmp.ne.s32.totalorder %s1769_s10, %s12623_s13  ;;  %p12630_p1 = scmp.lt.s32.totalorder %s1769_s10, %s1769_s10 }
  0xf1   : > { %p12631_p2 = scmp.lt.s32.totalorder %s12623_s13, %s12623_s13 }
  0xf2   : > { %p12625_p13 = pnand %p12624_p12, %p12102_p10 }
  0xf3   : > { %p12632_p3 = por %p12631_p2, %p12630_p1 }
  0xf4   : > { %11983 = dma.hbm_to_vmem [thread:$0]  (%p12102_p10), %s15241_s3, 512, %s1744_s0, [#allocation24], %s15143_s7, %s15143_s7, %s15145_s23  }
  0xf5   : > { %p12626_p0 = pneg %p12625_p13 }
  0xf7   : > { %p12633_p6 = pnand %p12632_p3, %p12626_p0 }
  0xf9   : > { %12636 = shalt.err (!%p12633_p6)
}
  0xfa   : > { %s15242_s4 = sld [smem:[#allocation109_spill]]  ;;  %s13492_s11 = smov [#allocation29]  }
  0xfb   : > { %s1790_s1 = sshll.u32 %s13492_s11, 4  ;;  %s13493_s0 = smov [#allocation32]   ;;  %s1791_s1 = int_to_ptr.vmem [resolvable:$true] %s1790_s1 }
  0xfc   : > { %s1814_s16 = sshll.u32 %s13493_s0, 4  ;;  %s12647_s2 = scalar_lea.vmem %s1791_s1, 32  ;;  %s1815_s16 = int_to_ptr.vmem [resolvable:$true] %s1814_s16 }
  0xfd   : > { %p12648_p5 = scmp.ne.s32.totalorder %s1791_s1, %s12647_s2  ;;  %p12654_p8 = scmp.lt.s32.totalorder %s1791_s1, %s1791_s1 }
  0xfe   : > { %p12655_p11 = scmp.lt.s32.totalorder %s12647_s2, %s12647_s2 }
  0xff   : > { %p12649_p4 = pnand %p12648_p5, %p12102_p10 }
 0x100   : > { %11987 = dma.hbm_to_vmem [thread:$0]  (%p12102_p10), %s15242_s4, 32, %s1769_s10, [#allocation27]  }
 0x101   : > { %p12650_p7 = pneg %p12649_p4  ;;  %p12656_p12 = por %p12655_p11, %p12654_p8 }
 0x103   : > { %p12657_p13 = pnand %p12656_p12, %p12650_p7 }
 0x105   : > { %12660 = shalt.err (!%p12657_p13)
}
 0x106   : > { %s15243_s5 = sld [smem:[#allocation111_spill]]  ;;  %s12671_s10 = scalar_lea.vmem %s1815_s16, 16 }
 0x107   : > { %p12672_p0 = scmp.ne.s32.totalorder %s1815_s16, %s12671_s10  ;;  %s12677_s13 = scalar_lea.vmem %s1815_s16, 32 }
 0x108   : > { %p12678_p3 = scmp.lt.s32.totalorder %s1815_s16, %s1815_s16  ;;  %p12679_p6 = scmp.lt.s32.totalorder %s12677_s13, %s12671_s10 }
 0x109   : > { %p12673_p1 = pnand %p12672_p0, %p12102_p10 }
 0x10a   : > { %p12680_p5 = por %p12679_p6, %p12678_p3 }
 0x10b   : > { %p12674_p2 = pneg %p12673_p1 }
 0x10c   : > { %11991 = dma.hbm_to_vmem [thread:$0]  (%p12102_p10), %s15243_s5, 32, %s1791_s1, [#allocation30]  }
 0x10d   : > { %p12681_p4 = pnand %p12680_p5, %p12674_p2 }
 0x10f   : > { %12684 = shalt.err (!%p12681_p4)
}
 0x110   : > { %11995 = dma.hbm_to_vmem [thread:$0]  (%p12102_p10), %s13746_s14, 16, %s1815_s16, [#allocation33]  }
 0x111   : > { %s13494_s11 = smov [#allocation35]   ;;  %s13495_s1 = smov [#allocation38]  }
 0x112   : > { %s1838_s0 = sshll.u32 %s13494_s11, 4  ;;  %s1862_s2 = sshll.u32 %s13495_s1, 4  ;;  %s1839_s0 = int_to_ptr.vmem [resolvable:$true] %s1838_s0  ;;  %s1863_s2 = int_to_ptr.vmem [resolvable:$true] %s1862_s2 }
 0x113   : > { %s12695_s7 = scalar_lea.vmem %s1839_s0, 16  ;;  %s12701_s23 = scalar_lea.vmem %s1839_s0, 32 }
 0x114   : > { %p12696_p7 = scmp.ne.s32.totalorder %s1839_s0, %s12695_s7  ;;  %p12702_p12 = scmp.lt.s32.totalorder %s1839_s0, %s1839_s0 }
 0x115   : > { %p12703_p13 = scmp.lt.s32.totalorder %s12701_s23, %s12695_s7 }
 0x116   : > { %p12697_p8 = pnand %p12696_p7, %p12102_p10 }
 0x117   : > { %p12704_p0 = por %p12703_p13, %p12702_p12 }
 0x118   : > { %p12698_p11 = pneg %p12697_p8 }
 0x11a   : > { %p12705_p1 = pnand %p12704_p0, %p12698_p11 }
 0x11c   : > { %12708 = shalt.err (!%p12705_p1)
}
 0x11d   : > { %11999 = dma.hbm_to_vmem [thread:$0]  (%p12102_p10), %s13756_s20, 16, %s1839_s0, [#allocation36]  }
 0x11e   : > { %s12719_s16 = scalar_lea.vmem %s1863_s2, 16  ;;  %s12725_s10 = scalar_lea.vmem %s1863_s2, 32 }
 0x11f   : > { %p12720_p2 = scmp.ne.s32.totalorder %s1863_s2, %s12719_s16  ;;  %p12726_p5 = scmp.lt.s32.totalorder %s1863_s2, %s1863_s2 }
 0x120   : > { %p12727_p4 = scmp.lt.s32.totalorder %s12725_s10, %s12719_s16 }
 0x121   : > { %p12721_p3 = pnand %p12720_p2, %p12102_p10 }
 0x122   : > { %p12728_p7 = por %p12727_p4, %p12726_p5 }
 0x123   : > { %p12722_p6 = pneg %p12721_p3 }
 0x125   : > { %p12729_p8 = pnand %p12728_p7, %p12722_p6 }
 0x127   : > { %12732 = shalt.err (!%p12729_p8)
}
 0x128   : > { %12003 = dma.hbm_to_vmem [thread:$0]  (%p12102_p10), %s13766_s27, 16, %s1863_s2, [#allocation39]  }
 0x129   : > { %s13496_s7 = smov [#allocation41]   ;;  %s13497_s13 = smov [#allocation44]  }
 0x12a   : > { %s1886_s23 = sshll.u32 %s13496_s7, 4  ;;  %s1910_s11 = sshll.u32 %s13497_s13, 4  ;;  %s1887_s23 = int_to_ptr.vmem [resolvable:$true] %s1886_s23  ;;  %s1911_s11 = int_to_ptr.vmem [resolvable:$true] %s1910_s11 }
 0x12b   : > { %s12743_s0 = scalar_lea.vmem %s1887_s23, 16  ;;  %s12749_s1 = scalar_lea.vmem %s1887_s23, 32 }
 0x12c   : > { %p12744_p11 = scmp.ne.s32.totalorder %s1887_s23, %s12743_s0  ;;  %p12750_p0 = scmp.lt.s32.totalorder %s1887_s23, %s1887_s23 }
 0x12d   : > { %p12751_p1 = scmp.lt.s32.totalorder %s12749_s1, %s12743_s0 }
 0x12e   : > { %p12745_p12 = pnand %p12744_p11, %p12102_p10 }
 0x12f   : > { %p12752_p2 = por %p12751_p1, %p12750_p0 }
 0x130   : > { %p12746_p13 = pneg %p12745_p12 }
 0x132   : > { %p12753_p3 = pnand %p12752_p2, %p12746_p13 }
 0x134   : > { %12756 = shalt.err (!%p12753_p3)
}
 0x135   : > { %12007 = dma.hbm_to_vmem [thread:$0]  (%p12102_p10), %s13776_s30, 16, %s1887_s23, [#allocation42]  }
 0x136   : > { %s12767_s2 = scalar_lea.vmem %s1911_s11, 512  ;;  %p12774_p7 = scmp.lt.s32.totalorder %s1911_s11, %s1911_s11 }
 0x137   : > { %p12768_p6 = scmp.ne.s32.totalorder %s1911_s11, %s12767_s2  ;;  %p12775_p8 = scmp.lt.s32.totalorder %s12767_s2, %s12767_s2 }
 0x139   : > { %p12769_p5 = pnand %p12768_p6, %p12102_p10  ;;  %p12776_p11 = por %p12775_p8, %p12774_p7 }
 0x13b   : > { %p12770_p4 = pneg %p12769_p5 }
 0x13d   : > { %p12777_p12 = pnand %p12776_p11, %p12770_p4 }
 0x13f   : > { %12780 = shalt.err (!%p12777_p12)
}
 0x140   : > { %s15244_s16 = smov 8   ;;  %s15245_s10 = smov 128  }
 0x141   : > { %12011 = dma.hbm_to_vmem [thread:$0]  (%p12102_p10), %s13791_s17, 512, %s1911_s11, [#allocation45], %s15245_s10, %s15245_s10, %s15244_s16  }
 0x142   : > { %s13498_s7 = smov [#allocation47]   ;;  %s13499_s13 = smov [#allocation50]  }
 0x143   : > { %s1935_s23 = sshll.u32 %s13498_s7, 4  ;;  %s1957_s0 = sshll.u32 %s13499_s13, 4  ;;  %s1936_s23 = int_to_ptr.vmem [resolvable:$true] %s1935_s23  ;;  %s1958_s0 = int_to_ptr.vmem [resolvable:$true] %s1957_s0 }
 0x144   : > { %s12791_s1 = scalar_lea.vmem %s1936_s23, 32  ;;  %p12798_p2 = scmp.lt.s32.totalorder %s1936_s23, %s1936_s23 }
 0x145   : > { %p12792_p13 = scmp.ne.s32.totalorder %s1936_s23, %s12791_s1  ;;  %p12799_p3 = scmp.lt.s32.totalorder %s12791_s1, %s12791_s1 }
 0x147   : > { %p12793_p0 = pnand %p12792_p13, %p12102_p10  ;;  %p12800_p6 = por %p12799_p3, %p12798_p2 }
 0x149   : > { %p12794_p1 = pneg %p12793_p0 }
 0x14b   : > { %p12801_p5 = pnand %p12800_p6, %p12794_p1 }
 0x14d   : > { %12804 = shalt.err (!%p12801_p5)
}
 0x14e   : > { %s15246_s2 = sld [smem:[#allocation119_spill]]  ;;  %s12815_s11 = scalar_lea.vmem %s1958_s0, 32 }
 0x14f   : > { %p12816_p4 = scmp.ne.s32.totalorder %s1958_s0, %s12815_s11  ;;  %p12822_p11 = scmp.lt.s32.totalorder %s1958_s0, %s1958_s0 }
 0x150   : > { %p12823_p12 = scmp.lt.s32.totalorder %s12815_s11, %s12815_s11 }
 0x151   : > { %p12817_p7 = pnand %p12816_p4, %p12102_p10 }
 0x152   : > { %p12824_p13 = por %p12823_p12, %p12822_p11 }
 0x153   : > { %p12818_p8 = pneg %p12817_p7 }
 0x154   : > { %12015 = dma.hbm_to_vmem [thread:$0]  (%p12102_p10), %s15246_s2, 32, %s1936_s23, [#allocation48]  }
 0x155   : > { %p12825_p0 = pnand %p12824_p13, %p12818_p8 }
 0x157   : > { %12828 = shalt.err (!%p12825_p0)
}
 0x158   : > { %s15247_s7 = sld [smem:[#allocation121_spill]]  ;;  %s13500_s13 = smov [#allocation53]  }
 0x159   : > { %s1985_s1 = sshll.u32 %s13500_s13, 4  ;;  %s1986_s1 = int_to_ptr.vmem [resolvable:$true] %s1985_s1 }
 0x15a   : > { %s12839_s23 = scalar_lea.vmem %s1986_s1, 16  ;;  %s12845_s2 = scalar_lea.vmem %s1986_s1, 32 }
 0x15b   : > { %p12840_p1 = scmp.ne.s32.totalorder %s1986_s1, %s12839_s23  ;;  %p12846_p6 = scmp.lt.s32.totalorder %s1986_s1, %s1986_s1 }
 0x15c   : > { %p12847_p5 = scmp.lt.s32.totalorder %s12845_s2, %s12839_s23 }
 0x15d   : > { %p12841_p2 = pnand %p12840_p1, %p12102_p10 }
 0x15e   : > { %12019 = dma.hbm_to_vmem [thread:$0]  (%p12102_p10), %s15247_s7, 32, %s1958_s0, [#allocation51]  }
 0x15f   : > { %p12842_p3 = pneg %p12841_p2  ;;  %p12848_p4 = por %p12847_p5, %p12846_p6 }
 0x161   : > { %p12849_p7 = pnand %p12848_p4, %p12842_p3 }
 0x163   : > { %12852 = shalt.err (!%p12849_p7)
}
 0x164   : > { %s15248_s11 = sld [smem:[#allocation125_spill]]  ;;  %s13501_s0 = smov [#allocation2]  }
 0x165   : > { %s1536_s7 = sshll.u32 %s13501_s0, 4  ;;  %s13502_s13 = smov [#allocation7]   ;;  %s1537_s7 = int_to_ptr.vmem [resolvable:$true] %s1536_s7 }
 0x166   : > { %s1561_s3 = sshll.u32 %s13502_s13, 4  ;;  %s12863_s4 = scalar_lea.vmem %s1537_s7, 64  ;;  %s1562_s3 = int_to_ptr.vmem [resolvable:$true] %s1561_s3 }
 0x167   : > { %p12864_p8 = scmp.ne.s32.totalorder %s1537_s7, %s12863_s4  ;;  %p12870_p13 = scmp.lt.s32.totalorder %s1537_s7, %s1537_s7 }
 0x168   : > { %p12871_p0 = scmp.lt.s32.totalorder %s12863_s4, %s12863_s4 }
 0x169   : > { %p12865_p11 = pnand %p12864_p8, %p12102_p10 }
 0x16a   : > { %12023 = dma.hbm_to_vmem [thread:$0]  (%p12102_p10), %s15248_s11, 16, %s1986_s1, [#allocation54]  }
 0x16b   : > { %p12866_p12 = pneg %p12865_p11  ;;  %p12872_p1 = por %p12871_p0, %p12870_p13 }
 0x16d   : > { %p12873_p2 = pnand %p12872_p1, %p12866_p12 }
 0x16f   : > { %12876 = shalt.err (!%p12873_p2)
}
 0x170   : > { %s15249_s23 = sld [smem:[#allocation77_spill]]  ;;  %s12887_s1 = scalar_lea.vmem %s1562_s3, 16 }
 0x171   : > { %p12888_p3 = scmp.ne.s32.totalorder %s1562_s3, %s12887_s1  ;;  %s12893_s2 = scalar_lea.vmem %s1562_s3, 32 }
 0x172   : > { %p12894_p4 = scmp.lt.s32.totalorder %s1562_s3, %s1562_s3  ;;  %p12895_p7 = scmp.lt.s32.totalorder %s12893_s2, %s12887_s1 }
 0x173   : > { %p12889_p6 = pnand %p12888_p3, %p12102_p10 }
 0x174   : > { %p12896_p8 = por %p12895_p7, %p12894_p4 }
 0x175   : > { %p12890_p5 = pneg %p12889_p6 }
 0x176   : > { %11957 = dma.hbm_to_vmem [thread:$0]  (%p12102_p10), %s15249_s23, 64, %s1537_s7, [#allocation3]  }
 0x177   : > { %p12897_p11 = pnand %p12896_p8, %p12890_p5 }
 0x179   : > { %12900 = shalt.err (!%p12897_p11)
}
 0x17a   : > { %s15250_s4 = sld [smem:[#allocation80_spill]]  ;;  %s13503_s11 = smov [#allocation10]  }
 0x17b   : > { %s1589_s0 = sshll.u32 %s13503_s11, 4  ;;  %s13504_s7 = smov [#allocation13]   ;;  %s1590_s0 = int_to_ptr.vmem [resolvable:$true] %s1589_s0 }
 0x17c   : > { %s1617_s13 = sshll.u32 %s13504_s7, 4  ;;  %s12911_s23 = scalar_lea.vmem %s1590_s0, 16  ;;  %s1618_s13 = int_to_ptr.vmem [resolvable:$true] %s1617_s13 }
 0x17d   : > { %p12912_p12 = scmp.ne.s32.totalorder %s1590_s0, %s12911_s23  ;;  %s12917_s5 = scalar_lea.vmem %s1590_s0, 32 }
 0x17e   : > { %p12918_p1 = scmp.lt.s32.totalorder %s1590_s0, %s1590_s0  ;;  %p12919_p2 = scmp.lt.s32.totalorder %s12917_s5, %s12911_s23 }
 0x17f   : > { %p12913_p13 = pnand %p12912_p12, %p12102_p10 }
 0x180   : > { %11961 = dma.hbm_to_vmem [thread:$0]  (%p12102_p10), %s15250_s4, 16, %s1562_s3, [#allocation6]  }
 0x181   : > { %p12914_p0 = pneg %p12913_p13  ;;  %p12920_p3 = por %p12919_p2, %p12918_p1 }
 0x183   : > { %p12921_p6 = pnand %p12920_p3, %p12914_p0 }
 0x185   : > { %12924 = shalt.err (!%p12921_p6)
}
 0x186   : > { %s15251_s1 = sld [smem:[#allocation83_spill]]  ;;  %s12935_s3 = scalar_lea.vmem %s1618_s13, 16 }
 0x187   : > { %p12936_p5 = scmp.ne.s32.totalorder %s1618_s13, %s12935_s3  ;;  %s12941_s2 = scalar_lea.vmem %s1618_s13, 32 }
 0x188   : > { %p12942_p8 = scmp.lt.s32.totalorder %s1618_s13, %s1618_s13  ;;  %p12943_p11 = scmp.lt.s32.totalorder %s12941_s2, %s12935_s3 }
 0x189   : > { %p12937_p4 = pnand %p12936_p5, %p12102_p10 }
 0x18a   : > { %p12944_p12 = por %p12943_p11, %p12942_p8 }
 0x18b   : > { %p12938_p7 = pneg %p12937_p4 }
 0x18c   : > { %11965 = dma.hbm_to_vmem [thread:$0]  (%p12102_p10), %s15251_s1, 16, %s1590_s0, [#allocation9]  }
 0x18d   : > { %p12945_p13 = pnand %p12944_p12, %p12938_p7 }
 0x18f   : > { %12948 = shalt.err (!%p12945_p13)
}
 0x190   : > { %s15252_s5 = sld [smem:[#allocation86_spill]]  ;;  %s13505_s4 = smov [#allocation16]  }
 0x191   : > { %s1681_s11 = sshll.u32 %s13505_s4, 4  ;;  %s13506_s0 = smov [#allocation19]   ;;  %s1682_s11 = int_to_ptr.vmem [resolvable:$true] %s1681_s11 }
 0x192   : > { %s1705_s7 = sshll.u32 %s13506_s0, 4  ;;  %s12959_s23 = scalar_lea.vmem %s1682_s11, 16  ;;  %s1706_s7 = int_to_ptr.vmem [resolvable:$true] %s1705_s7 }
 0x193   : > { %p12960_p0 = scmp.ne.s32.totalorder %s1682_s11, %s12959_s23  ;;  %s12965_s1 = scalar_lea.vmem %s1682_s11, 32 }
 0x194   : > { %p12966_p3 = scmp.lt.s32.totalorder %s1682_s11, %s1682_s11  ;;  %p12967_p6 = scmp.lt.s32.totalorder %s12965_s1, %s12959_s23 }
 0x195   : > { %p12961_p1 = pnand %p12960_p0, %p12102_p10 }
 0x196   : > { %11969 = dma.hbm_to_vmem [thread:$0]  (%p12102_p10), %s15252_s5, 16, %s1618_s13, [#allocation12]  }
 0x197   : > { %p12962_p2 = pneg %p12961_p1  ;;  %p12968_p5 = por %p12967_p6, %p12966_p3 }
 0x199   : > { %p12969_p4 = pnand %p12968_p5, %p12962_p2 }
 0x19b   : > { %12972 = shalt.err (!%p12969_p4)
}
 0x19c   : > { %s15253_s3 = sld [smem:[#allocation101_spill]]  ;;  %s12983_s13 = scalar_lea.vmem %s1706_s7, 512 }
 0x19d   : > { %p12984_p7 = scmp.ne.s32.totalorder %s1706_s7, %s12983_s13  ;;  %p12990_p12 = scmp.lt.s32.totalorder %s1706_s7, %s1706_s7 }
 0x19e   : > { %p12991_p13 = scmp.lt.s32.totalorder %s12983_s13, %s12983_s13 }
 0x19f   : > { %p12985_p8 = pnand %p12984_p7, %p12102_p10 }
 0x1a0   : > { %p12992_p0 = por %p12991_p13, %p12990_p12 }
 0x1a1   : > { %p12986_p11 = pneg %p12985_p8 }
 0x1a2   : > { %11973 = dma.hbm_to_vmem [thread:$0]  (%p12102_p10), %s15253_s3, 16, %s1682_s11, [#allocation15]  }
 0x1a3   : > { %p12993_p1 = pnand %p12992_p0, %p12986_p11 }
 0x1a5   : > { %12996 = shalt.err (!%p12993_p1)
}
 0x1a6   : > { %s15254_s2 = sld [smem:[#allocation104_spill]]  ;;  %s13507_s5 = smov [#allocation22]  }
 0x1a7   : > { %s1733_s4 = sshll.u32 %s13507_s5, 4  ;;  %s13508_s11 = smov [#allocation25]   ;;  %s1734_s4 = int_to_ptr.vmem [resolvable:$true] %s1733_s4 }
 0x1a8   : > { %s1757_s0 = sshll.u32 %s13508_s11, 4  ;;  %s13007_s23 = scalar_lea.vmem %s1734_s4, 16  ;;  %s1758_s0 = int_to_ptr.vmem [resolvable:$true] %s1757_s0 }
 0x1a9   : > { %p13008_p2 = scmp.ne.s32.totalorder %s1734_s4, %s13007_s23  ;;  %s13013_s1 = scalar_lea.vmem %s1734_s4, 32 }
 0x1aa   : > { %p13014_p5 = scmp.lt.s32.totalorder %s1734_s4, %s1734_s4  ;;  %p13015_p4 = scmp.lt.s32.totalorder %s13013_s1, %s13007_s23 }
 0x1ab   : > { %p13009_p3 = pnand %p13008_p2, %p12102_p10 }
 0x1ac   : > { %11977 = dma.hbm_to_vmem [thread:$0]  (%p12102_p10), %s15254_s2, 512, %s1706_s7, [#allocation18], %s15245_s10, %s15245_s10, %s15244_s16  }
 0x1ad   : > { %p13010_p6 = pneg %p13009_p3  ;;  %p13016_p7 = por %p13015_p4, %p13014_p5 }
 0x1af   : > { %p13017_p8 = pnand %p13016_p7, %p13010_p6 }
 0x1b1   : > { %13020 = shalt.err (!%p13017_p8)
}
 0x1b2   : > { %s15255_s3 = sld [smem:[#allocation106_spill]]  ;;  %s13031_s7 = scalar_lea.vmem %s1758_s0, 16 }
 0x1b3   : > { %p13032_p11 = scmp.ne.s32.totalorder %s1758_s0, %s13031_s7  ;;  %s13037_s13 = scalar_lea.vmem %s1758_s0, 32 }
 0x1b4   : > { %p13038_p0 = scmp.lt.s32.totalorder %s1758_s0, %s1758_s0  ;;  %p13039_p1 = scmp.lt.s32.totalorder %s13037_s13, %s13031_s7 }
 0x1b5   : > { %p13033_p12 = pnand %p13032_p11, %p12102_p10 }
 0x1b6   : > { %p13040_p2 = por %p13039_p1, %p13038_p0 }
 0x1b7   : > { %p13034_p13 = pneg %p13033_p12 }
 0x1b8   : > { %11981 = dma.hbm_to_vmem [thread:$0]  (%p12102_p10), %s15255_s3, 16, %s1734_s4, [#allocation21]  }
 0x1b9   : > { %p13041_p3 = pnand %p13040_p2, %p13034_p13 }
 0x1bb   : > { %13044 = shalt.err (!%p13041_p3)
}
 0x1bc   : > { %s15256_s2 = sld [smem:[#allocation108_spill]]  ;;  %s13509_s5 = smov [#allocation28]  }
 0x1bd   : > { %s1779_s11 = sshll.u32 %s13509_s5, 4  ;;  %s13510_s4 = smov [#allocation31]   ;;  %s1780_s11 = int_to_ptr.vmem [resolvable:$true] %s1779_s11 }
 0x1be   : > { %s1800_s23 = sshll.u32 %s13510_s4, 4  ;;  %s13055_s1 = scalar_lea.vmem %s1780_s11, 32  ;;  %s1801_s23 = int_to_ptr.vmem [resolvable:$true] %s1800_s23 }
 0x1bf   : > { %p13056_p6 = scmp.ne.s32.totalorder %s1780_s11, %s13055_s1  ;;  %p13062_p7 = scmp.lt.s32.totalorder %s1780_s11, %s1780_s11 }
 0x1c0   : > { %p13063_p8 = scmp.lt.s32.totalorder %s13055_s1, %s13055_s1 }
 0x1c1   : > { %p13057_p5 = pnand %p13056_p6, %p12102_p10 }
 0x1c2   : > { %11985 = dma.hbm_to_vmem [thread:$0]  (%p12102_p10), %s15256_s2, 16, %s1758_s0, [#allocation24]  }
 0x1c3   : > { %p13058_p4 = pneg %p13057_p5  ;;  %p13064_p11 = por %p13063_p8, %p13062_p7 }
 0x1c5   : > { %p13065_p12 = pnand %p13064_p11, %p13058_p4 }
 0x1c7   : > { %13068 = shalt.err (!%p13065_p12)
}
 0x1c8   : > { %s15257_s3 = sld [smem:[#allocation110_spill]]  ;;  %s13079_s0 = scalar_lea.vmem %s1801_s23, 512 }
 0x1c9   : > { %p13080_p13 = scmp.ne.s32.totalorder %s1801_s23, %s13079_s0  ;;  %p13086_p2 = scmp.lt.s32.totalorder %s1801_s23, %s1801_s23 }
 0x1ca   : > { %p13087_p3 = scmp.lt.s32.totalorder %s13079_s0, %s13079_s0 }
 0x1cb   : > { %p13081_p0 = pnand %p13080_p13, %p12102_p10 }
 0x1cc   : > { %p13088_p6 = por %p13087_p3, %p13086_p2 }
 0x1cd   : > { %p13082_p1 = pneg %p13081_p0 }
 0x1ce   : > { %11989 = dma.hbm_to_vmem [thread:$0]  (%p12102_p10), %s15257_s3, 32, %s1780_s11, [#allocation27]  }
 0x1cf   : > { %p13089_p5 = pnand %p13088_p6, %p13082_p1 }
 0x1d1   : > { %13092 = shalt.err (!%p13089_p5)
}
 0x1d2   : > { %s15258_s7 = sld [smem:[#allocation112_spill]]  ;;  %s13511_s13 = smov [#allocation34]  }
 0x1d3   : > { %s1824_s2 = sshll.u32 %s13511_s13, 4  ;;  %s13512_s5 = smov [#allocation37]   ;;  %s1825_s2 = int_to_ptr.vmem [resolvable:$true] %s1824_s2 }
 0x1d4   : > { %s1848_s11 = sshll.u32 %s13512_s5, 4  ;;  %s13103_s4 = scalar_lea.vmem %s1825_s2, 512  ;;  %s1849_s11 = int_to_ptr.vmem [resolvable:$true] %s1848_s11 }
 0x1d5   : > { %p13104_p4 = scmp.ne.s32.totalorder %s1825_s2, %s13103_s4  ;;  %p13110_p11 = scmp.lt.s32.totalorder %s1825_s2, %s1825_s2 }
 0x1d6   : > { %p13111_p12 = scmp.lt.s32.totalorder %s13103_s4, %s13103_s4 }
 0x1d7   : > { %p13105_p7 = pnand %p13104_p4, %p12102_p10 }
 0x1d8   : > { %11993 = dma.hbm_to_vmem [thread:$0]  (%p12102_p10), %s15258_s7, 512, %s1801_s23, [#allocation30], %s15245_s10, %s15245_s10, %s15244_s16  }
 0x1d9   : > { %p13106_p8 = pneg %p13105_p7  ;;  %p13112_p13 = por %p13111_p12, %p13110_p11 }
 0x1db   : > { %p13113_p0 = pnand %p13112_p13, %p13106_p8 }
 0x1dd   : > { %13116 = shalt.err (!%p13113_p0)
}
 0x1de   : > { %s15259_s23 = sld [smem:[#allocation113_spill]]  ;;  %s13127_s1 = scalar_lea.vmem %s1849_s11, 512 }
 0x1df   : > { %p13128_p1 = scmp.ne.s32.totalorder %s1849_s11, %s13127_s1  ;;  %p13134_p6 = scmp.lt.s32.totalorder %s1849_s11, %s1849_s11 }
 0x1e0   : > { %p13135_p5 = scmp.lt.s32.totalorder %s13127_s1, %s13127_s1 }
 0x1e1   : > { %p13129_p2 = pnand %p13128_p1, %p12102_p10 }
 0x1e2   : > { %p13136_p4 = por %p13135_p5, %p13134_p6 }
 0x1e3   : > { %p13130_p3 = pneg %p13129_p2 }
 0x1e4   : > { %11997 = dma.hbm_to_vmem [thread:$0]  (%p12102_p10), %s15259_s23, 512, %s1825_s2, [#allocation33], %s15245_s10, %s15245_s10, %s15244_s16  }
 0x1e5   : > { %p13137_p7 = pnand %p13136_p4, %p13130_p3 }
 0x1e7   : > { %13140 = shalt.err (!%p13137_p7)
}
 0x1e8   : > { %s15260_s3 = sld [smem:[#allocation114_spill]]  ;;  %s13513_s0 = smov [#allocation40]  }
 0x1e9   : > { %s1872_s7 = sshll.u32 %s13513_s0, 4  ;;  %s13514_s13 = smov [#allocation43]   ;;  %s1873_s7 = int_to_ptr.vmem [resolvable:$true] %s1872_s7 }
 0x1ea   : > { %s1900_s2 = sshll.u32 %s13514_s13, 4  ;;  %s13151_s5 = scalar_lea.vmem %s1873_s7, 512  ;;  %s1901_s2 = int_to_ptr.vmem [resolvable:$true] %s1900_s2 }
 0x1eb   : > { %p13152_p8 = scmp.ne.s32.totalorder %s1873_s7, %s13151_s5  ;;  %p13158_p13 = scmp.lt.s32.totalorder %s1873_s7, %s1873_s7 }
 0x1ec   : > { %p13159_p0 = scmp.lt.s32.totalorder %s13151_s5, %s13151_s5 }
 0x1ed   : > { %p13153_p11 = pnand %p13152_p8, %p12102_p10 }
 0x1ee   : > { %12001 = dma.hbm_to_vmem [thread:$0]  (%p12102_p10), %s15260_s3, 512, %s1849_s11, [#allocation36], %s15245_s10, %s15245_s10, %s15244_s16  }
 0x1ef   : > { %p13154_p12 = pneg %p13153_p11  ;;  %p13160_p1 = por %p13159_p0, %p13158_p13 }
 0x1f1   : > { %p13161_p2 = pnand %p13160_p1, %p13154_p12 }
 0x1f3   : > { %13164 = shalt.err (!%p13161_p2)
}
 0x1f4   : > { %s15261_s11 = sld [smem:[#allocation115_spill]]  ;;  %s13175_s4 = scalar_lea.vmem %s1901_s2, 16 }
 0x1f5   : > { %p13176_p3 = scmp.ne.s32.totalorder %s1901_s2, %s13175_s4  ;;  %s13181_s23 = scalar_lea.vmem %s1901_s2, 32 }
 0x1f6   : > { %p13182_p4 = scmp.lt.s32.totalorder %s1901_s2, %s1901_s2  ;;  %p13183_p7 = scmp.lt.s32.totalorder %s13181_s23, %s13175_s4 }
 0x1f7   : > { %p13177_p6 = pnand %p13176_p3, %p12102_p10 }
 0x1f8   : > { %p13184_p8 = por %p13183_p7, %p13182_p4 }
 0x1f9   : > { %p13178_p5 = pneg %p13177_p6 }
 0x1fa   : > { %12005 = dma.hbm_to_vmem [thread:$0]  (%p12102_p10), %s15261_s11, 512, %s1873_s7, [#allocation39], %s15245_s10, %s15245_s10, %s15244_s16  }
 0x1fb   : > { %p13185_p11 = pnand %p13184_p8, %p13178_p5 }
 0x1fd   : > { %13188 = shalt.err (!%p13185_p11)
}
 0x1fe   : > { %s15262_s1 = sld [smem:[#allocation117_spill]]  ;;  %s13515_s3 = smov [#allocation46]  }
 0x1ff   : > { %s1924_s0 = sshll.u32 %s13515_s3, 4  ;;  %s13516_s16 = smov [#allocation49]   ;;  %s1925_s0 = int_to_ptr.vmem [resolvable:$true] %s1924_s0 }
 0x200   : > { %s1946_s10 = sshll.u32 %s13516_s16, 4  ;;  %s13199_s7 = scalar_lea.vmem %s1925_s0, 16  ;;  %s1947_s10 = int_to_ptr.vmem [resolvable:$true] %s1946_s10 }
 0x201   : > { %p13200_p12 = scmp.ne.s32.totalorder %s1925_s0, %s13199_s7  ;;  %s13205_s13 = scalar_lea.vmem %s1925_s0, 32 }
 0x202   : > { %p13206_p1 = scmp.lt.s32.totalorder %s1925_s0, %s1925_s0  ;;  %p13207_p2 = scmp.lt.s32.totalorder %s13205_s13, %s13199_s7 }
 0x203   : > { %p13201_p13 = pnand %p13200_p12, %p12102_p10 }
 0x204   : > { %12009 = dma.hbm_to_vmem [thread:$0]  (%p12102_p10), %s15262_s1, 16, %s1901_s2, [#allocation42]  }
 0x205   : > { %p13202_p0 = pneg %p13201_p13  ;;  %p13208_p3 = por %p13207_p2, %p13206_p1 }
 0x207   : > { %p13209_p6 = pnand %p13208_p3, %p13202_p0 }
 0x209   : > { %13212 = shalt.err (!%p13209_p6)
}
 0x20a   : > { %s15263_s5 = sld [smem:[#allocation118_spill]]  ;;  %s13223_s2 = scalar_lea.vmem %s1947_s10, 32 }
 0x20b   : > { %p13224_p5 = scmp.ne.s32.totalorder %s1947_s10, %s13223_s2  ;;  %p13230_p8 = scmp.lt.s32.totalorder %s1947_s10, %s1947_s10 }
 0x20c   : > { %p13231_p11 = scmp.lt.s32.totalorder %s13223_s2, %s13223_s2 }
 0x20d   : > { %p13225_p4 = pnand %p13224_p5, %p12102_p10 }
 0x20e   : > { %p13232_p12 = por %p13231_p11, %p13230_p8 }
 0x20f   : > { %p13226_p7 = pneg %p13225_p4 }
 0x210   : > { %12013 = dma.hbm_to_vmem [thread:$0]  (%p12102_p10), %s15263_s5, 16, %s1925_s0, [#allocation45]  }
 0x211   : > { %p13233_p13 = pnand %p13232_p12, %p13226_p7 }
 0x213   : > { %13236 = shalt.err (!%p13233_p13)
}
 0x214   : > { %s15264_s11 = sld [smem:[#allocation120_spill]]  ;;  %s13517_s4 = smov [#allocation52]  }
 0x215   : > { %s1968_s23 = sshll.u32 %s13517_s4, 4  ;;  %s13518_s1 = smov [#allocation55]   ;;  %s1969_s23 = int_to_ptr.vmem [resolvable:$true] %s1968_s23 }
 0x216   : > { %s2002_s3 = sshll.u32 %s13518_s1, 4  ;;  %s13247_s0 = scalar_lea.vmem %s1969_s23, 32  ;;  %s2003_s3 = int_to_ptr.vmem [resolvable:$true] %s2002_s3 }
 0x217   : > { %p13248_p0 = scmp.ne.s32.totalorder %s1969_s23, %s13247_s0  ;;  %p13254_p3 = scmp.lt.s32.totalorder %s1969_s23, %s1969_s23 }
 0x218   : > { %p13255_p6 = scmp.lt.s32.totalorder %s13247_s0, %s13247_s0 }
 0x219   : > { %p13249_p1 = pnand %p13248_p0, %p12102_p10 }
 0x21a   : > { %12017 = dma.hbm_to_vmem [thread:$0]  (%p12102_p10), %s15264_s11, 32, %s1947_s10, [#allocation48]  }
 0x21b   : > { %p13250_p2 = pneg %p13249_p1  ;;  %p13256_p5 = por %p13255_p6, %p13254_p3 }
 0x21d   : > { %p13257_p4 = pnand %p13256_p5, %p13250_p2 }
 0x21f   : > { %13260 = shalt.err (!%p13257_p4)
}
 0x220   : > { %s15265_s16 = sld [smem:[#allocation122_spill]]  ;;  %s13271_s10 = scalar_lea.vmem %s2003_s3, 16 }
 0x221   : > { %p13272_p7 = scmp.ne.s32.totalorder %s2003_s3, %s13271_s10  ;;  %s13277_s7 = scalar_lea.vmem %s2003_s3, 32 }
 0x222   : > { %p13278_p12 = scmp.lt.s32.totalorder %s2003_s3, %s2003_s3  ;;  %p13279_p13 = scmp.lt.s32.totalorder %s13277_s7, %s13271_s10 }
 0x223   : > { %p13273_p8 = pnand %p13272_p7, %p12102_p10 }
 0x224   : > { %p13280_p0 = por %p13279_p13, %p13278_p12 }
 0x225   : > { %p13274_p11 = pneg %p13273_p8 }
 0x226   : > { %12021 = dma.hbm_to_vmem [thread:$0]  (%p12102_p10), %s15265_s16, 32, %s1969_s23, [#allocation51]  }
 0x227   : > { %p13281_p1 = pnand %p13280_p0, %p13274_p11 }
 0x229   : > { %13284 = shalt.err (!%p13281_p1)
}
 0x22a   : > { %s15266_s8 = sld [smem:[#allocation127_spill]] }
 0x230   : > { %12025 = dma.hbm_to_vmem [thread:$0]  (%p12102_p10), %s15266_s8, 16, %s2003_s3, [#allocation54]  }
 0x231 PF: > { %2022 = sbr.rel (%p13906_p9) target bundleno = 22303 (0x571f), region = 268  ;;  %p12137_p2 = scmp.eq.s32.totalorder (!%p13906_p9), %s13879_s28, 0 }
 0x236   : > { %13328 = dma.done.wait (%p12137_p2), [#allocation3], 64  }
 0x237   : > { %13330 = vsyncadd (%p12137_p2), [#allocation3], 4294967232 }
 0x238   : > { %13332 = dma.done.wait (%p12137_p2), [#allocation6], 32  }
 0x239   : > { %13334 = vsyncadd (%p12137_p2), [#allocation6], 4294967264 }
 0x23a   : > { %13336 = dma.done.wait (%p12137_p2), [#allocation9], 32  }
 0x23b   : > { %13338 = vsyncadd (%p12137_p2), [#allocation9], 4294967264 }
 0x23c   : > { %13340 = dma.done.wait (%p12137_p2), [#allocation12], 32  }
 0x23d   : > { %13342 = vsyncadd (%p12137_p2), [#allocation12], 4294967264 }
 0x23e   : > { %13344 = dma.done.wait (%p12137_p2), [#allocation15], 32  }
 0x23f   : > { %13346 = vsyncadd (%p12137_p2), [#allocation15], 4294967264 }
 0x240   : > { %13348 = dma.done.wait (%p12137_p2), [#allocation18], 528  }
 0x241   : > { %13350 = vsyncadd (%p12137_p2), [#allocation18], 4294966768 }
 0x242   : > { %13352 = dma.done.wait (%p12137_p2), [#allocation21], 32  }
 0x243   : > { %13354 = vsyncadd (%p12137_p2), [#allocation21], 4294967264 }
 0x244   : > { %13356 = dma.done.wait (%p12137_p2), [#allocation24], 528  }
 0x245   : > { %13358 = vsyncadd (%p12137_p2), [#allocation24], 4294966768 }
 0x246   : > { %13360 = dma.done.wait (%p12137_p2), [#allocation27], 64  }
 0x247   : > { %13362 = vsyncadd (%p12137_p2), [#allocation27], 4294967232 }
 0x248   : > { %13364 = dma.done.wait (%p12137_p2), [#allocation30], 544  }
 0x249   : > { %13366 = vsyncadd (%p12137_p2), [#allocation30], 4294966752 }
 0x24a   : > { %13368 = dma.done.wait (%p12137_p2), [#allocation33], 528  }
 0x24b   : > { %13370 = vsyncadd (%p12137_p2), [#allocation33], 4294966768 }
 0x24c   : > { %13372 = dma.done.wait (%p12137_p2), [#allocation36], 528  }
 0x24d   : > { %13374 = vsyncadd (%p12137_p2), [#allocation36], 4294966768 }
 0x24e   : > { %13376 = dma.done.wait (%p12137_p2), [#allocation39], 528  }
 0x24f   : > { %13378 = vsyncadd (%p12137_p2), [#allocation39], 4294966768 }
 0x250   : > { %13380 = dma.done.wait (%p12137_p2), [#allocation42], 32  }
 0x251   : > { %13382 = vsyncadd (%p12137_p2), [#allocation42], 4294967264 }
 0x252   : > { %13384 = dma.done.wait (%p12137_p2), [#allocation45], 528  }
 0x253   : > { %13386 = vsyncadd (%p12137_p2), [#allocation45], 4294966768 }
 0x254   : > { %13388 = dma.done.wait (%p12137_p2), [#allocation48], 64  }
 0x255   : > { %13390 = vsyncadd (%p12137_p2), [#allocation48], 4294967232 }
 0x256   : > { %13392 = dma.done.wait (%p12137_p2), [#allocation51], 64  }
 0x257   : > { %13394 = vsyncadd (%p12137_p2), [#allocation51], 4294967232 }
 0x258   : > { %13396 = dma.done.wait (%p12137_p2), [#allocation54], 32  }
 0x259   : > { %13398 = vsyncadd (%p12137_p2), [#allocation54], 4294967264  ;;  %s15267_s18 = sld [smem:[#allocation76_spill]]  ;;  %p2303_p9 = scmp.lt.s32.totalorder %s13879_s28, 1  ;;  %v13519_v0 = vmov 0.0   ;;  %vm13520_vm0 = vmmov 0  }
 0x25a   : > { %s15268_s13 = sld [smem:[#allocation79_spill]]  ;;  %11352 = vmatprep.subr.mxu0 %v13519_v0  ;;  %11354 = vmatprep.mubr.msk.f32.mxu0 %vm13520_vm0, %v13519_v0  ;;  %vm2323_vm1 = vcmask 1042432   ;;  %vm2319_vm2 = vcmask 23552   ;;  %v2311_v1 = vld [vmem:[#allocation2] sm:$0x7]  ;;  %vm2412_vm3 = vcmask 523264  }
 0x25b   : > { %s14189_s5 = scalar_select %p2303_p9, %s13879_s28, 1  ;;  %11357 = vmatprep.subr.mxu1 %v13519_v0  ;;  %11373 = vmatprep.mubr.msk.f32.mxu1 %vm13520_vm0, %v13519_v0  ;;  %v10930_v11 = vld [vmem:[#allocation5] ss:$0 sm:$0xff]  ;;  %v10933_v15 = vld [vmem:[#allocation7] ss:$0 sm:$0xff]  ;;  %vm2490_vm5 = vcmask 257024  }
 0x25c   : > { %11353 = vmatpush3.msk.msra.mxu0 %vm2323_vm1, %v2311_v1  ;;  %s15269_s4 = sld [smem:[#allocation81_spill]]  ;;  %vm2515_vm8 = vcmask 261120   ;;  %v10935_v36 = vld [vmem:[#allocation8] ss:$0 sm:$0xff]  ;;  %s15162_s23 = smov 96   ;;  %vm2605_vm9 = vcmask 64512  }
 0x25d   : > { %s10929_s2 = sshll.u32 %s14189_s5, 2  ;;  %11376 = vmatprep.subr.mxu0 %v13519_v0  ;;  %s15160_s1 = smov 120   ;;  %vm2681_vm10 = vcmask 27648   ;;  %vm2699_vm11 = vcmask 1043456   ;;  %vm2695_vm12 = vcmask 31744   ;;  %vm10166_vm13 = vcmask 254976  }
 0x25e   : > { %s15164_s3 = smov 64   ;;  %s15270_s0 = sld [smem:[#allocation82_spill]]  ;;  %vm10265_vm14 = vcmask 24576  }
 0x25f   : > { %s2306_s11 = scalar_lea.vmem %s15267_s18, %s10929_s2  ;;  %s15158_s10 = smov 88  }
 0x260   : > { %v2310_v2 = vld [vmem:[%s2306_s11] sm:$0xf]  ;;  %v2404_v3 = vld [vmem:[%s15268_s13 + $0x38] sm:$0xff]  ;;  %v2403_v4 = vld [vmem:[%s15268_s13 + $0x30] sm:$0xff]  ;;  %s15147_s7 = smov 80   ;;  %s15155_s18 = smov 112  }
 0x261   : > { %11358 = vmatpush3.msra.mxu1 %v2404_v3  ;;  %11355 = vmatmul.mubr.msk.f32.vlgmr.msra.gmra.mxu0 %vm2319_vm2, %v2310_v2  ;;  %v2402_v5 = vld [vmem:[%s15268_s13 + $0x28] sm:$0xff]  ;;  %v2401_v6 = vld [vmem:[%s15268_s13 + $0x20] sm:$0xff]  ;;  %v2400_v7 = vld [vmem:[%s15268_s13 + $0x18] sm:$0xff]  ;;  %s15157_s2 = smov 56   ;;  %s15154_s11 = smov 48  }
 0x262   : > { %11359 = vmatprep.subr.mxu1 %v13519_v0  ;;  %11384 = vmatprep.mubr.msk.f32.mxu0 %vm13520_vm0, %v13519_v0  ;;  %v2399_v8 = vld [vmem:[%s15268_s13 + $0x10] sm:$0xff]  ;;  %v2398_v9 = vld [vmem:[%s15268_s13 + $0x8] sm:$0xff]  ;;  %v2397_v10 = vld [vmem:[%s15268_s13] sm:$0xff]  ;;  %s15293_s8 = sld [smem:[#allocation97_spill]]  ;;  %p15308_p3 = scmp.ne.s32.totalorder %s15235_s15, 0 }
 0x263   : > { %11360 = vmatpush3.msra.mxu1 %v2403_v4  ;;  %v2507_v23 = vld [vmem:[%s15269_s4 + $0x18] sm:$0xff]  ;;  %v2506_v24 = vld [vmem:[%s15269_s4 + $0x10] sm:$0xff]  ;;  %v2505_v25 = vld [vmem:[%s15269_s4 + $0x8] sm:$0xff] }
 0x264   : > { %11361 = vmatprep.subr.mxu1 %v13519_v0  ;;  %11377 = vmatpush3.msra.mxu0 %v2507_v23  ;;  %v2504_v26 = vld [vmem:[%s15269_s4] sm:$0xff]  ;;  %s15271_s16 = smov %s15270_s0  ;;  %s15286_s4 = smov 72  }
 0x265   : > { %11362 = vmatpush3.msra.mxu1 %v2402_v5  ;;  %11378 = vmatprep.subr.mxu0 %v13519_v0  ;;  %v2589_v56 = vld [vmem:[%s15270_s0] sm:$0xff]  ;;  %s15152_s0 = smov 104  }
 0x266   : > { %11363 = vmatprep.subr.mxu1 %v13519_v0  ;;  %11379 = vmatpush3.msra.mxu0 %v2506_v24  ;;  %v10937_v24 = vld [vmem:[#allocation10] ss:$0 sm:$0xff] }
 0x267   : > { %11364 = vmatpush3.msra.mxu1 %v2401_v6  ;;  %11380 = vmatprep.subr.mxu0 %v13519_v0 }
 0x268   : > { %11365 = vmatprep.subr.mxu1 %v13519_v0  ;;  %11381 = vmatpush3.msra.mxu0 %v2505_v25 }
 0x269   : > { %11366 = vmatpush3.msra.mxu1 %v2400_v7  ;;  %11382 = vmatprep.subr.mxu0 %v13519_v0 }
 0x26a   : > { %11367 = vmatprep.subr.mxu1 %v13519_v0  ;;  %11383 = vmatpush3.msra.mxu0 %v2504_v26 }
 0x26b   : > { %11368 = vmatpush3.msra.mxu1 %v2399_v8  ;;  %11387 = vmatprep.subr.mxu0 %v13519_v0 }
 0x26c   : > { %11369 = vmatprep.subr.mxu1 %v13519_v0 }
 0x26d   : > { %11370 = vmatpush3.msra.mxu1 %v2398_v9 }
 0x26e   : > { %11371 = vmatprep.subr.mxu1 %v13519_v0 }
 0x26f   : > { %11372 = vmatpush3.msra.mxu1 %v2397_v10 }
 0x270   : > { %11397 = vmatprep.subr.mxu1 %v13519_v0 }
 0x321   : > { %v2393_v12 = vpop.f32.mrf.mxu0 }
 0x322   : > { %v2394_v13 = vadd.f32 %v10930_v11, %v2393_v12  ;;  %v2590_v12 = vld [vmem:[%s15271_s16 + $0x8] sm:$0xff] }
 0x323   : > { %v11356_v14 = vpop.f32.mrf.mxu0 }
 0x324   : > { %11374 = vmatmul.mubr.msk.f32.vlgmr.msra.gmra.mxu1 %vm2412_vm3, %v2394_v13 }
 0x325   : > { %11399 = vmatprep.mubr.msk.f32.mxu1 %vm13520_vm0, %v13519_v0  ;;  %11398 = vmatpush3.msra.mxu1 %v2589_v56 }
 0x326   : > { %11407 = vmatprep.subr.mxu1 %v13519_v0 }
 0x3e4   : > { %v2482_v16 = vpop.f32.mrf.mxu1 }
 0x3e5   : > { %v2483_v17 = vadd.f32 %v10933_v15, %v2482_v16 }
 0x3e6   : > { %v11375_v18 = vpop.f32.mrf.mxu1 }
 0x3e7   : > { %v2487_v19 = vmul.f32 0.01, %v2483_v17  ;;  %vm2486_vm4 = vcmp.ge.f32.partialorder %v2483_v17, 0.0 }
 0x3e9   : > { %v2488_v20 = vsel %vm2486_vm4, %v2483_v17, %v2487_v19 }
 0x3ea   : > { %v2489_v21 = vmul.f32 %v2488_v20, %v2488_v20 }
 0x3ec   : > { %v2491_v22 = vsel %vm2490_vm5, %v2489_v21, 0.0 }
 0x3ed   : > { %2492 = vadd.xlane.f32.xlu0 %v2491_v22 }
 0x476   : > { %v2493_v27 = vpop.xlane.xlu0 %2492 }
 0x477   : > { %12318 = vrsqrt.f32 %v2493_v27  ;;  %vm2496_vm6 = vcmp.eq.f32.partialorder %v2493_v27, inf  ;;  %v2499_v30 = vand.u32 2147483648, %v2493_v27  ;;  %vm2498_vm7 = vcmp.eq.f32.partialorder %v2493_v27, 0.0 }
 0x484   : > { %v12319_v28 = vpop.eup %12318 }
 0x485   : > { %v2495_v29 = vmul.f32 %v12319_v28, %v2493_v27 }
 0x487   : > { %v2497_v31 = vsel %vm2496_vm6, %v2493_v27, %v2495_v29 }
 0x488   : > { %v2500_v32 = vsel %vm2498_vm7, %v2499_v30, %v2497_v31 }
 0x489   : > { %v2501_v33 = vmax.f32 %v2500_v32, 1e-12 }
 0x48b   : > { %12320 = vrcp.f32 %v2501_v33 }
 0x498   : > { %v12321_v34 = vpop.eup %12320 }
 0x499   : > { %v14226_v35 = vmul.f32 %v12321_v34, %v2488_v20  ;;  %v2591_v34 = vld [vmem:[%s15271_s16 + $0x10] sm:$0xff] }
 0x49b   : > { %11385 = vmatmul.mubr.msk.f32.vlgmr.msra.gmra.mxu0 %vm2515_vm8, %v14226_v35 }
 0x49c   : > { %11389 = vmatprep.mubr.msk.f32.mxu0 %vm13520_vm0, %v13519_v0 }
 0x55b   : > { %v2585_v37 = vpop.f32.mrf.mxu0 }
 0x55c   : > { %v14232_v38 = vadd.f32 %v10935_v36, %v2585_v37 }
 0x55d   : > { %v11386_v39 = vpop.f32.mrf.mxu0 }
 0x55e   : > { %2603 = vrot.lane.b32.xlu0 %v14232_v38, %s15162_s23  ;;  %v14237_v40 = vmul.f32 0.35355338, %v14232_v38 }
 0x562   : > { %2846 = vrot.lane.b32.xlu0 %v14237_v40, %s15160_s1 }
 0x5d0   : > { %v2604_v41 = vpop.permute.xlu0 %2603 }
 0x5d1   : > { %11388 = vmatpush3.xpose.msk.msra.mxu0 %vm2605_vm9, %v2604_v41 }
 0x5d2   : > { %11392 = vmatprep.subr.mxu0 %v13519_v0 }
 0x5d4   : > { %11390 = vmatmul.mubr.msk.f32.vlgmr.msra.gmra.mxu0 %vm2605_vm9, %v14237_v40  ;;  %v2847_v55 = vpop.permute.xlu0 %2846 }
 0x5d5   : > { %11394 = vmatprep.mubr.msk.f32.mxu0 %vm13520_vm0, %v13519_v0 }
 0x694   : > { %v2677_v42 = vpop.f32.mrf.mxu0 }
 0x695   : > { %v2682_v43 = vsel %vm2681_vm10, %v2677_v42, -inf }
 0x696   : > { %2683 = vmax.xlane.f32.xlu1 %v2682_v43  ;;  %v11391_v44 = vpop.f32.mrf.mxu0 }
 0x6a7   : > { %2693 = vrot.lane.b32.xlu1 %v14232_v38, %s15164_s3 }
 0x71f   : > { %v2684_v45 = vpop.xlane.xlu1 %2683 }
 0x720   : > { %v2685_v46 = vsub.f32 %v2677_v42, %v2684_v45 }
 0x722   : > { %v2686_v47 = vmul.f32 1.442695, %v2685_v46 }
 0x723   : > { %v2694_v48 = vpop.permute.xlu1 %2693 }
 0x724   : > { %12322 = vpow2.f32 %v2686_v47  ;;  %11393 = vmatpush3.msk.msra.mxu0 %vm2699_vm11, %v2694_v48  ;;  %v2592_v47 = vld [vmem:[%s15271_s16 + $0x18] sm:$0xff] }
 0x725   : > { %11402 = vmatprep.subr.mxu0 %v13519_v0 }
 0x731   : > { %v12323_v49 = vpop.eup %12322 }
 0x732   : > { %v2688_v50 = vsel %vm2681_vm10, %v12323_v49, 0.0 }
 0x733   : > { %2689 = vadd.xlane.f32.xlu1 %v2688_v50 }
 0x744   : > { %2848 = vrot.lane.b32.xlu1 %v14232_v38, %s15158_s10 }
 0x7bc   : > { %v2690_v51 = vpop.xlane.xlu1 %2689 }
 0x7bd   : > { %12324 = vrcp.f32 %v2690_v51 }
 0x7c0   : > { %v2849_v54 = vpop.permute.xlu1 %2848 }
 0x7ca   : > { %v12325_v52 = vpop.eup %12324 }
 0x7cb   : > { %v2692_v53 = vmul.f32 %v12325_v52, %v12323_v49 }
 0x7cd   : > { %11395 = vmatmul.mubr.msk.f32.vlgmr.msra.gmra.mxu0 %vm2695_vm12, %v2692_v53 }
 0x7ce   : > { %11403 = vmatpush3.xpose.msk.msra.mxu0 %vm2605_vm9, %v2849_v54  ;;  %11404 = vmatprep.mubr.msk.f32.mxu0 %vm13520_vm0, %v13519_v0 }
 0x7cf   : > { %11412 = vmatprep.subr.mxu0 %v13519_v0 }
 0x7d1   : > { %11405 = vmatmul.mubr.msk.f32.vlgmr.msra.gmra.mxu0 %vm2605_vm9, %v2847_v55 }
 0x7d2   : > { %11414 = vmatprep.mubr.msk.f32.mxu0 %vm13520_vm0, %v13519_v0  ;;  %11413 = vmatpush3.msra.mxu0 %v2590_v12 }
 0x7d3   : > { %11422 = vmatprep.subr.mxu0 %v13519_v0 }
 0x88d   : > { %v2768_v57 = vpop.f32.mrf.mxu0 }
 0x88e   : > { %11400 = vmatmul.mubr.msk.f32.vlgmr.msra.gmra.mxu1 %vm2605_vm9, %v2768_v57 }
 0x88f   : > { %v11396_v58 = vpop.f32.mrf.mxu0  ;;  %11409 = vmatprep.mubr.msk.f32.mxu1 %vm13520_vm0, %v13519_v0 }
 0x891   : > { %v2920_v59 = vpop.f32.mrf.mxu0 }
 0x892   : > { %v2924_v60 = vsel %vm2681_vm10, %v2920_v59, -inf }
 0x893   : > { %2925 = vmax.xlane.f32.xlu1 %v2924_v60  ;;  %v11406_v61 = vpop.f32.mrf.mxu0 }
 0x8a4   : > { %3088 = vrot.lane.b32.xlu1 %v14232_v38, %s15147_s7  ;;  %s15149_s7 = smov 72  }
 0x8a8   : > { %3086 = vrot.lane.b32.xlu1 %v14237_v40, %s15155_s18  ;;  %s15275_s18 = sld [smem:[#allocation87_spill]] }
 0x91c   : > { %v2926_v62 = vpop.xlane.xlu1 %2925 }
 0x91d   : > { %v2927_v63 = vsub.f32 %v2920_v59, %v2926_v62 }
 0x91f   : > { %v2928_v1 = vmul.f32 1.442695, %v2927_v63 }
 0x920   : > { %v3089_v9 = vpop.permute.xlu1 %3088 }
 0x921   : > { %12326 = vpow2.f32 %v2928_v1 }
 0x924   : > { %v3087_v11 = vpop.permute.xlu1 %3086 }
 0x92e   : > { %v12327_v2 = vpop.eup %12326 }
 0x92f   : > { %v2930_v3 = vsel %vm2681_vm10, %v12327_v2, 0.0 }
 0x930   : > { %2931 = vadd.xlane.f32.xlu0 %v2930_v3 }
 0x946   : > { %2935 = vrot.lane.b32.xlu0 %v14232_v38, %s15157_s2  ;;  %s15278_s2 = sld [smem:[#allocation90_spill]] }
 0x94e   : > { %v2841_v4 = vpop.f32.mrf.mxu1 }
 0x94f   : > { %v2845_v25 = vadd.f32 %v10937_v24, %v2841_v4  ;;  %v10958_v24 = vld [vmem:[#allocation11] ss:$0 sm:$0xff] }
 0x950   : > { %v11401_v5 = vpop.f32.mrf.mxu1 }
 0x9b9   : > { %v2932_v6 = vpop.xlane.xlu0 %2931 }
 0x9ba   : > { %12328 = vrcp.f32 %v2932_v6 }
 0x9bd   : > { %v2936_v7 = vpop.permute.xlu0 %2935 }
 0x9be   : > { %11408 = vmatpush3.msk.msra.mxu1 %vm2699_vm11, %v2936_v7 }
 0x9bf   : > { %11417 = vmatprep.subr.mxu1 %v13519_v0 }
 0x9c7   : > { %v12329_v8 = vpop.eup %12328 }
 0x9c8   : > { %v2934_v10 = vmul.f32 %v12329_v8, %v12327_v2 }
 0x9ca   : > { %11410 = vmatmul.mubr.msk.f32.vlgmr.msra.gmra.mxu1 %vm2695_vm12, %v2934_v10  ;;  %v3582_v10 = vlaneseq }
 0x9cb   : > { %11418 = vmatpush3.xpose.msk.msra.mxu1 %vm2605_vm9, %v3089_v9  ;;  %11419 = vmatprep.mubr.msk.f32.mxu1 %vm13520_vm0, %v13519_v0 }
 0x9cc   : > { %11427 = vmatprep.subr.mxu1 %v13519_v0 }
 0x9ce   : > { %11420 = vmatmul.mubr.msk.f32.vlgmr.msra.gmra.mxu1 %vm2605_vm9, %v3087_v11  ;;  %v3583_v11 = vshrl.u32 %v3582_v10, 7 }
 0x9cf   : > { %11429 = vmatprep.mubr.msk.f32.mxu1 %vm13520_vm0, %v13519_v0  ;;  %11428 = vmatpush3.msra.mxu1 %v2591_v34 }
 0x9d0   : > { %11437 = vmatprep.subr.mxu1 %v13519_v0  ;;  %v14341_v12 = vsub.s32 0, %v3583_v11 }
 0xa8a   : > { %v3008_v13 = vpop.f32.mrf.mxu1 }
 0xa8b   : > { %11415 = vmatmul.mubr.msk.f32.vlgmr.msra.gmra.mxu0 %vm2605_vm9, %v3008_v13  ;;  %v3567_v13 = vld [vmem:[%s15275_s18] sm:$0x3]  ;;  %s15276_s18 = sld [smem:[#allocation89_spill]] }
 0xa8c   : > { %v11411_v14 = vpop.f32.mrf.mxu1  ;;  %11424 = vmatprep.mubr.msk.f32.mxu0 %vm13520_vm0, %v13519_v0 }
 0xa8d   : > { %v14344_v14 = vsub.s32 1, %v3583_v11 }
 0xa8e   : > { %v3160_v15 = vpop.f32.mrf.mxu1 }
 0xa8f   : > { %v3164_v16 = vsel %vm2681_vm10, %v3160_v15, -inf }
 0xa90   : > { %3165 = vmax.xlane.f32.xlu0 %v3164_v16  ;;  %v11421_v17 = vpop.f32.mrf.mxu1 }
 0xaa6   : > { %3175 = vrot.lane.b32.xlu0 %v14232_v38, %s15154_s11 }
 0xaaa   : > { %3326 = vrot.lane.b32.xlu0 %v14237_v40, %s15152_s0  ;;  %s15273_s0 = sld [smem:[#allocation85_spill]] }
 0xab0   : > { %s15274_s11 = smov %s15273_s0  ;;  %v3680_v6 = vld [vmem:[%s15273_s0 + $0x18] sm:$0xff]  ;;  %s15277_s0 = sld [smem:[#allocation88_spill]] }
 0xb19   : > { %v3166_v18 = vpop.xlane.xlu0 %3165 }
 0xb1a   : > { %v3167_v19 = vsub.f32 %v3160_v15, %v3166_v18  ;;  %v3585_v15 = vrot.slane %v3567_v13, %v14341_v12  ;;  %v3590_v18 = vrot.slane %v3567_v13, %v14344_v14 }
 0xb1c   : > { %v3168_v20 = vmul.f32 1.442695, %v3167_v19 }
 0xb1d   : > { %v3176_v21 = vpop.permute.xlu0 %3175 }
 0xb1e   : > { %12330 = vpow2.f32 %v3168_v20  ;;  %11423 = vmatpush3.msk.msra.mxu0 %vm2699_vm11, %v3176_v21  ;;  %v3679_v21 = vld [vmem:[%s15274_s11 + $0x10] sm:$0xff] }
 0xb1f   : > { %11432 = vmatprep.subr.mxu0 %v13519_v0 }
 0xb21   : > { %v3327_v33 = vpop.permute.xlu0 %3326 }
 0xb2b   : > { %v12331_v22 = vpop.eup %12330 }
 0xb2c   : > { %v3170_v23 = vsel %vm2681_vm10, %v12331_v22, 0.0 }
 0xb2d   : > { %3171 = vadd.xlane.f32.xlu1 %v3170_v23  ;;  %v3677_v23 = vld [vmem:[%s15274_s11] sm:$0xff] }
 0xb3e   : > { %3328 = vrot.lane.b32.xlu1 %v14232_v38, %s15149_s7  ;;  %s15151_s7 = smov 40  }
 0xb4b   : > { %v3081_v26 = vpop.f32.mrf.mxu0 }
 0xb4c   : > { %v3085_v27 = vadd.f32 %v3081_v26, %v2845_v25 }
 0xb4d   : > { %v11416_v28 = vpop.f32.mrf.mxu0 }
 0xbb6   : > { %v3172_v29 = vpop.xlane.xlu1 %3171 }
 0xbb7   : > { %12332 = vrcp.f32 %v3172_v29  ;;  %v10960_v29 = vld [vmem:[#allocation13] ss:$0 sm:$0xff] }
 0xbba   : > { %v3329_v32 = vpop.permute.xlu1 %3328 }
 0xbc4   : > { %v12333_v30 = vpop.eup %12332 }
 0xbc5   : > { %v3174_v31 = vmul.f32 %v12333_v30, %v12331_v22  ;;  %v3678_v22 = vld [vmem:[%s15274_s11 + $0x8] sm:$0xff]  ;;  %s15301_s11 = sld [smem:[#allocation96_spill]] }
 0xbc7   : > { %11425 = vmatmul.mubr.msk.f32.vlgmr.msra.gmra.mxu0 %vm2695_vm12, %v3174_v31 }
 0xbc8   : > { %11433 = vmatpush3.xpose.msk.msra.mxu0 %vm2605_vm9, %v3329_v32  ;;  %11434 = vmatprep.mubr.msk.f32.mxu0 %vm13520_vm0, %v13519_v0 }
 0xbc9   : > { %11442 = vmatprep.subr.mxu0 %v13519_v0 }
 0xbcb   : > { %11435 = vmatmul.mubr.msk.f32.vlgmr.msra.gmra.mxu0 %vm2605_vm9, %v3327_v33 }
 0xbcc   : > { %11444 = vmatprep.mubr.msk.f32.mxu0 %vm13520_vm0, %v13519_v0  ;;  %11443 = vmatpush3.msra.mxu0 %v2592_v47 }
 0xbcd   : > { %11458 = vmatprep.subr.mxu0 %v13519_v0 }
 0xc87   : > { %v3248_v36 = vpop.f32.mrf.mxu0 }
 0xc88   : > { %11430 = vmatmul.mubr.msk.f32.vlgmr.msra.gmra.mxu1 %vm2605_vm9, %v3248_v36 }
 0xc89   : > { %v11426_v37 = vpop.f32.mrf.mxu0  ;;  %11439 = vmatprep.mubr.msk.f32.mxu1 %vm13520_vm0, %v13519_v0 }
 0xc8b   : > { %v3400_v39 = vpop.f32.mrf.mxu0 }
 0xc8c   : > { %v3404_v40 = vsel %vm2681_vm10, %v3400_v39, -inf }
 0xc8d   : > { %3405 = vmax.xlane.f32.xlu1 %v3404_v40  ;;  %v11436_v41 = vpop.f32.mrf.mxu0 }
 0xd16   : > { %v3406_v42 = vpop.xlane.xlu1 %3405 }
 0xd17   : > { %v3407_v43 = vsub.f32 %v3400_v39, %v3406_v42  ;;  %v3789_v42 = vld [vmem:[%s15276_s18 + $0x18] sm:$0xff] }
 0xd19   : > { %v3408_v44 = vmul.f32 1.442695, %v3407_v43  ;;  %v3788_v43 = vld [vmem:[%s15276_s18 + $0x10] sm:$0xff] }
 0xd1b   : > { %12334 = vpow2.f32 %v3408_v44  ;;  %v3787_v44 = vld [vmem:[%s15276_s18 + $0x8] sm:$0xff] }
 0xd28   : > { %v12335_v45 = vpop.eup %12334 }
 0xd29   : > { %v3410_v46 = vsel %vm2681_vm10, %v12335_v45, 0.0 }
 0xd2a   : > { %3411 = vadd.xlane.f32.xlu0 %v3410_v46 }
 0xd40   : > { %3415 = vrot.lane.b32.xlu0 %v14232_v38, %s15151_s7  ;;  %s15272_s7 = sld [smem:[#allocation84_spill]] }
 0xd46   : > { %v3595_v3 = vld [vmem:[%s15272_s7 + $0x18] sm:$0xff]  ;;  %v3594_v4 = vld [vmem:[%s15272_s7 + $0x10] sm:$0xff]  ;;  %v3593_v5 = vld [vmem:[%s15272_s7 + $0x8] sm:$0xff] }
 0xd48   : > { %v3321_v48 = vpop.f32.mrf.mxu1 }
 0xd49   : > { %v3325_v49 = vadd.f32 %v3321_v48, %v3085_v27 }
 0xd4a   : > { %v11431_v50 = vpop.f32.mrf.mxu1 }
 0xdb3   : > { %v3412_v51 = vpop.xlane.xlu0 %3411 }
 0xdb4   : > { %12336 = vrcp.f32 %v3412_v51 }
 0xdb7   : > { %v3416_v52 = vpop.permute.xlu0 %3415 }
 0xdb8   : > { %11438 = vmatpush3.msk.msra.mxu1 %vm2699_vm11, %v3416_v52 }
 0xdb9   : > { %11447 = vmatprep.subr.mxu1 %v13519_v0 }
 0xdc1   : > { %v12337_v53 = vpop.eup %12336 }
 0xdc2   : > { %v3414_v54 = vmul.f32 %v12337_v53, %v12335_v45  ;;  %v3786_v45 = vld [vmem:[%s15276_s18] sm:$0xff] }
 0xdc4   : > { %11440 = vmatmul.mubr.msk.f32.vlgmr.msra.gmra.mxu1 %vm2695_vm12, %v3414_v54 }
 0xdc5   : > { %11455 = vmatprep.mubr.msk.f32.mxu1 %vm13520_vm0, %v13519_v0  ;;  %11448 = vmatpush3.msra.mxu1 %v3595_v3 }
 0xdc6   : > { %11449 = vmatprep.subr.mxu1 %v13519_v0 }
 0xdc7   : > { %11450 = vmatpush3.msra.mxu1 %v3594_v4 }
 0xdc8   : > { %11451 = vmatprep.subr.mxu1 %v13519_v0 }
 0xdc9   : > { %11452 = vmatpush3.msra.mxu1 %v3593_v5 }
 0xdca   : > { %11453 = vmatprep.subr.mxu1 %v13519_v0 }
 0xe84   : > { %v3488_v38 = vpop.f32.mrf.mxu1 }
 0xe85   : > { %11445 = vmatmul.mubr.msk.f32.vlgmr.msra.gmra.mxu0 %vm2605_vm9, %v3488_v38 }
 0xe86   : > { %v11441_v55 = vpop.f32.mrf.mxu1  ;;  %11466 = vmatprep.mubr.msk.f32.mxu0 %vm13520_vm0, %v13519_v0  ;;  %11459 = vmatpush3.msra.mxu0 %v3680_v6 }
 0xe87   : > { %11460 = vmatprep.subr.mxu0 %v13519_v0  ;;  %v10962_v55 = vld [vmem:[%s15278_s2] ss:$0 sm:$0xff]  ;;  %s15279_s2 = sld [smem:[#allocation91_spill]] }
 0xe88   : > { %11461 = vmatpush3.msra.mxu0 %v3679_v21 }
 0xe89   : > { %11462 = vmatprep.subr.mxu0 %v13519_v0 }
 0xe8a   : > { %11463 = vmatpush3.msra.mxu0 %v3678_v22 }
 0xe8b   : > { %11464 = vmatprep.subr.mxu0 %v13519_v0 }
 0xe8c   : > { %11465 = vmatpush3.msra.mxu0 %v3677_v23 }
 0xe8d   : > { %11480 = vmatprep.subr.mxu0 %v13519_v0  ;;  %v3870_v11 = vld [vmem:[%s15279_s2] sm:$0xff] }
 0xf45   : > { %v3561_v56 = vpop.f32.mrf.mxu0 }
 0xf46   : > { %v3565_v57 = vadd.f32 %v3561_v56, %v3325_v49  ;;  %v3762_v49 = vld [vmem:[%s15277_s0] sm:$0x3]  ;;  %s15280_s0 = smov 56  }
 0xf47   : > { %v11446_v58 = vpop.f32.mrf.mxu0  ;;  %v3779_v50 = vrot.slane %v3762_v49, %v14341_v12  ;;  %v3784_v53 = vrot.slane %v3762_v49, %v14344_v14 }
 0xf48   : > { %v3566_v59 = vadd.f32 %v3565_v57, %v14226_v35  ;;  %v3592_v35 = vld [vmem:[%s15272_s7] sm:$0xff]  ;;  %s15292_s7 = sld [smem:[#allocation95_spill]] }
 0xf49   : > { %11454 = vmatpush3.msra.mxu1 %v3592_v35 }
 0xf4a   : > { %v3568_v60 = vsel %vm2490_vm5, %v3566_v59, 0.0  ;;  %11469 = vmatprep.subr.mxu1 %v13519_v0 }
 0xf4b   : > { %3569 = vadd.xlane.f32.xlu1 %v3568_v60 }
 0xfd4   : > { %v3570_v61 = vpop.xlane.xlu1 %3569 }
 0xfd5   : > { %v3572_v62 = vmul.f32 0.03125, %v3570_v61 }
 0xfd7   : > { %v3573_v63 = vsub.f32 %v3566_v59, %v3572_v62 }
 0xfd9   : > { %v3574_v1 = vmul.f32 %v3573_v63, %v3573_v63 }
 0xfdb   : > { %v3575_v2 = vsel %vm2490_vm5, %v3574_v1, 0.0 }
 0xfdc   : > { %3576 = vadd.xlane.f32.xlu1 %v3575_v2 }
0x1065   : > { %v3577_v7 = vpop.xlane.xlu1 %3576 }
0x1066   : > { %v3578_v8 = vmul.f32 0.03125, %v3577_v7 }
0x1068   : > { %v3579_v9 = vadd.f32 1e-05, %v3578_v8 }
0x106a   : > { %12338 = vrsqrt.f32 %v3579_v9 }
0x1077   : > { %v12339_v16 = vpop.eup %12338 }
0x1078   : > { %v3581_v17 = vmul.f32 %v12339_v16, %v3573_v63 }
0x107a   : > { %v3586_v19 = vmul.f32 %v3585_v15, %v3581_v17 }
0x107c   : > { %v3591_v20 = vadd.f32 %v3590_v18, %v3586_v19 }
0x107e   : > { %11456 = vmatmul.mubr.msk.f32.vlgmr.msra.gmra.mxu1 %vm2515_vm8, %v3591_v20 }
0x107f   : > { %11477 = vmatprep.mubr.msk.f32.mxu1 %vm13520_vm0, %v13519_v0  ;;  %11470 = vmatpush3.msra.mxu1 %v3789_v42 }
0x1080   : > { %11471 = vmatprep.subr.mxu1 %v13519_v0 }
0x1081   : > { %11472 = vmatpush3.msra.mxu1 %v3788_v43 }
0x1082   : > { %11473 = vmatprep.subr.mxu1 %v13519_v0 }
0x1083   : > { %11474 = vmatpush3.msra.mxu1 %v3787_v44 }
0x1084   : > { %11475 = vmatprep.subr.mxu1 %v13519_v0 }
0x1085   : > { %11476 = vmatpush3.msra.mxu1 %v3786_v45 }
0x1086   : > { %11490 = vmatprep.subr.mxu1 %v13519_v0 }
0x113e   : > { %v3672_v25 = vpop.f32.mrf.mxu1 }
0x113f   : > { %v3673_v26 = vadd.f32 %v10958_v24, %v3672_v25 }
0x1140   : > { %v11457_v27 = vpop.f32.mrf.mxu1 }
0x1141   : > { %v3676_v28 = vmax.f32 %v3673_v26, 0.0 }
0x1143   : > { %11467 = vmatmul.mubr.msk.f32.vlgmr.msra.gmra.mxu0 %vm2515_vm8, %v3676_v28 }
0x1144   : > { %11482 = vmatprep.mubr.msk.f32.mxu0 %vm13520_vm0, %v13519_v0 }
0x1203   : > { %v3757_v30 = vpop.f32.mrf.mxu0 }
0x1204   : > { %v3758_v31 = vadd.f32 %v10960_v29, %v3757_v30 }
0x1205   : > { %v11468_v32 = vpop.f32.mrf.mxu0 }
0x1206   : > { %v3761_v33 = vadd.f32 %v3758_v31, %v3591_v20  ;;  %v3871_v32 = vld [vmem:[%s15279_s2 + $0x8] sm:$0xff] }
0x1208   : > { %v3763_v34 = vsel %vm2490_vm5, %v3761_v33, 0.0 }
0x1209   : > { %3764 = vadd.xlane.f32.xlu1 %v3763_v34 }
0x1292   : > { %v3765_v36 = vpop.xlane.xlu1 %3764 }
0x1293   : > { %v3766_v37 = vmul.f32 0.03125, %v3765_v36 }
0x1295   : > { %v3767_v39 = vsub.f32 %v3761_v33, %v3766_v37 }
0x1297   : > { %v3768_v40 = vmul.f32 %v3767_v39, %v3767_v39 }
0x1299   : > { %v3769_v41 = vsel %vm2490_vm5, %v3768_v40, 0.0 }
0x129a   : > { %3770 = vadd.xlane.f32.xlu1 %v3769_v41 }
0x1323   : > { %v3771_v46 = vpop.xlane.xlu1 %3770 }
0x1324   : > { %v3772_v47 = vmul.f32 0.03125, %v3771_v46 }
0x1326   : > { %v3773_v48 = vadd.f32 1e-05, %v3772_v47 }
0x1328   : > { %12340 = vrsqrt.f32 %v3773_v48 }
0x1335   : > { %v12341_v51 = vpop.eup %12340 }
0x1336   : > { %v3775_v52 = vmul.f32 %v12341_v51, %v3767_v39 }
0x1338   : > { %v3780_v54 = vmul.f32 %v3779_v50, %v3775_v52 }
0x133a   : > { %v14373_v38 = vadd.f32 %v3784_v53, %v3780_v54 }
0x133c   : > { %11478 = vmatmul.mubr.msk.f32.vlgmr.msra.gmra.mxu1 %vm2515_vm8, %v14373_v38 }
0x133d   : > { %11492 = vmatprep.mubr.msk.f32.mxu1 %vm13520_vm0, %v13519_v0  ;;  %11491 = vmatpush3.msra.mxu1 %v3870_v11 }
0x133e   : > { %11500 = vmatprep.subr.mxu1 %v13519_v0 }
0x13fc   : > { %v3866_v56 = vpop.f32.mrf.mxu1 }
0x13fd   : > { %v14380_v57 = vadd.f32 %v10962_v55, %v3866_v56  ;;  %v3872_v56 = vld [vmem:[%s15279_s2 + $0x10] sm:$0xff] }
0x13fe   : > { %v11479_v58 = vpop.f32.mrf.mxu1 }
0x13ff   : > { %3884 = vrot.lane.b32.xlu1 %v14380_v57, %s15162_s23  ;;  %v14386_v60 = vmul.f32 0.35355338, %v14380_v57  ;;  %s15284_s23 = smov 48  }
0x1471   : > { %v3885_v59 = vpop.permute.xlu1 %3884 }
0x1472   : > { %11481 = vmatpush3.xpose.msk.msra.mxu0 %vm2605_vm9, %v3885_v59 }
0x1473   : > { %11485 = vmatprep.subr.mxu0 %v13519_v0 }
0x1475   : > { %11483 = vmatmul.mubr.msk.f32.vlgmr.msra.gmra.mxu0 %vm2605_vm9, %v14386_v60 }
0x1476   : > { %11487 = vmatprep.mubr.msk.f32.mxu0 %vm13520_vm0, %v13519_v0 }
0x1535   : > { %v3957_v61 = vpop.f32.mrf.mxu0 }
0x1536   : > { %v3961_v62 = vsel %vm2681_vm10, %v3957_v61, -inf }
0x1537   : > { %3962 = vmax.xlane.f32.xlu0 %v3961_v62  ;;  %v11484_v63 = vpop.f32.mrf.mxu0 }
0x154d   : > { %3972 = vrot.lane.b32.xlu0 %v14380_v57, %s15164_s3  ;;  %s15285_s3 = smov 104  }
0x1551   : > { %4123 = vrot.lane.b32.xlu0 %v14386_v60, %s15160_s1  ;;  %s15282_s1 = smov 80  }
0x15c0   : > { %v3963_v1 = vpop.xlane.xlu0 %3962 }
0x15c1   : > { %v3964_v2 = vsub.f32 %v3957_v61, %v3963_v1 }
0x15c3   : > { %v3965_v3 = vmul.f32 1.442695, %v3964_v2 }
0x15c4   : > { %v3973_v4 = vpop.permute.xlu0 %3972 }
0x15c5   : > { %12342 = vpow2.f32 %v3965_v3  ;;  %11486 = vmatpush3.msk.msra.mxu0 %vm2699_vm11, %v3973_v4 }
0x15c6   : > { %11495 = vmatprep.subr.mxu0 %v13519_v0 }
0x15c8   : > { %v4124_v10 = vpop.permute.xlu0 %4123 }
0x15d2   : > { %v12343_v5 = vpop.eup %12342 }
0x15d3   : > { %v3967_v35 = vsel %vm2681_vm10, %v12343_v5, 0.0 }
0x15d4   : > { %3968 = vadd.xlane.f32.xlu1 %v3967_v35  ;;  %v3873_v35 = vld [vmem:[%s15279_s2 + $0x18] sm:$0xff] }
0x15e5   : > { %4125 = vrot.lane.b32.xlu1 %v14380_v57, %s15158_s10  ;;  %s15281_s10 = smov 112  }
0x165d   : > { %v3969_v6 = vpop.xlane.xlu1 %3968 }
0x165e   : > { %12344 = vrcp.f32 %v3969_v6 }
0x1661   : > { %v4126_v9 = vpop.permute.xlu1 %4125 }
0x166b   : > { %v12345_v7 = vpop.eup %12344 }
0x166c   : > { %v3971_v8 = vmul.f32 %v12345_v7, %v12343_v5 }
0x166e   : > { %11488 = vmatmul.mubr.msk.f32.vlgmr.msra.gmra.mxu0 %vm2695_vm12, %v3971_v8 }
0x166f   : > { %11496 = vmatpush3.xpose.msk.msra.mxu0 %vm2605_vm9, %v4126_v9  ;;  %11497 = vmatprep.mubr.msk.f32.mxu0 %vm13520_vm0, %v13519_v0 }
0x1670   : > { %11505 = vmatprep.subr.mxu0 %v13519_v0 }
0x1672   : > { %11498 = vmatmul.mubr.msk.f32.vlgmr.msra.gmra.mxu0 %vm2605_vm9, %v4124_v10 }
0x1673   : > { %11507 = vmatprep.mubr.msk.f32.mxu0 %vm13520_vm0, %v13519_v0  ;;  %11506 = vmatpush3.msra.mxu0 %v3871_v32 }
0x1674   : > { %11515 = vmatprep.subr.mxu0 %v13519_v0 }
0x172e   : > { %v4045_v13 = vpop.f32.mrf.mxu0 }
0x172f   : > { %11493 = vmatmul.mubr.msk.f32.vlgmr.msra.gmra.mxu1 %vm2605_vm9, %v4045_v13 }
0x1730   : > { %v11489_v15 = vpop.f32.mrf.mxu0  ;;  %11502 = vmatprep.mubr.msk.f32.mxu1 %vm13520_vm0, %v13519_v0 }
0x1732   : > { %v4197_v16 = vpop.f32.mrf.mxu0 }
0x1733   : > { %v4201_v17 = vsel %vm2681_vm10, %v4197_v16, -inf }
0x1734   : > { %4202 = vmax.xlane.f32.xlu0 %v4201_v17  ;;  %v11499_v18 = vpop.f32.mrf.mxu0 }
0x174a   : > { %4212 = vrot.lane.b32.xlu0 %v14380_v57, %s15280_s0  ;;  %s15283_s0 = sld [smem:[#allocation92_spill]] }
0x174e   : > { %4363 = vrot.lane.b32.xlu0 %v14386_v60, %s15281_s10 }
0x1750   : > { %v10964_v46 = vld [vmem:[%s15283_s0] ss:$0 sm:$0xff]  ;;  %s15288_s0 = sld [smem:[#allocation93_spill]] }
0x1756   : > { %s15289_s6 = smov %s15288_s0 }
0x17bd   : > { %v4203_v19 = vpop.xlane.xlu0 %4202 }
0x17be   : > { %v4204_v20 = vsub.f32 %v4197_v16, %v4203_v19 }
0x17c0   : > { %v4205_v21 = vmul.f32 1.442695, %v4204_v20 }
0x17c1   : > { %v4213_v22 = vpop.permute.xlu0 %4212 }
0x17c2   : > { %12346 = vpow2.f32 %v4205_v21  ;;  %11501 = vmatpush3.msk.msra.mxu1 %vm2699_vm11, %v4213_v22 }
0x17c3   : > { %11510 = vmatprep.subr.mxu1 %v13519_v0 }
0x17c5   : > { %v4364_v31 = vpop.permute.xlu0 %4363 }
0x17cf   : > { %v12347_v23 = vpop.eup %12346 }
0x17d0   : > { %v4207_v24 = vsel %vm2681_vm10, %v12347_v23, 0.0 }
0x17d1   : > { %4208 = vadd.xlane.f32.xlu1 %v4207_v24 }
0x17e2   : > { %4365 = vrot.lane.b32.xlu1 %v14380_v57, %s15282_s1 }
0x17ef   : > { %v4118_v25 = vpop.f32.mrf.mxu1 }
0x17f0   : > { %v4122_v47 = vadd.f32 %v10964_v46, %v4118_v25  ;;  %v4871_v25 = vld [vmem:[%s15288_s0 + $0x18] sm:$0xff]  ;;  %s15294_s0 = smov 64   ;;  %v4955_v46 = vld [vmem:[%s15292_s7 + $0x10] sm:$0xff] }
0x17f1   : > { %v11494_v26 = vpop.f32.mrf.mxu1 }
0x17f2   : > { %v4870_v26 = vld [vmem:[%s15289_s6 + $0x10] sm:$0xff] }
0x185a   : > { %v4209_v27 = vpop.xlane.xlu1 %4208 }
0x185b   : > { %12348 = vrcp.f32 %v4209_v27  ;;  %v4868_v27 = vld [vmem:[%s15289_s6] sm:$0xff] }
0x185e   : > { %v4366_v30 = vpop.permute.xlu1 %4365 }
0x1868   : > { %v12349_v28 = vpop.eup %12348 }
0x1869   : > { %v4211_v29 = vmul.f32 %v12349_v28, %v12347_v23 }
0x186b   : > { %11503 = vmatmul.mubr.msk.f32.vlgmr.msra.gmra.mxu1 %vm2695_vm12, %v4211_v29 }
0x186c   : > { %11511 = vmatpush3.xpose.msk.msra.mxu1 %vm2605_vm9, %v4366_v30  ;;  %11512 = vmatprep.mubr.msk.f32.mxu1 %vm13520_vm0, %v13519_v0 }
0x186d   : > { %11520 = vmatprep.subr.mxu1 %v13519_v0 }
0x186f   : > { %11513 = vmatmul.mubr.msk.f32.vlgmr.msra.gmra.mxu1 %vm2605_vm9, %v4364_v31  ;;  %v4956_v31 = vld [vmem:[%s15292_s7 + $0x18] sm:$0xff] }
0x1870   : > { %11522 = vmatprep.mubr.msk.f32.mxu1 %vm13520_vm0, %v13519_v0  ;;  %11521 = vmatpush3.msra.mxu1 %v3872_v56 }
0x1871   : > { %11530 = vmatprep.subr.mxu1 %v13519_v0 }
0x192b   : > { %v4285_v33 = vpop.f32.mrf.mxu1 }
0x192c   : > { %11508 = vmatmul.mubr.msk.f32.vlgmr.msra.gmra.mxu0 %vm2605_vm9, %v4285_v33 }
0x192d   : > { %v11504_v34 = vpop.f32.mrf.mxu1  ;;  %11517 = vmatprep.mubr.msk.f32.mxu0 %vm13520_vm0, %v13519_v0 }
0x192f   : > { %v4437_v36 = vpop.f32.mrf.mxu1 }
0x1930   : > { %v4441_v37 = vsel %vm2681_vm10, %v4437_v36, -inf }
0x1931   : > { %4442 = vmax.xlane.f32.xlu0 %v4441_v37  ;;  %v11514_v39 = vpop.f32.mrf.mxu1 }
0x1947   : > { %4452 = vrot.lane.b32.xlu0 %v14380_v57, %s15284_s23  ;;  %s15287_s23 = smov 40  }
0x194b   : > { %4603 = vrot.lane.b32.xlu0 %v14386_v60, %s15285_s3 }
0x19ba   : > { %v4443_v40 = vpop.xlane.xlu0 %4442 }
0x19bb   : > { %v4444_v41 = vsub.f32 %v4437_v36, %v4443_v40  ;;  %v4844_v36 = vld [vmem:[%s15293_s8] sm:$0x3]  ;;  %s15296_s8 = sld [smem:[#allocation94_spill]] }
0x19bc   : > { %v4861_v37 = vrot.slane %v4844_v36, %v14341_v12 }
0x19bd   : > { %v4445_v42 = vmul.f32 1.442695, %v4444_v41  ;;  %v4866_v41 = vrot.slane %v4844_v36, %v14344_v14 }
0x19be   : > { %v4453_v43 = vpop.permute.xlu0 %4452 }
0x19bf   : > { %12350 = vpow2.f32 %v4445_v42  ;;  %11516 = vmatpush3.msk.msra.mxu0 %vm2699_vm11, %v4453_v43 }
0x19c0   : > { %11525 = vmatprep.subr.mxu0 %v13519_v0 }
0x19c2   : > { %v4604_v55 = vpop.permute.xlu0 %4603 }
0x19cc   : > { %v12351_v44 = vpop.eup %12350 }
0x19cd   : > { %v4447_v45 = vsel %vm2681_vm10, %v12351_v44, 0.0 }
0x19ce   : > { %4448 = vadd.xlane.f32.xlu1 %v4447_v45 }
0x19df   : > { %4605 = vrot.lane.b32.xlu1 %v14380_v57, %s15286_s4 }
0x19ec   : > { %v4358_v48 = vpop.f32.mrf.mxu0 }
0x19ed   : > { %v4362_v49 = vadd.f32 %v4358_v48, %v4122_v47  ;;  %v4954_v47 = vld [vmem:[%s15292_s7 + $0x8] sm:$0xff]  ;;  %v4953_v48 = vld [vmem:[%s15292_s7] sm:$0xff]  ;;  %s15300_s7 = smov 88  }
0x19ee   : > { %v11509_v50 = vpop.f32.mrf.mxu0 }
0x1a57   : > { %v4449_v51 = vpop.xlane.xlu1 %4448 }
0x1a58   : > { %12352 = vrcp.f32 %v4449_v51 }
0x1a5b   : > { %v4606_v54 = vpop.permute.xlu1 %4605 }
0x1a65   : > { %v12353_v52 = vpop.eup %12352 }
0x1a66   : > { %v4451_v53 = vmul.f32 %v12353_v52, %v12351_v44 }
0x1a68   : > { %11518 = vmatmul.mubr.msk.f32.vlgmr.msra.gmra.mxu0 %vm2695_vm12, %v4451_v53 }
0x1a69   : > { %11526 = vmatpush3.xpose.msk.msra.mxu0 %vm2605_vm9, %v4606_v54  ;;  %11527 = vmatprep.mubr.msk.f32.mxu0 %vm13520_vm0, %v13519_v0  ;;  %v10989_v54 = vld [vmem:[#allocation14] ss:$0 sm:$0xff] }
0x1a6a   : > { %11535 = vmatprep.subr.mxu0 %v13519_v0 }
0x1a6c   : > { %11528 = vmatmul.mubr.msk.f32.vlgmr.msra.gmra.mxu0 %vm2605_vm9, %v4604_v55 }
0x1a6d   : > { %11537 = vmatprep.mubr.msk.f32.mxu0 %vm13520_vm0, %v13519_v0  ;;  %11536 = vmatpush3.msra.mxu0 %v3873_v35 }
0x1a6e   : > { %11551 = vmatprep.subr.mxu0 %v13519_v0 }
0x1b28   : > { %v4525_v58 = vpop.f32.mrf.mxu0 }
0x1b29   : > { %11523 = vmatmul.mubr.msk.f32.vlgmr.msra.gmra.mxu1 %vm2605_vm9, %v4525_v58 }
0x1b2a   : > { %v11519_v59 = vpop.f32.mrf.mxu0  ;;  %11532 = vmatprep.mubr.msk.f32.mxu1 %vm13520_vm0, %v13519_v0 }
0x1b2c   : > { %v4677_v60 = vpop.f32.mrf.mxu0 }
0x1b2d   : > { %v4681_v61 = vsel %vm2681_vm10, %v4677_v60, -inf }
0x1b2e   : > { %4682 = vmax.xlane.f32.xlu0 %v4681_v61  ;;  %v11529_v62 = vpop.f32.mrf.mxu0 }
0x1b44   : > { %4692 = vrot.lane.b32.xlu0 %v14380_v57, %s15287_s23  ;;  %s15290_s23 = sld [smem:[#allocation99_spill]] }
0x1b4a   : > { %s15291_s2 = smov %s15290_s23  ;;  %v5066_v28 = vld [vmem:[%s15290_s23 + $0x18] sm:$0xff]  ;;  %s15297_s23 = smov 96  }
0x1b4b   : > { %5158 = vrot.lane.b32.xlu0 %v5066_v28, %s15294_s0  ;;  %v5065_v29 = vld [vmem:[%s15291_s2 + $0x10] sm:$0xff]  ;;  %v5064_v30 = vld [vmem:[%s15291_s2 + $0x8] sm:$0xff]  ;;  %v5063_v44 = vld [vmem:[%s15291_s2] sm:$0xff]  ;;  %s15299_s2 = sld [smem:[#allocation100_spill]] }
0x1b4f   : > { %5156 = vrot.lane.b32.xlu0 %v5065_v29, %s15294_s0 }
0x1b53   : > { %5154 = vrot.lane.b32.xlu0 %v5064_v30, %s15294_s0 }
0x1bb7   : > { %v4683_v63 = vpop.xlane.xlu0 %4682 }
0x1bb8   : > { %v4684_v1 = vsub.f32 %v4677_v60, %v4683_v63 }
0x1bba   : > { %v4685_v2 = vmul.f32 1.442695, %v4684_v1 }
0x1bbb   : > { %v4693_v3 = vpop.permute.xlu0 %4692 }
0x1bbc   : > { %12354 = vpow2.f32 %v4685_v2  ;;  %11531 = vmatpush3.msk.msra.mxu1 %vm2699_vm11, %v4693_v3 }
0x1bbd   : > { %11540 = vmatprep.subr.mxu1 %v13519_v0 }
0x1bbf   : > { %v5159_v63 = vpop.permute.xlu0 %5158 }
0x1bc3   : > { %v5157_v1 = vpop.permute.xlu0 %5156 }
0x1bc7   : > { %v5155_v2 = vpop.permute.xlu0 %5154 }
0x1bc9   : > { %v12355_v4 = vpop.eup %12354 }
0x1bca   : > { %v4687_v5 = vsel %vm2681_vm10, %v12355_v4, 0.0 }
0x1bcb   : > { %4688 = vadd.xlane.f32.xlu1 %v4687_v5 }
0x1be9   : > { %v4598_v6 = vpop.f32.mrf.mxu1 }
0x1bea   : > { %v4602_v7 = vadd.f32 %v4598_v6, %v4362_v49  ;;  %v10985_v49 = vld [vmem:[%s15296_s8] ss:$0 sm:$0xff]  ;;  %s15298_s8 = smov 120  }
0x1beb   : > { %v11524_v57 = vpop.f32.mrf.mxu1 }
0x1c54   : > { %v4689_v8 = vpop.xlane.xlu1 %4688 }
0x1c55   : > { %12356 = vrcp.f32 %v4689_v8 }
0x1c62   : > { %v12357_v9 = vpop.eup %12356 }
0x1c63   : > { %v4691_v10 = vmul.f32 %v12357_v9, %v12355_v4 }
0x1c65   : > { %11533 = vmatmul.mubr.msk.f32.vlgmr.msra.gmra.mxu1 %vm2695_vm12, %v4691_v10 }
0x1c66   : > { %11548 = vmatprep.mubr.msk.f32.mxu1 %vm13520_vm0, %v13519_v0  ;;  %11541 = vmatpush3.msra.mxu1 %v4871_v25 }
0x1c67   : > { %11542 = vmatprep.subr.mxu1 %v13519_v0 }
0x1c68   : > { %11543 = vmatpush3.msra.mxu1 %v4870_v26 }
0x1c69   : > { %11544 = vmatprep.subr.mxu1 %v13519_v0 }
0x1d25   : > { %v4765_v11 = vpop.f32.mrf.mxu1 }
0x1d26   : > { %11538 = vmatmul.mubr.msk.f32.vlgmr.msra.gmra.mxu0 %vm2605_vm9, %v4765_v11 }
0x1d27   : > { %v11534_v13 = vpop.f32.mrf.mxu1  ;;  %11559 = vmatprep.mubr.msk.f32.mxu0 %vm13520_vm0, %v13519_v0  ;;  %11552 = vmatpush3.msra.mxu0 %v4956_v31 }
0x1d28   : > { %11553 = vmatprep.subr.mxu0 %v13519_v0 }
0x1d29   : > { %11554 = vmatpush3.msra.mxu0 %v4955_v46 }
0x1d2a   : > { %11555 = vmatprep.subr.mxu0 %v13519_v0 }
0x1d2b   : > { %11556 = vmatpush3.msra.mxu0 %v4954_v47 }
0x1d2c   : > { %11557 = vmatprep.subr.mxu0 %v13519_v0 }
0x1d2d   : > { %11558 = vmatpush3.msra.mxu0 %v4953_v48 }
0x1d2e   : > { %11573 = vmatprep.subr.mxu0 %v13519_v0 }
0x1de6   : > { %v4838_v15 = vpop.f32.mrf.mxu0 }
0x1de7   : > { %v4842_v16 = vadd.f32 %v4838_v15, %v4602_v7 }
0x1de8   : > { %v11539_v17 = vpop.f32.mrf.mxu0 }
0x1de9   : > { %v4843_v18 = vadd.f32 %v4842_v16, %v14373_v38  ;;  %v4869_v38 = vld [vmem:[%s15289_s6 + $0x8] sm:$0xff]  ;;  %s15295_s6 = sld [smem:[#allocation123_spill]] }
0x1dea   : > { %11545 = vmatpush3.msra.mxu1 %v4869_v38 }
0x1deb   : > { %v4845_v19 = vsel %vm2490_vm5, %v4843_v18, 0.0  ;;  %11546 = vmatprep.subr.mxu1 %v13519_v0 }
0x1dec   : > { %4846 = vadd.xlane.f32.xlu1 %v4845_v19  ;;  %11547 = vmatpush3.msra.mxu1 %v4868_v27 }
0x1ded   : > { %11562 = vmatprep.subr.mxu1 %v13519_v0 }
0x1def   : > { %v14509_v45 = vld [vmem:[%s15295_s6] sm:$0xf] }
0x1e75   : > { %v4847_v20 = vpop.xlane.xlu1 %4846 }
0x1e76   : > { %v4848_v21 = vmul.f32 0.03125, %v4847_v20 }
0x1e78   : > { %v4849_v22 = vsub.f32 %v4843_v18, %v4848_v21  ;;  %v5240_v21 = vld [vmem:[%s15299_s2] sm:$0xff] }
0x1e7a   : > { %v4850_v23 = vmul.f32 %v4849_v22, %v4849_v22 }
0x1e7c   : > { %v4851_v24 = vsel %vm2490_vm5, %v4850_v23, 0.0 }
0x1e7d   : > { %4852 = vadd.xlane.f32.xlu1 %v4851_v24 }
0x1f06   : > { %v4853_v32 = vpop.xlane.xlu1 %4852 }
0x1f07   : > { %v4854_v33 = vmul.f32 0.03125, %v4853_v32 }
0x1f09   : > { %v4855_v34 = vadd.f32 1e-05, %v4854_v33 }
0x1f0b   : > { %12358 = vrsqrt.f32 %v4855_v34 }
0x1f18   : > { %v12359_v39 = vpop.eup %12358 }
0x1f19   : > { %v4857_v40 = vmul.f32 %v12359_v39, %v4849_v22 }
0x1f1b   : > { %v4862_v42 = vmul.f32 %v4861_v37, %v4857_v40 }
0x1f1d   : > { %v14499_v43 = vadd.f32 %v4866_v41, %v4862_v42  ;;  %v5241_v41 = vld [vmem:[%s15299_s2 + $0x8] sm:$0xff] }
0x1f1f   : > { %11549 = vmatmul.mubr.msk.f32.vlgmr.msra.gmra.mxu1 %vm2515_vm8, %v14499_v43 }
0x1f20   : > { %11563 = vmatpush3.msra.mxu1 %v5066_v28  ;;  %11570 = vmatprep.mubr.msk.f32.mxu1 %vm13520_vm0, %v13519_v0 }
0x1f21   : > { %11564 = vmatprep.subr.mxu1 %v13519_v0 }
0x1f22   : > { %11565 = vmatpush3.msra.mxu1 %v5065_v29 }
0x1f23   : > { %11566 = vmatprep.subr.mxu1 %v13519_v0 }
0x1f24   : > { %11567 = vmatpush3.msra.mxu1 %v5064_v30 }
0x1f25   : > { %11568 = vmatprep.subr.mxu1 %v13519_v0 }
0x1f26   : > { %11569 = vmatpush3.msra.mxu1 %v5063_v44 }
0x1f27   : > { %11571 = vmatmul.mubr.msk.f32.vlgmr.msra.gmra.mxu1 %vm2515_vm8, %v14509_v45  ;;  %11584 = vmatprep.subr.mxu1 %v13519_v0 }
0x1f28   : > { %11586 = vmatprep.mubr.msk.f32.mxu1 %vm13520_vm0, %v13519_v0 }
0x1fdf   : > { %v4948_v50 = vpop.f32.mrf.mxu1 }
0x1fe0   : > { %v4949_v51 = vadd.f32 %v10985_v49, %v4948_v50 }
0x1fe1   : > { %v11550_v52 = vpop.f32.mrf.mxu1 }
0x1fe2   : > { %v4952_v53 = vmax.f32 %v4949_v51, 0.0 }
0x1fe4   : > { %11560 = vmatmul.mubr.msk.f32.vlgmr.msra.gmra.mxu0 %vm2515_vm8, %v4952_v53 }
0x1fe5   : > { %11581 = vmatprep.mubr.msk.f32.mxu0 %vm13520_vm0, %v13519_v0  ;;  %11574 = vmatpush3.msra.mxu0 %v5159_v63 }
0x1fe6   : > { %11575 = vmatprep.subr.mxu0 %v13519_v0 }
0x1fe7   : > { %v5144_v55 = vpop.f32.mrf.mxu1  ;;  %11576 = vmatpush3.msra.mxu0 %v5157_v1 }
0x1fe8   : > { %v14527_v56 = vadd.f32 %v10989_v54, %v5144_v55  ;;  %11577 = vmatprep.subr.mxu0 %v13519_v0  ;;  %v10991_v55 = vld [vmem:[#allocation16] ss:$0 sm:$0xff] }
0x1fe9   : > { %v11572_v58 = vpop.f32.mrf.mxu1  ;;  %11578 = vmatpush3.msra.mxu0 %v5155_v2 }
0x1fea   : > { %5254 = vrot.lane.b32.xlu1 %v14527_v56, %s15297_s23  ;;  %v14534_v60 = vmul.f32 0.35355338, %v14527_v56  ;;  %11579 = vmatprep.subr.mxu0 %v13519_v0 }
0x1fee   : > { %5152 = vrot.lane.b32.xlu1 %v5063_v44, %s15294_s0 }
0x205c   : > { %v5255_v59 = vpop.permute.xlu1 %5254 }
0x205d   : > { %11585 = vmatpush3.xpose.msk.msra.mxu1 %vm2605_vm9, %v5255_v59 }
0x205e   : > { %11594 = vmatprep.subr.mxu1 %v13519_v0 }
0x2060   : > { %11587 = vmatmul.mubr.msk.f32.vlgmr.msra.gmra.mxu1 %vm2605_vm9, %v14534_v60  ;;  %v5153_v3 = vpop.permute.xlu1 %5152 }
0x2061   : > { %11596 = vmatprep.mubr.msk.f32.mxu1 %vm13520_vm0, %v13519_v0  ;;  %11580 = vmatpush3.msra.mxu0 %v5153_v3 }
0x2062   : > { %11582 = vmatmul.mubr.f32.vlgmr.msra.gmra.mxu0 %v13519_v0  ;;  %11589 = vmatprep.subr.mxu0 %v13519_v0 }
0x2063   : > { %11591 = vmatprep.mubr.msk.f32.mxu0 %vm13520_vm0, %v13519_v0  ;;  %11595 = vmatpush3.msra.mxu1 %v5240_v21 }
0x2064   : > { %11604 = vmatprep.subr.mxu1 %v13519_v0 }
0x20a4   : > { %v14541_v61 = vpop.f32.mrf.mxu0 }
0x20a6   : > { %v11561_v62 = vpop.f32.mrf.mxu0 }
0x2120   : > { %v5327_v4 = vpop.f32.mrf.mxu1 }
0x2121   : > { %v5331_v5 = vsel %vm2681_vm10, %v5327_v4, -inf }
0x2122   : > { %5332 = vmax.xlane.f32.xlu0 %v5331_v5  ;;  %v11588_v35 = vpop.f32.mrf.mxu1  ;;  %v5236_v11 = vpop.f32.mrf.mxu0 }
0x2124   : > { %v11583_v15 = vpop.f32.mrf.mxu0 }
0x2138   : > { %5164 = vrot.lane.b32.xlu0 %v10989_v54, %s15294_s0 }
0x213c   : > { %5492 = vrot.lane.b32.xlu0 %v14534_v60, %s15298_s8 }
0x21ab   : > { %v5333_v6 = vpop.xlane.xlu0 %5332 }
0x21ac   : > { %v5334_v7 = vsub.f32 %v5327_v4, %v5333_v6  ;;  %v5242_v4 = vld [vmem:[%s15299_s2 + $0x10] sm:$0xff] }
0x21ae   : > { %v5335_v57 = vmul.f32 1.442695, %v5334_v7 }
0x21af   : > { %v5165_v10 = vpop.permute.xlu0 %5164 }
0x21b0   : > { %12360 = vpow2.f32 %v5335_v57  ;;  %v14555_v13 = vadd.f32 %v5236_v11, %v5165_v10 }
0x21b2   : > { %11590 = vmatpush3.msk.msra.mxu0 %vm2699_vm11, %v14555_v13 }
0x21b3   : > { %11599 = vmatprep.subr.mxu0 %v13519_v0  ;;  %v5493_v20 = vpop.permute.xlu0 %5492 }
0x21bd   : > { %v12361_v8 = vpop.eup %12360 }
0x21be   : > { %v5337_v9 = vsel %vm2681_vm10, %v12361_v8, 0.0 }
0x21bf   : > { %5338 = vadd.xlane.f32.xlu1 %v5337_v9 }
0x21d0   : > { %5494 = vrot.lane.b32.xlu1 %v14527_v56, %s15300_s7 }
0x2248   : > { %v5339_v16 = vpop.xlane.xlu1 %5338 }
0x2249   : > { %12362 = vrcp.f32 %v5339_v16  ;;  %v5243_v16 = vld [vmem:[%s15299_s2 + $0x18] sm:$0xff]  ;;  %s15302_s2 = sld [smem:[#allocation102_spill]] }
0x224c   : > { %v5495_v19 = vpop.permute.xlu1 %5494 }
0x2256   : > { %v12363_v17 = vpop.eup %12362 }
0x2257   : > { %v5341_v18 = vmul.f32 %v12363_v17, %v12361_v8 }
0x2259   : > { %11592 = vmatmul.mubr.msk.f32.vlgmr.msra.gmra.mxu0 %vm2695_vm12, %v5341_v18 }
0x225a   : > { %11600 = vmatpush3.xpose.msk.msra.mxu0 %vm2605_vm9, %v5495_v19  ;;  %11601 = vmatprep.mubr.msk.f32.mxu0 %vm13520_vm0, %v13519_v0 }
0x225b   : > { %11609 = vmatprep.subr.mxu0 %v13519_v0 }
0x225d   : > { %11602 = vmatmul.mubr.msk.f32.vlgmr.msra.gmra.mxu0 %vm2605_vm9, %v5493_v20 }
0x225e   : > { %11611 = vmatprep.mubr.msk.f32.mxu0 %vm13520_vm0, %v13519_v0  ;;  %11610 = vmatpush3.msra.mxu0 %v5241_v41 }
0x225f   : > { %11619 = vmatprep.subr.mxu0 %v13519_v0 }
0x2319   : > { %v5414_v22 = vpop.f32.mrf.mxu0 }
0x231a   : > { %11597 = vmatmul.mubr.msk.f32.vlgmr.msra.gmra.mxu1 %vm2605_vm9, %v5414_v22 }
0x231b   : > { %v11593_v23 = vpop.f32.mrf.mxu0  ;;  %11606 = vmatprep.mubr.msk.f32.mxu1 %vm13520_vm0, %v13519_v0 }
0x231d   : > { %v5566_v24 = vpop.f32.mrf.mxu0 }
0x231e   : > { %v5570_v25 = vsel %vm2681_vm10, %v5566_v24, -inf }
0x231f   : > { %5571 = vmax.xlane.f32.xlu1 %v5570_v25  ;;  %v11603_v26 = vpop.f32.mrf.mxu0  ;;  %v10987_v25 = vld [vmem:[%s15301_s11] ss:$0 sm:$0xff]  ;;  %s15303_s11 = sld [smem:[#allocation98_spill]] }
0x2320   : > { %v5034_v26 = vadd.f32 %v10987_v25, %v14541_v61  ;;  %v6238_v61 = vld [vmem:[%s15302_s2 + $0x8] sm:$0xff] }
0x2330   : > { %5734 = vrot.lane.b32.xlu1 %v14527_v56, %s15282_s1 }
0x2334   : > { %5732 = vrot.lane.b32.xlu1 %v14534_v60, %s15281_s10 }
0x23a8   : > { %v5572_v38 = vpop.xlane.xlu1 %5571 }
0x23a9   : > { %v5573_v27 = vsub.f32 %v5566_v24, %v5572_v38 }
0x23ab   : > { %v5574_v28 = vmul.f32 1.442695, %v5573_v27 }
0x23ac   : > { %v5735_v37 = vpop.permute.xlu1 %5734 }
0x23ad   : > { %12364 = vpow2.f32 %v5574_v28 }
0x23b0   : > { %v5733_v40 = vpop.permute.xlu1 %5732 }
0x23ba   : > { %v12365_v29 = vpop.eup %12364 }
0x23bb   : > { %v5576_v30 = vsel %vm2681_vm10, %v12365_v29, 0.0 }
0x23bc   : > { %5577 = vadd.xlane.f32.xlu0 %v5576_v30  ;;  %v5037_v30 = vadd.f32 %v5034_v26, %v14499_v43 }
0x23d2   : > { %5581 = vrot.lane.b32.xlu0 %v14555_v13, %s15298_s8 }
0x23da   : > { %v5487_v31 = vpop.f32.mrf.mxu1 }
0x23db   : > { %v5491_v58 = vadd.f32 %v10991_v55, %v5487_v31  ;;  %v5039_v31 = vsel %vm2490_vm5, %v5037_v30, 0.0 }
0x23dc   : > { %v11598_v32 = vpop.f32.mrf.mxu1 }
0x23dd   : > { %v6239_v32 = vld [vmem:[%s15302_s2 + $0x10] sm:$0xff] }
0x2445   : > { %v5578_v33 = vpop.xlane.xlu0 %5577 }
0x2446   : > { %12366 = vrcp.f32 %v5578_v33  ;;  %v6240_v33 = vld [vmem:[%s15302_s2 + $0x18] sm:$0xff] }
0x2449   : > { %v5582_v34 = vpop.permute.xlu0 %5581 }
0x244a   : > { %11605 = vmatpush3.msk.msra.mxu1 %vm2699_vm11, %v5582_v34  ;;  %v6237_v34 = vld [vmem:[%s15302_s2] sm:$0xff] }
0x244b   : > { %11614 = vmatprep.subr.mxu1 %v13519_v0 }
0x2453   : > { %v12367_v36 = vpop.eup %12366 }
0x2454   : > { %v5580_v39 = vmul.f32 %v12367_v36, %v12365_v29 }
0x2456   : > { %11607 = vmatmul.mubr.msk.f32.vlgmr.msra.gmra.mxu1 %vm2695_vm12, %v5580_v39 }
0x2457   : > { %11615 = vmatpush3.xpose.msk.msra.mxu1 %vm2605_vm9, %v5735_v37  ;;  %11616 = vmatprep.mubr.msk.f32.mxu1 %vm13520_vm0, %v13519_v0 }
0x2458   : > { %11624 = vmatprep.subr.mxu1 %v13519_v0 }
0x245a   : > { %11617 = vmatmul.mubr.msk.f32.vlgmr.msra.gmra.mxu1 %vm2605_vm9, %v5733_v40 }
0x245b   : > { %11626 = vmatprep.mubr.msk.f32.mxu1 %vm13520_vm0, %v13519_v0  ;;  %11625 = vmatpush3.msra.mxu1 %v5242_v4 }
0x245c   : > { %11634 = vmatprep.subr.mxu1 %v13519_v0 }
0x2516   : > { %v5654_v42 = vpop.f32.mrf.mxu1 }
0x2517   : > { %11612 = vmatmul.mubr.msk.f32.vlgmr.msra.gmra.mxu0 %vm2605_vm9, %v5654_v42 }
0x2518   : > { %v11608_v44 = vpop.f32.mrf.mxu1  ;;  %11621 = vmatprep.mubr.msk.f32.mxu0 %vm13520_vm0, %v13519_v0 }
0x251a   : > { %v5806_v46 = vpop.f32.mrf.mxu1 }
0x251b   : > { %v5810_v47 = vsel %vm2681_vm10, %v5806_v46, -inf }
0x251c   : > { %5811 = vmax.xlane.f32.xlu0 %v5810_v47  ;;  %v11618_v48 = vpop.f32.mrf.mxu1 }
0x251d   : > { %v11012_v48 = vld [vmem:[#allocation17] ss:$0 sm:$0xff] }
0x2532   : > { %5821 = vrot.lane.b32.xlu0 %v14555_v13, %s15281_s10 }
0x2536   : > { %5972 = vrot.lane.b32.xlu0 %v14534_v60, %s15285_s3 }
0x25a5   : > { %v5812_v49 = vpop.xlane.xlu0 %5811 }
0x25a6   : > { %v5813_v50 = vsub.f32 %v5806_v46, %v5812_v49 }
0x25a8   : > { %v5814_v51 = vmul.f32 1.442695, %v5813_v50 }
0x25a9   : > { %v5822_v52 = vpop.permute.xlu0 %5821 }
0x25aa   : > { %12368 = vpow2.f32 %v5814_v51  ;;  %11620 = vmatpush3.msk.msra.mxu0 %vm2699_vm11, %v5822_v52 }
0x25ab   : > { %11629 = vmatprep.subr.mxu0 %v13519_v0 }
0x25b7   : > { %v12369_v53 = vpop.eup %12368 }
0x25b8   : > { %v5816_v54 = vsel %vm2681_vm10, %v12369_v53, 0.0 }
0x25b9   : > { %5817 = vadd.xlane.f32.xlu1 %v5816_v54 }
0x25ca   : > { %5974 = vrot.lane.b32.xlu1 %v14527_v56, %s15286_s4  ;;  %v5973_v56 = vpop.permute.xlu0 %5972 }
0x25d7   : > { %v5727_v59 = vpop.f32.mrf.mxu0 }
0x25d8   : > { %v5731_v60 = vadd.f32 %v5727_v59, %v5491_v58 }
0x25d9   : > { %v11613_v62 = vpop.f32.mrf.mxu0 }
0x25da   : > { %v5038_v62 = vld [vmem:[%s15303_s11] sm:$0x3]  ;;  %s15304_s11 = sld [smem:[#allocation105_spill]] }
0x2642   : > { %v5818_v63 = vpop.xlane.xlu1 %5817 }
0x2643   : > { %12370 = vrcp.f32 %v5818_v63  ;;  %v5055_v63 = vrot.slane %v5038_v62, %v14341_v12 }
0x2646   : > { %v5975_v3 = vpop.permute.xlu1 %5974 }
0x2650   : > { %v12371_v1 = vpop.eup %12370 }
0x2651   : > { %v5820_v2 = vmul.f32 %v12371_v1, %v12369_v53 }
0x2653   : > { %11622 = vmatmul.mubr.msk.f32.vlgmr.msra.gmra.mxu0 %vm2695_vm12, %v5820_v2  ;;  %v6213_v2 = vld [vmem:[#allocation26] sm:$0x3] }
0x2654   : > { %11630 = vmatpush3.xpose.msk.msra.mxu0 %vm2605_vm9, %v5975_v3  ;;  %11631 = vmatprep.mubr.msk.f32.mxu0 %vm13520_vm0, %v13519_v0 }
0x2655   : > { %11639 = vmatprep.subr.mxu0 %v13519_v0 }
0x2657   : > { %11632 = vmatmul.mubr.msk.f32.vlgmr.msra.gmra.mxu0 %vm2605_vm9, %v5973_v56  ;;  %v5060_v56 = vrot.slane %v5038_v62, %v14344_v14 }
0x2658   : > { %11641 = vmatprep.mubr.msk.f32.mxu0 %vm13520_vm0, %v13519_v0  ;;  %11640 = vmatpush3.msra.mxu0 %v5243_v16 }
0x2659   : > { %11655 = vmatprep.subr.mxu0 %v13519_v0 }
0x2713   : > { %v5894_v5 = vpop.f32.mrf.mxu0 }
0x2714   : > { %11627 = vmatmul.mubr.msk.f32.vlgmr.msra.gmra.mxu1 %vm2605_vm9, %v5894_v5  ;;  %v6230_v5 = vrot.slane %v6213_v2, %v14341_v12 }
0x2715   : > { %v11623_v35 = vpop.f32.mrf.mxu0  ;;  %11636 = vmatprep.mubr.msk.f32.mxu1 %vm13520_vm0, %v13519_v0 }
0x2717   : > { %v6046_v6 = vpop.f32.mrf.mxu0 }
0x2718   : > { %v6050_v7 = vsel %vm2681_vm10, %v6046_v6, -inf }
0x2719   : > { %6051 = vmax.xlane.f32.xlu1 %v6050_v7  ;;  %v11633_v57 = vpop.f32.mrf.mxu0 }
0x271a   : > { %v6235_v57 = vrot.slane %v6213_v2, %v14344_v14 }
0x27a2   : > { %v6052_v8 = vpop.xlane.xlu1 %6051 }
0x27a3   : > { %v6053_v9 = vsub.f32 %v6046_v6, %v6052_v8 }
0x27a5   : > { %v6054_v10 = vmul.f32 1.442695, %v6053_v9 }
0x27a7   : > { %12372 = vpow2.f32 %v6054_v10 }
0x27b4   : > { %v12373_v11 = vpop.eup %12372 }
0x27b5   : > { %v6056_v15 = vsel %vm2681_vm10, %v12373_v11, 0.0 }
0x27b6   : > { %6057 = vadd.xlane.f32.xlu0 %v6056_v15 }
0x27cc   : > { %6061 = vrot.lane.b32.xlu0 %v14555_v13, %s15285_s3 }
0x27d0   : > { %6330 = vrot.lane.b32.xlu0 %v6239_v32, %s15297_s23 }
0x27d4   : > { %v5967_v17 = vpop.f32.mrf.mxu1  ;;  %6328 = vrot.lane.b32.xlu0 %v6238_v61, %s15297_s23 }
0x27d5   : > { %v5971_v18 = vadd.f32 %v5967_v17, %v5731_v60 }
0x27d6   : > { %v11628_v19 = vpop.f32.mrf.mxu1 }
0x27d8   : > { %6326 = vrot.lane.b32.xlu0 %v6237_v34, %s15297_s23 }
0x27dc   : > { %6338 = vrot.lane.b32.xlu0 %v11012_v48, %s15297_s23 }
0x283f   : > { %v6058_v20 = vpop.xlane.xlu0 %6057 }
0x2840   : > { %12374 = vrcp.f32 %v6058_v20 }
0x2843   : > { %v6062_v21 = vpop.permute.xlu0 %6061 }
0x2844   : > { %11635 = vmatpush3.msk.msra.mxu1 %vm2699_vm11, %v6062_v21 }
0x2845   : > { %11644 = vmatprep.subr.mxu1 %v13519_v0 }
0x2847   : > { %v6331_v50 = vpop.permute.xlu0 %6330 }
0x284b   : > { %v6329_v55 = vpop.permute.xlu0 %6328 }
0x284d   : > { %v12375_v22 = vpop.eup %12374 }
0x284e   : > { %v6060_v23 = vmul.f32 %v12375_v22, %v12373_v11 }
0x284f   : > { %v6327_v60 = vpop.permute.xlu0 %6326 }
0x2850   : > { %11637 = vmatmul.mubr.msk.f32.vlgmr.msra.gmra.mxu1 %vm2695_vm12, %v6060_v23 }
0x2851   : > { %11652 = vmatprep.mubr.msk.f32.mxu1 %vm13520_vm0, %v13519_v0  ;;  %11645 = vmatpush3.msra.mxu1 %v6240_v33 }
0x2852   : > { %11646 = vmatprep.subr.mxu1 %v13519_v0 }
0x2853   : > { %11647 = vmatpush3.msra.mxu1 %v6239_v32  ;;  %v6339_v11 = vpop.permute.xlu0 %6338 }
0x2854   : > { %11648 = vmatprep.subr.mxu1 %v13519_v0 }
0x2855   : > { %11649 = vmatpush3.msra.mxu1 %v6238_v61 }
0x2856   : > { %11650 = vmatprep.subr.mxu1 %v13519_v0 }
0x2857   : > { %11651 = vmatpush3.msra.mxu1 %v6237_v34 }
0x2858   : > { %11666 = vmatprep.subr.mxu1 %v13519_v0 }
0x2910   : > { %v6134_v13 = vpop.f32.mrf.mxu1 }
0x2911   : > { %11642 = vmatmul.mubr.msk.f32.vlgmr.msra.gmra.mxu0 %vm2605_vm9, %v6134_v13 }
0x2912   : > { %v11638_v24 = vpop.f32.mrf.mxu1  ;;  %11663 = vmatprep.mubr.msk.f32.mxu0 %vm13520_vm0, %v13519_v0 }
0x29d1   : > { %v6207_v38 = vpop.f32.mrf.mxu0 }
0x29d2   : > { %v6211_v27 = vadd.f32 %v6207_v38, %v5971_v18 }
0x29d3   : > { %v11643_v28 = vpop.f32.mrf.mxu0 }
0x29d4   : > { %v6214_v29 = vsel %vm2490_vm5, %v6211_v27, 0.0 }
0x29d5   : > { %6215 = vadd.xlane.f32.xlu1 %v6214_v29 }
0x29d9   : > { %5040 = vadd.xlane.f32.xlu1 %v5039_v31 }
0x2a5e   : > { %v6216_v43 = vpop.xlane.xlu1 %6215 }
0x2a5f   : > { %v6217_v36 = vmul.f32 0.03125, %v6216_v43 }
0x2a61   : > { %v6218_v40 = vsub.f32 %v6211_v27, %v6217_v36 }
0x2a62   : > { %v5041_v37 = vpop.xlane.xlu1 %5040 }
0x2a63   : > { %v5042_v39 = vmul.f32 0.03125, %v5041_v37  ;;  %v6219_v46 = vmul.f32 %v6218_v40, %v6218_v40 }
0x2a65   : > { %v5043_v41 = vsub.f32 %v5037_v30, %v5042_v39  ;;  %v6220_v47 = vsel %vm2490_vm5, %v6219_v46, 0.0 }
0x2a67   : > { %v5044_v42 = vmul.f32 %v5043_v41, %v5043_v41 }
0x2a69   : > { %v5045_v44 = vsel %vm2490_vm5, %v5044_v42, 0.0 }
0x2a6a   : > { %5046 = vadd.xlane.f32.xlu1 %v5045_v44 }
0x2a6e   : > { %6221 = vadd.xlane.f32.xlu1 %v6220_v47 }
0x2a7f   : > { %6332 = vrot.lane.b32.xlu1 %v6240_v33, %s15297_s23  ;;  %v6414_v33 = vld [vmem:[#allocation19] sm:$0xff] }
0x2af3   : > { %v5047_v49 = vpop.xlane.xlu1 %5046 }
0x2af4   : > { %v5048_v51 = vmul.f32 0.03125, %v5047_v49 }
0x2af6   : > { %v5049_v52 = vadd.f32 1e-05, %v5048_v51 }
0x2af7   : > { %v6222_v53 = vpop.xlane.xlu1 %6221 }
0x2af8   : > { %12376 = vrsqrt.f32 %v5049_v52  ;;  %v6223_v54 = vmul.f32 0.03125, %v6222_v53 }
0x2afa   : > { %v6224_v58 = vadd.f32 1e-05, %v6223_v54  ;;  %v6415_v54 = vld [vmem:[#allocation19 + $0x8] sm:$0xff] }
0x2afb   : > { %v6333_v59 = vpop.permute.xlu1 %6332 }
0x2afc   : > { %12378 = vrsqrt.f32 %v6224_v58  ;;  %11656 = vmatpush3.msra.mxu0 %v6333_v59 }
0x2afd   : > { %11657 = vmatprep.subr.mxu0 %v13519_v0 }
0x2afe   : > { %11658 = vmatpush3.msra.mxu0 %v6331_v50 }
0x2aff   : > { %11659 = vmatprep.subr.mxu0 %v13519_v0 }
0x2b00   : > { %11660 = vmatpush3.msra.mxu0 %v6329_v55 }
0x2b01   : > { %11661 = vmatprep.subr.mxu0 %v13519_v0 }
0x2b02   : > { %11662 = vmatpush3.msra.mxu0 %v6327_v60 }
0x2b03   : > { %11671 = vmatprep.subr.mxu0 %v13519_v0 }
0x2b05   : > { %v12377_v1 = vpop.eup %12376 }
0x2b06   : > { %v5051_v3 = vmul.f32 %v12377_v1, %v5043_v41 }
0x2b08   : > { %v5056_v4 = vmul.f32 %v5055_v63, %v5051_v3 }
0x2b09   : > { %v12379_v35 = vpop.eup %12378 }
0x2b0a   : > { %v6226_v6 = vmul.f32 %v12379_v35, %v6218_v40  ;;  %v14663_v7 = vadd.f32 %v5060_v56, %v5056_v4  ;;  %v11015_v4 = vld [vmem:[#allocation20] ss:$0 sm:$0xff] }
0x2b0c   : > { %11664 = vmatmul.mubr.msk.f32.vlgmr.msra.gmra.mxu0 %vm2515_vm8, %v14663_v7  ;;  %v6231_v8 = vmul.f32 %v6230_v5, %v6226_v6 }
0x2b0d   : > { %11673 = vmatprep.mubr.msk.f32.mxu0 %vm13520_vm0, %v13519_v0 }
0x2b0e   : > { %v14670_v9 = vadd.f32 %v6235_v57, %v6231_v8 }
0x2b10   : > { %v6242_v10 = vadd.f32 %v14670_v9, %v14509_v45 }
0x2b12   : > { %11653 = vmatmul.mubr.msk.f32.vlgmr.msra.gmra.mxu1 %vm2515_vm8, %v6242_v10 }
0x2b13   : > { %11668 = vmatprep.mubr.msk.f32.mxu1 %vm13520_vm0, %v13519_v0 }
0x2bcc   : > { %v6410_v15 = vpop.f32.mrf.mxu0 }
0x2bcd   : > { %v14677_v16 = vadd.f32 %v6410_v15, %v6339_v11 }
0x2bce   : > { %v11665_v17 = vpop.f32.mrf.mxu0 }
0x2bcf   : > { %11667 = vmatpush3.xpose.msk.msra.mxu1 %vm2605_vm9, %v14677_v16 }
0x2bd0   : > { %11676 = vmatprep.subr.mxu1 %v13519_v0 }
0x2bd2   : > { %v6318_v18 = vpop.f32.mrf.mxu1 }
0x2bd3   : > { %v6319_v19 = vadd.f32 %v11012_v48, %v6318_v18 }
0x2bd4   : > { %v11654_v20 = vpop.f32.mrf.mxu1 }
0x2bd5   : > { %v14682_v21 = vmul.f32 0.35355338, %v6319_v19  ;;  %v6416_v19 = vld [vmem:[#allocation19 + $0x10] sm:$0xff] }
0x2bd7   : > { %11669 = vmatmul.mubr.msk.f32.vlgmr.msra.gmra.mxu1 %vm2605_vm9, %v14682_v21 }
0x2bd8   : > { %11678 = vmatprep.mubr.msk.f32.mxu1 %vm13520_vm0, %v13519_v0  ;;  %11677 = vmatpush3.msra.mxu1 %v6414_v33 }
0x2bd9   : > { %11686 = vmatprep.subr.mxu1 %v13519_v0 }
0x2c97   : > { %v6499_v45 = vpop.f32.mrf.mxu1 }
0x2c98   : > { %v6503_v22 = vsel %vm2681_vm10, %v6499_v45, -inf }
0x2c99   : > { %6504 = vmax.xlane.f32.xlu1 %v6503_v22  ;;  %v11670_v23 = vpop.f32.mrf.mxu1 }
0x2caa   : > { %6667 = vrot.lane.b32.xlu1 %v14677_v16, %s15298_s8 }
0x2cae   : > { %6665 = vrot.lane.b32.xlu1 %v14682_v21, %s15298_s8 }
0x2d22   : > { %v6505_v13 = vpop.xlane.xlu1 %6504 }
0x2d23   : > { %v6506_v24 = vsub.f32 %v6499_v45, %v6505_v13 }
0x2d25   : > { %v6507_v25 = vmul.f32 1.442695, %v6506_v24 }
0x2d26   : > { %v6668_v30 = vpop.permute.xlu1 %6667 }
0x2d27   : > { %12380 = vpow2.f32 %v6507_v25 }
0x2d2a   : > { %v6666_v32 = vpop.permute.xlu1 %6665 }
0x2d34   : > { %v12381_v26 = vpop.eup %12380 }
0x2d35   : > { %v6509_v38 = vsel %vm2681_vm10, %v12381_v26, 0.0 }
0x2d36   : > { %6510 = vadd.xlane.f32.xlu0 %v6509_v38 }
0x2d4c   : > { %6514 = vrot.lane.b32.xlu0 %v14677_v16, %s15297_s23 }
0x2dbf   : > { %v6511_v27 = vpop.xlane.xlu0 %6510 }
0x2dc0   : > { %12382 = vrcp.f32 %v6511_v27 }
0x2dc3   : > { %v6515_v28 = vpop.permute.xlu0 %6514 }
0x2dc4   : > { %11672 = vmatpush3.msk.msra.mxu0 %vm2699_vm11, %v6515_v28  ;;  %v6417_v28 = vld [vmem:[#allocation19 + $0x18] sm:$0xff] }
0x2dc5   : > { %11681 = vmatprep.subr.mxu0 %v13519_v0 }
0x2dcd   : > { %v12383_v29 = vpop.eup %12382 }
0x2dce   : > { %v6513_v31 = vmul.f32 %v12383_v29, %v12381_v26 }
0x2dd0   : > { %11674 = vmatmul.mubr.msk.f32.vlgmr.msra.gmra.mxu0 %vm2695_vm12, %v6513_v31 }
0x2dd1   : > { %11682 = vmatpush3.xpose.msk.msra.mxu0 %vm2605_vm9, %v6668_v30  ;;  %11683 = vmatprep.mubr.msk.f32.mxu0 %vm13520_vm0, %v13519_v0 }
0x2dd2   : > { %11691 = vmatprep.subr.mxu0 %v13519_v0 }
0x2dd4   : > { %11684 = vmatmul.mubr.msk.f32.vlgmr.msra.gmra.mxu0 %vm2605_vm9, %v6666_v32 }
0x2dd5   : > { %11693 = vmatprep.mubr.msk.f32.mxu0 %vm13520_vm0, %v13519_v0  ;;  %11692 = vmatpush3.msra.mxu0 %v6415_v54 }
0x2dd6   : > { %11701 = vmatprep.subr.mxu0 %v13519_v0 }
0x2e90   : > { %v6587_v61 = vpop.f32.mrf.mxu0 }
0x2e91   : > { %11679 = vmatmul.mubr.msk.f32.vlgmr.msra.gmra.mxu1 %vm2605_vm9, %v6587_v61 }
0x2e92   : > { %v11675_v34 = vpop.f32.mrf.mxu0  ;;  %11688 = vmatprep.mubr.msk.f32.mxu1 %vm13520_vm0, %v13519_v0 }
0x2e94   : > { %v6739_v43 = vpop.f32.mrf.mxu0 }
0x2e95   : > { %v6743_v36 = vsel %vm2681_vm10, %v6739_v43, -inf }
0x2e96   : > { %6744 = vmax.xlane.f32.xlu0 %v6743_v36  ;;  %v11685_v37 = vpop.f32.mrf.mxu0 }
0x2eac   : > { %6754 = vrot.lane.b32.xlu0 %v14677_v16, %s15300_s7 }
0x2eb0   : > { %6905 = vrot.lane.b32.xlu0 %v14682_v21, %s15281_s10 }
0x2f1f   : > { %v6745_v39 = vpop.xlane.xlu0 %6744 }
0x2f20   : > { %v6746_v40 = vsub.f32 %v6739_v43, %v6745_v39 }
0x2f22   : > { %v6747_v41 = vmul.f32 1.442695, %v6746_v40 }
0x2f23   : > { %v6755_v42 = vpop.permute.xlu0 %6754 }
0x2f24   : > { %12384 = vpow2.f32 %v6747_v41  ;;  %11687 = vmatpush3.msk.msra.mxu1 %vm2699_vm11, %v6755_v42 }
0x2f25   : > { %11696 = vmatprep.subr.mxu1 %v13519_v0 }
0x2f27   : > { %v6906_v53 = vpop.permute.xlu0 %6905 }
0x2f31   : > { %v12385_v44 = vpop.eup %12384 }
0x2f32   : > { %v6749_v46 = vsel %vm2681_vm10, %v12385_v44, 0.0 }
0x2f33   : > { %6750 = vadd.xlane.f32.xlu1 %v6749_v46 }
0x2f44   : > { %6907 = vrot.lane.b32.xlu1 %v14677_v16, %s15281_s10 }
0x2f51   : > { %v6660_v47 = vpop.f32.mrf.mxu1 }
0x2f52   : > { %v6664_v5 = vadd.f32 %v11015_v4, %v6660_v47  ;;  %v11036_v4 = vld [vmem:[#allocation22] ss:$0 sm:$0xff] }
0x2f53   : > { %v11680_v48 = vpop.f32.mrf.mxu1 }
0x2f54   : > { %v7413_v48 = vld [vmem:[%s15304_s11 + $0x18] sm:$0xff] }
0x2fbc   : > { %v6751_v49 = vpop.xlane.xlu1 %6750 }
0x2fbd   : > { %12386 = vrcp.f32 %v6751_v49  ;;  %v7412_v49 = vld [vmem:[%s15304_s11 + $0x10] sm:$0xff] }
0x2fc0   : > { %v6908_v52 = vpop.permute.xlu1 %6907 }
0x2fca   : > { %v12387_v50 = vpop.eup %12386 }
0x2fcb   : > { %v6753_v51 = vmul.f32 %v12387_v50, %v12385_v44  ;;  %v7411_v50 = vld [vmem:[%s15304_s11 + $0x8] sm:$0xff] }
0x2fcd   : > { %11689 = vmatmul.mubr.msk.f32.vlgmr.msra.gmra.mxu1 %vm2695_vm12, %v6753_v51  ;;  %v7498_v51 = vld [vmem:[#allocation23 + $0x18] sm:$0xff] }
0x2fce   : > { %11697 = vmatpush3.xpose.msk.msra.mxu1 %vm2605_vm9, %v6908_v52  ;;  %11698 = vmatprep.mubr.msk.f32.mxu1 %vm13520_vm0, %v13519_v0 }
0x2fcf   : > { %11706 = vmatprep.subr.mxu1 %v13519_v0 }
0x2fd1   : > { %11699 = vmatmul.mubr.msk.f32.vlgmr.msra.gmra.mxu1 %vm2605_vm9, %v6906_v53 }
0x2fd2   : > { %11708 = vmatprep.mubr.msk.f32.mxu1 %vm13520_vm0, %v13519_v0  ;;  %11707 = vmatpush3.msra.mxu1 %v6416_v19 }
0x2fd3   : > { %11716 = vmatprep.subr.mxu1 %v13519_v0 }
0x308d   : > { %v6827_v55 = vpop.f32.mrf.mxu1 }
0x308e   : > { %11694 = vmatmul.mubr.msk.f32.vlgmr.msra.gmra.mxu0 %vm2605_vm9, %v6827_v55  ;;  %v7386_v55 = vld [vmem:[#allocation28] sm:$0x3] }
0x308f   : > { %v11690_v58 = vpop.f32.mrf.mxu1  ;;  %11703 = vmatprep.mubr.msk.f32.mxu0 %vm13520_vm0, %v13519_v0 }
0x3090   : > { %v7403_v58 = vrot.slane %v7386_v55, %v14341_v12 }
0x3091   : > { %v6979_v59 = vpop.f32.mrf.mxu1 }
0x3092   : > { %v6983_v60 = vsel %vm2681_vm10, %v6979_v59, -inf }
0x3093   : > { %6984 = vmax.xlane.f32.xlu1 %v6983_v60  ;;  %v11700_v62 = vpop.f32.mrf.mxu1 }
0x3094   : > { %v7408_v62 = vrot.slane %v7386_v55, %v14344_v14 }
0x30a4   : > { %7147 = vrot.lane.b32.xlu1 %v14677_v16, %s15285_s3 }
0x30a8   : > { %7145 = vrot.lane.b32.xlu1 %v14682_v21, %s15285_s3 }
0x311c   : > { %v6985_v63 = vpop.xlane.xlu1 %6984 }
0x311d   : > { %v6986_v1 = vsub.f32 %v6979_v59, %v6985_v63 }
0x311f   : > { %v6987_v2 = vmul.f32 1.442695, %v6986_v1 }
0x3120   : > { %v7148_v15 = vpop.permute.xlu1 %7147 }
0x3121   : > { %12388 = vpow2.f32 %v6987_v2  ;;  %v7497_v2 = vld [vmem:[#allocation23 + $0x10] sm:$0xff] }
0x3124   : > { %v7146_v18 = vpop.permute.xlu1 %7145 }
0x312e   : > { %v12389_v3 = vpop.eup %12388 }
0x312f   : > { %v6989_v56 = vsel %vm2681_vm10, %v12389_v3, 0.0 }
0x3130   : > { %6990 = vadd.xlane.f32.xlu0 %v6989_v56  ;;  %v7495_v56 = vld [vmem:[#allocation23] sm:$0xff] }
0x3146   : > { %6994 = vrot.lane.b32.xlu0 %v14677_v16, %s15282_s1 }
0x314e   : > { %v6900_v35 = vpop.f32.mrf.mxu0 }
0x314f   : > { %v6904_v6 = vadd.f32 %v6900_v35, %v6664_v5 }
0x3150   : > { %v11695_v57 = vpop.f32.mrf.mxu0 }
0x31b9   : > { %v6991_v8 = vpop.xlane.xlu0 %6990 }
0x31ba   : > { %12390 = vrcp.f32 %v6991_v8  ;;  %v11038_v8 = vld [vmem:[#allocation25] ss:$0 sm:$0xff] }
0x31bd   : > { %v6995_v10 = vpop.permute.xlu0 %6994 }
0x31be   : > { %11702 = vmatpush3.msk.msra.mxu0 %vm2699_vm11, %v6995_v10 }
0x31bf   : > { %11711 = vmatprep.subr.mxu0 %v13519_v0 }
0x31c7   : > { %v12391_v11 = vpop.eup %12390 }
0x31c8   : > { %v6993_v17 = vmul.f32 %v12391_v11, %v12389_v3  ;;  %v7496_v3 = vld [vmem:[#allocation23 + $0x8] sm:$0xff] }
0x31ca   : > { %11704 = vmatmul.mubr.msk.f32.vlgmr.msra.gmra.mxu0 %vm2695_vm12, %v6993_v17 }
0x31cb   : > { %11712 = vmatpush3.xpose.msk.msra.mxu0 %vm2605_vm9, %v7148_v15  ;;  %11713 = vmatprep.mubr.msk.f32.mxu0 %vm13520_vm0, %v13519_v0 }
0x31cc   : > { %11721 = vmatprep.subr.mxu0 %v13519_v0 }
0x31ce   : > { %11714 = vmatmul.mubr.msk.f32.vlgmr.msra.gmra.mxu0 %vm2605_vm9, %v7146_v18 }
0x31cf   : > { %11723 = vmatprep.mubr.msk.f32.mxu0 %vm13520_vm0, %v13519_v0  ;;  %11722 = vmatpush3.msra.mxu0 %v6417_v28  ;;  %v7580_v28 = vld [vmem:[#allocation29] sm:$0x3] }
0x31d0   : > { %11737 = vmatprep.subr.mxu0 %v13519_v0 }
0x328a   : > { %v7067_v20 = vpop.f32.mrf.mxu0 }
0x328b   : > { %11709 = vmatmul.mubr.msk.f32.vlgmr.msra.gmra.mxu1 %vm2605_vm9, %v7067_v20 }
0x328c   : > { %v11705_v21 = vpop.f32.mrf.mxu0  ;;  %11718 = vmatprep.mubr.msk.f32.mxu1 %vm13520_vm0, %v13519_v0 }
0x328e   : > { %v7219_v45 = vpop.f32.mrf.mxu0 }
0x328f   : > { %v7223_v22 = vsel %vm2681_vm10, %v7219_v45, -inf }
0x3290   : > { %7224 = vmax.xlane.f32.xlu0 %v7223_v22  ;;  %v11715_v23 = vpop.f32.mrf.mxu0 }
0x3291   : > { %v7607_v23 = vld [vmem:[#allocation31 + $0x18] sm:$0xff] }
0x32a6   : > { %7234 = vrot.lane.b32.xlu0 %v14677_v16, %s15286_s4 }
0x3319   : > { %v7225_v13 = vpop.xlane.xlu0 %7224 }
0x331a   : > { %v7226_v24 = vsub.f32 %v7219_v45, %v7225_v13  ;;  %v7606_v13 = vld [vmem:[#allocation31 + $0x10] sm:$0xff] }
0x331c   : > { %v7227_v25 = vmul.f32 1.442695, %v7226_v24  ;;  %v7605_v24 = vld [vmem:[#allocation31 + $0x8] sm:$0xff] }
0x331d   : > { %v7235_v26 = vpop.permute.xlu0 %7234 }
0x331e   : > { %12392 = vpow2.f32 %v7227_v25  ;;  %11717 = vmatpush3.msk.msra.mxu1 %vm2699_vm11, %v7235_v26  ;;  %v7604_v25 = vld [vmem:[#allocation31] sm:$0xff] }
0x331f   : > { %11726 = vmatprep.subr.mxu1 %v13519_v0 }
0x332b   : > { %v12393_v38 = vpop.eup %12392 }
0x332c   : > { %v7229_v27 = vsel %vm2681_vm10, %v12393_v38, 0.0 }
0x332d   : > { %7230 = vadd.xlane.f32.xlu1 %v7229_v27 }
0x334b   : > { %v7140_v29 = vpop.f32.mrf.mxu1 }
0x334c   : > { %v7144_v30 = vadd.f32 %v7140_v29, %v6904_v6  ;;  %v7597_v29 = vrot.slane %v7580_v28, %v14341_v12 }
0x334d   : > { %v11710_v16 = vpop.f32.mrf.mxu1 }
0x33b6   : > { %v7231_v31 = vpop.xlane.xlu1 %7230 }
0x33b7   : > { %12394 = vrcp.f32 %v7231_v31  ;;  %v7602_v31 = vrot.slane %v7580_v28, %v14344_v14 }
0x33c4   : > { %v12395_v32 = vpop.eup %12394 }
0x33c5   : > { %v7233_v33 = vmul.f32 %v12395_v32, %v12393_v38 }
0x33c7   : > { %11719 = vmatmul.mubr.msk.f32.vlgmr.msra.gmra.mxu1 %vm2695_vm12, %v7233_v33 }
0x33c8   : > { %11734 = vmatprep.mubr.msk.f32.mxu1 %vm13520_vm0, %v13519_v0  ;;  %11727 = vmatpush3.msra.mxu1 %v7413_v48 }
0x33c9   : > { %11728 = vmatprep.subr.mxu1 %v13519_v0 }
0x33ca   : > { %11729 = vmatpush3.msra.mxu1 %v7412_v49 }
0x33cb   : > { %11730 = vmatprep.subr.mxu1 %v13519_v0 }
0x33cc   : > { %11731 = vmatpush3.msra.mxu1 %v7411_v50 }
0x33cd   : > { %11732 = vmatprep.subr.mxu1 %v13519_v0 }
0x3487   : > { %v7307_v61 = vpop.f32.mrf.mxu1 }
0x3488   : > { %11724 = vmatmul.mubr.msk.f32.vlgmr.msra.gmra.mxu0 %vm2605_vm9, %v7307_v61  ;;  %v14802_v61 = vld [vmem:[%s15295_s6] sm:$0xf] }
0x3489   : > { %v11720_v34 = vpop.f32.mrf.mxu1  ;;  %11745 = vmatprep.mubr.msk.f32.mxu0 %vm13520_vm0, %v13519_v0  ;;  %11738 = vmatpush3.msra.mxu0 %v7498_v51 }
0x348a   : > { %11739 = vmatprep.subr.mxu0 %v13519_v0 }
0x348b   : > { %11740 = vmatpush3.msra.mxu0 %v7497_v2 }
0x348c   : > { %11741 = vmatprep.subr.mxu0 %v13519_v0 }
0x348d   : > { %11742 = vmatpush3.msra.mxu0 %v7496_v3 }
0x348e   : > { %11743 = vmatprep.subr.mxu0 %v13519_v0 }
0x348f   : > { %11744 = vmatpush3.msra.mxu0 %v7495_v56  ;;  %v7781_v56 = vld [vmem:[#allocation34] sm:$0xff] }
0x3490   : > { %11759 = vmatprep.subr.mxu0 %v13519_v0 }
0x3548   : > { %v7380_v43 = vpop.f32.mrf.mxu0 }
0x3549   : > { %v7384_v36 = vadd.f32 %v7380_v43, %v7144_v30 }
0x354a   : > { %v11725_v37 = vpop.f32.mrf.mxu0 }
0x354b   : > { %v7385_v39 = vadd.f32 %v7384_v36, %v14670_v9  ;;  %v7410_v9 = vld [vmem:[%s15304_s11] sm:$0xff] }
0x354c   : > { %11733 = vmatpush3.msra.mxu1 %v7410_v9  ;;  %v11040_v36 = vld [vmem:[#allocation32] ss:$0 sm:$0xff] }
0x354d   : > { %v7387_v40 = vsel %vm2490_vm5, %v7385_v39, 0.0  ;;  %11748 = vmatprep.subr.mxu1 %v13519_v0 }
0x354e   : > { %7388 = vadd.xlane.f32.xlu1 %v7387_v40 }
0x35d7   : > { %v7389_v41 = vpop.xlane.xlu1 %7388 }
0x35d8   : > { %v7390_v42 = vmul.f32 0.03125, %v7389_v41 }
0x35da   : > { %v7391_v44 = vsub.f32 %v7385_v39, %v7390_v42 }
0x35dc   : > { %v7392_v46 = vmul.f32 %v7391_v44, %v7391_v44 }
0x35de   : > { %v7393_v47 = vsel %vm2490_vm5, %v7392_v46, 0.0 }
0x35df   : > { %7394 = vadd.xlane.f32.xlu1 %v7393_v47 }
0x3668   : > { %v7395_v52 = vpop.xlane.xlu1 %7394 }
0x3669   : > { %v7396_v53 = vmul.f32 0.03125, %v7395_v52 }
0x366b   : > { %v7397_v54 = vadd.f32 1e-05, %v7396_v53 }
0x366d   : > { %12396 = vrsqrt.f32 %v7397_v54 }
0x367a   : > { %v12397_v59 = vpop.eup %12396 }
0x367b   : > { %v7399_v60 = vmul.f32 %v12397_v59, %v7391_v44 }
0x367d   : > { %v7404_v63 = vmul.f32 %v7403_v58, %v7399_v60 }
0x367f   : > { %v7409_v1 = vadd.f32 %v7408_v62, %v7404_v63 }
0x3681   : > { %11735 = vmatmul.mubr.msk.f32.vlgmr.msra.gmra.mxu1 %vm2515_vm8, %v7409_v1 }
0x3682   : > { %11756 = vmatprep.mubr.msk.f32.mxu1 %vm13520_vm0, %v13519_v0  ;;  %11749 = vmatpush3.msra.mxu1 %v7607_v23 }
0x3683   : > { %11750 = vmatprep.subr.mxu1 %v13519_v0 }
0x3684   : > { %11751 = vmatpush3.msra.mxu1 %v7606_v13 }
0x3685   : > { %11752 = vmatprep.subr.mxu1 %v13519_v0 }
0x3686   : > { %11753 = vmatpush3.msra.mxu1 %v7605_v24 }
0x3687   : > { %11754 = vmatprep.subr.mxu1 %v13519_v0 }
0x3688   : > { %11755 = vmatpush3.msra.mxu1 %v7604_v25 }
0x3689   : > { %11770 = vmatprep.subr.mxu1 %v13519_v0 }
0x3741   : > { %v7490_v5 = vpop.f32.mrf.mxu1 }
0x3742   : > { %v7491_v35 = vadd.f32 %v11036_v4, %v7490_v5 }
0x3743   : > { %v11736_v6 = vpop.f32.mrf.mxu1 }
0x3744   : > { %v7494_v57 = vmax.f32 %v7491_v35, 0.0 }
0x3746   : > { %11746 = vmatmul.mubr.msk.f32.vlgmr.msra.gmra.mxu0 %vm2515_vm8, %v7494_v57 }
0x3747   : > { %11767 = vmatprep.mubr.msk.f32.mxu0 %vm13520_vm0, %v13519_v0 }
0x3806   : > { %v7575_v10 = vpop.f32.mrf.mxu0 }
0x3807   : > { %v7576_v11 = vadd.f32 %v11038_v8, %v7575_v10 }
0x3808   : > { %v11747_v15 = vpop.f32.mrf.mxu0 }
0x3809   : > { %v7579_v17 = vadd.f32 %v7576_v11, %v7409_v1 }
0x380b   : > { %v7581_v18 = vsel %vm2490_vm5, %v7579_v17, 0.0 }
0x380c   : > { %7582 = vadd.xlane.f32.xlu1 %v7581_v18 }
0x3895   : > { %v7583_v19 = vpop.xlane.xlu1 %7582 }
0x3896   : > { %v7584_v20 = vmul.f32 0.03125, %v7583_v19 }
0x3898   : > { %v7585_v21 = vsub.f32 %v7579_v17, %v7584_v20 }
0x389a   : > { %v7586_v45 = vmul.f32 %v7585_v21, %v7585_v21 }
0x389c   : > { %v7587_v22 = vsel %vm2490_vm5, %v7586_v45, 0.0 }
0x389d   : > { %7588 = vadd.xlane.f32.xlu1 %v7587_v22 }
0x38ae   : > { %7699 = vrot.lane.b32.xlu1 %v7607_v23, %s15294_s0 }
0x3926   : > { %v7589_v26 = vpop.xlane.xlu1 %7588 }
0x3927   : > { %v7590_v38 = vmul.f32 0.03125, %v7589_v26 }
0x3929   : > { %v7591_v27 = vadd.f32 1e-05, %v7590_v38 }
0x392a   : > { %v7700_v43 = vpop.permute.xlu1 %7699 }
0x392b   : > { %12398 = vrsqrt.f32 %v7591_v27  ;;  %11760 = vmatpush3.msra.mxu0 %v7700_v43  ;;  %v11043_v43 = vld [vmem:[#allocation35] ss:$0 sm:$0xff] }
0x392c   : > { %11761 = vmatprep.subr.mxu0 %v13519_v0 }
0x3938   : > { %v12399_v30 = vpop.eup %12398 }
0x3939   : > { %v7593_v16 = vmul.f32 %v12399_v30, %v7585_v21 }
0x393b   : > { %v7598_v32 = vmul.f32 %v7597_v29, %v7593_v16 }
0x393d   : > { %v14799_v33 = vadd.f32 %v7602_v31, %v7598_v32 }
0x393f   : > { %v7609_v34 = vadd.f32 %v14802_v61, %v14799_v33 }
0x3941   : > { %11757 = vmatmul.mubr.msk.f32.vlgmr.msra.gmra.mxu1 %vm2515_vm8, %v7609_v34 }
0x3942   : > { %11772 = vmatprep.mubr.msk.f32.mxu1 %vm13520_vm0, %v13519_v0 }
0x3a01   : > { %v7685_v37 = vpop.f32.mrf.mxu1 }
0x3a02   : > { %v14810_v39 = vadd.f32 %v11040_v36, %v7685_v37 }
0x3a03   : > { %v11758_v40 = vpop.f32.mrf.mxu1 }
0x3a04   : > { %7795 = vrot.lane.b32.xlu0 %v14810_v39, %s15297_s23  ;;  %v14819_v42 = vmul.f32 0.35355338, %v14810_v39 }
0x3a08   : > { %7697 = vrot.lane.b32.xlu0 %v7606_v13, %s15294_s0 }
0x3a0c   : > { %7695 = vrot.lane.b32.xlu0 %v7605_v24, %s15294_s0  ;;  %v7782_v24 = vld [vmem:[#allocation34 + $0x8] sm:$0xff] }
0x3a10   : > { %7693 = vrot.lane.b32.xlu0 %v7604_v25, %s15294_s0 }
0x3a76   : > { %v7796_v41 = vpop.permute.xlu0 %7795 }
0x3a77   : > { %11771 = vmatpush3.xpose.msk.msra.mxu1 %vm2605_vm9, %v7796_v41 }
0x3a78   : > { %11780 = vmatprep.subr.mxu1 %v13519_v0 }
0x3a7a   : > { %v7698_v44 = vpop.permute.xlu0 %7697  ;;  %11773 = vmatmul.mubr.msk.f32.vlgmr.msra.gmra.mxu1 %vm2605_vm9, %v14819_v42 }
0x3a7b   : > { %11762 = vmatpush3.msra.mxu0 %v7698_v44  ;;  %11782 = vmatprep.mubr.msk.f32.mxu1 %vm13520_vm0, %v13519_v0 }
0x3a7c   : > { %11763 = vmatprep.subr.mxu0 %v13519_v0  ;;  %11781 = vmatpush3.msra.mxu1 %v7781_v56 }
0x3a7d   : > { %11790 = vmatprep.subr.mxu1 %v13519_v0 }
0x3a7e   : > { %v7696_v46 = vpop.permute.xlu0 %7695 }
0x3a7f   : > { %11764 = vmatpush3.msra.mxu0 %v7696_v46 }
0x3a80   : > { %11765 = vmatprep.subr.mxu0 %v13519_v0 }
0x3a82   : > { %v7694_v47 = vpop.permute.xlu0 %7693 }
0x3a83   : > { %11766 = vmatpush3.msra.mxu0 %v7694_v47 }
0x3a84   : > { %11768 = vmatmul.mubr.msk.f32.vlgmr.msra.gmra.mxu0 %vm2515_vm8, %v14799_v33  ;;  %11775 = vmatprep.subr.mxu0 %v13519_v0 }
0x3a85   : > { %11777 = vmatprep.mubr.msk.f32.mxu0 %vm13520_vm0, %v13519_v0 }
0x3b3a   : > { %v7868_v48 = vpop.f32.mrf.mxu1 }
0x3b3b   : > { %v7872_v49 = vsel %vm2681_vm10, %v7868_v48, -inf }
0x3b3c   : > { %7873 = vmax.xlane.f32.xlu0 %v7872_v49  ;;  %v11774_v50 = vpop.f32.mrf.mxu1 }
0x3b44   : > { %v7777_v9 = vpop.f32.mrf.mxu0 }
0x3b46   : > { %v11769_v51 = vpop.f32.mrf.mxu0 }
0x3b52   : > { %7705 = vrot.lane.b32.xlu0 %v11040_v36, %s15294_s0  ;;  %s11094_s0 = sshll.u32 %s13879_s28, 4 }
0x3b56   : > { %8033 = vrot.lane.b32.xlu0 %v14819_v42, %s15298_s8 }
0x3bc5   : > { %v7874_v52 = vpop.xlane.xlu0 %7873 }
0x3bc6   : > { %v7875_v53 = vsub.f32 %v7868_v48, %v7874_v52  ;;  %v7783_v48 = vld [vmem:[#allocation34 + $0x10] sm:$0xff] }
0x3bc8   : > { %v7876_v54 = vmul.f32 1.442695, %v7875_v53 }
0x3bc9   : > { %v7706_v55 = vpop.permute.xlu0 %7705 }
0x3bca   : > { %12400 = vpow2.f32 %v7876_v54  ;;  %v14837_v58 = vadd.f32 %v7777_v9, %v7706_v55 }
0x3bcc   : > { %11776 = vmatpush3.msk.msra.mxu0 %vm2699_vm11, %v14837_v58 }
0x3bcd   : > { %11785 = vmatprep.subr.mxu0 %v13519_v0  ;;  %v8034_v3 = vpop.permute.xlu0 %8033 }
0x3bd7   : > { %v12401_v59 = vpop.eup %12400 }
0x3bd8   : > { %v7878_v60 = vsel %vm2681_vm10, %v12401_v59, 0.0 }
0x3bd9   : > { %7879 = vadd.xlane.f32.xlu1 %v7878_v60 }
0x3bea   : > { %8035 = vrot.lane.b32.xlu1 %v14810_v39, %s15300_s7 }
0x3c62   : > { %v7880_v62 = vpop.xlane.xlu1 %7879 }
0x3c63   : > { %12402 = vrcp.f32 %v7880_v62  ;;  %v7784_v62 = vld [vmem:[#allocation34 + $0x18] sm:$0xff] }
0x3c66   : > { %v8036_v2 = vpop.permute.xlu1 %8035 }
0x3c70   : > { %v12403_v63 = vpop.eup %12402 }
0x3c71   : > { %v7882_v1 = vmul.f32 %v12403_v63, %v12401_v59 }
0x3c73   : > { %11778 = vmatmul.mubr.msk.f32.vlgmr.msra.gmra.mxu0 %vm2695_vm12, %v7882_v1 }
0x3c74   : > { %11786 = vmatpush3.xpose.msk.msra.mxu0 %vm2605_vm9, %v8036_v2  ;;  %11787 = vmatprep.mubr.msk.f32.mxu0 %vm13520_vm0, %v13519_v0 }
0x3c75   : > { %11795 = vmatprep.subr.mxu0 %v13519_v0 }
0x3c77   : > { %11788 = vmatmul.mubr.msk.f32.vlgmr.msra.gmra.mxu0 %vm2605_vm9, %v8034_v3 }
0x3c78   : > { %11797 = vmatprep.mubr.msk.f32.mxu0 %vm13520_vm0, %v13519_v0  ;;  %11796 = vmatpush3.msra.mxu0 %v7782_v24 }
0x3c79   : > { %11805 = vmatprep.subr.mxu0 %v13519_v0 }
0x3d33   : > { %v7955_v4 = vpop.f32.mrf.mxu0 }
0x3d34   : > { %11783 = vmatmul.mubr.msk.f32.vlgmr.msra.gmra.mxu1 %vm2605_vm9, %v7955_v4 }
0x3d35   : > { %v11779_v5 = vpop.f32.mrf.mxu0  ;;  %11792 = vmatprep.mubr.msk.f32.mxu1 %vm13520_vm0, %v13519_v0 }
0x3d37   : > { %v8107_v35 = vpop.f32.mrf.mxu0 }
0x3d38   : > { %v8111_v6 = vsel %vm2681_vm10, %v8107_v35, -inf }
0x3d39   : > { %8112 = vmax.xlane.f32.xlu1 %v8111_v6  ;;  %v11789_v57 = vpop.f32.mrf.mxu0  ;;  %v8781_v6 = vld [vmem:[#allocation37 + $0x18] sm:$0xff] }
0x3d4a   : > { %8275 = vrot.lane.b32.xlu1 %v14810_v39, %s15282_s1 }
0x3d4e   : > { %8273 = vrot.lane.b32.xlu1 %v14819_v42, %s15281_s10 }
0x3dc2   : > { %v8113_v8 = vpop.xlane.xlu1 %8112 }
0x3dc3   : > { %v8114_v10 = vsub.f32 %v8107_v35, %v8113_v8 }
0x3dc5   : > { %v8115_v11 = vmul.f32 1.442695, %v8114_v10 }
0x3dc6   : > { %v8276_v22 = vpop.permute.xlu1 %8275 }
0x3dc7   : > { %12404 = vpow2.f32 %v8115_v11 }
0x3dca   : > { %v8274_v13 = vpop.permute.xlu1 %8273 }
0x3dd4   : > { %v12405_v15 = vpop.eup %12404 }
0x3dd5   : > { %v8117_v17 = vsel %vm2681_vm10, %v12405_v15, 0.0 }
0x3dd6   : > { %8118 = vadd.xlane.f32.xlu0 %v8117_v17  ;;  %v8780_v17 = vld [vmem:[#allocation37 + $0x10] sm:$0xff] }
0x3dec   : > { %8122 = vrot.lane.b32.xlu0 %v14837_v58, %s15298_s8 }
0x3df4   : > { %v8028_v18 = vpop.f32.mrf.mxu1 }
0x3df5   : > { %v8032_v36 = vadd.f32 %v11043_v43, %v8028_v18  ;;  %v8779_v18 = vld [vmem:[#allocation37 + $0x8] sm:$0xff] }
0x3df6   : > { %v11784_v19 = vpop.f32.mrf.mxu1 }
0x3df7   : > { %v8778_v19 = vld [vmem:[#allocation37] sm:$0xff] }
0x3e5f   : > { %v8119_v20 = vpop.xlane.xlu0 %8118 }
0x3e60   : > { %12406 = vrcp.f32 %v8119_v20 }
0x3e63   : > { %v8123_v21 = vpop.permute.xlu0 %8122 }
0x3e64   : > { %11791 = vmatpush3.msk.msra.mxu1 %vm2699_vm11, %v8123_v21 }
0x3e65   : > { %11800 = vmatprep.subr.mxu1 %v13519_v0 }
0x3e6d   : > { %v12407_v45 = vpop.eup %12406 }
0x3e6e   : > { %v8121_v23 = vmul.f32 %v12407_v45, %v12405_v15 }
0x3e70   : > { %11793 = vmatmul.mubr.msk.f32.vlgmr.msra.gmra.mxu1 %vm2695_vm12, %v8121_v23 }
0x3e71   : > { %11801 = vmatpush3.xpose.msk.msra.mxu1 %vm2605_vm9, %v8276_v22  ;;  %11802 = vmatprep.mubr.msk.f32.mxu1 %vm13520_vm0, %v13519_v0 }
0x3e72   : > { %11810 = vmatprep.subr.mxu1 %v13519_v0 }
0x3e74   : > { %11803 = vmatmul.mubr.msk.f32.vlgmr.msra.gmra.mxu1 %vm2605_vm9, %v8274_v13 }
0x3e75   : > { %11812 = vmatprep.mubr.msk.f32.mxu1 %vm13520_vm0, %v13519_v0  ;;  %11811 = vmatpush3.msra.mxu1 %v7783_v48 }
0x3e76   : > { %11820 = vmatprep.subr.mxu1 %v13519_v0 }
0x3f30   : > { %v8195_v25 = vpop.f32.mrf.mxu1 }
0x3f31   : > { %11798 = vmatmul.mubr.msk.f32.vlgmr.msra.gmra.mxu0 %vm2605_vm9, %v8195_v25  ;;  %v11064_v25 = vld [vmem:[#allocation38] ss:$0 sm:$0xff] }
0x3f32   : > { %v11794_v26 = vpop.f32.mrf.mxu1  ;;  %11807 = vmatprep.mubr.msk.f32.mxu0 %vm13520_vm0, %v13519_v0 }
0x3f34   : > { %v8347_v38 = vpop.f32.mrf.mxu1 }
0x3f35   : > { %v8351_v27 = vsel %vm2681_vm10, %v8347_v38, -inf }
0x3f36   : > { %8352 = vmax.xlane.f32.xlu0 %v8351_v27  ;;  %v11804_v28 = vpop.f32.mrf.mxu1 }
0x3f4c   : > { %8362 = vrot.lane.b32.xlu0 %v14837_v58, %s15281_s10 }
0x3f50   : > { %8513 = vrot.lane.b32.xlu0 %v14819_v42, %s15285_s3 }
0x3fbf   : > { %v8353_v29 = vpop.xlane.xlu0 %8352 }
0x3fc0   : > { %v8354_v30 = vsub.f32 %v8347_v38, %v8353_v29  ;;  %v8754_v29 = vld [vmem:[#allocation47] sm:$0x3] }
0x3fc2   : > { %v8355_v16 = vmul.f32 1.442695, %v8354_v30  ;;  %v8771_v30 = vrot.slane %v8754_v29, %v14341_v12 }
0x3fc3   : > { %v8363_v31 = vpop.permute.xlu0 %8362 }
0x3fc4   : > { %12408 = vpow2.f32 %v8355_v16  ;;  %11806 = vmatpush3.msk.msra.mxu0 %vm2699_vm11, %v8363_v31 }
0x3fc5   : > { %11815 = vmatprep.subr.mxu0 %v13519_v0 }
0x3fd1   : > { %v12409_v32 = vpop.eup %12408 }
0x3fd2   : > { %v8357_v34 = vsel %vm2681_vm10, %v12409_v32, 0.0 }
0x3fd3   : > { %8358 = vadd.xlane.f32.xlu1 %v8357_v34 }
0x3fe4   : > { %8515 = vrot.lane.b32.xlu1 %v14810_v39, %s15286_s4  ;;  %v8514_v39 = vpop.permute.xlu0 %8513 }
0x3ff1   : > { %v8268_v37 = vpop.f32.mrf.mxu0 }
0x3ff2   : > { %v8272_v40 = vadd.f32 %v8268_v37, %v8032_v36 }
0x3ff3   : > { %v11799_v41 = vpop.f32.mrf.mxu0 }
0x405c   : > { %v8359_v42 = vpop.xlane.xlu1 %8358 }
0x405d   : > { %12410 = vrcp.f32 %v8359_v42 }
0x4060   : > { %v8516_v47 = vpop.permute.xlu1 %8515 }
0x406a   : > { %v12411_v44 = vpop.eup %12410 }
0x406b   : > { %v8361_v46 = vmul.f32 %v12411_v44, %v12409_v32  ;;  %v8776_v32 = vrot.slane %v8754_v29, %v14344_v14 }
0x406d   : > { %11808 = vmatmul.mubr.msk.f32.vlgmr.msra.gmra.mxu0 %vm2695_vm12, %v8361_v46 }
0x406e   : > { %11816 = vmatpush3.xpose.msk.msra.mxu0 %vm2605_vm9, %v8516_v47  ;;  %11817 = vmatprep.mubr.msk.f32.mxu0 %vm13520_vm0, %v13519_v0 }
0x406f   : > { %11825 = vmatprep.subr.mxu0 %v13519_v0 }
0x4071   : > { %11818 = vmatmul.mubr.msk.f32.vlgmr.msra.gmra.mxu0 %vm2605_vm9, %v8514_v39 }
0x4072   : > { %11827 = vmatprep.mubr.msk.f32.mxu0 %vm13520_vm0, %v13519_v0  ;;  %11826 = vmatpush3.msra.mxu0 %v7784_v62 }
0x4073   : > { %11841 = vmatprep.subr.mxu0 %v13519_v0 }
0x412d   : > { %v8435_v49 = vpop.f32.mrf.mxu0 }
0x412e   : > { %11813 = vmatmul.mubr.msk.f32.vlgmr.msra.gmra.mxu1 %vm2605_vm9, %v8435_v49 }
0x412f   : > { %v11809_v50 = vpop.f32.mrf.mxu0  ;;  %11822 = vmatprep.mubr.msk.f32.mxu1 %vm13520_vm0, %v13519_v0 }
0x4131   : > { %v8587_v9 = vpop.f32.mrf.mxu0 }
0x4132   : > { %v8591_v51 = vsel %vm2681_vm10, %v8587_v9, -inf }
0x4133   : > { %8592 = vmax.xlane.f32.xlu1 %v8591_v51  ;;  %v11819_v52 = vpop.f32.mrf.mxu0 }
0x41bc   : > { %v8593_v53 = vpop.xlane.xlu1 %8592 }
0x41bd   : > { %v8594_v54 = vsub.f32 %v8587_v9, %v8593_v53 }
0x41bf   : > { %v8595_v55 = vmul.f32 1.442695, %v8594_v54 }
0x41c1   : > { %12412 = vpow2.f32 %v8595_v55 }
0x41ce   : > { %v12413_v59 = vpop.eup %12412 }
0x41cf   : > { %v8597_v60 = vsel %vm2681_vm10, %v12413_v59, 0.0 }
0x41d0   : > { %8598 = vadd.xlane.f32.xlu0 %v8597_v60 }
0x41e6   : > { %8602 = vrot.lane.b32.xlu0 %v14837_v58, %s15285_s3 }
0x41ea   : > { %8871 = vrot.lane.b32.xlu0 %v8780_v17, %s15297_s23 }
0x41ee   : > { %v8508_v63 = vpop.f32.mrf.mxu1  ;;  %8869 = vrot.lane.b32.xlu0 %v8779_v18, %s15297_s23 }
0x41ef   : > { %v8512_v1 = vadd.f32 %v8508_v63, %v8272_v40  ;;  %v8952_v63 = vld [vmem:[#allocation40] sm:$0xff] }
0x41f0   : > { %v11814_v2 = vpop.f32.mrf.mxu1 }
0x41f2   : > { %8879 = vrot.lane.b32.xlu0 %v11064_v25, %s15297_s23 }
0x4259   : > { %v8599_v3 = vpop.xlane.xlu0 %8598 }
0x425a   : > { %12414 = vrcp.f32 %v8599_v3 }
0x425d   : > { %v8603_v56 = vpop.permute.xlu0 %8602 }
0x425e   : > { %11821 = vmatpush3.msk.msra.mxu1 %vm2699_vm11, %v8603_v56 }
0x425f   : > { %11830 = vmatprep.subr.mxu1 %v13519_v0 }
0x4261   : > { %v8872_v23 = vpop.permute.xlu0 %8871 }
0x4265   : > { %v8870_v24 = vpop.permute.xlu0 %8869 }
0x4267   : > { %v12415_v4 = vpop.eup %12414 }
0x4268   : > { %v8601_v5 = vmul.f32 %v12415_v4, %v12413_v59 }
0x426a   : > { %11823 = vmatmul.mubr.msk.f32.vlgmr.msra.gmra.mxu1 %vm2695_vm12, %v8601_v5 }
0x426b   : > { %11838 = vmatprep.mubr.msk.f32.mxu1 %vm13520_vm0, %v13519_v0  ;;  %11831 = vmatpush3.msra.mxu1 %v8781_v6 }
0x426c   : > { %11832 = vmatprep.subr.mxu1 %v13519_v0 }
0x426d   : > { %11833 = vmatpush3.msra.mxu1 %v8780_v17 }
0x426e   : > { %11834 = vmatprep.subr.mxu1 %v13519_v0 }
0x426f   : > { %11835 = vmatpush3.msra.mxu1 %v8779_v18 }
0x4270   : > { %11836 = vmatprep.subr.mxu1 %v13519_v0 }
0x4271   : > { %11837 = vmatpush3.msra.mxu1 %v8778_v19 }
0x4272   : > { %11852 = vmatprep.subr.mxu1 %v13519_v0 }
0x432a   : > { %v8675_v58 = vpop.f32.mrf.mxu1 }
0x432b   : > { %11828 = vmatmul.mubr.msk.f32.vlgmr.msra.gmra.mxu0 %vm2605_vm9, %v8675_v58 }
0x432c   : > { %v11824_v35 = vpop.f32.mrf.mxu1  ;;  %11849 = vmatprep.mubr.msk.f32.mxu0 %vm13520_vm0, %v13519_v0 }
0x43eb   : > { %v8748_v57 = vpop.f32.mrf.mxu0 }
0x43ec   : > { %v8752_v8 = vadd.f32 %v8748_v57, %v8512_v1 }
0x43ed   : > { %v11829_v10 = vpop.f32.mrf.mxu0 }
0x43ee   : > { %v8753_v11 = vadd.f32 %v8752_v8, %v14799_v33 }
0x43f0   : > { %v8755_v15 = vsel %vm2490_vm5, %v8753_v11, 0.0 }
0x43f1   : > { %8756 = vadd.xlane.f32.xlu1 %v8755_v15 }
0x4402   : > { %8873 = vrot.lane.b32.xlu1 %v8781_v6, %s15297_s23 }
0x447a   : > { %v8757_v33 = vpop.xlane.xlu1 %8756 }
0x447b   : > { %v8758_v20 = vmul.f32 0.03125, %v8757_v33 }
0x447d   : > { %v8759_v21 = vsub.f32 %v8753_v11, %v8758_v20  ;;  %v8953_v20 = vld [vmem:[#allocation40 + $0x8] sm:$0xff] }
0x447e   : > { %v8874_v45 = vpop.permute.xlu1 %8873 }
0x447f   : > { %v8760_v22 = vmul.f32 %v8759_v21, %v8759_v21  ;;  %11842 = vmatpush3.msra.mxu0 %v8874_v45 }
0x4480   : > { %11843 = vmatprep.subr.mxu0 %v13519_v0 }
0x4481   : > { %v8761_v13 = vsel %vm2490_vm5, %v8760_v22, 0.0  ;;  %11844 = vmatpush3.msra.mxu0 %v8872_v23 }
0x4482   : > { %8762 = vadd.xlane.f32.xlu1 %v8761_v13  ;;  %11845 = vmatprep.subr.mxu0 %v13519_v0 }
0x4483   : > { %11846 = vmatpush3.msra.mxu0 %v8870_v24 }
0x4484   : > { %11847 = vmatprep.subr.mxu0 %v13519_v0 }
0x4493   : > { %8867 = vrot.lane.b32.xlu1 %v8778_v19, %s15297_s23 }
0x450b   : > { %v8763_v26 = vpop.xlane.xlu1 %8762 }
0x450c   : > { %v8764_v38 = vmul.f32 0.03125, %v8763_v26 }
0x450e   : > { %v8765_v27 = vadd.f32 1e-05, %v8764_v38 }
0x450f   : > { %v8868_v28 = vpop.permute.xlu1 %8867 }
0x4510   : > { %12416 = vrsqrt.f32 %v8765_v27  ;;  %11848 = vmatpush3.msra.mxu0 %v8868_v28  ;;  %v11067_v28 = vld [vmem:[#allocation41] ss:$0 sm:$0xff] }
0x4511   : > { %11850 = vmatmul.mubr.msk.f32.vlgmr.msra.gmra.mxu0 %vm2515_vm8, %v14663_v7  ;;  %11857 = vmatprep.subr.mxu0 %v13519_v0  ;;  %v8880_v7 = vpop.permute.xlu0 %8879 }
0x4512   : > { %11859 = vmatprep.mubr.msk.f32.mxu0 %vm13520_vm0, %v13519_v0 }
0x451d   : > { %v12417_v16 = vpop.eup %12416 }
0x451e   : > { %v8767_v31 = vmul.f32 %v12417_v16, %v8759_v21 }
0x4520   : > { %v8772_v34 = vmul.f32 %v8771_v30, %v8767_v31 }
0x4522   : > { %v14936_v43 = vadd.f32 %v8776_v32, %v8772_v34 }
0x4524   : > { %v8783_v36 = vadd.f32 %v14802_v61, %v14936_v43 }
0x4526   : > { %11839 = vmatmul.mubr.msk.f32.vlgmr.msra.gmra.mxu1 %vm2515_vm8, %v8783_v36 }
0x4527   : > { %11854 = vmatprep.mubr.msk.f32.mxu1 %vm13520_vm0, %v13519_v0 }
0x45d1   : > { %v8948_v37 = vpop.f32.mrf.mxu0 }
0x45d2   : > { %v14943_v40 = vadd.f32 %v8948_v37, %v8880_v7 }
0x45d3   : > { %v11851_v41 = vpop.f32.mrf.mxu0 }
0x45d4   : > { %11853 = vmatpush3.xpose.msk.msra.mxu1 %vm2605_vm9, %v14943_v40 }
0x45d5   : > { %11862 = vmatprep.subr.mxu1 %v13519_v0 }
0x45e6   : > { %v8859_v42 = vpop.f32.mrf.mxu1 }
0x45e7   : > { %v8860_v44 = vadd.f32 %v11064_v25, %v8859_v42  ;;  %v8954_v42 = vld [vmem:[#allocation40 + $0x10] sm:$0xff] }
0x45e8   : > { %v11840_v46 = vpop.f32.mrf.mxu1 }
0x45e9   : > { %v14948_v47 = vmul.f32 0.35355338, %v8860_v44 }
0x45eb   : > { %11855 = vmatmul.mubr.msk.f32.vlgmr.msra.gmra.mxu1 %vm2605_vm9, %v14948_v47 }
0x45ec   : > { %11864 = vmatprep.mubr.msk.f32.mxu1 %vm13520_vm0, %v13519_v0  ;;  %11863 = vmatpush3.msra.mxu1 %v8952_v63 }
0x45ed   : > { %11872 = vmatprep.subr.mxu1 %v13519_v0 }
0x46ab   : > { %v9037_v61 = vpop.f32.mrf.mxu1 }
0x46ac   : > { %v9041_v39 = vsel %vm2681_vm10, %v9037_v61, -inf }
0x46ad   : > { %9042 = vmax.xlane.f32.xlu1 %v9041_v39  ;;  %v11856_v48 = vpop.f32.mrf.mxu1 }
0x46be   : > { %9205 = vrot.lane.b32.xlu1 %v14943_v40, %s15298_s8 }
0x46c2   : > { %9203 = vrot.lane.b32.xlu1 %v14948_v47, %s15298_s8  ;;  %s10378_s8 = scalar_lea.hbm %s13851_s9, %s11094_s0 }
0x4736   : > { %v9043_v49 = vpop.xlane.xlu1 %9042 }
0x4737   : > { %v9044_v50 = vsub.f32 %v9037_v61, %v9043_v49 }
0x4739   : > { %v9045_v9 = vmul.f32 1.442695, %v9044_v50 }
0x473a   : > { %v9206_v59 = vpop.permute.xlu1 %9205 }
0x473b   : > { %12418 = vpow2.f32 %v9045_v9 }
0x473e   : > { %v9204_v62 = vpop.permute.xlu1 %9203 }
0x4748   : > { %v12419_v51 = vpop.eup %12418 }
0x4749   : > { %v9047_v52 = vsel %vm2681_vm10, %v12419_v51, 0.0 }
0x474a   : > { %9048 = vadd.xlane.f32.xlu0 %v9047_v52 }
0x4760   : > { %9052 = vrot.lane.b32.xlu0 %v14943_v40, %s15297_s23 }
0x47d3   : > { %v9049_v53 = vpop.xlane.xlu0 %9048 }
0x47d4   : > { %12420 = vrcp.f32 %v9049_v53  ;;  %v8955_v53 = vld [vmem:[#allocation40 + $0x18] sm:$0xff] }
0x47d7   : > { %v9053_v54 = vpop.permute.xlu0 %9052 }
0x47d8   : > { %11858 = vmatpush3.msk.msra.mxu0 %vm2699_vm11, %v9053_v54 }
0x47d9   : > { %11867 = vmatprep.subr.mxu0 %v13519_v0 }
0x47e1   : > { %v12421_v55 = vpop.eup %12420 }
0x47e2   : > { %v9051_v60 = vmul.f32 %v12421_v55, %v12419_v51 }
0x47e4   : > { %11860 = vmatmul.mubr.msk.f32.vlgmr.msra.gmra.mxu0 %vm2695_vm12, %v9051_v60 }
0x47e5   : > { %11868 = vmatpush3.xpose.msk.msra.mxu0 %vm2605_vm9, %v9206_v59  ;;  %11869 = vmatprep.mubr.msk.f32.mxu0 %vm13520_vm0, %v13519_v0 }
0x47e6   : > { %11877 = vmatprep.subr.mxu0 %v13519_v0 }
0x47e8   : > { %11870 = vmatmul.mubr.msk.f32.vlgmr.msra.gmra.mxu0 %vm2605_vm9, %v9204_v62 }
0x47e9   : > { %11879 = vmatprep.mubr.msk.f32.mxu0 %vm13520_vm0, %v13519_v0  ;;  %11878 = vmatpush3.msra.mxu0 %v8953_v20  ;;  %v9924_v20 = vld [vmem:[#allocation49] sm:$0x3] }
0x47ea   : > { %11887 = vmatprep.subr.mxu0 %v13519_v0 }
0x48a4   : > { %v9125_v1 = vpop.f32.mrf.mxu0 }
0x48a5   : > { %11865 = vmatmul.mubr.msk.f32.vlgmr.msra.gmra.mxu1 %vm2605_vm9, %v9125_v1 }
0x48a6   : > { %v11861_v2 = vpop.f32.mrf.mxu0  ;;  %11874 = vmatprep.mubr.msk.f32.mxu1 %vm13520_vm0, %v13519_v0 }
0x48a8   : > { %v9277_v3 = vpop.f32.mrf.mxu0 }
0x48a9   : > { %v9281_v56 = vsel %vm2681_vm10, %v9277_v3, -inf }
0x48aa   : > { %9282 = vmax.xlane.f32.xlu0 %v9281_v56  ;;  %v11871_v4 = vpop.f32.mrf.mxu0 }
0x48c0   : > { %9292 = vrot.lane.b32.xlu0 %v14943_v40, %s15300_s7 }
0x48c4   : > { %9443 = vrot.lane.b32.xlu0 %v14948_v47, %s15281_s10 }
0x4933   : > { %v9283_v5 = vpop.xlane.xlu0 %9282 }
0x4934   : > { %v9284_v58 = vsub.f32 %v9277_v3, %v9283_v5 }
0x4936   : > { %v9285_v35 = vmul.f32 1.442695, %v9284_v58 }
0x4937   : > { %v9293_v6 = vpop.permute.xlu0 %9292 }
0x4938   : > { %12422 = vpow2.f32 %v9285_v35  ;;  %11873 = vmatpush3.msk.msra.mxu1 %vm2699_vm11, %v9293_v6 }
0x4939   : > { %11882 = vmatprep.subr.mxu1 %v13519_v0 }
0x493b   : > { %v9444_v33 = vpop.permute.xlu0 %9443 }
0x4945   : > { %v12423_v57 = vpop.eup %12422 }
0x4946   : > { %v9287_v8 = vsel %vm2681_vm10, %v12423_v57, 0.0 }
0x4947   : > { %9288 = vadd.xlane.f32.xlu1 %v9287_v8 }
0x4958   : > { %9445 = vrot.lane.b32.xlu1 %v14943_v40, %s15281_s10  ;;  %s2296_s10 = sand.u32 1, %s13409_s22  }
0x4959   : > { %s2297_s7 = scalar_lea.vmem [#allocation56], %s2296_s10 }
0x495a   : > { %s10380_s23 = sshll.u32 %s2297_s7, 4  ;;  %s10381_s23 = int_to_ptr.vmem [resolvable:$true] %s10380_s23 }
0x495b   : > { %s13285_s2 = scalar_lea.vmem %s10381_s23, 16 }
0x495c   : > { %p13286_p10 = scmp.ne.s32.totalorder %s10381_s23, %s13285_s2 }
0x495e   : > { %p13287_p6 = pnand %p13286_p10, %p15308_p3 }
0x4960   : > { %p13288_p5 = pneg %p13287_p6 }
0x4965   : > { %v9198_v10 = vpop.f32.mrf.mxu1 }
0x4966   : > { %v9202_v29 = vadd.f32 %v11067_v28, %v9198_v10 }
0x4967   : > { %v11866_v11 = vpop.f32.mrf.mxu1 }
0x49d0   : > { %v9289_v15 = vpop.xlane.xlu1 %9288 }
0x49d1   : > { %12424 = vrcp.f32 %v9289_v15 }
0x49d4   : > { %v9446_v19 = vpop.permute.xlu1 %9445 }
0x49de   : > { %v12425_v17 = vpop.eup %12424 }
0x49df   : > { %v9291_v18 = vmul.f32 %v12425_v17, %v12423_v57  ;;  %v10036_v17 = vld [vmem:[#allocation44 + $0x18] sm:$0xff] }
0x49e1   : > { %11875 = vmatmul.mubr.msk.f32.vlgmr.msra.gmra.mxu1 %vm2695_vm12, %v9291_v18 }
0x49e2   : > { %11883 = vmatpush3.xpose.msk.msra.mxu1 %vm2605_vm9, %v9446_v19  ;;  %11884 = vmatprep.mubr.msk.f32.mxu1 %vm13520_vm0, %v13519_v0 }
0x49e3   : > { %11892 = vmatprep.subr.mxu1 %v13519_v0 }
0x49e5   : > { %11885 = vmatmul.mubr.msk.f32.vlgmr.msra.gmra.mxu1 %vm2605_vm9, %v9444_v33 }
0x49e6   : > { %11894 = vmatprep.mubr.msk.f32.mxu1 %vm13520_vm0, %v13519_v0  ;;  %11893 = vmatpush3.msra.mxu1 %v8954_v42 }
0x49e7   : > { %11902 = vmatprep.subr.mxu1 %v13519_v0 }
0x4aa1   : > { %v9365_v21 = vpop.f32.mrf.mxu1 }
0x4aa2   : > { %11880 = vmatmul.mubr.msk.f32.vlgmr.msra.gmra.mxu0 %vm2605_vm9, %v9365_v21  ;;  %v9941_v21 = vrot.slane %v9924_v20, %v14341_v12 }
0x4aa3   : > { %v11876_v45 = vpop.f32.mrf.mxu1  ;;  %11889 = vmatprep.mubr.msk.f32.mxu0 %vm13520_vm0, %v13519_v0 }
0x4aa5   : > { %v9517_v22 = vpop.f32.mrf.mxu1 }
0x4aa6   : > { %v9521_v23 = vsel %vm2681_vm10, %v9517_v22, -inf }
0x4aa7   : > { %9522 = vmax.xlane.f32.xlu1 %v9521_v23  ;;  %v11886_v13 = vpop.f32.mrf.mxu1  ;;  %v9946_v23 = vrot.slane %v9924_v20, %v14344_v14 }
0x4ab8   : > { %9685 = vrot.lane.b32.xlu1 %v14943_v40, %s15285_s3 }
0x4abc   : > { %9683 = vrot.lane.b32.xlu1 %v14948_v47, %s15285_s3  ;;  %s15307_s3 = sld [smem:[#allocation126_spill]] }
0x4b30   : > { %v9523_v24 = vpop.xlane.xlu1 %9522 }
0x4b31   : > { %v9524_v25 = vsub.f32 %v9517_v22, %v9523_v24 }
0x4b33   : > { %v9525_v26 = vmul.f32 1.442695, %v9524_v25  ;;  %v10035_v25 = vld [vmem:[#allocation44 + $0x10] sm:$0xff] }
0x4b34   : > { %v9686_v7 = vpop.permute.xlu1 %9685 }
0x4b35   : > { %12426 = vpow2.f32 %v9525_v26  ;;  %v10034_v26 = vld [vmem:[#allocation44 + $0x8] sm:$0xff] }
0x4b38   : > { %v9684_v41 = vpop.permute.xlu1 %9683 }
0x4b42   : > { %v12427_v38 = vpop.eup %12426 }
0x4b43   : > { %v9527_v27 = vsel %vm2681_vm10, %v12427_v38, 0.0 }
0x4b44   : > { %9528 = vadd.xlane.f32.xlu0 %v9527_v27  ;;  %v11088_v27 = vld [vmem:[#allocation43] ss:$0 sm:$0xff] }
0x4b5a   : > { %9532 = vrot.lane.b32.xlu0 %v14943_v40, %s15282_s1  ;;  %s15306_s1 = sld [smem:[#allocation124_spill]] }
0x4b62   : > { %v9438_v30 = vpop.f32.mrf.mxu0 }
0x4b63   : > { %v9442_v16 = vadd.f32 %v9438_v30, %v9202_v29 }
0x4b64   : > { %v11881_v31 = vpop.f32.mrf.mxu0 }
0x4b65   : > { %v11090_v31 = vld [vmem:[#allocation46] ss:$0 sm:$0xff] }
0x4bcd   : > { %v9529_v32 = vpop.xlane.xlu0 %9528 }
0x4bce   : > { %12428 = vrcp.f32 %v9529_v32 }
0x4bd1   : > { %v9533_v34 = vpop.permute.xlu0 %9532 }
0x4bd2   : > { %11888 = vmatpush3.msk.msra.mxu0 %vm2699_vm11, %v9533_v34 }
0x4bd3   : > { %11897 = vmatprep.subr.mxu0 %v13519_v0 }
0x4bdb   : > { %v12429_v36 = vpop.eup %12428 }
0x4bdc   : > { %v9531_v37 = vmul.f32 %v12429_v36, %v12427_v38  ;;  %v10033_v38 = vld [vmem:[#allocation44] sm:$0xff] }
0x4bde   : > { %11890 = vmatmul.mubr.msk.f32.vlgmr.msra.gmra.mxu0 %vm2695_vm12, %v9531_v37 }
0x4bdf   : > { %11898 = vmatpush3.xpose.msk.msra.mxu0 %vm2605_vm9, %v9686_v7  ;;  %11899 = vmatprep.mubr.msk.f32.mxu0 %vm13520_vm0, %v13519_v0 }
0x4be0   : > { %11907 = vmatprep.subr.mxu0 %v13519_v0 }
0x4be2   : > { %11900 = vmatmul.mubr.msk.f32.vlgmr.msra.gmra.mxu0 %vm2605_vm9, %v9684_v41 }
0x4be3   : > { %11909 = vmatprep.mubr.msk.f32.mxu0 %vm13520_vm0, %v13519_v0  ;;  %11908 = vmatpush3.msra.mxu0 %v8955_v53 }
0x4be4   : > { %11923 = vmatprep.subr.mxu0 %v13519_v0 }
0x4c9e   : > { %v9605_v44 = vpop.f32.mrf.mxu0 }
0x4c9f   : > { %11895 = vmatmul.mubr.msk.f32.vlgmr.msra.gmra.mxu1 %vm2605_vm9, %v9605_v44 }
0x4ca0   : > { %v11891_v46 = vpop.f32.mrf.mxu0  ;;  %11904 = vmatprep.mubr.msk.f32.mxu1 %vm13520_vm0, %v13519_v0 }
0x4ca2   : > { %v9757_v47 = vpop.f32.mrf.mxu0 }
0x4ca3   : > { %v9761_v61 = vsel %vm2681_vm10, %v9757_v47, -inf }
0x4ca4   : > { %9762 = vmax.xlane.f32.xlu0 %v9761_v61  ;;  %v11901_v39 = vpop.f32.mrf.mxu0 }
0x4cba   : > { %9772 = vrot.lane.b32.xlu0 %v14943_v40, %s15286_s4  ;;  %s15305_s4 = sld [smem:[#allocation116_spill]] }
0x4cc0   : > { %v9951_v10 = vld [vmem:[%s15305_s4 + $0x18] sm:$0xff]  ;;  %v9950_v11 = vld [vmem:[%s15305_s4 + $0x10] sm:$0xff]  ;;  %v9949_v15 = vld [vmem:[%s15305_s4 + $0x8] sm:$0xff] }
0x4d2d   : > { %v9763_v48 = vpop.xlane.xlu0 %9762 }
0x4d2e   : > { %v9764_v49 = vsub.f32 %v9757_v47, %v9763_v48 }
0x4d30   : > { %v9765_v50 = vmul.f32 1.442695, %v9764_v49  ;;  %v10118_v49 = vld [vmem:[#allocation50] sm:$0x3] }
0x4d31   : > { %v9773_v9 = vpop.permute.xlu0 %9772 }
0x4d32   : > { %12430 = vpow2.f32 %v9765_v50  ;;  %11903 = vmatpush3.msk.msra.mxu1 %vm2699_vm11, %v9773_v9  ;;  %v10135_v50 = vrot.slane %v10118_v49, %v14341_v12 }
0x4d33   : > { %11912 = vmatprep.subr.mxu1 %v13519_v0 }
0x4d3f   : > { %v12431_v51 = vpop.eup %12430 }
0x4d40   : > { %v9767_v52 = vsel %vm2681_vm10, %v12431_v51, 0.0 }
0x4d41   : > { %9768 = vadd.xlane.f32.xlu1 %v9767_v52  ;;  %v10140_v52 = vrot.slane %v10118_v49, %v14344_v14 }
0x4d5f   : > { %v9678_v54 = vpop.f32.mrf.mxu1 }
0x4d60   : > { %v9682_v55 = vadd.f32 %v9678_v54, %v9442_v16 }
0x4d61   : > { %v11896_v40 = vpop.f32.mrf.mxu1 }
0x4dca   : > { %v9769_v59 = vpop.xlane.xlu1 %9768 }
0x4dcb   : > { %12432 = vrcp.f32 %v9769_v59 }
0x4dd8   : > { %v12433_v60 = vpop.eup %12432 }
0x4dd9   : > { %v9771_v62 = vmul.f32 %v12433_v60, %v12431_v51 }
0x4ddb   : > { %11905 = vmatmul.mubr.msk.f32.vlgmr.msra.gmra.mxu1 %vm2695_vm12, %v9771_v62 }
0x4ddc   : > { %11920 = vmatprep.mubr.msk.f32.mxu1 %vm13520_vm0, %v13519_v0  ;;  %11913 = vmatpush3.msra.mxu1 %v9951_v10  ;;  %v10142_v10 = vld [vmem:[#allocation52] sm:$0x3] }
0x4ddd   : > { %11914 = vmatprep.subr.mxu1 %v13519_v0 }
0x4dde   : > { %11915 = vmatpush3.msra.mxu1 %v9950_v11  ;;  %v10159_v11 = vrot.slane %v10142_v10, %v14341_v12 }
0x4ddf   : > { %11916 = vmatprep.subr.mxu1 %v13519_v0 }
0x4de0   : > { %11917 = vmatpush3.msra.mxu1 %v9949_v15 }
0x4de1   : > { %11918 = vmatprep.subr.mxu1 %v13519_v0 }
0x4e9b   : > { %v9845_v63 = vpop.f32.mrf.mxu1 }
0x4e9c   : > { %11910 = vmatmul.mubr.msk.f32.vlgmr.msra.gmra.mxu0 %vm2605_vm9, %v9845_v63 }
0x4e9d   : > { %v11906_v1 = vpop.f32.mrf.mxu1  ;;  %11931 = vmatprep.mubr.msk.f32.mxu0 %vm13520_vm0, %v13519_v0  ;;  %11924 = vmatpush3.msra.mxu0 %v10036_v17  ;;  %v10164_v17 = vrot.slane %v10142_v10, %v14344_v14 }
0x4e9e   : > { %11925 = vmatprep.subr.mxu0 %v13519_v0  ;;  %v10190_v1 = vld [vmem:[%s15306_s1 + $0x18] sm:$0xff] }
0x4e9f   : > { %11926 = vmatpush3.msra.mxu0 %v10035_v25 }
0x4ea0   : > { %11927 = vmatprep.subr.mxu0 %v13519_v0 }
0x4ea1   : > { %11928 = vmatpush3.msra.mxu0 %v10034_v26 }
0x4ea2   : > { %11929 = vmatprep.subr.mxu0 %v13519_v0 }
0x4ea3   : > { %11930 = vmatpush3.msra.mxu0 %v10033_v38 }
0x4ea4   : > { %11945 = vmatprep.subr.mxu0 %v13519_v0 }
0x4f5c   : > { %v9918_v2 = vpop.f32.mrf.mxu0 }
0x4f5d   : > { %v9922_v3 = vadd.f32 %v9918_v2, %v9682_v55  ;;  %v10189_v2 = vld [vmem:[%s15306_s1 + $0x10] sm:$0xff] }
0x4f5e   : > { %v11911_v56 = vpop.f32.mrf.mxu0 }
0x4f5f   : > { %v9923_v4 = vadd.f32 %v9922_v3, %v14936_v43  ;;  %v9948_v43 = vld [vmem:[%s15305_s4] sm:$0xff]  ;;  %v10281_v3 = vld [vmem:[%s15307_s3 + $0x18] sm:$0xff]  ;;  %v10280_v56 = vld [vmem:[%s15307_s3 + $0x10] sm:$0xff] }
0x4f60   : > { %11919 = vmatpush3.msra.mxu1 %v9948_v43 }
0x4f61   : > { %v9925_v5 = vsel %vm2490_vm5, %v9923_v4, 0.0  ;;  %11934 = vmatprep.subr.mxu1 %v13519_v0 }
0x4f62   : > { %9926 = vadd.xlane.f32.xlu1 %v9925_v5  ;;  %v10279_v5 = vld [vmem:[%s15307_s3 + $0x8] sm:$0xff] }
0x4feb   : > { %v9927_v58 = vpop.xlane.xlu1 %9926 }
0x4fec   : > { %v9928_v35 = vmul.f32 0.03125, %v9927_v58  ;;  %v10187_v58 = vld [vmem:[%s15306_s1] sm:$0xff] }
0x4fee   : > { %v9929_v6 = vsub.f32 %v9923_v4, %v9928_v35  ;;  %v10188_v4 = vld [vmem:[%s15306_s1 + $0x8] sm:$0xff]  ;;  %v10278_v35 = vld [vmem:[%s15307_s3] sm:$0xff]  ;;  %s10365_s1 = scalar_lea.sflag [#allocation4], %s2296_s10  ;;  %s13532_s3 = smov [#allocation56]  }
0x4fef   : > { %s13289_s4 = sshll.u32 %s13532_s3, 4  ;;  %s13290_s4 = int_to_ptr.vmem [resolvable:$false] %s13289_s4 }
0x4ff0   : > { %v9930_v57 = vmul.f32 %v9929_v6, %v9929_v6  ;;  %s13291_s6 = scalar_lea.vmem %s13290_s4, 32  ;;  %p13292_p4 = scmp.lt.s32.totalorder %s10381_s23, %s13290_s4 }
0x4ff1   : > { %p13293_p7 = scmp.lt.s32.totalorder %s13291_s6, %s13285_s2 }
0x4ff2   : > { %v9931_v8 = vsel %vm2490_vm5, %v9930_v57, 0.0 }
0x4ff3   : > { %9932 = vadd.xlane.f32.xlu1 %v9931_v8  ;;  %p13294_p8 = por %p13293_p7, %p13292_p4 }
0x4ff5   : > { %p13295_p11 = pnand %p13294_p8, %p13288_p5 }
0x507c   : > { %v9933_v18 = vpop.xlane.xlu1 %9932 }
0x507d   : > { %v9934_v19 = vmul.f32 0.03125, %v9933_v18 }
0x507f   : > { %v9935_v33 = vadd.f32 1e-05, %v9934_v19 }
0x5081   : > { %12434 = vrsqrt.f32 %v9935_v33 }
0x508e   : > { %v12435_v45 = vpop.eup %12434 }
0x508f   : > { %v9937_v22 = vmul.f32 %v12435_v45, %v9929_v6 }
0x5091   : > { %v9942_v13 = vmul.f32 %v9941_v21, %v9937_v22 }
0x5093   : > { %v9947_v24 = vadd.f32 %v9946_v23, %v9942_v13 }
0x5095   : > { %11921 = vmatmul.mubr.msk.f32.vlgmr.msra.gmra.mxu1 %vm2515_vm8, %v9947_v24 }
0x5096   : > { %11942 = vmatprep.mubr.msk.f32.mxu1 %vm13520_vm0, %v13519_v0  ;;  %11935 = vmatpush3.msra.mxu1 %v10190_v1 }
0x5097   : > { %11936 = vmatprep.subr.mxu1 %v13519_v0 }
0x5098   : > { %11937 = vmatpush3.msra.mxu1 %v10189_v2 }
0x5099   : > { %11938 = vmatprep.subr.mxu1 %v13519_v0 }
0x509a   : > { %11939 = vmatpush3.msra.mxu1 %v10188_v4 }
0x509b   : > { %11940 = vmatprep.subr.mxu1 %v13519_v0 }
0x509c   : > { %11941 = vmatpush3.msra.mxu1 %v10187_v58 }
0x5155   : > { %v10028_v28 = vpop.f32.mrf.mxu1 }
0x5156   : > { %v10029_v29 = vadd.f32 %v11088_v27, %v10028_v28 }
0x5157   : > { %v11922_v30 = vpop.f32.mrf.mxu1 }
0x5158   : > { %v10032_v16 = vmax.f32 %v10029_v29, 0.0  ;;  %v10191_v30 = vld [vmem:[#allocation53] sm:$0x1] }
0x515a   : > { %11932 = vmatmul.mubr.msk.f32.vlgmr.msra.gmra.mxu0 %vm2515_vm8, %v10032_v16 }
0x515b   : > { %11953 = vmatprep.mubr.msk.f32.mxu0 %vm13520_vm0, %v13519_v0  ;;  %11946 = vmatpush3.msra.mxu0 %v10281_v3 }
0x515c   : > { %11947 = vmatprep.subr.mxu0 %v13519_v0 }
0x515d   : > { %11948 = vmatpush3.msra.mxu0 %v10280_v56 }
0x515e   : > { %11949 = vmatprep.subr.mxu0 %v13519_v0 }
0x515f   : > { %11950 = vmatpush3.msra.mxu0 %v10279_v5 }
0x5160   : > { %11951 = vmatprep.subr.mxu0 %v13519_v0 }
0x5161   : > { %11952 = vmatpush3.msra.mxu0 %v10278_v35 }
0x521a   : > { %v10113_v32 = vpop.f32.mrf.mxu0 }
0x521b   : > { %v10114_v34 = vadd.f32 %v11090_v31, %v10113_v32 }
0x521c   : > { %v11933_v36 = vpop.f32.mrf.mxu0 }
0x521d   : > { %v10117_v7 = vadd.f32 %v10114_v34, %v9947_v24 }
0x521f   : > { %v10119_v37 = vsel %vm2490_vm5, %v10117_v7, 0.0 }
0x5220   : > { %10120 = vadd.xlane.f32.xlu1 %v10119_v37 }
0x52a9   : > { %v10121_v41 = vpop.xlane.xlu1 %10120 }
0x52aa   : > { %v10122_v42 = vmul.f32 0.03125, %v10121_v41 }
0x52ac   : > { %v10123_v44 = vsub.f32 %v10117_v7, %v10122_v42 }
0x52ae   : > { %v10124_v46 = vmul.f32 %v10123_v44, %v10123_v44 }
0x52b0   : > { %v10125_v47 = vsel %vm2490_vm5, %v10124_v46, 0.0 }
0x52b1   : > { %10126 = vadd.xlane.f32.xlu1 %v10125_v47 }
0x533a   : > { %v10127_v61 = vpop.xlane.xlu1 %10126 }
0x533b   : > { %v10128_v39 = vmul.f32 0.03125, %v10127_v61  ;;  %v10282_v61 = vld [vmem:[%s13841_s25] sm:$0x1] }
0x533d   : > { %v10129_v48 = vadd.f32 1e-05, %v10128_v39 }
0x533f   : > { %12436 = vrsqrt.f32 %v10129_v48  ;;  %v10356_v48 = vld [vmem:[#allocation55] sm:$0x1] }
0x534c   : > { %v12437_v9 = vpop.eup %12436 }
0x534d   : > { %v10131_v51 = vmul.f32 %v12437_v9, %v10123_v44 }
0x534f   : > { %v10136_v53 = vmul.f32 %v10135_v50, %v10131_v51 }
0x5351   : > { %v10141_v54 = vadd.f32 %v10140_v52, %v10136_v53 }
0x5353   : > { %v10143_v55 = vsel %vm2490_vm5, %v10141_v54, 0.0 }
0x5354   : > { %10144 = vadd.xlane.f32.xlu0 %v10143_v55 }
0x53dd   : > { %v10145_v40 = vpop.xlane.xlu0 %10144 }
0x53de   : > { %v10146_v59 = vmul.f32 0.03125, %v10145_v40 }
0x53e0   : > { %v10147_v60 = vsub.f32 %v10141_v54, %v10146_v59 }
0x53e2   : > { %v10148_v62 = vmul.f32 %v10147_v60, %v10147_v60 }
0x53e4   : > { %v10149_v63 = vsel %vm2490_vm5, %v10148_v62, 0.0 }
0x53e5   : > { %10150 = vadd.xlane.f32.xlu1 %v10149_v63 }
0x546e   : > { %v10151_v6 = vpop.xlane.xlu1 %10150 }
0x546f   : > { %v10152_v57 = vmul.f32 0.03125, %v10151_v6 }
0x5471   : > { %v10153_v8 = vadd.f32 1e-05, %v10152_v57 }
0x5473   : > { %12438 = vrsqrt.f32 %v10153_v8 }
0x5480   : > { %v12439_v15 = vpop.eup %12438 }
0x5481   : > { %v10155_v43 = vmul.f32 %v12439_v15, %v10147_v60 }
0x5483   : > { %v10160_v18 = vmul.f32 %v10159_v11, %v10155_v43 }
0x5485   : > { %v10165_v19 = vadd.f32 %v10164_v17, %v10160_v18 }
0x5487   : > { %v10167_v33 = vsel %vm10166_vm13, %v10165_v19, 0.0  ;;  %v10177_v20 = vrot.slane %v10165_v19, 2 }
0x5488   : > { %v10168_v0 = vrot.slane %v10167_v33, 4 }
0x5489   : > { %v10179_v21 = vsel %vm10166_vm13, %v10177_v20, 0.0 }
0x548a   : > { %v10169_v45 = vadd.f32 %v10168_v0, %v10167_v33  ;;  %v10180_v22 = vrot.slane %v10179_v21, 4 }
0x548c   : > { %v10170_v23 = vrot.slane %v10169_v45, 2  ;;  %v10181_v13 = vadd.f32 %v10180_v22, %v10179_v21 }
0x548e   : > { %v10171_v24 = vadd.f32 %v10170_v23, %v10169_v45  ;;  %v10182_v25 = vrot.slane %v10181_v13, 2 }
0x5490   : > { %v10172_v26 = vrot.slane %v10171_v24, 1  ;;  %v10183_v12 = vadd.f32 %v10182_v25, %v10181_v13 }
0x5492   : > { %v10173_v38 = vadd.f32 %v10172_v26, %v10171_v24  ;;  %v10184_v27 = vrot.slane %v10183_v12, 1 }
0x5494   : > { %v10175_v14 = vmul.f32 0.5, %v10173_v38  ;;  %v10185_v28 = vadd.f32 %v10184_v27, %v10183_v12 }
0x5496   : > { %11943 = vmatmul.mubr.msk.f32.vlgmr.msra.gmra.mxu1 %vm2515_vm8, %v10175_v14  ;;  %v10186_v29 = vmul.f32 0.5, %v10185_v28 }
0x5498   : > { %11954 = vmatmul.mubr.msk.f32.vlgmr.msra.gmra.mxu0 %vm2515_vm8, %v10186_v29 }
0x5556   : > { %v10261_v16 = vpop.f32.mrf.mxu1 }
0x5557   : > { %v10262_v31 = vadd.f32 %v10261_v16, %v10191_v30 }
0x5558   : > { %v11944_v32 = vpop.f32.mrf.mxu1  ;;  %v10352_v34 = vpop.f32.mrf.mxu0 }
0x5559   : > { %v10267_v36 = vsel %vm10265_vm14, %v10262_v31, -inf  ;;  %10266 = vst.msk [vmem:[%s2297_s7] sm:$0x1] %vm10265_vm14, %v10262_v31  ;;  %v10353_v39 = vadd.f32 %v10352_v34, %v10282_v61 }
0x555a   : > { %10268 = vmax.xlane.f32.xlu1 %v10267_v36  ;;  %v11955_v7 = vpop.f32.mrf.mxu0 }
0x555b   : > { %v10357_v50 = vadd.f32 %v10356_v48, %v10353_v39 }
0x55e3   : > { %v10269_v37 = vpop.xlane.xlu1 %10268 }
0x55e4   : > { %v10270_v41 = vsub.f32 %v10262_v31, %v10269_v37 }
0x55e6   : > { %v10271_v42 = vmul.f32 1.442695, %v10270_v41 }
0x55e8   : > { %12440 = vpow2.f32 %v10271_v42 }
0x55f5   : > { %v12441_v44 = vpop.eup %12440 }
0x55f6   : > { %v10273_v46 = vsel %vm10265_vm14, %v12441_v44, 0.0 }
0x55f7   : > { %10274 = vadd.xlane.f32.xlu1 %v10273_v46 }
0x5680   : > { %v10275_v47 = vpop.xlane.xlu1 %10274 }
0x5681   : > { %12442 = vrcp.f32 %v10275_v47 }
0x568e   : > { %v12443_v49 = vpop.eup %12442 }
0x568f   : > { %v10277_v9 = vmul.f32 %v12443_v49, %v12441_v44 }
0x5691   : > { %v10358_v51 = vmul.f32 %v10357_v50, %v10277_v9 }
0x5693   : > { %v10359_v52 = vsel %vm10265_vm14, %v10358_v51, 0.0 }
0x5694   : > { %10360 = vadd.xlane.f32.xlu1 %v10359_v52 }
0x5695   : > { %13298 = shalt.err (!%p13295_p11)
}
0x5696   : > { %s13299_s28 = scalar_lea.hbm %s10378_s8, 16  ;;  %s13303_s10 = scalar_lea.hbm %s13851_s9, 32 }
0x5697   : > { %p13300_p12 = scmp.ne.s32.totalorder %s10378_s8, %s13299_s28  ;;  %p13304_p1 = scmp.lt.s32.totalorder %s10378_s8, %s13851_s9 }
0x5698   : > { %p13305_p2 = scmp.lt.s32.totalorder %s13303_s10, %s13299_s28 }
0x5699   : > { %p13301_p13 = pnand %p13300_p12, %p15308_p3 }
0x569a   : > { %p13306_p9 = por %p13305_p2, %p13304_p1 }
0x569b   : > { %p13302_p0 = pneg %p13301_p13 }
0x569d   : > { %p13307_p10 = pnand %p13306_p9, %p13302_p0 }
0x569f   : > { %13310 = shalt.err (!%p13307_p10)
}
0x56a0   : > { %12096 = dma.vmem_to_hbm [thread:$0]  (%p15308_p3), %s10381_s23, 16, %s10378_s8, %s10365_s1   ;;  %vm10362_vm15 = vcmask 0  }
0x56a1   : > { %s2309_s6 = scalar_lea.vmem %s13856_s21, %s14189_s5 }
0x571d   : > { %v10361_v53 = vpop.xlane.xlu1 %10360 }
0x571e   : > { %10363 = vst.msk [vmem:[%s2309_s6] sm:$0x1] %vm10362_vm15, %v10361_v53 }
0x571f PF: > { %s15309_s2 = sld [smem:[#allocation128_spill]]  ;;  %p12172_p6 = scmp.ge.s32.totalorder %s13417_s26, 2 }
0x5720   : > { %s15310_s4 = sld [smem:[#allocation132_spill]] }
0x5725   : > { %s10395_s3 = sand.u32 1, %s15309_s2  }
0x5726   : > { %p15311_p5 = scmp.ne.s32.totalorder %s15310_s4, 0  ;;  %s10396_s7 = scalar_lea.sflag [#allocation4], %s10395_s3 }
0x5728   : > { %p12099_p4 = pnand %p12172_p6, %p15311_p5 }
0x572a   : > { %p12100_p7 = pneg %p12099_p4 }
0x572c   : > { %13400 = dma.done.wait (%p12100_p7), %s10396_s7, 16  }
0x572d   : > { %13402 = vsyncadd (%p12100_p7), %s10396_s7, 4294967280  ;;  %s15312_s26 = sld [smem:[#allocation130_spill]]  ;;  %s15315_s0 = smov %s13409_s22 }
0x572e   : > { %s15313_s15 = sld [smem:[#allocation129_spill]] }
0x572f   : > { %s15314_s23 = sld [smem:[#allocation131_spill]] }
0x5733   : > { %p156_p3 = scmp.ge.s32.totalorder %s15312_s26, 4  }
0x5734   : > { %s15316_s22 = smov %s15313_s15 }
0x5735   :  { %158 = sbr.rel (!%p156_p3) target bundleno = 142 (0x8e), region = 519 }
0x573a   :  { %10406 = vsyncpa [#allocation3], 1 }
0x573b   :  { %10408 = vsyncpa [#allocation3 + $0x1], 1 }
0x573c   :  { %10409 = vsyncpa [#allocation6], 1 }
0x573d   :  { %10410 = vsyncpa [#allocation9], 1 }
0x573e   :  { %10411 = vsyncpa [#allocation12], 1 }
0x573f   :  { %10412 = vsyncpa [#allocation15], 1 }
0x5740   :  { %10413 = vsyncpa [#allocation18], 1 }
0x5741   :  { %10414 = vsyncpa [#allocation21], 1 }
0x5742   :  { %10415 = vsyncpa [#allocation24], 1 }
0x5743   :  { %10416 = vsyncpa [#allocation27], 1 }
0x5744   :  { %10417 = vsyncpa [#allocation30], 1 }
0x5745   :  { %10418 = vsyncpa [#allocation33], 1 }
0x5746   :  { %10419 = vsyncpa [#allocation36], 1 }
0x5747   :  { %10420 = vsyncpa [#allocation39], 1 }
0x5748   :  { %10421 = vsyncpa [#allocation42], 1 }
0x5749   :  { %10422 = vsyncpa [#allocation45], 1 }
0x574a   :  { %10423 = vsyncpa [#allocation48], 1 }
0x574b   :  { %10424 = vsyncpa [#allocation51], 1 }
0x574c   :  { %10425 = vsyncpa [#allocation54], 1 }
0x574d   :  { %10426 = vsyncpa [#allocation4], 1 }
0x574e   :  { %10428 = vsyncpa [#allocation4 + $0x1], 1 }

</bundles_post_ra>
